<compile_context>
chip_gen: v5e
topology: v5e:2x2
jax: 0.10.0
libtpu: 0.0.40
codegen_flags: <defaults>
</compile_context>

<pallas_src>
import functools

import numpy as np

import jax
import jax.numpy as jnp
from jax import lax
from jax.experimental import pallas as pl
from jax.experimental.pallas import tpu as pltpu


# ----------------------------------------------------------------------------
# Architecture constants
# ----------------------------------------------------------------------------
INPUT_DIM = 1
DIM = 8
N_DOWNSAMPLE = 2
N_RES = 2
IMG = 16
LANES = 128
EPS = 1e-5


def make_plan(img=IMG):
    """Ordered conv-layer descriptors for gen_a.encode_cont + gen_b.decode_cont."""
    plan = []
    h = w = img
    c = INPUT_DIM
    d = DIM
    plan.append(dict(name="enc_stem", k=7, s=1, p=3, u=1, hin=h, win=w, cin=c,
                     oh=h, ow=w, cout=d, norm="in_relu", res=None))
    c = d
    for i in range(N_DOWNSAMPLE):
        plan.append(dict(name=f"enc_down{i}", k=4, s=2, p=1, u=1, hin=h, win=w,
                         cin=c, oh=h // 2, ow=w // 2, cout=2 * c,
                         norm="in_relu", res=None))
        h //= 2
        w //= 2
        c *= 2
    for prefix in ("enc_res", "dec_res"):
        for r in range(N_RES):
            plan.append(dict(name=f"{prefix}{r}a", k=3, s=1, p=1, u=1, hin=h,
                             win=w, cin=c, oh=h, ow=w, cout=c,
                             norm="in_relu", res="start"))
            plan.append(dict(name=f"{prefix}{r}b", k=3, s=1, p=1, u=1, hin=h,
                             win=w, cin=c, oh=h, ow=w, cout=c,
                             norm="in", res="end"))
    for i in range(N_DOWNSAMPLE):
        plan.append(dict(name=f"dec_up{i}", k=5, s=1, p=2, u=2, hin=h, win=w,
                         cin=c, oh=2 * h, ow=2 * w, cout=c // 2,
                         norm="ln_relu", res=None))
        h *= 2
        w *= 2
        c //= 2
    plan.append(dict(name="dec_out", k=7, s=1, p=3, u=1, hin=h, win=w, cin=c,
                     oh=h, ow=w, cout=INPUT_DIM, norm="tanh", res=None))
    return plan


# ----------------------------------------------------------------------------
# Static metadata shared by the host-side packer and the kernel (single source
# of truth for slab offsets / indices).
# ----------------------------------------------------------------------------
def build_meta(b_tile):
    plan = make_plan()
    layers = []
    t_off = 0
    n_rows = 0
    proj_keys = []     # distinct (ow, cout) used by InstanceNorm layers
    mrow_keys = []     # distinct oh used by IN / LN layers
    for spec in plan:
        e = dict(spec)
        e["t_off"] = t_off
        t_off += spec["k"] * LANES
        e["bias_row"] = n_rows
        n_rows += 1
        if spec["norm"] == "ln_relu":
            e["gamma_row"] = n_rows
            e["beta_row"] = n_rows + 1
            n_rows += 2
        if spec["norm"] in ("in", "in_relu"):
            key = (spec["ow"], spec["cout"])
            if key not in proj_keys:
                proj_keys.append(key)
            e["proj_idx"] = proj_keys.index(key)
        if spec["norm"] in ("in", "in_relu", "ln_relu"):
            if spec["oh"] not in mrow_keys:
                mrow_keys.append(spec["oh"])
            e["mrow_idx"] = mrow_keys.index(spec["oh"])
        e["bhin"] = b_tile * spec["hin"]
        e["boh"] = b_tile * spec["oh"]
        layers.append(e)
    return dict(layers=layers,
                t_cols=t_off,
                n_rows=((n_rows + 7) // 8) * 8,
                proj_keys=proj_keys,
                mrow_keys=mrow_keys,
                pr=b_tile * IMG,               # max B*OH
                pc=7 * b_tile * IMG,           # max kh*B*Hin
                mr=2 * b_tile * IMG)           # max 2*B*OH


# ----------------------------------------------------------------------------
# Host-side weight repacking: fold reflect pad / stride / nearest-upsample into
# constant selection matrices so the kernel only does dense, lane-aligned
# matmuls.  Activation layout (per batch-tile): (B*H, W*C) with W*C padded to
# 128 lanes.
#   conv:  out = P_h @ vstack_i( A @ T_i ) + bias_row
#     P_i[y, r]               = 1  iff  r == reflect(s*y + i - p, u*Hin) // u
#     T_i[w*Cin+ci, x*Cout+co]= sum_{j: reflect(s*x+j-p, u*Win)//u == w} W[i,j,ci,co]
#     P_h = [I_B (x) P_0 | ... | I_B (x) P_{kh-1}]
# ----------------------------------------------------------------------------
def _reflect(t, n):
    if t < 0:
        t = -t
    if t >= n:
        t = 2 * n - 2 - t
    assert 0 <= t < n, (t, n)          # single reflection must stay in range
    return t


def _row_select(kh, s, p, u, hin, oh):
    P = np.zeros((kh, oh, hin), np.float32)
    for i in range(kh):
        for y in range(oh):
            P[i, y, _reflect(s * y + i - p, u * hin) // u] = 1.0
    return P


def _col_select(kw, s, p, u, win, ow):
    S = np.zeros((kw, win, ow), np.float32)
    for j in range(kw):
        for x in range(ow):
            S[j, _reflect(s * x + j - p, u * win) // u, x] += 1.0
    return S


def init_params(key):
    """Raw conv parameters (k, k, cin, cout) + LayerNorm affine params."""
    plan = make_plan()
    keys = jax.random.split(key, 2 * len(plan))
    params = {}
    for i, spec in enumerate(plan):
        w = jax.random.normal(
            keys[2 * i], (spec["k"], spec["k"], spec["cin"], spec["cout"]),
            jnp.float32) * 0.02
        b = jnp.zeros((spec["cout"],), jnp.float32)
        entry = {"w": w, "b": b}
        if spec["norm"] == "ln_relu":
            entry["gamma"] = jax.random.uniform(
                keys[2 * i + 1], (spec["cout"],), jnp.float32)
            entry["beta"] = jnp.zeros((spec["cout"],), jnp.float32)
        params[spec["name"]] = entry
    return params


def pack_params(params, b_tile):
    """One-time repack into 5 lane-aligned constant slabs."""
    meta = build_meta(b_tile)
    t_slab = np.zeros((LANES, meta["t_cols"]), np.float32)
    p_slab = np.zeros((len(meta["layers"]), meta["pr"], meta["pc"]), np.float32)
    row_slab = np.zeros((meta["n_rows"], LANES), np.float32)
    proj_slab = np.zeros((len(meta["proj_keys"]), LANES, LANES), np.float32)
    mrow_slab = np.zeros((len(meta["mrow_keys"]), meta["mr"], meta["mr"]),
                         np.float32)
    eye_b = np.eye(b_tile, dtype=np.float32)

    for li, e in enumerate(meta["layers"]):
        raw = params[e["name"]]
        w = np.asarray(raw["w"], np.float32)
        b = np.asarray(raw["b"], np.float32)
        k, s, p, u = e["k"], e["s"], e["p"], e["u"]
        owc = e["ow"] * e["cout"]
        # weight-Toeplitz T (pad along W / stride / upsample folded in)
        S = _col_select(k, s, p, u, e["win"], e["ow"])
        T = np.einsum("jwx,kjco->wckxo", S, w)
        T = T.reshape(e["win"] * e["cin"], k, owc)
        blk = np.zeros((LANES, k, LANES), np.float32)     # pad rows & per-i cols
        blk[:T.shape[0], :, :owc] = T
        t_slab[:, e["t_off"]:e["t_off"] + k * LANES] = blk.reshape(LANES, k * LANES)
        # row selectors P (pad along H / stride / upsample folded in),
        # block-diag over the batch tile, hstacked over kernel rows.
        P = _row_select(k, s, p, u, e["hin"], e["oh"])
        Ph = np.concatenate([np.kron(eye_b, P[i]) for i in range(k)], axis=1)
        p_slab[li, :Ph.shape[0], :Ph.shape[1]] = Ph
        # bias / LayerNorm affine rows (lane-padded to 128)
        row_slab[e["bias_row"], :owc] = np.tile(b, e["ow"])
        if e["norm"] == "ln_relu":
            row_slab[e["gamma_row"], :owc] = np.tile(
                np.asarray(raw["gamma"], np.float32), e["ow"])
            row_slab[e["beta_row"], :owc] = np.tile(
                np.asarray(raw["beta"], np.float32), e["ow"])

    # InstanceNorm per-channel fold+broadcast over W:  kron(ones(ow,ow), eye(c))
    for pi, (ow, c) in enumerate(meta["proj_keys"]):
        proj_slab[pi] = np.kron(np.ones((ow, ow), np.float32),
                                np.eye(c, dtype=np.float32))
    # Per-sample fold+broadcast over H, doubled (for [x ; x^2] stacks):
    #   blockdiag(M, M) with M = kron(eye(B), ones(oh,oh))
    for mi, oh in enumerate(meta["mrow_keys"]):
        M = np.kron(eye_b, np.ones((oh, oh), np.float32))
        M2 = np.kron(np.eye(2, dtype=np.float32), M)
        mrow_slab[mi, :M2.shape[0], :M2.shape[1]] = M2

    return dict(
        t=jnp.asarray(t_slab).astype(jnp.bfloat16),      # bf16 MXU operands
        p=jnp.asarray(p_slab).astype(jnp.bfloat16),      # 0/1 -> exact in bf16
        rows=jnp.asarray(row_slab),                      # f32 epilogue constants
        proj=jnp.asarray(proj_slab),                     # f32 (norm stays f32)
        mrow=jnp.asarray(mrow_slab),                     # f32
    )


# ----------------------------------------------------------------------------
# Fused forward: one pallas_call, grid = (batch tiles,)
# ----------------------------------------------------------------------------
def make_forward(b_tile):
    meta = build_meta(b_tile)
    layers = meta["layers"]

    def _row(ref, i):                      # (1, 128) constant row view
        return ref[i:i + 1, :]

    def kernel(x_ref, t_ref, p_ref, row_ref, proj_ref, mrow_ref, o_ref):
        bt, H, WP = x_ref.shape
        act = x_ref[...].reshape(bt * H, WP)          # (B*16, 128) f32
        res_in = None
        for li, e in enumerate(layers):
            if e["res"] == "start":
                res_in = act
            kh, bhin, boh = e["k"], e["bhin"], e["boh"]
            # ---- conv:  P_h @ vstack_i(A @ T_i) + bias  (bf16 MXU, f32 acc) --
            a_bf = act.astype(jnp.bfloat16)
            t_val = t_ref[:, e["t_off"]:e["t_off"] + kh * LANES]   # (128, kh*128)
            call = jnp.dot(a_bf, t_val, preferred_element_type=jnp.float32)
            stacked = jnp.concatenate(
                [call[:, i * LANES:(i + 1) * LANES] for i in range(kh)], axis=0)
            p_val = p_ref[li][:boh, :kh * bhin]                    # (B*OH, kh*B*Hin)
            y = jnp.dot(p_val, stacked.astype(jnp.bfloat16),
                        preferred_element_type=jnp.float32)        # (B*OH, 128)
            y = y + _row(row_ref, e["bias_row"])
            # ---- norm + activation epilogue (strictly f32 on VPU/EUP) --------
            if e["norm"] in ("in_relu", "in"):
                inv_n = 1.0 / float(e["oh"] * e["ow"])
                proj = proj_ref[e["proj_idx"]]                     # (128, 128)
                m2 = mrow_ref[e["mrow_idx"]][:2 * boh, :2 * boh]
                z = jnp.concatenate([y, y * y], axis=0)            # [x ; x^2]
                s = jnp.dot(m2, z, preferred_element_type=jnp.float32)
                f = jnp.dot(s, proj, preferred_element_type=jnp.float32) * inv_n
                mean_b, ex2_b = f[:boh], f[boh:]
                var_b = jnp.maximum(ex2_b - mean_b * mean_b, 0.0)  # one-pass stats
                y = (y - mean_b) * lax.rsqrt(var_b + EPS)
                if e["norm"] == "in_relu":
                    y = jnp.maximum(y, 0.0)
            elif e["norm"] == "ln_relu":
                n_el = float(e["oh"] * e["ow"] * e["cout"])
                m2 = mrow_ref[e["mrow_idx"]][:2 * boh, :2 * boh]
                z = jnp.concatenate([y, y * y], axis=0)
                s = jnp.dot(m2, z, preferred_element_type=jnp.float32)
                t = jnp.sum(s, axis=1, keepdims=True)              # (2*B*OH, 1)
                tot, totsq = t[:boh], t[boh:]
                mean = tot * (1.0 / n_el)
                var = jnp.maximum((totsq - n_el * mean * mean) * (1.0 / (n_el - 1.0)),
                                  0.0)                             # unbiased (UNIT LN)
                y = (y - mean) / (jnp.sqrt(var) + EPS)
                y = jnp.maximum(y * _row(row_ref, e["gamma_row"])
                                + _row(row_ref, e["beta_row"]), 0.0)
            else:  # "tanh"
                y = jnp.tanh(y)
            if e["res"] == "end":
                y = y + res_in
            act = y
        o_ref[...] = act.reshape(bt, H, WP)

    def forward(packed, x_a, x_b):
        """UNIT_Trainer.forward: x_ab = gen_b.decode_cont(gen_a.encode_cont(x_a)).
        x_b is accepted (matching the reference signature) but unused."""
        del x_b
        n, cin, h, w = x_a.shape
        assert cin == INPUT_DIM and h == IMG and w == IMG, x_a.shape
        n_pad = ((n + b_tile - 1) // b_tile) * b_tile
        x = x_a.reshape(n, h, w)
        x = jnp.pad(x, ((0, n_pad - n), (0, 0), (0, LANES - w)))   # lane-dense input
        grid = (n_pad // b_tile,)
        # Weight slabs are grid-invariant (constant index_map): DMA'd once at
        # step 0 and held resident in VMEM for the whole grid.
        in_specs = [
            pl.BlockSpec((b_tile, h, LANES), lambda g: (g, 0, 0)),
            pl.BlockSpec(packed["t"].shape, lambda g: (0, 0)),
            pl.BlockSpec(packed["p"].shape, lambda g: (0, 0, 0)),
            pl.BlockSpec(packed["rows"].shape, lambda g: (0, 0)),
            pl.BlockSpec(packed["proj"].shape, lambda g: (0, 0, 0)),
            pl.BlockSpec(packed["mrow"].shape, lambda g: (0, 0, 0)),
        ]
        out = pl.pallas_call(
            kernel,
            out_shape=jax.ShapeDtypeStruct((n_pad, h, LANES), jnp.float32),
            grid=grid,
            in_specs=in_specs,
            out_specs=pl.BlockSpec((b_tile, h, LANES), lambda g: (g, 0, 0)),
            compiler_params=pltpu.CompilerParams(
                dimension_semantics=("parallel",),
                vmem_limit_bytes=32 * 1024 * 1024),
        )(x, packed["t"], packed["p"], packed["rows"], packed["proj"],
          packed["mrow"])
        return out[:n, :, :w].reshape(n, 1, h, w)                  # back to NCHW

    return jax.jit(forward)


def pick_b_tile(n):
    """Fold batch into the matmul M dim; keep >=2 grid steps when batch allows
    (both TensorCores busy on v7x)."""
    if n >= 16:
        return 8
    if n >= 8:
        return max(4, n // 2)
    return max(1, n)


# ----------------------------------------------------------------------------
# Main
# ----------------------------------------------------------------------------
if __name__ == "__main__":
    key = jax.random.PRNGKey(0)
    k_param, k_a, k_b = jax.random.split(key, 3)

    # small shapes: batch=2, input_dim=1, 16x16 images (NCHW, like PyTorch)
    x_a = jax.random.normal(k_a, (2, INPUT_DIM, IMG, IMG), jnp.float32)
    x_b = jax.random.normal(k_b, (2, INPUT_DIM, IMG, IMG), jnp.float32)

    n = x_a.shape[0]
    b_tile = pick_b_tile(n)

    params = init_params(k_param)
    packed = pack_params(params, b_tile)     # one-time weight repacking (host)

    fwd = make_forward(b_tile)
    x_ab = fwd(packed, x_a, x_b)
    jax.block_until_ready(x_ab)

    assert x_ab.shape == (2, INPUT_DIM, IMG, IMG), x_ab.shape
    assert bool(jnp.all(jnp.isfinite(x_ab)))
    assert bool(jnp.max(jnp.abs(x_ab)) <= 1.0 + 1e-5)   # tanh output range
    print("KERNEL_OK")
</pallas_src>

<mosaic_0001>
module attributes {stable_mosaic.version = 11 : i64} {
  func.func @kernel(%arg0: i32, %arg1: memref<2x16x128xf32, #tpu.memory_space<vmem>>, %arg2: memref<128x7168xbf16, #tpu.memory_space<vmem>>, %arg3: memref<14x32x224xbf16, #tpu.memory_space<vmem>>, %arg4: memref<24x128xf32, #tpu.memory_space<vmem>>, %arg5: memref<3x128x128xf32, #tpu.memory_space<vmem>>, %arg6: memref<3x64x64xf32, #tpu.memory_space<vmem>>, %arg7: memref<2x16x128xf32, #tpu.memory_space<vmem>>) attributes {dimension_semantics = [#tpu.dimension_semantics<parallel>], iteration_bounds = array<i64: 1>, scalar_prefetch = 0 : i64, scratch_operands = 0 : i64, tpu.core_type = #tpu.core_type<tc>, window_params = [{transform_indices = @transform_0, window_bounds = array<i64: 2, 16, 128>}, {pipeline_mode = #tpu.pipeline_mode<synchronous>, transform_indices = @transform_1, window_bounds = array<i64: 128, 7168>}, {pipeline_mode = #tpu.pipeline_mode<synchronous>, transform_indices = @transform_2, window_bounds = array<i64: 14, 32, 224>}, {pipeline_mode = #tpu.pipeline_mode<synchronous>, transform_indices = @transform_3, window_bounds = array<i64: 24, 128>}, {pipeline_mode = #tpu.pipeline_mode<synchronous>, transform_indices = @transform_4, window_bounds = array<i64: 3, 128, 128>}, {pipeline_mode = #tpu.pipeline_mode<synchronous>, transform_indices = @transform_5, window_bounds = array<i64: 3, 64, 64>}, {transform_indices = @transform_6, window_bounds = array<i64: 2, 16, 128>}]} {
    %c0 = arith.constant 0 : index
    %c0_0 = arith.constant 0 : index
    %c0_1 = arith.constant 0 : index
    %0 = vector.load %arg1[%c0, %c0_0, %c0_1] : memref<2x16x128xf32, #tpu.memory_space<vmem>>, vector<2x16x128xf32>
    %1 = vector.shape_cast %0 : vector<2x16x128xf32> to vector<32x128xf32>
    %2 = arith.truncf %1 : vector<32x128xf32> to vector<32x128xbf16>
    %c0_2 = arith.constant 0 : index
    %c0_3 = arith.constant 0 : index
    %3 = vector.load %arg2[%c0_2, %c0_3] : memref<128x7168xbf16, #tpu.memory_space<vmem>>, vector<128x896xbf16>
    %cst = arith.constant dense<0.000000e+00> : vector<32x896xf32>
    %4 = tpu.matmul %2, %3, %cst {dimension_numbers = #tpu.dot_dimension_numbers<[1], [0], [0], [1], [0, 0, 1, 1], [], []>} : vector<32x128xbf16>, vector<128x896xbf16>, vector<32x896xf32> -> vector<32x896xf32>
    %5 = vector.extract_strided_slice %4 {offsets = [0, 0], sizes = [32, 128], strides = [1, 1]} : vector<32x896xf32> to vector<32x128xf32>
    %6 = vector.extract_strided_slice %4 {offsets = [0, 128], sizes = [32, 128], strides = [1, 1]} : vector<32x896xf32> to vector<32x128xf32>
    %7 = vector.extract_strided_slice %4 {offsets = [0, 256], sizes = [32, 128], strides = [1, 1]} : vector<32x896xf32> to vector<32x128xf32>
    %8 = vector.extract_strided_slice %4 {offsets = [0, 384], sizes = [32, 128], strides = [1, 1]} : vector<32x896xf32> to vector<32x128xf32>
    %9 = vector.extract_strided_slice %4 {offsets = [0, 512], sizes = [32, 128], strides = [1, 1]} : vector<32x896xf32> to vector<32x128xf32>
    %10 = vector.extract_strided_slice %4 {offsets = [0, 640], sizes = [32, 128], strides = [1, 1]} : vector<32x896xf32> to vector<32x128xf32>
    %11 = vector.extract_strided_slice %4 {offsets = [0, 768], sizes = [32, 128], strides = [1, 1]} : vector<32x896xf32> to vector<32x128xf32>
    %12 = tpu.concatenate %5, %6, %7, %8, %9, %10, %11 in 0 : vector<32x128xf32>, vector<32x128xf32>, vector<32x128xf32>, vector<32x128xf32>, vector<32x128xf32>, vector<32x128xf32>, vector<32x128xf32> -> vector<224x128xf32>
    %c0_4 = arith.constant 0 : index
    %c0_5 = arith.constant 0 : index
    %c0_6 = arith.constant 0 : index
    %13 = vector.load %arg3[%c0_4, %c0_5, %c0_6] : memref<14x32x224xbf16, #tpu.memory_space<vmem>>, vector<1x32x224xbf16>
    %14 = vector.shape_cast %13 : vector<1x32x224xbf16> to vector<32x224xbf16>
    %15 = arith.truncf %12 : vector<224x128xf32> to vector<224x128xbf16>
    %cst_7 = arith.constant dense<0.000000e+00> : vector<32x128xf32>
    %16 = tpu.matmul %14, %15, %cst_7 {dimension_numbers = #tpu.dot_dimension_numbers<[1], [0], [0], [1], [0, 0, 1, 1], [], []>} : vector<32x224xbf16>, vector<224x128xbf16>, vector<32x128xf32> -> vector<32x128xf32>
    %c0_8 = arith.constant 0 : index
    %c0_9 = arith.constant 0 : index
    %17 = vector.load %arg4[%c0_8, %c0_9] : memref<24x128xf32, #tpu.memory_space<vmem>>, vector<1x128xf32>
    %18 = vector.broadcast %17 : vector<1x128xf32> to vector<32x128xf32>
    %19 = arith.addf %16, %18 : vector<32x128xf32>
    %c0_10 = arith.constant 0 : index
    %c0_11 = arith.constant 0 : index
    %c0_12 = arith.constant 0 : index
    %20 = vector.load %arg5[%c0_10, %c0_11, %c0_12] : memref<3x128x128xf32, #tpu.memory_space<vmem>>, vector<1x128x128xf32>
    %21 = vector.shape_cast %20 : vector<1x128x128xf32> to vector<128x128xf32>
    %c0_13 = arith.constant 0 : index
    %c0_14 = arith.constant 0 : index
    %c0_15 = arith.constant 0 : index
    %22 = vector.load %arg6[%c0_13, %c0_14, %c0_15] : memref<3x64x64xf32, #tpu.memory_space<vmem>>, vector<1x64x64xf32>
    %23 = vector.shape_cast %22 : vector<1x64x64xf32> to vector<64x64xf32>
    %24 = arith.mulf %19, %19 : vector<32x128xf32>
    %25 = tpu.concatenate %19, %24 in 0 : vector<32x128xf32>, vector<32x128xf32> -> vector<64x128xf32>
    %cst_16 = arith.constant dense<0.000000e+00> : vector<64x128xf32>
    %26 = tpu.matmul %23, %25, %cst_16 {dimension_numbers = #tpu.dot_dimension_numbers<[1], [0], [0], [1], [0, 0, 1, 1], [], []>} : vector<64x64xf32>, vector<64x128xf32>, vector<64x128xf32> -> vector<64x128xf32>
    %cst_17 = arith.constant dense<0.000000e+00> : vector<64x128xf32>
    %27 = tpu.matmul %26, %21, %cst_17 {dimension_numbers = #tpu.dot_dimension_numbers<[1], [0], [0], [1], [0, 0, 1, 1], [], []>} : vector<64x128xf32>, vector<128x128xf32>, vector<64x128xf32> -> vector<64x128xf32>
    %cst_18 = arith.constant 3.906250e-03 : f32
    %28 = vector.broadcast %cst_18 : f32 to vector<64x128xf32>
    %29 = arith.mulf %27, %28 : vector<64x128xf32>
    %30 = vector.extract_strided_slice %29 {offsets = [0, 0], sizes = [32, 128], strides = [1, 1]} : vector<64x128xf32> to vector<32x128xf32>
    %31 = vector.extract_strided_slice %29 {offsets = [32, 0], sizes = [32, 128], strides = [1, 1]} : vector<64x128xf32> to vector<32x128xf32>
    %32 = arith.mulf %30, %30 : vector<32x128xf32>
    %33 = arith.subf %31, %32 : vector<32x128xf32>
    %cst_19 = arith.constant 0.000000e+00 : f32
    %34 = vector.broadcast %cst_19 : f32 to vector<32x128xf32>
    %35 = arith.maximumf %33, %34 : vector<32x128xf32>
    %36 = arith.subf %19, %30 : vector<32x128xf32>
    %cst_20 = arith.constant 9.99999974E-6 : f32
    %37 = vector.broadcast %cst_20 : f32 to vector<32x128xf32>
    %38 = arith.addf %35, %37 : vector<32x128xf32>
    %39 = math.rsqrt %38 : vector<32x128xf32>
    %40 = arith.mulf %36, %39 : vector<32x128xf32>
    %cst_21 = arith.constant 0.000000e+00 : f32
    %41 = vector.broadcast %cst_21 : f32 to vector<32x128xf32>
    %42 = arith.maximumf %40, %41 : vector<32x128xf32>
    %43 = arith.truncf %42 : vector<32x128xf32> to vector<32x128xbf16>
    %c0_22 = arith.constant 0 : index
    %c896 = arith.constant 896 : index
    %44 = vector.load %arg2[%c0_22, %c896] : memref<128x7168xbf16, #tpu.memory_space<vmem>>, vector<128x512xbf16>
    %cst_23 = arith.constant dense<0.000000e+00> : vector<32x512xf32>
    %45 = tpu.matmul %43, %44, %cst_23 {dimension_numbers = #tpu.dot_dimension_numbers<[1], [0], [0], [1], [0, 0, 1, 1], [], []>} : vector<32x128xbf16>, vector<128x512xbf16>, vector<32x512xf32> -> vector<32x512xf32>
    %46 = vector.extract_strided_slice %45 {offsets = [0, 0], sizes = [32, 128], strides = [1, 1]} : vector<32x512xf32> to vector<32x128xf32>
    %47 = vector.extract_strided_slice %45 {offsets = [0, 128], sizes = [32, 128], strides = [1, 1]} : vector<32x512xf32> to vector<32x128xf32>
    %48 = vector.extract_strided_slice %45 {offsets = [0, 256], sizes = [32, 128], strides = [1, 1]} : vector<32x512xf32> to vector<32x128xf32>
    %49 = vector.extract_strided_slice %45 {offsets = [0, 384], sizes = [32, 128], strides = [1, 1]} : vector<32x512xf32> to vector<32x128xf32>
    %50 = tpu.concatenate %46, %47, %48, %49 in 0 : vector<32x128xf32>, vector<32x128xf32>, vector<32x128xf32>, vector<32x128xf32> -> vector<128x128xf32>
    %c1 = arith.constant 1 : index
    %c0_24 = arith.constant 0 : index
    %c0_25 = arith.constant 0 : index
    %51 = vector.load %arg3[%c1, %c0_24, %c0_25] : memref<14x32x224xbf16, #tpu.memory_space<vmem>>, vector<1x32x224xbf16>
    %52 = vector.shape_cast %51 : vector<1x32x224xbf16> to vector<32x224xbf16>
    %53 = vector.extract_strided_slice %52 {offsets = [0, 0], sizes = [16, 128], strides = [1, 1]} : vector<32x224xbf16> to vector<16x128xbf16>
    %54 = arith.truncf %50 : vector<128x128xf32> to vector<128x128xbf16>
    %cst_26 = arith.constant dense<0.000000e+00> : vector<16x128xf32>
    %55 = tpu.matmul %53, %54, %cst_26 {dimension_numbers = #tpu.dot_dimension_numbers<[1], [0], [0], [1], [0, 0, 1, 1], [], []>} : vector<16x128xbf16>, vector<128x128xbf16>, vector<16x128xf32> -> vector<16x128xf32>
    %c1_27 = arith.constant 1 : index
    %c0_28 = arith.constant 0 : index
    %56 = vector.load %arg4[%c1_27, %c0_28] : memref<24x128xf32, #tpu.memory_space<vmem>>, vector<1x128xf32>
    %57 = vector.broadcast %56 : vector<1x128xf32> to vector<16x128xf32>
    %58 = arith.addf %55, %57 : vector<16x128xf32>
    %c1_29 = arith.constant 1 : index
    %c0_30 = arith.constant 0 : index
    %c0_31 = arith.constant 0 : index
    %59 = vector.load %arg5[%c1_29, %c0_30, %c0_31] : memref<3x128x128xf32, #tpu.memory_space<vmem>>, vector<1x128x128xf32>
    %60 = vector.shape_cast %59 : vector<1x128x128xf32> to vector<128x128xf32>
    %c1_32 = arith.constant 1 : index
    %c0_33 = arith.constant 0 : index
    %c0_34 = arith.constant 0 : index
    %61 = vector.load %arg6[%c1_32, %c0_33, %c0_34] : memref<3x64x64xf32, #tpu.memory_space<vmem>>, vector<1x64x64xf32>
    %62 = vector.shape_cast %61 : vector<1x64x64xf32> to vector<64x64xf32>
    %63 = vector.extract_strided_slice %62 {offsets = [0, 0], sizes = [32, 32], strides = [1, 1]} : vector<64x64xf32> to vector<32x32xf32>
    %64 = arith.mulf %58, %58 : vector<16x128xf32>
    %65 = tpu.concatenate %58, %64 in 0 : vector<16x128xf32>, vector<16x128xf32> -> vector<32x128xf32>
    %cst_35 = arith.constant dense<0.000000e+00> : vector<32x128xf32>
    %66 = tpu.matmul %63, %65, %cst_35 {dimension_numbers = #tpu.dot_dimension_numbers<[1], [0], [0], [1], [0, 0, 1, 1], [], []>} : vector<32x32xf32>, vector<32x128xf32>, vector<32x128xf32> -> vector<32x128xf32>
    %cst_36 = arith.constant dense<0.000000e+00> : vector<32x128xf32>
    %67 = tpu.matmul %66, %60, %cst_36 {dimension_numbers = #tpu.dot_dimension_numbers<[1], [0], [0], [1], [0, 0, 1, 1], [], []>} : vector<32x128xf32>, vector<128x128xf32>, vector<32x128xf32> -> vector<32x128xf32>
    %cst_37 = arith.constant 1.562500e-02 : f32
    %68 = vector.broadcast %cst_37 : f32 to vector<32x128xf32>
    %69 = arith.mulf %67, %68 : vector<32x128xf32>
    %70 = vector.extract_strided_slice %69 {offsets = [0, 0], sizes = [16, 128], strides = [1, 1]} : vector<32x128xf32> to vector<16x128xf32>
    %71 = vector.extract_strided_slice %69 {offsets = [16, 0], sizes = [16, 128], strides = [1, 1]} : vector<32x128xf32> to vector<16x128xf32>
    %72 = arith.mulf %70, %70 : vector<16x128xf32>
    %73 = arith.subf %71, %72 : vector<16x128xf32>
    %cst_38 = arith.constant 0.000000e+00 : f32
    %74 = vector.broadcast %cst_38 : f32 to vector<16x128xf32>
    %75 = arith.maximumf %73, %74 : vector<16x128xf32>
    %76 = arith.subf %58, %70 : vector<16x128xf32>
    %cst_39 = arith.constant 9.99999974E-6 : f32
    %77 = vector.broadcast %cst_39 : f32 to vector<16x128xf32>
    %78 = arith.addf %75, %77 : vector<16x128xf32>
    %79 = math.rsqrt %78 : vector<16x128xf32>
    %80 = arith.mulf %76, %79 : vector<16x128xf32>
    %cst_40 = arith.constant 0.000000e+00 : f32
    %81 = vector.broadcast %cst_40 : f32 to vector<16x128xf32>
    %82 = arith.maximumf %80, %81 : vector<16x128xf32>
    %83 = arith.truncf %82 : vector<16x128xf32> to vector<16x128xbf16>
    %c0_41 = arith.constant 0 : index
    %c1408 = arith.constant 1408 : index
    %84 = vector.load %arg2[%c0_41, %c1408] : memref<128x7168xbf16, #tpu.memory_space<vmem>>, vector<128x512xbf16>
    %cst_42 = arith.constant dense<0.000000e+00> : vector<16x512xf32>
    %85 = tpu.matmul %83, %84, %cst_42 {dimension_numbers = #tpu.dot_dimension_numbers<[1], [0], [0], [1], [0, 0, 1, 1], [], []>} : vector<16x128xbf16>, vector<128x512xbf16>, vector<16x512xf32> -> vector<16x512xf32>
    %86 = vector.extract_strided_slice %85 {offsets = [0, 0], sizes = [16, 128], strides = [1, 1]} : vector<16x512xf32> to vector<16x128xf32>
    %87 = vector.extract_strided_slice %85 {offsets = [0, 128], sizes = [16, 128], strides = [1, 1]} : vector<16x512xf32> to vector<16x128xf32>
    %88 = vector.extract_strided_slice %85 {offsets = [0, 256], sizes = [16, 128], strides = [1, 1]} : vector<16x512xf32> to vector<16x128xf32>
    %89 = vector.extract_strided_slice %85 {offsets = [0, 384], sizes = [16, 128], strides = [1, 1]} : vector<16x512xf32> to vector<16x128xf32>
    %90 = tpu.concatenate %86, %87, %88, %89 in 0 : vector<16x128xf32>, vector<16x128xf32>, vector<16x128xf32>, vector<16x128xf32> -> vector<64x128xf32>
    %c2 = arith.constant 2 : index
    %c0_43 = arith.constant 0 : index
    %c0_44 = arith.constant 0 : index
    %91 = vector.load %arg3[%c2, %c0_43, %c0_44] : memref<14x32x224xbf16, #tpu.memory_space<vmem>>, vector<1x32x224xbf16>
    %92 = vector.shape_cast %91 : vector<1x32x224xbf16> to vector<32x224xbf16>
    %93 = vector.extract_strided_slice %92 {offsets = [0, 0], sizes = [8, 64], strides = [1, 1]} : vector<32x224xbf16> to vector<8x64xbf16>
    %94 = arith.truncf %90 : vector<64x128xf32> to vector<64x128xbf16>
    %cst_45 = arith.constant dense<0.000000e+00> : vector<8x128xf32>
    %95 = tpu.matmul %93, %94, %cst_45 {dimension_numbers = #tpu.dot_dimension_numbers<[1], [0], [0], [1], [0, 0, 1, 1], [], []>} : vector<8x64xbf16>, vector<64x128xbf16>, vector<8x128xf32> -> vector<8x128xf32>
    %c2_46 = arith.constant 2 : index
    %c0_47 = arith.constant 0 : index
    %96 = vector.load %arg4[%c2_46, %c0_47] : memref<24x128xf32, #tpu.memory_space<vmem>>, vector<1x128xf32>
    %97 = vector.broadcast %96 : vector<1x128xf32> to vector<8x128xf32>
    %98 = arith.addf %95, %97 : vector<8x128xf32>
    %c2_48 = arith.constant 2 : index
    %c0_49 = arith.constant 0 : index
    %c0_50 = arith.constant 0 : index
    %99 = vector.load %arg5[%c2_48, %c0_49, %c0_50] : memref<3x128x128xf32, #tpu.memory_space<vmem>>, vector<1x128x128xf32>
    %100 = vector.shape_cast %99 : vector<1x128x128xf32> to vector<128x128xf32>
    %c2_51 = arith.constant 2 : index
    %c0_52 = arith.constant 0 : index
    %c0_53 = arith.constant 0 : index
    %101 = vector.load %arg6[%c2_51, %c0_52, %c0_53] : memref<3x64x64xf32, #tpu.memory_space<vmem>>, vector<1x64x64xf32>
    %102 = vector.shape_cast %101 : vector<1x64x64xf32> to vector<64x64xf32>
    %103 = vector.extract_strided_slice %102 {offsets = [0, 0], sizes = [16, 16], strides = [1, 1]} : vector<64x64xf32> to vector<16x16xf32>
    %104 = arith.mulf %98, %98 : vector<8x128xf32>
    %105 = tpu.concatenate %98, %104 in 0 : vector<8x128xf32>, vector<8x128xf32> -> vector<16x128xf32>
    %cst_54 = arith.constant dense<0.000000e+00> : vector<16x128xf32>
    %106 = tpu.matmul %103, %105, %cst_54 {dimension_numbers = #tpu.dot_dimension_numbers<[1], [0], [0], [1], [0, 0, 1, 1], [], []>} : vector<16x16xf32>, vector<16x128xf32>, vector<16x128xf32> -> vector<16x128xf32>
    %cst_55 = arith.constant dense<0.000000e+00> : vector<16x128xf32>
    %107 = tpu.matmul %106, %100, %cst_55 {dimension_numbers = #tpu.dot_dimension_numbers<[1], [0], [0], [1], [0, 0, 1, 1], [], []>} : vector<16x128xf32>, vector<128x128xf32>, vector<16x128xf32> -> vector<16x128xf32>
    %cst_56 = arith.constant 6.250000e-02 : f32
    %108 = vector.broadcast %cst_56 : f32 to vector<16x128xf32>
    %109 = arith.mulf %107, %108 : vector<16x128xf32>
    %110 = vector.extract_strided_slice %109 {offsets = [0, 0], sizes = [8, 128], strides = [1, 1]} : vector<16x128xf32> to vector<8x128xf32>
    %111 = vector.extract_strided_slice %109 {offsets = [8, 0], sizes = [8, 128], strides = [1, 1]} : vector<16x128xf32> to vector<8x128xf32>
    %112 = arith.mulf %110, %110 : vector<8x128xf32>
    %113 = arith.subf %111, %112 : vector<8x128xf32>
    %cst_57 = arith.constant 0.000000e+00 : f32
    %114 = vector.broadcast %cst_57 : f32 to vector<8x128xf32>
    %115 = arith.maximumf %113, %114 : vector<8x128xf32>
    %116 = arith.subf %98, %110 : vector<8x128xf32>
    %cst_58 = arith.constant 9.99999974E-6 : f32
    %117 = vector.broadcast %cst_58 : f32 to vector<8x128xf32>
    %118 = arith.addf %115, %117 : vector<8x128xf32>
    %119 = math.rsqrt %118 : vector<8x128xf32>
    %120 = arith.mulf %116, %119 : vector<8x128xf32>
    %cst_59 = arith.constant 0.000000e+00 : f32
    %121 = vector.broadcast %cst_59 : f32 to vector<8x128xf32>
    %122 = arith.maximumf %120, %121 : vector<8x128xf32>
    %123 = arith.truncf %122 : vector<8x128xf32> to vector<8x128xbf16>
    %c0_60 = arith.constant 0 : index
    %c1920 = arith.constant 1920 : index
    %124 = vector.load %arg2[%c0_60, %c1920] : memref<128x7168xbf16, #tpu.memory_space<vmem>>, vector<128x384xbf16>
    %cst_61 = arith.constant dense<0.000000e+00> : vector<8x384xf32>
    %125 = tpu.matmul %123, %124, %cst_61 {dimension_numbers = #tpu.dot_dimension_numbers<[1], [0], [0], [1], [0, 0, 1, 1], [], []>} : vector<8x128xbf16>, vector<128x384xbf16>, vector<8x384xf32> -> vector<8x384xf32>
    %126 = vector.extract_strided_slice %125 {offsets = [0, 0], sizes = [8, 128], strides = [1, 1]} : vector<8x384xf32> to vector<8x128xf32>
    %127 = vector.extract_strided_slice %125 {offsets = [0, 128], sizes = [8, 128], strides = [1, 1]} : vector<8x384xf32> to vector<8x128xf32>
    %128 = vector.extract_strided_slice %125 {offsets = [0, 256], sizes = [8, 128], strides = [1, 1]} : vector<8x384xf32> to vector<8x128xf32>
    %129 = tpu.concatenate %126, %127, %128 in 0 : vector<8x128xf32>, vector<8x128xf32>, vector<8x128xf32> -> vector<24x128xf32>
    %c3 = arith.constant 3 : index
    %c0_62 = arith.constant 0 : index
    %c0_63 = arith.constant 0 : index
    %130 = vector.load %arg3[%c3, %c0_62, %c0_63] : memref<14x32x224xbf16, #tpu.memory_space<vmem>>, vector<1x32x224xbf16>
    %131 = vector.shape_cast %130 : vector<1x32x224xbf16> to vector<32x224xbf16>
    %132 = vector.extract_strided_slice %131 {offsets = [0, 0], sizes = [8, 24], strides = [1, 1]} : vector<32x224xbf16> to vector<8x24xbf16>
    %133 = arith.truncf %129 : vector<24x128xf32> to vector<24x128xbf16>
    %cst_64 = arith.constant dense<0.000000e+00> : vector<8x128xf32>
    %134 = tpu.matmul %132, %133, %cst_64 {dimension_numbers = #tpu.dot_dimension_numbers<[1], [0], [0], [1], [0, 0, 1, 1], [], []>} : vector<8x24xbf16>, vector<24x128xbf16>, vector<8x128xf32> -> vector<8x128xf32>
    %c3_65 = arith.constant 3 : index
    %c0_66 = arith.constant 0 : index
    %135 = vector.load %arg4[%c3_65, %c0_66] : memref<24x128xf32, #tpu.memory_space<vmem>>, vector<1x128xf32>
    %136 = vector.broadcast %135 : vector<1x128xf32> to vector<8x128xf32>
    %137 = arith.addf %134, %136 : vector<8x128xf32>
    %c2_67 = arith.constant 2 : index
    %c0_68 = arith.constant 0 : index
    %c0_69 = arith.constant 0 : index
    %138 = vector.load %arg5[%c2_67, %c0_68, %c0_69] : memref<3x128x128xf32, #tpu.memory_space<vmem>>, vector<1x128x128xf32>
    %139 = vector.shape_cast %138 : vector<1x128x128xf32> to vector<128x128xf32>
    %c2_70 = arith.constant 2 : index
    %c0_71 = arith.constant 0 : index
    %c0_72 = arith.constant 0 : index
    %140 = vector.load %arg6[%c2_70, %c0_71, %c0_72] : memref<3x64x64xf32, #tpu.memory_space<vmem>>, vector<1x64x64xf32>
    %141 = vector.shape_cast %140 : vector<1x64x64xf32> to vector<64x64xf32>
    %142 = vector.extract_strided_slice %141 {offsets = [0, 0], sizes = [16, 16], strides = [1, 1]} : vector<64x64xf32> to vector<16x16xf32>
    %143 = arith.mulf %137, %137 : vector<8x128xf32>
    %144 = tpu.concatenate %137, %143 in 0 : vector<8x128xf32>, vector<8x128xf32> -> vector<16x128xf32>
    %cst_73 = arith.constant dense<0.000000e+00> : vector<16x128xf32>
    %145 = tpu.matmul %142, %144, %cst_73 {dimension_numbers = #tpu.dot_dimension_numbers<[1], [0], [0], [1], [0, 0, 1, 1], [], []>} : vector<16x16xf32>, vector<16x128xf32>, vector<16x128xf32> -> vector<16x128xf32>
    %cst_74 = arith.constant dense<0.000000e+00> : vector<16x128xf32>
    %146 = tpu.matmul %145, %139, %cst_74 {dimension_numbers = #tpu.dot_dimension_numbers<[1], [0], [0], [1], [0, 0, 1, 1], [], []>} : vector<16x128xf32>, vector<128x128xf32>, vector<16x128xf32> -> vector<16x128xf32>
    %cst_75 = arith.constant 6.250000e-02 : f32
    %147 = vector.broadcast %cst_75 : f32 to vector<16x128xf32>
    %148 = arith.mulf %146, %147 : vector<16x128xf32>
    %149 = vector.extract_strided_slice %148 {offsets = [0, 0], sizes = [8, 128], strides = [1, 1]} : vector<16x128xf32> to vector<8x128xf32>
    %150 = vector.extract_strided_slice %148 {offsets = [8, 0], sizes = [8, 128], strides = [1, 1]} : vector<16x128xf32> to vector<8x128xf32>
    %151 = arith.mulf %149, %149 : vector<8x128xf32>
    %152 = arith.subf %150, %151 : vector<8x128xf32>
    %cst_76 = arith.constant 0.000000e+00 : f32
    %153 = vector.broadcast %cst_76 : f32 to vector<8x128xf32>
    %154 = arith.maximumf %152, %153 : vector<8x128xf32>
    %155 = arith.subf %137, %149 : vector<8x128xf32>
    %cst_77 = arith.constant 9.99999974E-6 : f32
    %156 = vector.broadcast %cst_77 : f32 to vector<8x128xf32>
    %157 = arith.addf %154, %156 : vector<8x128xf32>
    %158 = math.rsqrt %157 : vector<8x128xf32>
    %159 = arith.mulf %155, %158 : vector<8x128xf32>
    %cst_78 = arith.constant 0.000000e+00 : f32
    %160 = vector.broadcast %cst_78 : f32 to vector<8x128xf32>
    %161 = arith.maximumf %159, %160 : vector<8x128xf32>
    %162 = arith.truncf %161 : vector<8x128xf32> to vector<8x128xbf16>
    %c0_79 = arith.constant 0 : index
    %c2304 = arith.constant 2304 : index
    %163 = vector.load %arg2[%c0_79, %c2304] : memref<128x7168xbf16, #tpu.memory_space<vmem>>, vector<128x384xbf16>
    %cst_80 = arith.constant dense<0.000000e+00> : vector<8x384xf32>
    %164 = tpu.matmul %162, %163, %cst_80 {dimension_numbers = #tpu.dot_dimension_numbers<[1], [0], [0], [1], [0, 0, 1, 1], [], []>} : vector<8x128xbf16>, vector<128x384xbf16>, vector<8x384xf32> -> vector<8x384xf32>
    %165 = vector.extract_strided_slice %164 {offsets = [0, 0], sizes = [8, 128], strides = [1, 1]} : vector<8x384xf32> to vector<8x128xf32>
    %166 = vector.extract_strided_slice %164 {offsets = [0, 128], sizes = [8, 128], strides = [1, 1]} : vector<8x384xf32> to vector<8x128xf32>
    %167 = vector.extract_strided_slice %164 {offsets = [0, 256], sizes = [8, 128], strides = [1, 1]} : vector<8x384xf32> to vector<8x128xf32>
    %168 = tpu.concatenate %165, %166, %167 in 0 : vector<8x128xf32>, vector<8x128xf32>, vector<8x128xf32> -> vector<24x128xf32>
    %c4 = arith.constant 4 : index
    %c0_81 = arith.constant 0 : index
    %c0_82 = arith.constant 0 : index
    %169 = vector.load %arg3[%c4, %c0_81, %c0_82] : memref<14x32x224xbf16, #tpu.memory_space<vmem>>, vector<1x32x224xbf16>
    %170 = vector.shape_cast %169 : vector<1x32x224xbf16> to vector<32x224xbf16>
    %171 = vector.extract_strided_slice %170 {offsets = [0, 0], sizes = [8, 24], strides = [1, 1]} : vector<32x224xbf16> to vector<8x24xbf16>
    %172 = arith.truncf %168 : vector<24x128xf32> to vector<24x128xbf16>
    %cst_83 = arith.constant dense<0.000000e+00> : vector<8x128xf32>
    %173 = tpu.matmul %171, %172, %cst_83 {dimension_numbers = #tpu.dot_dimension_numbers<[1], [0], [0], [1], [0, 0, 1, 1], [], []>} : vector<8x24xbf16>, vector<24x128xbf16>, vector<8x128xf32> -> vector<8x128xf32>
    %c4_84 = arith.constant 4 : index
    %c0_85 = arith.constant 0 : index
    %174 = vector.load %arg4[%c4_84, %c0_85] : memref<24x128xf32, #tpu.memory_space<vmem>>, vector<1x128xf32>
    %175 = vector.broadcast %174 : vector<1x128xf32> to vector<8x128xf32>
    %176 = arith.addf %173, %175 : vector<8x128xf32>
    %c2_86 = arith.constant 2 : index
    %c0_87 = arith.constant 0 : index
    %c0_88 = arith.constant 0 : index
    %177 = vector.load %arg5[%c2_86, %c0_87, %c0_88] : memref<3x128x128xf32, #tpu.memory_space<vmem>>, vector<1x128x128xf32>
    %178 = vector.shape_cast %177 : vector<1x128x128xf32> to vector<128x128xf32>
    %c2_89 = arith.constant 2 : index
    %c0_90 = arith.constant 0 : index
    %c0_91 = arith.constant 0 : index
    %179 = vector.load %arg6[%c2_89, %c0_90, %c0_91] : memref<3x64x64xf32, #tpu.memory_space<vmem>>, vector<1x64x64xf32>
    %180 = vector.shape_cast %179 : vector<1x64x64xf32> to vector<64x64xf32>
    %181 = vector.extract_strided_slice %180 {offsets = [0, 0], sizes = [16, 16], strides = [1, 1]} : vector<64x64xf32> to vector<16x16xf32>
    %182 = arith.mulf %176, %176 : vector<8x128xf32>
    %183 = tpu.concatenate %176, %182 in 0 : vector<8x128xf32>, vector<8x128xf32> -> vector<16x128xf32>
    %cst_92 = arith.constant dense<0.000000e+00> : vector<16x128xf32>
    %184 = tpu.matmul %181, %183, %cst_92 {dimension_numbers = #tpu.dot_dimension_numbers<[1], [0], [0], [1], [0, 0, 1, 1], [], []>} : vector<16x16xf32>, vector<16x128xf32>, vector<16x128xf32> -> vector<16x128xf32>
    %cst_93 = arith.constant dense<0.000000e+00> : vector<16x128xf32>
    %185 = tpu.matmul %184, %178, %cst_93 {dimension_numbers = #tpu.dot_dimension_numbers<[1], [0], [0], [1], [0, 0, 1, 1], [], []>} : vector<16x128xf32>, vector<128x128xf32>, vector<16x128xf32> -> vector<16x128xf32>
    %cst_94 = arith.constant 6.250000e-02 : f32
    %186 = vector.broadcast %cst_94 : f32 to vector<16x128xf32>
    %187 = arith.mulf %185, %186 : vector<16x128xf32>
    %188 = vector.extract_strided_slice %187 {offsets = [0, 0], sizes = [8, 128], strides = [1, 1]} : vector<16x128xf32> to vector<8x128xf32>
    %189 = vector.extract_strided_slice %187 {offsets = [8, 0], sizes = [8, 128], strides = [1, 1]} : vector<16x128xf32> to vector<8x128xf32>
    %190 = arith.mulf %188, %188 : vector<8x128xf32>
    %191 = arith.subf %189, %190 : vector<8x128xf32>
    %cst_95 = arith.constant 0.000000e+00 : f32
    %192 = vector.broadcast %cst_95 : f32 to vector<8x128xf32>
    %193 = arith.maximumf %191, %192 : vector<8x128xf32>
    %194 = arith.subf %176, %188 : vector<8x128xf32>
    %cst_96 = arith.constant 9.99999974E-6 : f32
    %195 = vector.broadcast %cst_96 : f32 to vector<8x128xf32>
    %196 = arith.addf %193, %195 : vector<8x128xf32>
    %197 = math.rsqrt %196 : vector<8x128xf32>
    %198 = arith.mulf %194, %197 : vector<8x128xf32>
    %199 = arith.addf %198, %122 : vector<8x128xf32>
    %200 = arith.truncf %199 : vector<8x128xf32> to vector<8x128xbf16>
    %c0_97 = arith.constant 0 : index
    %c2688 = arith.constant 2688 : index
    %201 = vector.load %arg2[%c0_97, %c2688] : memref<128x7168xbf16, #tpu.memory_space<vmem>>, vector<128x384xbf16>
    %cst_98 = arith.constant dense<0.000000e+00> : vector<8x384xf32>
    %202 = tpu.matmul %200, %201, %cst_98 {dimension_numbers = #tpu.dot_dimension_numbers<[1], [0], [0], [1], [0, 0, 1, 1], [], []>} : vector<8x128xbf16>, vector<128x384xbf16>, vector<8x384xf32> -> vector<8x384xf32>
    %203 = vector.extract_strided_slice %202 {offsets = [0, 0], sizes = [8, 128], strides = [1, 1]} : vector<8x384xf32> to vector<8x128xf32>
    %204 = vector.extract_strided_slice %202 {offsets = [0, 128], sizes = [8, 128], strides = [1, 1]} : vector<8x384xf32> to vector<8x128xf32>
    %205 = vector.extract_strided_slice %202 {offsets = [0, 256], sizes = [8, 128], strides = [1, 1]} : vector<8x384xf32> to vector<8x128xf32>
    %206 = tpu.concatenate %203, %204, %205 in 0 : vector<8x128xf32>, vector<8x128xf32>, vector<8x128xf32> -> vector<24x128xf32>
    %c5 = arith.constant 5 : index
    %c0_99 = arith.constant 0 : index
    %c0_100 = arith.constant 0 : index
    %207 = vector.load %arg3[%c5, %c0_99, %c0_100] : memref<14x32x224xbf16, #tpu.memory_space<vmem>>, vector<1x32x224xbf16>
    %208 = vector.shape_cast %207 : vector<1x32x224xbf16> to vector<32x224xbf16>
    %209 = vector.extract_strided_slice %208 {offsets = [0, 0], sizes = [8, 24], strides = [1, 1]} : vector<32x224xbf16> to vector<8x24xbf16>
    %210 = arith.truncf %206 : vector<24x128xf32> to vector<24x128xbf16>
    %cst_101 = arith.constant dense<0.000000e+00> : vector<8x128xf32>
    %211 = tpu.matmul %209, %210, %cst_101 {dimension_numbers = #tpu.dot_dimension_numbers<[1], [0], [0], [1], [0, 0, 1, 1], [], []>} : vector<8x24xbf16>, vector<24x128xbf16>, vector<8x128xf32> -> vector<8x128xf32>
    %c5_102 = arith.constant 5 : index
    %c0_103 = arith.constant 0 : index
    %212 = vector.load %arg4[%c5_102, %c0_103] : memref<24x128xf32, #tpu.memory_space<vmem>>, vector<1x128xf32>
    %213 = vector.broadcast %212 : vector<1x128xf32> to vector<8x128xf32>
    %214 = arith.addf %211, %213 : vector<8x128xf32>
    %c2_104 = arith.constant 2 : index
    %c0_105 = arith.constant 0 : index
    %c0_106 = arith.constant 0 : index
    %215 = vector.load %arg5[%c2_104, %c0_105, %c0_106] : memref<3x128x128xf32, #tpu.memory_space<vmem>>, vector<1x128x128xf32>
    %216 = vector.shape_cast %215 : vector<1x128x128xf32> to vector<128x128xf32>
    %c2_107 = arith.constant 2 : index
    %c0_108 = arith.constant 0 : index
    %c0_109 = arith.constant 0 : index
    %217 = vector.load %arg6[%c2_107, %c0_108, %c0_109] : memref<3x64x64xf32, #tpu.memory_space<vmem>>, vector<1x64x64xf32>
    %218 = vector.shape_cast %217 : vector<1x64x64xf32> to vector<64x64xf32>
    %219 = vector.extract_strided_slice %218 {offsets = [0, 0], sizes = [16, 16], strides = [1, 1]} : vector<64x64xf32> to vector<16x16xf32>
    %220 = arith.mulf %214, %214 : vector<8x128xf32>
    %221 = tpu.concatenate %214, %220 in 0 : vector<8x128xf32>, vector<8x128xf32> -> vector<16x128xf32>
    %cst_110 = arith.constant dense<0.000000e+00> : vector<16x128xf32>
    %222 = tpu.matmul %219, %221, %cst_110 {dimension_numbers = #tpu.dot_dimension_numbers<[1], [0], [0], [1], [0, 0, 1, 1], [], []>} : vector<16x16xf32>, vector<16x128xf32>, vector<16x128xf32> -> vector<16x128xf32>
    %cst_111 = arith.constant dense<0.000000e+00> : vector<16x128xf32>
    %223 = tpu.matmul %222, %216, %cst_111 {dimension_numbers = #tpu.dot_dimension_numbers<[1], [0], [0], [1], [0, 0, 1, 1], [], []>} : vector<16x128xf32>, vector<128x128xf32>, vector<16x128xf32> -> vector<16x128xf32>
    %cst_112 = arith.constant 6.250000e-02 : f32
    %224 = vector.broadcast %cst_112 : f32 to vector<16x128xf32>
    %225 = arith.mulf %223, %224 : vector<16x128xf32>
    %226 = vector.extract_strided_slice %225 {offsets = [0, 0], sizes = [8, 128], strides = [1, 1]} : vector<16x128xf32> to vector<8x128xf32>
    %227 = vector.extract_strided_slice %225 {offsets = [8, 0], sizes = [8, 128], strides = [1, 1]} : vector<16x128xf32> to vector<8x128xf32>
    %228 = arith.mulf %226, %226 : vector<8x128xf32>
    %229 = arith.subf %227, %228 : vector<8x128xf32>
    %cst_113 = arith.constant 0.000000e+00 : f32
    %230 = vector.broadcast %cst_113 : f32 to vector<8x128xf32>
    %231 = arith.maximumf %229, %230 : vector<8x128xf32>
    %232 = arith.subf %214, %226 : vector<8x128xf32>
    %cst_114 = arith.constant 9.99999974E-6 : f32
    %233 = vector.broadcast %cst_114 : f32 to vector<8x128xf32>
    %234 = arith.addf %231, %233 : vector<8x128xf32>
    %235 = math.rsqrt %234 : vector<8x128xf32>
    %236 = arith.mulf %232, %235 : vector<8x128xf32>
    %cst_115 = arith.constant 0.000000e+00 : f32
    %237 = vector.broadcast %cst_115 : f32 to vector<8x128xf32>
    %238 = arith.maximumf %236, %237 : vector<8x128xf32>
    %239 = arith.truncf %238 : vector<8x128xf32> to vector<8x128xbf16>
    %c0_116 = arith.constant 0 : index
    %c3072 = arith.constant 3072 : index
    %240 = vector.load %arg2[%c0_116, %c3072] : memref<128x7168xbf16, #tpu.memory_space<vmem>>, vector<128x384xbf16>
    %cst_117 = arith.constant dense<0.000000e+00> : vector<8x384xf32>
    %241 = tpu.matmul %239, %240, %cst_117 {dimension_numbers = #tpu.dot_dimension_numbers<[1], [0], [0], [1], [0, 0, 1, 1], [], []>} : vector<8x128xbf16>, vector<128x384xbf16>, vector<8x384xf32> -> vector<8x384xf32>
    %242 = vector.extract_strided_slice %241 {offsets = [0, 0], sizes = [8, 128], strides = [1, 1]} : vector<8x384xf32> to vector<8x128xf32>
    %243 = vector.extract_strided_slice %241 {offsets = [0, 128], sizes = [8, 128], strides = [1, 1]} : vector<8x384xf32> to vector<8x128xf32>
    %244 = vector.extract_strided_slice %241 {offsets = [0, 256], sizes = [8, 128], strides = [1, 1]} : vector<8x384xf32> to vector<8x128xf32>
    %245 = tpu.concatenate %242, %243, %244 in 0 : vector<8x128xf32>, vector<8x128xf32>, vector<8x128xf32> -> vector<24x128xf32>
    %c6 = arith.constant 6 : index
    %c0_118 = arith.constant 0 : index
    %c0_119 = arith.constant 0 : index
    %246 = vector.load %arg3[%c6, %c0_118, %c0_119] : memref<14x32x224xbf16, #tpu.memory_space<vmem>>, vector<1x32x224xbf16>
    %247 = vector.shape_cast %246 : vector<1x32x224xbf16> to vector<32x224xbf16>
    %248 = vector.extract_strided_slice %247 {offsets = [0, 0], sizes = [8, 24], strides = [1, 1]} : vector<32x224xbf16> to vector<8x24xbf16>
    %249 = arith.truncf %245 : vector<24x128xf32> to vector<24x128xbf16>
    %cst_120 = arith.constant dense<0.000000e+00> : vector<8x128xf32>
    %250 = tpu.matmul %248, %249, %cst_120 {dimension_numbers = #tpu.dot_dimension_numbers<[1], [0], [0], [1], [0, 0, 1, 1], [], []>} : vector<8x24xbf16>, vector<24x128xbf16>, vector<8x128xf32> -> vector<8x128xf32>
    %c6_121 = arith.constant 6 : index
    %c0_122 = arith.constant 0 : index
    %251 = vector.load %arg4[%c6_121, %c0_122] : memref<24x128xf32, #tpu.memory_space<vmem>>, vector<1x128xf32>
    %252 = vector.broadcast %251 : vector<1x128xf32> to vector<8x128xf32>
    %253 = arith.addf %250, %252 : vector<8x128xf32>
    %c2_123 = arith.constant 2 : index
    %c0_124 = arith.constant 0 : index
    %c0_125 = arith.constant 0 : index
    %254 = vector.load %arg5[%c2_123, %c0_124, %c0_125] : memref<3x128x128xf32, #tpu.memory_space<vmem>>, vector<1x128x128xf32>
    %255 = vector.shape_cast %254 : vector<1x128x128xf32> to vector<128x128xf32>
    %c2_126 = arith.constant 2 : index
    %c0_127 = arith.constant 0 : index
    %c0_128 = arith.constant 0 : index
    %256 = vector.load %arg6[%c2_126, %c0_127, %c0_128] : memref<3x64x64xf32, #tpu.memory_space<vmem>>, vector<1x64x64xf32>
    %257 = vector.shape_cast %256 : vector<1x64x64xf32> to vector<64x64xf32>
    %258 = vector.extract_strided_slice %257 {offsets = [0, 0], sizes = [16, 16], strides = [1, 1]} : vector<64x64xf32> to vector<16x16xf32>
    %259 = arith.mulf %253, %253 : vector<8x128xf32>
    %260 = tpu.concatenate %253, %259 in 0 : vector<8x128xf32>, vector<8x128xf32> -> vector<16x128xf32>
    %cst_129 = arith.constant dense<0.000000e+00> : vector<16x128xf32>
    %261 = tpu.matmul %258, %260, %cst_129 {dimension_numbers = #tpu.dot_dimension_numbers<[1], [0], [0], [1], [0, 0, 1, 1], [], []>} : vector<16x16xf32>, vector<16x128xf32>, vector<16x128xf32> -> vector<16x128xf32>
    %cst_130 = arith.constant dense<0.000000e+00> : vector<16x128xf32>
    %262 = tpu.matmul %261, %255, %cst_130 {dimension_numbers = #tpu.dot_dimension_numbers<[1], [0], [0], [1], [0, 0, 1, 1], [], []>} : vector<16x128xf32>, vector<128x128xf32>, vector<16x128xf32> -> vector<16x128xf32>
    %cst_131 = arith.constant 6.250000e-02 : f32
    %263 = vector.broadcast %cst_131 : f32 to vector<16x128xf32>
    %264 = arith.mulf %262, %263 : vector<16x128xf32>
    %265 = vector.extract_strided_slice %264 {offsets = [0, 0], sizes = [8, 128], strides = [1, 1]} : vector<16x128xf32> to vector<8x128xf32>
    %266 = vector.extract_strided_slice %264 {offsets = [8, 0], sizes = [8, 128], strides = [1, 1]} : vector<16x128xf32> to vector<8x128xf32>
    %267 = arith.mulf %265, %265 : vector<8x128xf32>
    %268 = arith.subf %266, %267 : vector<8x128xf32>
    %cst_132 = arith.constant 0.000000e+00 : f32
    %269 = vector.broadcast %cst_132 : f32 to vector<8x128xf32>
    %270 = arith.maximumf %268, %269 : vector<8x128xf32>
    %271 = arith.subf %253, %265 : vector<8x128xf32>
    %cst_133 = arith.constant 9.99999974E-6 : f32
    %272 = vector.broadcast %cst_133 : f32 to vector<8x128xf32>
    %273 = arith.addf %270, %272 : vector<8x128xf32>
    %274 = math.rsqrt %273 : vector<8x128xf32>
    %275 = arith.mulf %271, %274 : vector<8x128xf32>
    %276 = arith.addf %275, %199 : vector<8x128xf32>
    %277 = arith.truncf %276 : vector<8x128xf32> to vector<8x128xbf16>
    %c0_134 = arith.constant 0 : index
    %c3456 = arith.constant 3456 : index
    %278 = vector.load %arg2[%c0_134, %c3456] : memref<128x7168xbf16, #tpu.memory_space<vmem>>, vector<128x384xbf16>
    %cst_135 = arith.constant dense<0.000000e+00> : vector<8x384xf32>
    %279 = tpu.matmul %277, %278, %cst_135 {dimension_numbers = #tpu.dot_dimension_numbers<[1], [0], [0], [1], [0, 0, 1, 1], [], []>} : vector<8x128xbf16>, vector<128x384xbf16>, vector<8x384xf32> -> vector<8x384xf32>
    %280 = vector.extract_strided_slice %279 {offsets = [0, 0], sizes = [8, 128], strides = [1, 1]} : vector<8x384xf32> to vector<8x128xf32>
    %281 = vector.extract_strided_slice %279 {offsets = [0, 128], sizes = [8, 128], strides = [1, 1]} : vector<8x384xf32> to vector<8x128xf32>
    %282 = vector.extract_strided_slice %279 {offsets = [0, 256], sizes = [8, 128], strides = [1, 1]} : vector<8x384xf32> to vector<8x128xf32>
    %283 = tpu.concatenate %280, %281, %282 in 0 : vector<8x128xf32>, vector<8x128xf32>, vector<8x128xf32> -> vector<24x128xf32>
    %c7 = arith.constant 7 : index
    %c0_136 = arith.constant 0 : index
    %c0_137 = arith.constant 0 : index
    %284 = vector.load %arg3[%c7, %c0_136, %c0_137] : memref<14x32x224xbf16, #tpu.memory_space<vmem>>, vector<1x32x224xbf16>
    %285 = vector.shape_cast %284 : vector<1x32x224xbf16> to vector<32x224xbf16>
    %286 = vector.extract_strided_slice %285 {offsets = [0, 0], sizes = [8, 24], strides = [1, 1]} : vector<32x224xbf16> to vector<8x24xbf16>
    %287 = arith.truncf %283 : vector<24x128xf32> to vector<24x128xbf16>
    %cst_138 = arith.constant dense<0.000000e+00> : vector<8x128xf32>
    %288 = tpu.matmul %286, %287, %cst_138 {dimension_numbers = #tpu.dot_dimension_numbers<[1], [0], [0], [1], [0, 0, 1, 1], [], []>} : vector<8x24xbf16>, vector<24x128xbf16>, vector<8x128xf32> -> vector<8x128xf32>
    %c7_139 = arith.constant 7 : index
    %c0_140 = arith.constant 0 : index
    %289 = vector.load %arg4[%c7_139, %c0_140] : memref<24x128xf32, #tpu.memory_space<vmem>>, vector<1x128xf32>
    %290 = vector.broadcast %289 : vector<1x128xf32> to vector<8x128xf32>
    %291 = arith.addf %288, %290 : vector<8x128xf32>
    %c2_141 = arith.constant 2 : index
    %c0_142 = arith.constant 0 : index
    %c0_143 = arith.constant 0 : index
    %292 = vector.load %arg5[%c2_141, %c0_142, %c0_143] : memref<3x128x128xf32, #tpu.memory_space<vmem>>, vector<1x128x128xf32>
    %293 = vector.shape_cast %292 : vector<1x128x128xf32> to vector<128x128xf32>
    %c2_144 = arith.constant 2 : index
    %c0_145 = arith.constant 0 : index
    %c0_146 = arith.constant 0 : index
    %294 = vector.load %arg6[%c2_144, %c0_145, %c0_146] : memref<3x64x64xf32, #tpu.memory_space<vmem>>, vector<1x64x64xf32>
    %295 = vector.shape_cast %294 : vector<1x64x64xf32> to vector<64x64xf32>
    %296 = vector.extract_strided_slice %295 {offsets = [0, 0], sizes = [16, 16], strides = [1, 1]} : vector<64x64xf32> to vector<16x16xf32>
    %297 = arith.mulf %291, %291 : vector<8x128xf32>
    %298 = tpu.concatenate %291, %297 in 0 : vector<8x128xf32>, vector<8x128xf32> -> vector<16x128xf32>
    %cst_147 = arith.constant dense<0.000000e+00> : vector<16x128xf32>
    %299 = tpu.matmul %296, %298, %cst_147 {dimension_numbers = #tpu.dot_dimension_numbers<[1], [0], [0], [1], [0, 0, 1, 1], [], []>} : vector<16x16xf32>, vector<16x128xf32>, vector<16x128xf32> -> vector<16x128xf32>
    %cst_148 = arith.constant dense<0.000000e+00> : vector<16x128xf32>
    %300 = tpu.matmul %299, %293, %cst_148 {dimension_numbers = #tpu.dot_dimension_numbers<[1], [0], [0], [1], [0, 0, 1, 1], [], []>} : vector<16x128xf32>, vector<128x128xf32>, vector<16x128xf32> -> vector<16x128xf32>
    %cst_149 = arith.constant 6.250000e-02 : f32
    %301 = vector.broadcast %cst_149 : f32 to vector<16x128xf32>
    %302 = arith.mulf %300, %301 : vector<16x128xf32>
    %303 = vector.extract_strided_slice %302 {offsets = [0, 0], sizes = [8, 128], strides = [1, 1]} : vector<16x128xf32> to vector<8x128xf32>
    %304 = vector.extract_strided_slice %302 {offsets = [8, 0], sizes = [8, 128], strides = [1, 1]} : vector<16x128xf32> to vector<8x128xf32>
    %305 = arith.mulf %303, %303 : vector<8x128xf32>
    %306 = arith.subf %304, %305 : vector<8x128xf32>
    %cst_150 = arith.constant 0.000000e+00 : f32
    %307 = vector.broadcast %cst_150 : f32 to vector<8x128xf32>
    %308 = arith.maximumf %306, %307 : vector<8x128xf32>
    %309 = arith.subf %291, %303 : vector<8x128xf32>
    %cst_151 = arith.constant 9.99999974E-6 : f32
    %310 = vector.broadcast %cst_151 : f32 to vector<8x128xf32>
    %311 = arith.addf %308, %310 : vector<8x128xf32>
    %312 = math.rsqrt %311 : vector<8x128xf32>
    %313 = arith.mulf %309, %312 : vector<8x128xf32>
    %cst_152 = arith.constant 0.000000e+00 : f32
    %314 = vector.broadcast %cst_152 : f32 to vector<8x128xf32>
    %315 = arith.maximumf %313, %314 : vector<8x128xf32>
    %316 = arith.truncf %315 : vector<8x128xf32> to vector<8x128xbf16>
    %c0_153 = arith.constant 0 : index
    %c3840 = arith.constant 3840 : index
    %317 = vector.load %arg2[%c0_153, %c3840] : memref<128x7168xbf16, #tpu.memory_space<vmem>>, vector<128x384xbf16>
    %cst_154 = arith.constant dense<0.000000e+00> : vector<8x384xf32>
    %318 = tpu.matmul %316, %317, %cst_154 {dimension_numbers = #tpu.dot_dimension_numbers<[1], [0], [0], [1], [0, 0, 1, 1], [], []>} : vector<8x128xbf16>, vector<128x384xbf16>, vector<8x384xf32> -> vector<8x384xf32>
    %319 = vector.extract_strided_slice %318 {offsets = [0, 0], sizes = [8, 128], strides = [1, 1]} : vector<8x384xf32> to vector<8x128xf32>
    %320 = vector.extract_strided_slice %318 {offsets = [0, 128], sizes = [8, 128], strides = [1, 1]} : vector<8x384xf32> to vector<8x128xf32>
    %321 = vector.extract_strided_slice %318 {offsets = [0, 256], sizes = [8, 128], strides = [1, 1]} : vector<8x384xf32> to vector<8x128xf32>
    %322 = tpu.concatenate %319, %320, %321 in 0 : vector<8x128xf32>, vector<8x128xf32>, vector<8x128xf32> -> vector<24x128xf32>
    %c8 = arith.constant 8 : index
    %c0_155 = arith.constant 0 : index
    %c0_156 = arith.constant 0 : index
    %323 = vector.load %arg3[%c8, %c0_155, %c0_156] : memref<14x32x224xbf16, #tpu.memory_space<vmem>>, vector<1x32x224xbf16>
    %324 = vector.shape_cast %323 : vector<1x32x224xbf16> to vector<32x224xbf16>
    %325 = vector.extract_strided_slice %324 {offsets = [0, 0], sizes = [8, 24], strides = [1, 1]} : vector<32x224xbf16> to vector<8x24xbf16>
    %326 = arith.truncf %322 : vector<24x128xf32> to vector<24x128xbf16>
    %cst_157 = arith.constant dense<0.000000e+00> : vector<8x128xf32>
    %327 = tpu.matmul %325, %326, %cst_157 {dimension_numbers = #tpu.dot_dimension_numbers<[1], [0], [0], [1], [0, 0, 1, 1], [], []>} : vector<8x24xbf16>, vector<24x128xbf16>, vector<8x128xf32> -> vector<8x128xf32>
    %c8_158 = arith.constant 8 : index
    %c0_159 = arith.constant 0 : index
    %328 = vector.load %arg4[%c8_158, %c0_159] : memref<24x128xf32, #tpu.memory_space<vmem>>, vector<1x128xf32>
    %329 = vector.broadcast %328 : vector<1x128xf32> to vector<8x128xf32>
    %330 = arith.addf %327, %329 : vector<8x128xf32>
    %c2_160 = arith.constant 2 : index
    %c0_161 = arith.constant 0 : index
    %c0_162 = arith.constant 0 : index
    %331 = vector.load %arg5[%c2_160, %c0_161, %c0_162] : memref<3x128x128xf32, #tpu.memory_space<vmem>>, vector<1x128x128xf32>
    %332 = vector.shape_cast %331 : vector<1x128x128xf32> to vector<128x128xf32>
    %c2_163 = arith.constant 2 : index
    %c0_164 = arith.constant 0 : index
    %c0_165 = arith.constant 0 : index
    %333 = vector.load %arg6[%c2_163, %c0_164, %c0_165] : memref<3x64x64xf32, #tpu.memory_space<vmem>>, vector<1x64x64xf32>
    %334 = vector.shape_cast %333 : vector<1x64x64xf32> to vector<64x64xf32>
    %335 = vector.extract_strided_slice %334 {offsets = [0, 0], sizes = [16, 16], strides = [1, 1]} : vector<64x64xf32> to vector<16x16xf32>
    %336 = arith.mulf %330, %330 : vector<8x128xf32>
    %337 = tpu.concatenate %330, %336 in 0 : vector<8x128xf32>, vector<8x128xf32> -> vector<16x128xf32>
    %cst_166 = arith.constant dense<0.000000e+00> : vector<16x128xf32>
    %338 = tpu.matmul %335, %337, %cst_166 {dimension_numbers = #tpu.dot_dimension_numbers<[1], [0], [0], [1], [0, 0, 1, 1], [], []>} : vector<16x16xf32>, vector<16x128xf32>, vector<16x128xf32> -> vector<16x128xf32>
    %cst_167 = arith.constant dense<0.000000e+00> : vector<16x128xf32>
    %339 = tpu.matmul %338, %332, %cst_167 {dimension_numbers = #tpu.dot_dimension_numbers<[1], [0], [0], [1], [0, 0, 1, 1], [], []>} : vector<16x128xf32>, vector<128x128xf32>, vector<16x128xf32> -> vector<16x128xf32>
    %cst_168 = arith.constant 6.250000e-02 : f32
    %340 = vector.broadcast %cst_168 : f32 to vector<16x128xf32>
    %341 = arith.mulf %339, %340 : vector<16x128xf32>
    %342 = vector.extract_strided_slice %341 {offsets = [0, 0], sizes = [8, 128], strides = [1, 1]} : vector<16x128xf32> to vector<8x128xf32>
    %343 = vector.extract_strided_slice %341 {offsets = [8, 0], sizes = [8, 128], strides = [1, 1]} : vector<16x128xf32> to vector<8x128xf32>
    %344 = arith.mulf %342, %342 : vector<8x128xf32>
    %345 = arith.subf %343, %344 : vector<8x128xf32>
    %cst_169 = arith.constant 0.000000e+00 : f32
    %346 = vector.broadcast %cst_169 : f32 to vector<8x128xf32>
    %347 = arith.maximumf %345, %346 : vector<8x128xf32>
    %348 = arith.subf %330, %342 : vector<8x128xf32>
    %cst_170 = arith.constant 9.99999974E-6 : f32
    %349 = vector.broadcast %cst_170 : f32 to vector<8x128xf32>
    %350 = arith.addf %347, %349 : vector<8x128xf32>
    %351 = math.rsqrt %350 : vector<8x128xf32>
    %352 = arith.mulf %348, %351 : vector<8x128xf32>
    %353 = arith.addf %352, %276 : vector<8x128xf32>
    %354 = arith.truncf %353 : vector<8x128xf32> to vector<8x128xbf16>
    %c0_171 = arith.constant 0 : index
    %c4224 = arith.constant 4224 : index
    %355 = vector.load %arg2[%c0_171, %c4224] : memref<128x7168xbf16, #tpu.memory_space<vmem>>, vector<128x384xbf16>
    %cst_172 = arith.constant dense<0.000000e+00> : vector<8x384xf32>
    %356 = tpu.matmul %354, %355, %cst_172 {dimension_numbers = #tpu.dot_dimension_numbers<[1], [0], [0], [1], [0, 0, 1, 1], [], []>} : vector<8x128xbf16>, vector<128x384xbf16>, vector<8x384xf32> -> vector<8x384xf32>
    %357 = vector.extract_strided_slice %356 {offsets = [0, 0], sizes = [8, 128], strides = [1, 1]} : vector<8x384xf32> to vector<8x128xf32>
    %358 = vector.extract_strided_slice %356 {offsets = [0, 128], sizes = [8, 128], strides = [1, 1]} : vector<8x384xf32> to vector<8x128xf32>
    %359 = vector.extract_strided_slice %356 {offsets = [0, 256], sizes = [8, 128], strides = [1, 1]} : vector<8x384xf32> to vector<8x128xf32>
    %360 = tpu.concatenate %357, %358, %359 in 0 : vector<8x128xf32>, vector<8x128xf32>, vector<8x128xf32> -> vector<24x128xf32>
    %c9 = arith.constant 9 : index
    %c0_173 = arith.constant 0 : index
    %c0_174 = arith.constant 0 : index
    %361 = vector.load %arg3[%c9, %c0_173, %c0_174] : memref<14x32x224xbf16, #tpu.memory_space<vmem>>, vector<1x32x224xbf16>
    %362 = vector.shape_cast %361 : vector<1x32x224xbf16> to vector<32x224xbf16>
    %363 = vector.extract_strided_slice %362 {offsets = [0, 0], sizes = [8, 24], strides = [1, 1]} : vector<32x224xbf16> to vector<8x24xbf16>
    %364 = arith.truncf %360 : vector<24x128xf32> to vector<24x128xbf16>
    %cst_175 = arith.constant dense<0.000000e+00> : vector<8x128xf32>
    %365 = tpu.matmul %363, %364, %cst_175 {dimension_numbers = #tpu.dot_dimension_numbers<[1], [0], [0], [1], [0, 0, 1, 1], [], []>} : vector<8x24xbf16>, vector<24x128xbf16>, vector<8x128xf32> -> vector<8x128xf32>
    %c9_176 = arith.constant 9 : index
    %c0_177 = arith.constant 0 : index
    %366 = vector.load %arg4[%c9_176, %c0_177] : memref<24x128xf32, #tpu.memory_space<vmem>>, vector<1x128xf32>
    %367 = vector.broadcast %366 : vector<1x128xf32> to vector<8x128xf32>
    %368 = arith.addf %365, %367 : vector<8x128xf32>
    %c2_178 = arith.constant 2 : index
    %c0_179 = arith.constant 0 : index
    %c0_180 = arith.constant 0 : index
    %369 = vector.load %arg5[%c2_178, %c0_179, %c0_180] : memref<3x128x128xf32, #tpu.memory_space<vmem>>, vector<1x128x128xf32>
    %370 = vector.shape_cast %369 : vector<1x128x128xf32> to vector<128x128xf32>
    %c2_181 = arith.constant 2 : index
    %c0_182 = arith.constant 0 : index
    %c0_183 = arith.constant 0 : index
    %371 = vector.load %arg6[%c2_181, %c0_182, %c0_183] : memref<3x64x64xf32, #tpu.memory_space<vmem>>, vector<1x64x64xf32>
    %372 = vector.shape_cast %371 : vector<1x64x64xf32> to vector<64x64xf32>
    %373 = vector.extract_strided_slice %372 {offsets = [0, 0], sizes = [16, 16], strides = [1, 1]} : vector<64x64xf32> to vector<16x16xf32>
    %374 = arith.mulf %368, %368 : vector<8x128xf32>
    %375 = tpu.concatenate %368, %374 in 0 : vector<8x128xf32>, vector<8x128xf32> -> vector<16x128xf32>
    %cst_184 = arith.constant dense<0.000000e+00> : vector<16x128xf32>
    %376 = tpu.matmul %373, %375, %cst_184 {dimension_numbers = #tpu.dot_dimension_numbers<[1], [0], [0], [1], [0, 0, 1, 1], [], []>} : vector<16x16xf32>, vector<16x128xf32>, vector<16x128xf32> -> vector<16x128xf32>
    %cst_185 = arith.constant dense<0.000000e+00> : vector<16x128xf32>
    %377 = tpu.matmul %376, %370, %cst_185 {dimension_numbers = #tpu.dot_dimension_numbers<[1], [0], [0], [1], [0, 0, 1, 1], [], []>} : vector<16x128xf32>, vector<128x128xf32>, vector<16x128xf32> -> vector<16x128xf32>
    %cst_186 = arith.constant 6.250000e-02 : f32
    %378 = vector.broadcast %cst_186 : f32 to vector<16x128xf32>
    %379 = arith.mulf %377, %378 : vector<16x128xf32>
    %380 = vector.extract_strided_slice %379 {offsets = [0, 0], sizes = [8, 128], strides = [1, 1]} : vector<16x128xf32> to vector<8x128xf32>
    %381 = vector.extract_strided_slice %379 {offsets = [8, 0], sizes = [8, 128], strides = [1, 1]} : vector<16x128xf32> to vector<8x128xf32>
    %382 = arith.mulf %380, %380 : vector<8x128xf32>
    %383 = arith.subf %381, %382 : vector<8x128xf32>
    %cst_187 = arith.constant 0.000000e+00 : f32
    %384 = vector.broadcast %cst_187 : f32 to vector<8x128xf32>
    %385 = arith.maximumf %383, %384 : vector<8x128xf32>
    %386 = arith.subf %368, %380 : vector<8x128xf32>
    %cst_188 = arith.constant 9.99999974E-6 : f32
    %387 = vector.broadcast %cst_188 : f32 to vector<8x128xf32>
    %388 = arith.addf %385, %387 : vector<8x128xf32>
    %389 = math.rsqrt %388 : vector<8x128xf32>
    %390 = arith.mulf %386, %389 : vector<8x128xf32>
    %cst_189 = arith.constant 0.000000e+00 : f32
    %391 = vector.broadcast %cst_189 : f32 to vector<8x128xf32>
    %392 = arith.maximumf %390, %391 : vector<8x128xf32>
    %393 = arith.truncf %392 : vector<8x128xf32> to vector<8x128xbf16>
    %c0_190 = arith.constant 0 : index
    %c4608 = arith.constant 4608 : index
    %394 = vector.load %arg2[%c0_190, %c4608] : memref<128x7168xbf16, #tpu.memory_space<vmem>>, vector<128x384xbf16>
    %cst_191 = arith.constant dense<0.000000e+00> : vector<8x384xf32>
    %395 = tpu.matmul %393, %394, %cst_191 {dimension_numbers = #tpu.dot_dimension_numbers<[1], [0], [0], [1], [0, 0, 1, 1], [], []>} : vector<8x128xbf16>, vector<128x384xbf16>, vector<8x384xf32> -> vector<8x384xf32>
    %396 = vector.extract_strided_slice %395 {offsets = [0, 0], sizes = [8, 128], strides = [1, 1]} : vector<8x384xf32> to vector<8x128xf32>
    %397 = vector.extract_strided_slice %395 {offsets = [0, 128], sizes = [8, 128], strides = [1, 1]} : vector<8x384xf32> to vector<8x128xf32>
    %398 = vector.extract_strided_slice %395 {offsets = [0, 256], sizes = [8, 128], strides = [1, 1]} : vector<8x384xf32> to vector<8x128xf32>
    %399 = tpu.concatenate %396, %397, %398 in 0 : vector<8x128xf32>, vector<8x128xf32>, vector<8x128xf32> -> vector<24x128xf32>
    %c10 = arith.constant 10 : index
    %c0_192 = arith.constant 0 : index
    %c0_193 = arith.constant 0 : index
    %400 = vector.load %arg3[%c10, %c0_192, %c0_193] : memref<14x32x224xbf16, #tpu.memory_space<vmem>>, vector<1x32x224xbf16>
    %401 = vector.shape_cast %400 : vector<1x32x224xbf16> to vector<32x224xbf16>
    %402 = vector.extract_strided_slice %401 {offsets = [0, 0], sizes = [8, 24], strides = [1, 1]} : vector<32x224xbf16> to vector<8x24xbf16>
    %403 = arith.truncf %399 : vector<24x128xf32> to vector<24x128xbf16>
    %cst_194 = arith.constant dense<0.000000e+00> : vector<8x128xf32>
    %404 = tpu.matmul %402, %403, %cst_194 {dimension_numbers = #tpu.dot_dimension_numbers<[1], [0], [0], [1], [0, 0, 1, 1], [], []>} : vector<8x24xbf16>, vector<24x128xbf16>, vector<8x128xf32> -> vector<8x128xf32>
    %c10_195 = arith.constant 10 : index
    %c0_196 = arith.constant 0 : index
    %405 = vector.load %arg4[%c10_195, %c0_196] : memref<24x128xf32, #tpu.memory_space<vmem>>, vector<1x128xf32>
    %406 = vector.broadcast %405 : vector<1x128xf32> to vector<8x128xf32>
    %407 = arith.addf %404, %406 : vector<8x128xf32>
    %c2_197 = arith.constant 2 : index
    %c0_198 = arith.constant 0 : index
    %c0_199 = arith.constant 0 : index
    %408 = vector.load %arg5[%c2_197, %c0_198, %c0_199] : memref<3x128x128xf32, #tpu.memory_space<vmem>>, vector<1x128x128xf32>
    %409 = vector.shape_cast %408 : vector<1x128x128xf32> to vector<128x128xf32>
    %c2_200 = arith.constant 2 : index
    %c0_201 = arith.constant 0 : index
    %c0_202 = arith.constant 0 : index
    %410 = vector.load %arg6[%c2_200, %c0_201, %c0_202] : memref<3x64x64xf32, #tpu.memory_space<vmem>>, vector<1x64x64xf32>
    %411 = vector.shape_cast %410 : vector<1x64x64xf32> to vector<64x64xf32>
    %412 = vector.extract_strided_slice %411 {offsets = [0, 0], sizes = [16, 16], strides = [1, 1]} : vector<64x64xf32> to vector<16x16xf32>
    %413 = arith.mulf %407, %407 : vector<8x128xf32>
    %414 = tpu.concatenate %407, %413 in 0 : vector<8x128xf32>, vector<8x128xf32> -> vector<16x128xf32>
    %cst_203 = arith.constant dense<0.000000e+00> : vector<16x128xf32>
    %415 = tpu.matmul %412, %414, %cst_203 {dimension_numbers = #tpu.dot_dimension_numbers<[1], [0], [0], [1], [0, 0, 1, 1], [], []>} : vector<16x16xf32>, vector<16x128xf32>, vector<16x128xf32> -> vector<16x128xf32>
    %cst_204 = arith.constant dense<0.000000e+00> : vector<16x128xf32>
    %416 = tpu.matmul %415, %409, %cst_204 {dimension_numbers = #tpu.dot_dimension_numbers<[1], [0], [0], [1], [0, 0, 1, 1], [], []>} : vector<16x128xf32>, vector<128x128xf32>, vector<16x128xf32> -> vector<16x128xf32>
    %cst_205 = arith.constant 6.250000e-02 : f32
    %417 = vector.broadcast %cst_205 : f32 to vector<16x128xf32>
    %418 = arith.mulf %416, %417 : vector<16x128xf32>
    %419 = vector.extract_strided_slice %418 {offsets = [0, 0], sizes = [8, 128], strides = [1, 1]} : vector<16x128xf32> to vector<8x128xf32>
    %420 = vector.extract_strided_slice %418 {offsets = [8, 0], sizes = [8, 128], strides = [1, 1]} : vector<16x128xf32> to vector<8x128xf32>
    %421 = arith.mulf %419, %419 : vector<8x128xf32>
    %422 = arith.subf %420, %421 : vector<8x128xf32>
    %cst_206 = arith.constant 0.000000e+00 : f32
    %423 = vector.broadcast %cst_206 : f32 to vector<8x128xf32>
    %424 = arith.maximumf %422, %423 : vector<8x128xf32>
    %425 = arith.subf %407, %419 : vector<8x128xf32>
    %cst_207 = arith.constant 9.99999974E-6 : f32
    %426 = vector.broadcast %cst_207 : f32 to vector<8x128xf32>
    %427 = arith.addf %424, %426 : vector<8x128xf32>
    %428 = math.rsqrt %427 : vector<8x128xf32>
    %429 = arith.mulf %425, %428 : vector<8x128xf32>
    %430 = arith.addf %429, %353 : vector<8x128xf32>
    %431 = arith.truncf %430 : vector<8x128xf32> to vector<8x128xbf16>
    %c0_208 = arith.constant 0 : index
    %c4992 = arith.constant 4992 : index
    %432 = vector.load %arg2[%c0_208, %c4992] : memref<128x7168xbf16, #tpu.memory_space<vmem>>, vector<128x640xbf16>
    %cst_209 = arith.constant dense<0.000000e+00> : vector<8x640xf32>
    %433 = tpu.matmul %431, %432, %cst_209 {dimension_numbers = #tpu.dot_dimension_numbers<[1], [0], [0], [1], [0, 0, 1, 1], [], []>} : vector<8x128xbf16>, vector<128x640xbf16>, vector<8x640xf32> -> vector<8x640xf32>
    %434 = vector.extract_strided_slice %433 {offsets = [0, 0], sizes = [8, 128], strides = [1, 1]} : vector<8x640xf32> to vector<8x128xf32>
    %435 = vector.extract_strided_slice %433 {offsets = [0, 128], sizes = [8, 128], strides = [1, 1]} : vector<8x640xf32> to vector<8x128xf32>
    %436 = vector.extract_strided_slice %433 {offsets = [0, 256], sizes = [8, 128], strides = [1, 1]} : vector<8x640xf32> to vector<8x128xf32>
    %437 = vector.extract_strided_slice %433 {offsets = [0, 384], sizes = [8, 128], strides = [1, 1]} : vector<8x640xf32> to vector<8x128xf32>
    %438 = vector.extract_strided_slice %433 {offsets = [0, 512], sizes = [8, 128], strides = [1, 1]} : vector<8x640xf32> to vector<8x128xf32>
    %439 = tpu.concatenate %434, %435, %436, %437, %438 in 0 : vector<8x128xf32>, vector<8x128xf32>, vector<8x128xf32>, vector<8x128xf32>, vector<8x128xf32> -> vector<40x128xf32>
    %c11 = arith.constant 11 : index
    %c0_210 = arith.constant 0 : index
    %c0_211 = arith.constant 0 : index
    %440 = vector.load %arg3[%c11, %c0_210, %c0_211] : memref<14x32x224xbf16, #tpu.memory_space<vmem>>, vector<1x32x224xbf16>
    %441 = vector.shape_cast %440 : vector<1x32x224xbf16> to vector<32x224xbf16>
    %442 = vector.extract_strided_slice %441 {offsets = [0, 0], sizes = [16, 40], strides = [1, 1]} : vector<32x224xbf16> to vector<16x40xbf16>
    %443 = arith.truncf %439 : vector<40x128xf32> to vector<40x128xbf16>
    %cst_212 = arith.constant dense<0.000000e+00> : vector<16x128xf32>
    %444 = tpu.matmul %442, %443, %cst_212 {dimension_numbers = #tpu.dot_dimension_numbers<[1], [0], [0], [1], [0, 0, 1, 1], [], []>} : vector<16x40xbf16>, vector<40x128xbf16>, vector<16x128xf32> -> vector<16x128xf32>
    %c11_213 = arith.constant 11 : index
    %c0_214 = arith.constant 0 : index
    %445 = vector.load %arg4[%c11_213, %c0_214] : memref<24x128xf32, #tpu.memory_space<vmem>>, vector<1x128xf32>
    %446 = vector.broadcast %445 : vector<1x128xf32> to vector<16x128xf32>
    %447 = arith.addf %444, %446 : vector<16x128xf32>
    %c1_215 = arith.constant 1 : index
    %c0_216 = arith.constant 0 : index
    %c0_217 = arith.constant 0 : index
    %448 = vector.load %arg6[%c1_215, %c0_216, %c0_217] : memref<3x64x64xf32, #tpu.memory_space<vmem>>, vector<1x64x64xf32>
    %449 = vector.shape_cast %448 : vector<1x64x64xf32> to vector<64x64xf32>
    %450 = vector.extract_strided_slice %449 {offsets = [0, 0], sizes = [32, 32], strides = [1, 1]} : vector<64x64xf32> to vector<32x32xf32>
    %451 = arith.mulf %447, %447 : vector<16x128xf32>
    %452 = tpu.concatenate %447, %451 in 0 : vector<16x128xf32>, vector<16x128xf32> -> vector<32x128xf32>
    %cst_218 = arith.constant dense<0.000000e+00> : vector<32x128xf32>
    %453 = tpu.matmul %450, %452, %cst_218 {dimension_numbers = #tpu.dot_dimension_numbers<[1], [0], [0], [1], [0, 0, 1, 1], [], []>} : vector<32x32xf32>, vector<32x128xf32>, vector<32x128xf32> -> vector<32x128xf32>
    %cst_219 = arith.constant dense<0.000000e+00> : vector<32xf32>
    %454 = vector.multi_reduction <add>, %453, %cst_219 [1] : vector<32x128xf32> to vector<32xf32>
    %455 = vector.shape_cast %454 : vector<32xf32> to vector<32x1xf32>
    %456 = vector.extract_strided_slice %455 {offsets = [0, 0], sizes = [16, 1], strides = [1, 1]} : vector<32x1xf32> to vector<16x1xf32>
    %457 = vector.extract_strided_slice %455 {offsets = [16, 0], sizes = [16, 1], strides = [1, 1]} : vector<32x1xf32> to vector<16x1xf32>
    %cst_220 = arith.constant 9.765625E-4 : f32
    %458 = vector.broadcast %cst_220 : f32 to vector<16x1xf32>
    %459 = arith.mulf %456, %458 : vector<16x1xf32>
    %cst_221 = arith.constant 1.024000e+03 : f32
    %460 = vector.broadcast %cst_221 : f32 to vector<16x1xf32>
    %461 = arith.mulf %460, %459 : vector<16x1xf32>
    %462 = arith.mulf %461, %459 : vector<16x1xf32>
    %463 = arith.subf %457, %462 : vector<16x1xf32>
    %cst_222 = arith.constant 9.77517105E-4 : f32
    %464 = vector.broadcast %cst_222 : f32 to vector<16x1xf32>
    %465 = arith.mulf %463, %464 : vector<16x1xf32>
    %cst_223 = arith.constant 0.000000e+00 : f32
    %466 = vector.broadcast %cst_223 : f32 to vector<16x1xf32>
    %467 = arith.maximumf %465, %466 : vector<16x1xf32>
    %468 = vector.broadcast %459 : vector<16x1xf32> to vector<16x128xf32>
    %469 = arith.subf %447, %468 : vector<16x128xf32>
    %470 = math.sqrt %467 : vector<16x1xf32>
    %cst_224 = arith.constant 9.99999974E-6 : f32
    %471 = vector.broadcast %cst_224 : f32 to vector<16x1xf32>
    %472 = arith.addf %470, %471 : vector<16x1xf32>
    %473 = vector.broadcast %472 : vector<16x1xf32> to vector<16x128xf32>
    %474 = arith.divf %469, %473 : vector<16x128xf32>
    %c12 = arith.constant 12 : index
    %c0_225 = arith.constant 0 : index
    %475 = vector.load %arg4[%c12, %c0_225] : memref<24x128xf32, #tpu.memory_space<vmem>>, vector<1x128xf32>
    %476 = vector.broadcast %475 : vector<1x128xf32> to vector<16x128xf32>
    %477 = arith.mulf %474, %476 : vector<16x128xf32>
    %c13 = arith.constant 13 : index
    %c0_226 = arith.constant 0 : index
    %478 = vector.load %arg4[%c13, %c0_226] : memref<24x128xf32, #tpu.memory_space<vmem>>, vector<1x128xf32>
    %479 = vector.broadcast %478 : vector<1x128xf32> to vector<16x128xf32>
    %480 = arith.addf %477, %479 : vector<16x128xf32>
    %cst_227 = arith.constant 0.000000e+00 : f32
    %481 = vector.broadcast %cst_227 : f32 to vector<16x128xf32>
    %482 = arith.maximumf %480, %481 : vector<16x128xf32>
    %483 = arith.truncf %482 : vector<16x128xf32> to vector<16x128xbf16>
    %c0_228 = arith.constant 0 : index
    %c5632 = arith.constant 5632 : index
    %484 = vector.load %arg2[%c0_228, %c5632] : memref<128x7168xbf16, #tpu.memory_space<vmem>>, vector<128x640xbf16>
    %cst_229 = arith.constant dense<0.000000e+00> : vector<16x640xf32>
    %485 = tpu.matmul %483, %484, %cst_229 {dimension_numbers = #tpu.dot_dimension_numbers<[1], [0], [0], [1], [0, 0, 1, 1], [], []>} : vector<16x128xbf16>, vector<128x640xbf16>, vector<16x640xf32> -> vector<16x640xf32>
    %486 = vector.extract_strided_slice %485 {offsets = [0, 0], sizes = [16, 128], strides = [1, 1]} : vector<16x640xf32> to vector<16x128xf32>
    %487 = vector.extract_strided_slice %485 {offsets = [0, 128], sizes = [16, 128], strides = [1, 1]} : vector<16x640xf32> to vector<16x128xf32>
    %488 = vector.extract_strided_slice %485 {offsets = [0, 256], sizes = [16, 128], strides = [1, 1]} : vector<16x640xf32> to vector<16x128xf32>
    %489 = vector.extract_strided_slice %485 {offsets = [0, 384], sizes = [16, 128], strides = [1, 1]} : vector<16x640xf32> to vector<16x128xf32>
    %490 = vector.extract_strided_slice %485 {offsets = [0, 512], sizes = [16, 128], strides = [1, 1]} : vector<16x640xf32> to vector<16x128xf32>
    %491 = tpu.concatenate %486, %487, %488, %489, %490 in 0 : vector<16x128xf32>, vector<16x128xf32>, vector<16x128xf32>, vector<16x128xf32>, vector<16x128xf32> -> vector<80x128xf32>
    %c12_230 = arith.constant 12 : index
    %c0_231 = arith.constant 0 : index
    %c0_232 = arith.constant 0 : index
    %492 = vector.load %arg3[%c12_230, %c0_231, %c0_232] : memref<14x32x224xbf16, #tpu.memory_space<vmem>>, vector<1x32x224xbf16>
    %493 = vector.shape_cast %492 : vector<1x32x224xbf16> to vector<32x224xbf16>
    %494 = vector.extract_strided_slice %493 {offsets = [0, 0], sizes = [32, 80], strides = [1, 1]} : vector<32x224xbf16> to vector<32x80xbf16>
    %495 = arith.truncf %491 : vector<80x128xf32> to vector<80x128xbf16>
    %cst_233 = arith.constant dense<0.000000e+00> : vector<32x128xf32>
    %496 = tpu.matmul %494, %495, %cst_233 {dimension_numbers = #tpu.dot_dimension_numbers<[1], [0], [0], [1], [0, 0, 1, 1], [], []>} : vector<32x80xbf16>, vector<80x128xbf16>, vector<32x128xf32> -> vector<32x128xf32>
    %c14 = arith.constant 14 : index
    %c0_234 = arith.constant 0 : index
    %497 = vector.load %arg4[%c14, %c0_234] : memref<24x128xf32, #tpu.memory_space<vmem>>, vector<1x128xf32>
    %498 = vector.broadcast %497 : vector<1x128xf32> to vector<32x128xf32>
    %499 = arith.addf %496, %498 : vector<32x128xf32>
    %c0_235 = arith.constant 0 : index
    %c0_236 = arith.constant 0 : index
    %c0_237 = arith.constant 0 : index
    %500 = vector.load %arg6[%c0_235, %c0_236, %c0_237] : memref<3x64x64xf32, #tpu.memory_space<vmem>>, vector<1x64x64xf32>
    %501 = vector.shape_cast %500 : vector<1x64x64xf32> to vector<64x64xf32>
    %502 = arith.mulf %499, %499 : vector<32x128xf32>
    %503 = tpu.concatenate %499, %502 in 0 : vector<32x128xf32>, vector<32x128xf32> -> vector<64x128xf32>
    %cst_238 = arith.constant dense<0.000000e+00> : vector<64x128xf32>
    %504 = tpu.matmul %501, %503, %cst_238 {dimension_numbers = #tpu.dot_dimension_numbers<[1], [0], [0], [1], [0, 0, 1, 1], [], []>} : vector<64x64xf32>, vector<64x128xf32>, vector<64x128xf32> -> vector<64x128xf32>
    %cst_239 = arith.constant dense<0.000000e+00> : vector<64xf32>
    %505 = vector.multi_reduction <add>, %504, %cst_239 [1] : vector<64x128xf32> to vector<64xf32>
    %506 = vector.shape_cast %505 : vector<64xf32> to vector<64x1xf32>
    %507 = vector.extract_strided_slice %506 {offsets = [0, 0], sizes = [32, 1], strides = [1, 1]} : vector<64x1xf32> to vector<32x1xf32>
    %508 = vector.extract_strided_slice %506 {offsets = [32, 0], sizes = [32, 1], strides = [1, 1]} : vector<64x1xf32> to vector<32x1xf32>
    %cst_240 = arith.constant 4.8828125E-4 : f32
    %509 = vector.broadcast %cst_240 : f32 to vector<32x1xf32>
    %510 = arith.mulf %507, %509 : vector<32x1xf32>
    %cst_241 = arith.constant 2.048000e+03 : f32
    %511 = vector.broadcast %cst_241 : f32 to vector<32x1xf32>
    %512 = arith.mulf %511, %510 : vector<32x1xf32>
    %513 = arith.mulf %512, %510 : vector<32x1xf32>
    %514 = arith.subf %508, %513 : vector<32x1xf32>
    %cst_242 = arith.constant 4.88519785E-4 : f32
    %515 = vector.broadcast %cst_242 : f32 to vector<32x1xf32>
    %516 = arith.mulf %514, %515 : vector<32x1xf32>
    %cst_243 = arith.constant 0.000000e+00 : f32
    %517 = vector.broadcast %cst_243 : f32 to vector<32x1xf32>
    %518 = arith.maximumf %516, %517 : vector<32x1xf32>
    %519 = vector.broadcast %510 : vector<32x1xf32> to vector<32x128xf32>
    %520 = arith.subf %499, %519 : vector<32x128xf32>
    %521 = math.sqrt %518 : vector<32x1xf32>
    %cst_244 = arith.constant 9.99999974E-6 : f32
    %522 = vector.broadcast %cst_244 : f32 to vector<32x1xf32>
    %523 = arith.addf %521, %522 : vector<32x1xf32>
    %524 = vector.broadcast %523 : vector<32x1xf32> to vector<32x128xf32>
    %525 = arith.divf %520, %524 : vector<32x128xf32>
    %c15 = arith.constant 15 : index
    %c0_245 = arith.constant 0 : index
    %526 = vector.load %arg4[%c15, %c0_245] : memref<24x128xf32, #tpu.memory_space<vmem>>, vector<1x128xf32>
    %527 = vector.broadcast %526 : vector<1x128xf32> to vector<32x128xf32>
    %528 = arith.mulf %525, %527 : vector<32x128xf32>
    %c16 = arith.constant 16 : index
    %c0_246 = arith.constant 0 : index
    %529 = vector.load %arg4[%c16, %c0_246] : memref<24x128xf32, #tpu.memory_space<vmem>>, vector<1x128xf32>
    %530 = vector.broadcast %529 : vector<1x128xf32> to vector<32x128xf32>
    %531 = arith.addf %528, %530 : vector<32x128xf32>
    %cst_247 = arith.constant 0.000000e+00 : f32
    %532 = vector.broadcast %cst_247 : f32 to vector<32x128xf32>
    %533 = arith.maximumf %531, %532 : vector<32x128xf32>
    %534 = arith.truncf %533 : vector<32x128xf32> to vector<32x128xbf16>
    %c0_248 = arith.constant 0 : index
    %c6272 = arith.constant 6272 : index
    %535 = vector.load %arg2[%c0_248, %c6272] : memref<128x7168xbf16, #tpu.memory_space<vmem>>, vector<128x896xbf16>
    %cst_249 = arith.constant dense<0.000000e+00> : vector<32x896xf32>
    %536 = tpu.matmul %534, %535, %cst_249 {dimension_numbers = #tpu.dot_dimension_numbers<[1], [0], [0], [1], [0, 0, 1, 1], [], []>} : vector<32x128xbf16>, vector<128x896xbf16>, vector<32x896xf32> -> vector<32x896xf32>
    %537 = vector.extract_strided_slice %536 {offsets = [0, 0], sizes = [32, 128], strides = [1, 1]} : vector<32x896xf32> to vector<32x128xf32>
    %538 = vector.extract_strided_slice %536 {offsets = [0, 128], sizes = [32, 128], strides = [1, 1]} : vector<32x896xf32> to vector<32x128xf32>
    %539 = vector.extract_strided_slice %536 {offsets = [0, 256], sizes = [32, 128], strides = [1, 1]} : vector<32x896xf32> to vector<32x128xf32>
    %540 = vector.extract_strided_slice %536 {offsets = [0, 384], sizes = [32, 128], strides = [1, 1]} : vector<32x896xf32> to vector<32x128xf32>
    %541 = vector.extract_strided_slice %536 {offsets = [0, 512], sizes = [32, 128], strides = [1, 1]} : vector<32x896xf32> to vector<32x128xf32>
    %542 = vector.extract_strided_slice %536 {offsets = [0, 640], sizes = [32, 128], strides = [1, 1]} : vector<32x896xf32> to vector<32x128xf32>
    %543 = vector.extract_strided_slice %536 {offsets = [0, 768], sizes = [32, 128], strides = [1, 1]} : vector<32x896xf32> to vector<32x128xf32>
    %544 = tpu.concatenate %537, %538, %539, %540, %541, %542, %543 in 0 : vector<32x128xf32>, vector<32x128xf32>, vector<32x128xf32>, vector<32x128xf32>, vector<32x128xf32>, vector<32x128xf32>, vector<32x128xf32> -> vector<224x128xf32>
    %c13_250 = arith.constant 13 : index
    %c0_251 = arith.constant 0 : index
    %c0_252 = arith.constant 0 : index
    %545 = vector.load %arg3[%c13_250, %c0_251, %c0_252] : memref<14x32x224xbf16, #tpu.memory_space<vmem>>, vector<1x32x224xbf16>
    %546 = vector.shape_cast %545 : vector<1x32x224xbf16> to vector<32x224xbf16>
    %547 = arith.truncf %544 : vector<224x128xf32> to vector<224x128xbf16>
    %cst_253 = arith.constant dense<0.000000e+00> : vector<32x128xf32>
    %548 = tpu.matmul %546, %547, %cst_253 {dimension_numbers = #tpu.dot_dimension_numbers<[1], [0], [0], [1], [0, 0, 1, 1], [], []>} : vector<32x224xbf16>, vector<224x128xbf16>, vector<32x128xf32> -> vector<32x128xf32>
    %c17 = arith.constant 17 : index
    %c0_254 = arith.constant 0 : index
    %549 = vector.load %arg4[%c17, %c0_254] : memref<24x128xf32, #tpu.memory_space<vmem>>, vector<1x128xf32>
    %550 = vector.broadcast %549 : vector<1x128xf32> to vector<32x128xf32>
    %551 = arith.addf %548, %550 : vector<32x128xf32>
    %552 = math.tanh %551 : vector<32x128xf32>
    %553 = vector.shape_cast %552 : vector<32x128xf32> to vector<2x16x128xf32>
    %c0_255 = arith.constant 0 : index
    %c0_256 = arith.constant 0 : index
    %c0_257 = arith.constant 0 : index
    %554 = vector.load %arg7[%c0_255, %c0_256, %c0_257] : memref<2x16x128xf32, #tpu.memory_space<vmem>>, vector<2x16x128xf32>
    tpu.vector_store %arg7[%c0_255, %c0_256, %c0_257], %553 {strides = array<i32>} : memref<2x16x128xf32, #tpu.memory_space<vmem>>, vector<2x16x128xf32>,
    return
  }
  func.func @transform_0(%arg0: i32) -> (i32, i32, i32) {
    %c0_i32 = arith.constant 0 : i32
    %c0_i32_0 = arith.constant 0 : i32
    %c0_i32_1 = arith.constant 0 : i32
    return %arg0, %c0_i32, %c0_i32_0 : i32, i32, i32
  }
  func.func @transform_1(%arg0: i32) -> (i32, i32) {
    %c0_i32 = arith.constant 0 : i32
    %c0_i32_0 = arith.constant 0 : i32
    %c0_i32_1 = arith.constant 0 : i32
    return %c0_i32, %c0_i32_0 : i32, i32
  }
  func.func @transform_2(%arg0: i32) -> (i32, i32, i32) {
    %c0_i32 = arith.constant 0 : i32
    %c0_i32_0 = arith.constant 0 : i32
    %c0_i32_1 = arith.constant 0 : i32
    %c0_i32_2 = arith.constant 0 : i32
    return %c0_i32, %c0_i32_0, %c0_i32_1 : i32, i32, i32
  }
  func.func @transform_3(%arg0: i32) -> (i32, i32) {
    %c0_i32 = arith.constant 0 : i32
    %c0_i32_0 = arith.constant 0 : i32
    %c0_i32_1 = arith.constant 0 : i32
    return %c0_i32, %c0_i32_0 : i32, i32
  }
  func.func @transform_4(%arg0: i32) -> (i32, i32, i32) {
    %c0_i32 = arith.constant 0 : i32
    %c0_i32_0 = arith.constant 0 : i32
    %c0_i32_1 = arith.constant 0 : i32
    %c0_i32_2 = arith.constant 0 : i32
    return %c0_i32, %c0_i32_0, %c0_i32_1 : i32, i32, i32
  }
  func.func @transform_5(%arg0: i32) -> (i32, i32, i32) {
    %c0_i32 = arith.constant 0 : i32
    %c0_i32_0 = arith.constant 0 : i32
    %c0_i32_1 = arith.constant 0 : i32
    %c0_i32_2 = arith.constant 0 : i32
    return %c0_i32, %c0_i32_0, %c0_i32_1 : i32, i32, i32
  }
  func.func @transform_6(%arg0: i32) -> (i32, i32, i32) {
    %c0_i32 = arith.constant 0 : i32
    %c0_i32_0 = arith.constant 0 : i32
    %c0_i32_1 = arith.constant 0 : i32
    return %arg0, %c0_i32, %c0_i32_0 : i32, i32, i32
  }
}

</mosaic_0001>

<bundles_post_ra>
// kernel: forward.1
= control target key start
LH: loop header
LB: loop body
LE: loop exit
PB: predicated region body
PF: predicated region fallthrough
CT: control target
= control target key end

     0   :  { %11 = vsyncpa [#allocation3], 0  ;;  %s9074_s0 = inlined_call_operand.vmem [shape: f32[2,16,128], index: 0, kind: input, shape index: {}]   ;;  %s9075_s1 = inlined_call_operand.hbm [shape: bf16[128,7168], index: 1, kind: input, shape index: {}]   ;;  %s9076_s2 = inlined_call_operand.hbm [shape: bf16[14,32,224], index: 2, kind: input, shape index: {}]   ;;  %s9077_s3 = inlined_call_operand.hbm [shape: f32[24,128], index: 3, kind: input, shape index: {}]   ;;  %s9078_s4 = inlined_call_operand.hbm [shape: f32[3,128,128], index: 4, kind: input, shape index: {}]   ;;  %s9079_s5 = inlined_call_operand.hbm [shape: f32[3,64,64], index: 5, kind: input, shape index: {}]   ;;  %s9080_s6 = inlined_call_operand.vmem [shape: f32[2,16,128], index: 6, kind: output, shape index: {}]  }
   0x1   :  { %12 = vsyncpa [#allocation5], 0  ;;  %s33_s23 = sshll.u32 %s9076_s2, 4  ;;  %s34_s23 = int_to_ptr.hbm [resolvable:$true] %s33_s23 }
   0x2   :  { %13 = vsyncpa [#allocation8], 0  ;;  %s8292_s24 = smov [#allocation4]   ;;  %s59_s28 = sshll.u32 %s9078_s4, 4  ;;  %s60_s28 = int_to_ptr.hbm [resolvable:$true] %s59_s28 }
   0x3   :  { %s35_s25 = sshll.u32 %s8292_s24, 4  ;;  %s8293_s29 = smov 128   ;;  %s36_s25 = int_to_ptr.vmem [resolvable:$true] %s35_s25 }
   0x4   :  { %s8294_s30 = smov 8   ;;  %s8295_s7 = smov [#allocation7]  }
   0x5   :  { %41 = dma.hbm_to_vmem [thread:$0]  %s34_s23, 7168, %s36_s25, [#allocation5], %s8293_s29, %s8293_s29, %s8294_s30  }
   0x6   :  { %s61_s8 = sshll.u32 %s8295_s7, 4  ;;  %s20_s10 = sshll.u32 %s9075_s1, 4  ;;  %s62_s8 = int_to_ptr.vmem [resolvable:$true] %s61_s8  ;;  %s21_s10 = int_to_ptr.hbm [resolvable:$true] %s20_s10 }
   0x7   :  { %67 = dma.hbm_to_vmem [thread:$0]  %s60_s28, 6144, %s62_s8, [#allocation8], %s8293_s29, %s8293_s29, %s8294_s30  }
   0x8   :  { %s8296_s4 = smov [#allocation2]   ;;  %s46_s14 = sshll.u32 %s9077_s3, 4  ;;  %s47_s14 = int_to_ptr.hbm [resolvable:$true] %s46_s14 }
   0x9   :  { %s22_s11 = sshll.u32 %s8296_s4, 4  ;;  %s8297_s15 = smov 3584   ;;  %s23_s11 = int_to_ptr.vmem [resolvable:$true] %s22_s11 }
   0xa   :  { %s8298_s16 = smov 224   ;;  %s8299_s17 = smov [#allocation6]  }
   0xb   :  { %28 = dma.hbm_to_vmem [thread:$0]  %s21_s10, 57344, %s23_s11, [#allocation3], %s8297_s15, %s8297_s15, %s8298_s16  }
   0xc   :  { %s48_s18 = sshll.u32 %s8299_s17, 4  ;;  %s72_s20 = sshll.u32 %s9079_s5, 4  ;;  %s49_s18 = int_to_ptr.vmem [resolvable:$true] %s48_s18  ;;  %s73_s20 = int_to_ptr.hbm [resolvable:$true] %s72_s20 }
   0xd   :  { %54 = dma.hbm_to_vmem [thread:$0]  %s47_s14, 384, %s49_s18, [#allocation5], %s8293_s29, %s8293_s29, %s8294_s30  }
   0xe   :  { %s8300_s21 = smov [#allocation9]  }
   0xf   :  { %s74_s22 = sshll.u32 %s8300_s21, 4  ;;  %s75_s22 = int_to_ptr.vmem [resolvable:$true] %s74_s22 }
  0x10   :  { %80 = dma.hbm_to_vmem [thread:$0]  %s73_s20, 3072, %s75_s22, [#allocation8], %s8293_s29, %s8293_s29, %s8294_s30  }
  0x11   :  { %8286 = dma.done.wait [#allocation3], 57344  }
  0x12   :  { %8287 = vsyncadd [#allocation3], 4294909952 }
  0x13   :  { %8288 = dma.done.wait [#allocation5], 7552  }
  0x14   :  { %8289 = vsyncadd [#allocation5], 4294959744 }
  0x15   :  { %8290 = dma.done.wait [#allocation8], 9216  }
  0x16   :  { %8291 = vsyncadd [#allocation8], 4294958080  ;;  %v5877_v0 = vld [vmem:[#allocation2 + $0xc48] sm:$0xf]  ;;  %v7619_v2 = vld [vmem:[#allocation2 + $0xc4c] sm:$0xf] }
  0x17   :  { %v7622_v1 = vld [vmem:[#allocation2 + $0xd24] sm:$0xf0]  ;;  %v5879_v4 = vld [vmem:[#allocation2 + $0xd28] sm:$0xf0]  ;;  %v7618_v10 = vld [vmem:[#allocation2 + $0xc44] sm:$0xf] }
  0x18   :  { %v5878_v3 = vor.u32 %v7622_v1, %v5877_v0  ;;  %v5849_v5 = vld [vmem:[#allocation2 + $0xa88] sm:$0xf]  ;;  %v5882_v7 = vor.u32 %v7619_v2, %v5879_v4  ;;  %v7612_v8 = vld [vmem:[#allocation2 + $0xa8c] sm:$0xf]  ;;  %v5871_v12 = vld [vmem:[#allocation2 + $0xd20] sm:$0xf0] }
  0x19   :  { %v7615_v6 = vld [vmem:[#allocation2 + $0xb64] sm:$0xf0]  ;;  %v5851_v9 = vld [vmem:[#allocation2 + $0xb68] sm:$0xf0]  ;;  %v5874_v14 = vor.u32 %v7618_v10, %v5871_v12  ;;  %v7611_v17 = vld [vmem:[#allocation2 + $0xa84] sm:$0xf] }
  0x1a   :  { %498 = vmatpush.bf16.msra.mxu2 %v5878_v3  ;;  %v5850_v11 = vor.u32 %v7615_v6, %v5849_v5  ;;  %517 = vmatpush.bf16.msra.mxu3 %v5882_v7  ;;  %v5854_v13 = vor.u32 %v7612_v8, %v5851_v9  ;;  %v5821_v15 = vld [vmem:[#allocation2 + $0x8c8] sm:$0xf]  ;;  %v7605_v18 = vld [vmem:[#allocation2 + $0x8cc] sm:$0xf]  ;;  %v5843_v20 = vld [vmem:[#allocation2 + $0xb60] sm:$0xf0] }
  0x1b   :  { %v7608_v16 = vld [vmem:[#allocation2 + $0x9a4] sm:$0xf0]  ;;  %v5823_v19 = vld [vmem:[#allocation2 + $0x9a8] sm:$0xf0]  ;;  %479 = vmatpush.bf16.msra.mxu1 %v5874_v14  ;;  %v5846_v21 = vor.u32 %v7611_v17, %v5843_v20  ;;  %v5869_v22 = vld [vmem:[#allocation2 + $0xc40] sm:$0xf] }
  0x1c   :  { %v5822_v23 = vor.u32 %v7608_v16, %v5821_v15  ;;  %v7621_v24 = vld [vmem:[#allocation2 + $0xd1c] sm:$0xf0]  ;;  %v7604_v25 = vld [vmem:[#allocation2 + $0x8c4] sm:$0xf]  ;;  %v5826_v27 = vor.u32 %v7605_v18, %v5823_v19  ;;  %v5793_v28 = vld [vmem:[#allocation2 + $0x708] sm:$0xf] }
  0x1d   :  { %v5815_v26 = vld [vmem:[#allocation2 + $0x9a0] sm:$0xf0]  ;;  %v7601_v29 = vld [vmem:[#allocation2 + $0x7e4] sm:$0xf0]  ;;  %v7598_v30 = vld [vmem:[#allocation2 + $0x70c] sm:$0xf]  ;;  %v5870_v31 = vor.u32 %v7621_v24, %v5869_v22 }
  0x1e   :  { %499 = vmatpush.bf16.msra.mxu2 %v5850_v11  ;;  %518 = vmatpush.bf16.msra.mxu3 %v5854_v13  ;;  %v5795_v32 = vld [vmem:[#allocation2 + $0x7e8] sm:$0xf0]  ;;  %v5841_v33 = vld [vmem:[#allocation2 + $0xa80] sm:$0xf]  ;;  %v5818_v35 = vor.u32 %v7604_v25, %v5815_v26  ;;  %v5794_v37 = vor.u32 %v7601_v29, %v5793_v28  ;;  %v5765_v38 = vld [vmem:[#allocation2 + $0x548] sm:$0xf] }
  0x1f   :  { %v7614_v34 = vld [vmem:[#allocation2 + $0xb5c] sm:$0xf0]  ;;  %480 = vmatpush.bf16.msra.mxu1 %v5846_v21  ;;  %460 = vmatpush.bf16.msra.mxu0 %v5870_v31  ;;  %v7597_v39 = vld [vmem:[#allocation2 + $0x704] sm:$0xf]  ;;  %v5798_v41 = vor.u32 %v7598_v30, %v5795_v32  ;;  %v7594_v42 = vld [vmem:[#allocation2 + $0x624] sm:$0xf0] }
  0x20   :  { %v5842_v36 = vor.u32 %v7614_v34, %v5841_v33  ;;  %v5787_v40 = vld [vmem:[#allocation2 + $0x7e0] sm:$0xf0]  ;;  %v5813_v43 = vld [vmem:[#allocation2 + $0x8c0] sm:$0xf]  ;;  %v7591_v45 = vld [vmem:[#allocation2 + $0x54c] sm:$0xf]  ;;  %v5766_v50 = vor.u32 %v7594_v42, %v5765_v38 }
  0x21   :  { %v7607_v44 = vld [vmem:[#allocation2 + $0x99c] sm:$0xf0]  ;;  %v5767_v46 = vld [vmem:[#allocation2 + $0x628] sm:$0xf0]  ;;  %v5790_v47 = vor.u32 %v7597_v39, %v5787_v40  ;;  %v7590_v49 = vld [vmem:[#allocation2 + $0x544] sm:$0xf] }
  0x22   :  { %500 = vmatpush.bf16.msra.mxu2 %v5822_v23  ;;  %519 = vmatpush.bf16.msra.mxu3 %v5826_v27  ;;  %v5814_v48 = vor.u32 %v7607_v44, %v5813_v43  ;;  %v5759_v51 = vld [vmem:[#allocation2 + $0x620] sm:$0xf0]  ;;  %v5785_v52 = vld [vmem:[#allocation2 + $0x700] sm:$0xf]  ;;  %v5770_v54 = vor.u32 %v7591_v45, %v5767_v46  ;;  %v5737_v55 = vld [vmem:[#allocation2 + $0x388] sm:$0xf] }
  0x23   :  { %481 = vmatpush.bf16.msra.mxu1 %v5818_v35  ;;  %461 = vmatpush.bf16.msra.mxu0 %v5842_v36  ;;  %v7600_v53 = vld [vmem:[#allocation2 + $0x7dc] sm:$0xf0]  ;;  %v7587_v56 = vld [vmem:[#allocation2 + $0x464] sm:$0xf0]  ;;  %v7584_v57 = vld [vmem:[#allocation2 + $0x38c] sm:$0xf]  ;;  %v5762_v59 = vor.u32 %v7590_v49, %v5759_v51 }
  0x24   :  { %v5739_v58 = vld [vmem:[#allocation2 + $0x468] sm:$0xf0]  ;;  %v5786_v60 = vor.u32 %v7600_v53, %v5785_v52  ;;  %v7583_v61 = vld [vmem:[#allocation2 + $0x384] sm:$0xf]  ;;  %v5738_v62 = vor.u32 %v7587_v56, %v5737_v55  ;;  %v5757_v0 = vld [vmem:[#allocation2 + $0x540] sm:$0xf] }
  0x25   :  { %v5731_v63 = vld [vmem:[#allocation2 + $0x460] sm:$0xf0]  ;;  %v7593_v1 = vld [vmem:[#allocation2 + $0x61c] sm:$0xf0]  ;;  %v5742_v2 = vor.u32 %v7584_v57, %v5739_v58  ;;  %v5709_v3 = vld [vmem:[#allocation2 + $0x1c8] sm:$0xf] }
  0x26   :  { %501 = vmatpush.bf16.msra.mxu2 %v5794_v37  ;;  %520 = vmatpush.bf16.msra.mxu3 %v5798_v41  ;;  %v7580_v4 = vld [vmem:[#allocation2 + $0x2a4] sm:$0xf0]  ;;  %v7577_v5 = vld [vmem:[#allocation2 + $0x1cc] sm:$0xf]  ;;  %v5734_v7 = vor.u32 %v7583_v61, %v5731_v63  ;;  %v5758_v8 = vor.u32 %v7593_v1, %v5757_v0  ;;  %v7576_v9 = vld [vmem:[#allocation2 + $0x1c4] sm:$0xf] }
  0x27   :  { %482 = vmatpush.bf16.msra.mxu1 %v5790_v47  ;;  %462 = vmatpush.bf16.msra.mxu0 %v5814_v48  ;;  %v5711_v6 = vld [vmem:[#allocation2 + $0x2a8] sm:$0xf0]  ;;  %v5710_v10 = vor.u32 %v7580_v4, %v5709_v3  ;;  %v5703_v11 = vld [vmem:[#allocation2 + $0x2a0] sm:$0xf0]  ;;  %v5729_v12 = vld [vmem:[#allocation2 + $0x380] sm:$0xf] }
  0x28   :  { %v7586_v13 = vld [vmem:[#allocation2 + $0x45c] sm:$0xf0]  ;;  %v5714_v14 = vor.u32 %v7577_v5, %v5711_v6  ;;  %v5681_v15 = vld [vmem:[#allocation2 + $0x8] sm:$0xf]  ;;  %v7570_v17 = vld [vmem:[#allocation2 + $0xc] sm:$0xf]  ;;  %v5706_v21 = vor.u32 %v7576_v9, %v5703_v11 }
  0x29   :  { %v7573_v16 = vld [vmem:[#allocation2 + $0xe4] sm:$0xf0]  ;;  %v5683_v18 = vld [vmem:[#allocation2 + $0xe8] sm:$0xf0]  ;;  %v5893_v19 = vld [vmem:[#allocation2 + $0xc58] sm:$0xf]  ;;  %v5730_v23 = vor.u32 %v7586_v13, %v5729_v12 }
  0x2a   :  { %502 = vmatpush.bf16.msra.mxu2 %v5766_v50  ;;  %521 = vmatpush.bf16.msra.mxu3 %v5770_v54  ;;  %v7624_v20 = vld [vmem:[#allocation2 + $0xd34] sm:$0xf0]  ;;  %v102_v22 = vld [vmem:[%s9074_s0] sm:$0xff]  ;;  %v5682_v24 = vor.u32 %v7573_v16, %v5681_v15  ;;  %v103_v25 = vld [vmem:[%s9074_s0 + $0x8] sm:$0xff]  ;;  %v5686_v28 = vor.u32 %v7570_v17, %v5683_v18  ;;  %vm631_vm0 = vcmask 785408   ;;  %vm704_vm1 = vcmask 523264  }
  0x2b   :  { %483 = vmatpush.bf16.msra.mxu1 %v5762_v59  ;;  %463 = vmatpush.bf16.msra.mxu0 %v5786_v60  ;;  %v7569_v26 = vld [vmem:[#allocation2 + $0x4] sm:$0xf]  ;;  %v5894_v29 = vor.u32 %v7624_v20, %v5893_v19  ;;  %v5865_v30 = vld [vmem:[#allocation2 + $0xa98] sm:$0xf]  ;;  %v5701_v31 = vld [vmem:[#allocation2 + $0x1c0] sm:$0xf]  ;;  %v8369_v36 = vpack.c.bf16 %v103_v25, %v102_v22 }
  0x2c   :  { %v5675_v27 = vld [vmem:[#allocation2 + $0xe0] sm:$0xf0]  ;;  %v7579_v32 = vld [vmem:[#allocation2 + $0x29c] sm:$0xf0]  ;;  %v7617_v33 = vld [vmem:[#allocation2 + $0xb74] sm:$0xf0] }
  0x2d   :  { %v7620_v34 = vld [vmem:[#allocation2 + $0xc54] sm:$0xf]  ;;  %v5678_v37 = vor.u32 %v7569_v26, %v5675_v27  ;;  %v5702_v38 = vor.u32 %v7579_v32, %v5701_v31  ;;  %v5866_v39 = vor.u32 %v7617_v33, %v5865_v30  ;;  %v5837_v41 = vld [vmem:[#allocation2 + $0x8d8] sm:$0xf]  ;;  %v5673_v42 = vld [vmem:[#allocation2] sm:$0xf] }
  0x2e   :  { %503 = vmatpush.bf16.msra.mxu2 %v5738_v62  ;;  %522 = vmatpush.bf16.msra.mxu3 %v5742_v2  ;;  %v5887_v35 = vld [vmem:[#allocation2 + $0xd30] sm:$0xf0]  ;;  %v7572_v43 = vld [vmem:[#allocation2 + $0xdc] sm:$0xf0]  ;;  %v7610_v44 = vld [vmem:[#allocation2 + $0x9b4] sm:$0xf0] }
  0x2f   :  { %484 = vmatpush.bf16.msra.mxu1 %v5734_v7  ;;  %464 = vmatpush.bf16.msra.mxu0 %v5758_v8  ;;  %v5890_v40 = vor.u32 %v7620_v34, %v5887_v35  ;;  %v7613_v45 = vld [vmem:[#allocation2 + $0xa94] sm:$0xf]  ;;  %v5885_v47 = vld [vmem:[#allocation2 + $0xc50] sm:$0xf]  ;;  %v5674_v49 = vor.u32 %v7572_v43, %v5673_v42  ;;  %v5838_v50 = vor.u32 %v7610_v44, %v5837_v41  ;;  %v5809_v52 = vld [vmem:[#allocation2 + $0x718] sm:$0xf] }
  0x30   :  { %v5859_v46 = vld [vmem:[#allocation2 + $0xb70] sm:$0xf0]  ;;  %v7623_v48 = vld [vmem:[#allocation2 + $0xd2c] sm:$0xf0]  ;;  %v7603_v53 = vld [vmem:[#allocation2 + $0x7f4] sm:$0xf0] }
  0x31   :  { %v5862_v51 = vor.u32 %v7613_v45, %v5859_v46  ;;  %v5886_v54 = vor.u32 %v7623_v48, %v5885_v47  ;;  %v7606_v55 = vld [vmem:[#allocation2 + $0x8d4] sm:$0xf]  ;;  %v5857_v57 = vld [vmem:[#allocation2 + $0xa90] sm:$0xf]  ;;  %v5781_v59 = vld [vmem:[#allocation2 + $0x558] sm:$0xf]  ;;  %v5810_v63 = vor.u32 %v7603_v53, %v5809_v52 }
  0x32   :  { %504 = vmatpush.bf16.msra.mxu2 %v5710_v10  ;;  %523 = vmatpush.bf16.msra.mxu3 %v5714_v14  ;;  %v5831_v56 = vld [vmem:[#allocation2 + $0x9b0] sm:$0xf0]  ;;  %v7616_v58 = vld [vmem:[#allocation2 + $0xb6c] sm:$0xf0]  ;;  %v7596_v60 = vld [vmem:[#allocation2 + $0x634] sm:$0xf0] }
  0x33   :  { %485 = vmatpush.bf16.msra.mxu1 %v5706_v21  ;;  %465 = vmatpush.bf16.msra.mxu0 %v5730_v23  ;;  %v7599_v61 = vld [vmem:[#allocation2 + $0x714] sm:$0xf]  ;;  %v5834_v0 = vor.u32 %v7606_v55, %v5831_v56  ;;  %v5829_v1 = vld [vmem:[#allocation2 + $0x8d0] sm:$0xf]  ;;  %v105_v4 = vld [vmem:[%s9074_s0 + $0x18] sm:$0xff]  ;;  %v5858_v5 = vor.u32 %v7616_v58, %v5857_v57  ;;  %v5782_v6 = vor.u32 %v7596_v60, %v5781_v59  ;;  %vm1214_vm14 = vcmask 261120  }
  0x34   :  { %v5803_v62 = vld [vmem:[#allocation2 + $0x7f0] sm:$0xf0]  ;;  %v7609_v2 = vld [vmem:[#allocation2 + $0x9ac] sm:$0xf0]  ;;  %v5753_v8 = vld [vmem:[#allocation2 + $0x398] sm:$0xf] }
  0x35   :  { %v104_v3 = vld [vmem:[%s9074_s0 + $0x10] sm:$0xff]  ;;  %v5806_v7 = vor.u32 %v7599_v61, %v5803_v62  ;;  %v7589_v9 = vld [vmem:[#allocation2 + $0x474] sm:$0xf0]  ;;  %v5830_v10 = vor.u32 %v7609_v2, %v5829_v1 }
  0x36   :  { %505 = vmatpush.bf16.msra.mxu2 %v5682_v24  ;;  %524 = vmatpush.bf16.msra.mxu3 %v5686_v28  ;;  %v7592_v11 = vld [vmem:[#allocation2 + $0x554] sm:$0xf]  ;;  %v107_v13 = vpack.c.bf16 %v105_v4, %v104_v3  ;;  %v5801_v14 = vld [vmem:[#allocation2 + $0x710] sm:$0xf]  ;;  %v5754_v16 = vor.u32 %v7589_v9, %v5753_v8  ;;  %v5725_v18 = vld [vmem:[#allocation2 + $0x1d8] sm:$0xf] }
  0x37   :  { %486 = vmatpush.bf16.msra.mxu1 %v5678_v37  ;;  %466 = vmatpush.bf16.msra.mxu0 %v5702_v38  ;;  %v5775_v12 = vld [vmem:[#allocation2 + $0x630] sm:$0xf0]  ;;  %v7602_v15 = vld [vmem:[#allocation2 + $0x7ec] sm:$0xf0]  ;;  %v7582_v19 = vld [vmem:[#allocation2 + $0x2b4] sm:$0xf0] }
  0x38   :  { %v5778_v17 = vor.u32 %v7592_v11, %v5775_v12  ;;  %v5802_v20 = vor.u32 %v7602_v15, %v5801_v14  ;;  %v7585_v21 = vld [vmem:[#allocation2 + $0x394] sm:$0xf]  ;;  %v5773_v23 = vld [vmem:[#allocation2 + $0x550] sm:$0xf]  ;;  %v5726_v25 = vor.u32 %v7582_v19, %v5725_v18  ;;  %v5697_v27 = vld [vmem:[#allocation2 + $0x18] sm:$0xf] }
  0x39   :  { %506 = vmatmul.bf16.vlgmr.msra.gmra.mxu2 %v8369_v36  ;;  %525 = vmatmul.bf16.vlgmr.msra.gmra.mxu3 %v8369_v36  ;;  %v5747_v22 = vld [vmem:[#allocation2 + $0x470] sm:$0xf0]  ;;  %v7595_v24 = vld [vmem:[#allocation2 + $0x62c] sm:$0xf0]  ;;  %v7575_v28 = vld [vmem:[#allocation2 + $0xf4] sm:$0xf0] }
  0x3a   :  { %574 = vmatpush.bf16.msrb.mxu2 %v5894_v29  ;;  %487 = vmatmul.bf16.vlgmr.msra.gmra.mxu1 %v8369_v36  ;;  %v5750_v26 = vor.u32 %v7585_v21, %v5747_v22  ;;  %v5774_v29 = vor.u32 %v7595_v24, %v5773_v23  ;;  %v7578_v30 = vld [vmem:[#allocation2 + $0x1d4] sm:$0xf]  ;;  %v5745_v32 = vld [vmem:[#allocation2 + $0x390] sm:$0xf]  ;;  %v5698_v34 = vor.u32 %v7575_v28, %v5697_v27  ;;  %v7626_v14 = vld [vmem:[#allocation4 + $0x4] sm:$0xf0] }
  0x3b   :  { %555 = vmatpush.bf16.msrb.mxu1 %v5890_v40  ;;  %467 = vmatpush.bf16.msra.mxu0 %v5674_v49  ;;  %v5719_v31 = vld [vmem:[#allocation2 + $0x2b0] sm:$0xf0]  ;;  %v7588_v33 = vld [vmem:[#allocation2 + $0x46c] sm:$0xf0]  ;;  %v7628_v24 = vld [vmem:[#allocation4 + $0x14] sm:$0xf0] }
  0x3c   :  { %v5722_v35 = vor.u32 %v7578_v30, %v5719_v31  ;;  %v5746_v37 = vor.u32 %v7588_v33, %v5745_v32  ;;  %v7571_v38 = vld [vmem:[#allocation2 + $0x14] sm:$0xf]  ;;  %v5717_v40 = vld [vmem:[#allocation2 + $0x1d0] sm:$0xf]  ;;  %v5899_v30 = vld [vmem:[#allocation4 + $0x8] sm:$0xf0] }
  0x3d   :  { %v7581_v41 = vld [vmem:[#allocation2 + $0x2ac] sm:$0xf0]  ;;  %v7627_v33 = vld [vmem:[#allocation4 + $0x14] sm:$0xf] }
  0x3e   :  { %575 = vmatpush.bf16.msrb.mxu2 %v5866_v39  ;;  %468 = vmatmul.bf16.vlgmr.msra.gmra.mxu0 %v8369_v36  ;;  %v5691_v39 = vld [vmem:[#allocation2 + $0xf0] sm:$0xf0]  ;;  %v5718_v43 = vor.u32 %v7581_v41, %v5717_v40  ;;  %v5689_v44 = vld [vmem:[#allocation2 + $0x10] sm:$0xf] }
  0x3f   :  { %556 = vmatpush.bf16.msrb.mxu1 %v5862_v51  ;;  %536 = vmatpush.bf16.msrb.mxu0 %v5886_v54  ;;  %v5694_v42 = vor.u32 %v7571_v38, %v5691_v39  ;;  %v7574_v45 = vld [vmem:[#allocation2 + $0xec] sm:$0xf0] }
  0x40   :  { %v5690_v46 = vor.u32 %v7574_v45, %v5689_v44  ;;  %v5905_v23 = vld [vmem:[#allocation4 + $0x10] sm:$0xf] }
  0x41   :  { %v5906_v27 = vor.u32 %v7628_v24, %v5905_v23 }
  0x42   :  { %576 = vmatpush.bf16.msrb.mxu2 %v5838_v50 }
  0x43   :  { %557 = vmatpush.bf16.msrb.mxu1 %v5834_v0  ;;  %537 = vmatpush.bf16.msrb.mxu0 %v5858_v5 }
  0x46   :  { %577 = vmatpush.bf16.msrb.mxu2 %v5810_v63 }
  0x47   :  { %558 = vmatpush.bf16.msrb.mxu1 %v5806_v7  ;;  %538 = vmatpush.bf16.msrb.mxu0 %v5830_v10 }
  0x49   :  { %511 = vmatmul.bf16.gmra.mxu2 %v107_v13  ;;  %530 = vmatmul.bf16.gmra.mxu3 %v107_v13 }
  0x4a   :  { %578 = vmatpush.bf16.msrb.mxu2 %v5782_v6  ;;  %492 = vmatmul.bf16.gmra.mxu1 %v107_v13 }
  0x4b   :  { %559 = vmatpush.bf16.msrb.mxu1 %v5778_v17  ;;  %539 = vmatpush.bf16.msrb.mxu0 %v5802_v20 }
  0x4e   :  { %579 = vmatpush.bf16.msrb.mxu2 %v5754_v16  ;;  %473 = vmatmul.bf16.gmra.mxu0 %v107_v13 }
  0x4f   :  { %560 = vmatpush.bf16.msrb.mxu1 %v5750_v26  ;;  %540 = vmatpush.bf16.msrb.mxu0 %v5774_v29  ;;  %v7625_v29 = vld [vmem:[#allocation4 + $0x4] sm:$0xf] }
  0x50   :  { %v5902_v32 = vor.u32 %v7625_v29, %v5899_v30  ;;  %v7657_v29 = vld [vmem:[#allocation2 + $0xc60] sm:$0xf] }
  0x52   :  { %580 = vmatpush.bf16.msrb.mxu2 %v5726_v25 }
  0x53   :  { %561 = vmatpush.bf16.msrb.mxu1 %v5722_v35  ;;  %541 = vmatpush.bf16.msrb.mxu0 %v5746_v37 }
  0x56   :  { %581 = vmatpush.bf16.msrb.mxu2 %v5698_v34  ;;  %v5907_v34 = vld [vmem:[#allocation4 + $0x18] sm:$0xf0] }
  0x57   :  { %562 = vmatpush.bf16.msrb.mxu1 %v5694_v42  ;;  %542 = vmatpush.bf16.msrb.mxu0 %v5718_v43  ;;  %v5910_v35 = vor.u32 %v7627_v33, %v5907_v34  ;;  %v8038_v43 = vld [vmem:[#allocation6] ss:$0 sm:$0xff]  ;;  %v6019_v33 = vld [vmem:[#allocation2 + $0xa9c] sm:$0xf] }
  0x58   :  { %v7655_v34 = vld [vmem:[#allocation2 + $0xb78] sm:$0xf0] }
  0x59   :  { %582 = vmatmul.bf16.vlgmr.msrb.gmra.mxu2 %v8369_v36 }
  0x5a   :  { %563 = vmatmul.bf16.vlgmr.msrb.gmra.mxu1 %v8369_v36 }
  0x5b   :  { %543 = vmatpush.bf16.msrb.mxu0 %v5690_v46 }
  0x5e   :  { %544 = vmatmul.bf16.vlgmr.msrb.gmra.mxu0 %v8369_v36 }
  0x69   :  { %587 = vmatmul.bf16.gmra.mxu2 %v107_v13 }
  0x6a   :  { %568 = vmatmul.bf16.gmra.mxu1 %v107_v13 }
  0x6e   :  { %549 = vmatmul.bf16.gmra.mxu0 %v107_v13  ;;  %v5897_v13 = vld [vmem:[#allocation4] sm:$0xf] }
  0x6f   :  { %v5898_v16 = vor.u32 %v7626_v14, %v5897_v13  ;;  %v678_v13 = vld [vmem:[#allocation7 + $0x10] sm:$0xff]  ;;  %v677_v14 = vld [vmem:[#allocation7 + $0x8] sm:$0xff] }
  0xb7   :  { %v488_v47 = vpop.f32.mrf.mxu1 }
  0xbb   :  { %v469_v50 = vpop.f32.mrf.mxu0 }
  0xbc   :  { %v507_v48 = vpop.f32.mrf.mxu2  ;;  %v526_v49 = vpop.f32.mrf.mxu3 }
  0xbf   :  { %v490_v51 = vpop.f32.mrf.mxu1 }
  0xc0   :  { %v599_v8 = vpack.c.bf16 %v490_v51, %v488_v47 }
  0xc3   :  { %v471_v54 = vpop.f32.mrf.mxu0 }
  0xc4   :  { %v509_v52 = vpop.f32.mrf.mxu2  ;;  %v528_v53 = vpop.f32.mrf.mxu3  ;;  %v597_v15 = vpack.c.bf16 %v471_v54, %v469_v50 }
  0xc5   :  { %v603_v36 = vpack.c.bf16 %v528_v53, %v526_v49  ;;  %v601_v3 = vpack.c.bf16 %v509_v52, %v507_v48 }
  0xc7   :  { %v493_v55 = vpop.f32.mrf.mxu1 }
  0xcb   :  { %v474_v58 = vpop.f32.mrf.mxu0 }
  0xcc   :  { %v512_v56 = vpop.f32.mrf.mxu2  ;;  %v531_v57 = vpop.f32.mrf.mxu3 }
  0xcf   :  { %v495_v59 = vpop.f32.mrf.mxu1 }
  0xd0   :  { %v600_v7 = vpack.c.bf16 %v495_v59, %v493_v55  ;;  %v693_v59 = vld [vmem:[#allocation9 + $0x8] sm:$0xff] }
  0xd3   :  { %v476_v63 = vpop.f32.mrf.mxu0 }
  0xd4   :  { %v514_v60 = vpop.f32.mrf.mxu2  ;;  %v533_v61 = vpop.f32.mrf.mxu3  ;;  %v598_v11 = vpack.c.bf16 %v476_v63, %v474_v58  ;;  %v692_v58 = vld [vmem:[#allocation9] sm:$0xff]  ;;  %v689_v63 = vld [vmem:[#allocation7 + $0x68] sm:$0xff] }
  0xd5   :  { %v604_v62 = vpack.c.bf16 %v533_v61, %v531_v57  ;;  %v602_v2 = vpack.c.bf16 %v514_v60, %v512_v56  ;;  %v694_v60 = vld [vmem:[#allocation9 + $0x10] sm:$0xff]  ;;  %v695_v61 = vld [vmem:[#allocation9 + $0x18] sm:$0xff] }
  0xd7   :  { %638 = vmatpush.bf16.msrb.mxu3 %v604_v62  ;;  %v564_v0 = vpop.f32.mrf.mxu1  ;;  %v691_v62 = vld [vmem:[#allocation7 + $0x78] sm:$0xff] }
  0xd8   :  { %770 = vmatpush.msra.mxu2 %v691_v62  ;;  %v5973_v62 = vld [vmem:[#allocation2 + $0x63c] sm:$0xf0] }
  0xdb   :  { %639 = vmatpush.bf16.msrb.mxu3 %v603_v36  ;;  %v545_v4 = vpop.f32.mrf.mxu0  ;;  %v690_v36 = vld [vmem:[#allocation7 + $0x70] sm:$0xff] }
  0xdc   :  { %v583_v1 = vpop.f32.mrf.mxu2  ;;  %771 = vmatpush.msra.mxu2 %v690_v36 }
  0xde   :  { %772 = vmatpush.msra.mxu2 %v689_v63  ;;  %v5955_v63 = vld [vmem:[#allocation2 + $0x39c] sm:$0xf] }
  0xdf   :  { %640 = vmatpush.bf16.msrb.mxu3 %v602_v2  ;;  %v566_v6 = vpop.f32.mrf.mxu1  ;;  %v687_v2 = vld [vmem:[#allocation7 + $0x58] sm:$0xff] }
  0xe0   :  { %v607_v25 = vpack.c.bf16 %v566_v6, %v564_v0  ;;  %v688_v0 = vld [vmem:[#allocation7 + $0x60] sm:$0xff]  ;;  %v697_v6 = vld [vmem:[#allocation9 + $0x28] sm:$0xff] }
  0xe1   :  { %773 = vmatpush.msra.mxu2 %v688_v0  ;;  %v7639_v0 = vld [vmem:[#allocation2 + $0x478] sm:$0xf0] }
  0xe3   :  { %641 = vmatpush.bf16.msrb.mxu3 %v601_v3  ;;  %v547_v10 = vpop.f32.mrf.mxu0  ;;  %v686_v3 = vld [vmem:[#allocation7 + $0x50] sm:$0xff]  ;;  %774 = vmatpush.msra.mxu2 %v687_v2 }
  0xe4   :  { %v585_v5 = vpop.f32.mrf.mxu2  ;;  %v605_v31 = vpack.c.bf16 %v547_v10, %v545_v4  ;;  %v685_v4 = vld [vmem:[#allocation7 + $0x48] sm:$0xff]  ;;  %v680_v10 = vld [vmem:[#allocation7 + $0x20] sm:$0xff] }
  0xe5   :  { %v609_v20 = vpack.c.bf16 %v585_v5, %v583_v1  ;;  %v696_v1 = vld [vmem:[#allocation9 + $0x20] sm:$0xff]  ;;  %775 = vmatpush.msra.mxu2 %v686_v3  ;;  %v5956_v3 = vor.u32 %v7639_v0, %v5955_v63  ;;  %v7646_v63 = vld [vmem:[#allocation2 + $0x728] sm:$0xf] }
  0xe6   :  { %v684_v5 = vld [vmem:[#allocation7 + $0x40] sm:$0xff]  ;;  %v5997_v0 = vld [vmem:[#allocation2 + $0x804] sm:$0xf0] }
  0xe7   :  { %642 = vmatpush.bf16.msrb.mxu3 %v600_v7  ;;  %v569_v12 = vpop.f32.mrf.mxu1  ;;  %776 = vmatpush.msra.mxu2 %v685_v4  ;;  %v683_v7 = vld [vmem:[#allocation7 + $0x38] sm:$0xff]  ;;  %v5957_v4 = vld [vmem:[#allocation2 + $0x47c] sm:$0xf0] }
  0xe9   :  { %777 = vmatpush.msra.mxu2 %v684_v5 }
  0xeb   :  { %643 = vmatpush.bf16.msrb.mxu3 %v599_v8  ;;  %v550_v19 = vpop.f32.mrf.mxu0  ;;  %v682_v8 = vld [vmem:[#allocation7 + $0x30] sm:$0xff]  ;;  %778 = vmatpush.msra.mxu2 %v683_v7  ;;  %v5939_v7 = vld [vmem:[#allocation2 + $0x1dc] sm:$0xf] }
  0xec   :  { %v588_v9 = vpop.f32.mrf.mxu2 }
  0xed   :  { %779 = vmatpush.msra.mxu2 %v682_v8  ;;  %v7635_v8 = vld [vmem:[#allocation2 + $0x2b8] sm:$0xf0] }
  0xef   :  { %644 = vmatpush.bf16.msrb.mxu3 %v598_v11  ;;  %v571_v21 = vpop.f32.mrf.mxu1  ;;  %v698_v11 = vld [vmem:[#allocation9 + $0x30] sm:$0xff] }
  0xf0   :  { %v608_v22 = vpack.c.bf16 %v571_v21, %v569_v12  ;;  %v679_v12 = vld [vmem:[#allocation7 + $0x18] sm:$0xff] }
  0xf3   :  { %645 = vmatpush.bf16.msrb.mxu3 %v597_v15  ;;  %v552_v26 = vpop.f32.mrf.mxu0  ;;  %v699_v15 = vld [vmem:[#allocation9 + $0x38] sm:$0xff] }
  0xf4   :  { %v590_v17 = vpop.f32.mrf.mxu2  ;;  %v606_v28 = vpack.c.bf16 %v552_v26, %v550_v19 }
  0xf5   :  { %v610_v18 = vpack.c.bf16 %v590_v17, %v588_v9  ;;  %v681_v9 = vld [vmem:[#allocation7 + $0x28] sm:$0xff] }
  0xf6   :  { %646 = vmatmul.bf16.vlgmr.msrb.gmra.mxu3 %v5898_v16  ;;  %780 = vmatpush.msra.mxu2 %v681_v9  ;;  %v676_v16 = vld [vmem:[#allocation7] sm:$0xff]  ;;  %v7633_v9 = vld [vmem:[#allocation2 + $0x1e0] sm:$0xf] }
  0xf7   :  { %659 = vmatpush.bf16.msra.mxu0 %v610_v18 }
  0xf8   :  { %781 = vmatpush.msra.mxu2 %v680_v10 }
  0xfa   :  { %782 = vmatpush.msra.mxu2 %v679_v12  ;;  %v5940_v12 = vor.u32 %v7635_v8, %v5939_v7 }
  0xfb   :  { %660 = vmatpush.bf16.msra.mxu0 %v609_v20 }
  0xfc   :  { %783 = vmatpush.msra.mxu2 %v678_v13  ;;  %v5941_v13 = vld [vmem:[#allocation2 + $0x2bc] sm:$0xf0] }
  0xfe   :  { %784 = vmatpush.msra.mxu2 %v677_v14  ;;  %v5944_v14 = vor.u32 %v7633_v9, %v5941_v13  ;;  %v5979_v13 = vld [vmem:[#allocation2 + $0x564] sm:$0xf] }
  0xff   :  { %661 = vmatpush.bf16.msra.mxu0 %v608_v22 }
 0x100   :  { %785 = vmatpush.msra.mxu2 %v676_v16  ;;  %v5923_v16 = vld [vmem:[#allocation2 + $0x1c] sm:$0xf] }
 0x103   :  { %662 = vmatpush.bf16.msra.mxu0 %v607_v25 }
 0x106   :  { %651 = vmatmul.bf16.gmra.mxu3 %v5906_v27  ;;  %v6035_v27 = vld [vmem:[#allocation2 + $0xc5c] sm:$0xf] }
 0x107   :  { %663 = vmatpush.bf16.msra.mxu0 %v606_v28  ;;  %v7659_v28 = vld [vmem:[#allocation2 + $0xd38] sm:$0xf0] }
 0x108   :  { %v6036_v30 = vor.u32 %v7659_v28, %v6035_v27  ;;  %v6043_v27 = vld [vmem:[#allocation2 + $0xc64] sm:$0xf] }
 0x109   :  { %v7660_v28 = vld [vmem:[#allocation2 + $0xd40] sm:$0xf0] }
 0x10a   :  { %1081 = vmatpush.bf16.msra.mxu3 %v6036_v30 }
 0x10b   :  { %664 = vmatpush.bf16.msra.mxu0 %v605_v31  ;;  %v6037_v31 = vld [vmem:[#allocation2 + $0xd3c] sm:$0xf0] }
 0x10e   :  { %5911 = vmatmul.msk.bf16.vlgmr.msra.gmra.mxu0 %vm631_vm0, %v5902_v32  ;;  %v6040_v32 = vor.u32 %v7657_v29, %v6037_v31  ;;  %v7658_v29 = vld [vmem:[#allocation2 + $0xc68] sm:$0xf] }
 0x110   :  { %1100 = vmatpush.bf16.msrb.mxu0 %v6040_v32  ;;  %v6045_v32 = vld [vmem:[#allocation2 + $0xd44] sm:$0xf0] }
 0x11e   :  { %5912 = vmatmul.msk.bf16.gmra.mxu0 %vm631_vm0, %v5910_v35  ;;  %v7653_v35 = vld [vmem:[#allocation2 + $0xaa0] sm:$0xf] }
 0x179   :  { %v647_v37 = vpop.f32.mrf.mxu3 }
 0x17a   :  { %v648_v48 = vadd.f32 %v8038_v43, %v647_v37  ;;  %v6020_v37 = vor.u32 %v7655_v34, %v6019_v33  ;;  %v6048_v33 = vor.u32 %v7658_v29, %v6045_v32  ;;  %v5947_v32 = vld [vmem:[#allocation2 + $0x1e4] sm:$0xf] }
 0x17c   :  { %1082 = vmatpush.bf16.msra.mxu3 %v6020_v37  ;;  %v7656_v37 = vld [vmem:[#allocation2 + $0xb80] sm:$0xf0] }
 0x181   :  { %v649_v38 = vpop.f32.mrf.mxu3 }
 0x182   :  { %v650_v49 = vadd.f32 %v8038_v43, %v649_v38  ;;  %v6021_v38 = vld [vmem:[#allocation2 + $0xb7c] sm:$0xf0] }
 0x189   :  { %v652_v41 = vpop.f32.mrf.mxu3 }
 0x18a   :  { %v653_v45 = vadd.f32 %v8038_v43, %v652_v41  ;;  %v6003_v41 = vld [vmem:[#allocation2 + $0x8dc] sm:$0xf] }
 0x18b   :  { %v666_v39 = vpop.f32.mrf.mxu0 }
 0x18c   :  { %v8394_v54 = vadd.f32 %v666_v39, %v648_v48  ;;  %v6024_v39 = vor.u32 %v7653_v35, %v6021_v38  ;;  %v7647_v48 = vld [vmem:[#allocation2 + $0x7f8] sm:$0xf0]  ;;  %v6027_v35 = vld [vmem:[#allocation2 + $0xaa4] sm:$0xf]  ;;  %v7654_v38 = vld [vmem:[#allocation2 + $0xaa8] sm:$0xf] }
 0x18e   :  { %v700_v57 = vmul.f32 %v8394_v54, %v8394_v54  ;;  %1101 = vmatpush.bf16.msrb.mxu0 %v6024_v39 }
 0x191   :  { %v654_v44 = vpop.f32.mrf.mxu3 }
 0x192   :  { %v655_v46 = vadd.f32 %v8038_v43, %v654_v44  ;;  %v7649_v43 = vld [vmem:[#allocation2 + $0x8e0] sm:$0xf] }
 0x193   :  { %v668_v40 = vpop.f32.mrf.mxu0 }
 0x194   :  { %v8390_v52 = vadd.f32 %v668_v40, %v650_v49  ;;  %v7645_v49 = vld [vmem:[#allocation2 + $0x720] sm:$0xf] }
 0x196   :  { %v701_v56 = vmul.f32 %v8390_v52, %v8390_v52 }
 0x19b   :  { %v671_v42 = vpop.f32.mrf.mxu0 }
 0x19c   :  { %v8386_v50 = vadd.f32 %v671_v42, %v653_v45  ;;  %v7651_v42 = vld [vmem:[#allocation2 + $0x9b8] sm:$0xf0]  ;;  %v6005_v45 = vld [vmem:[#allocation2 + $0x9bc] sm:$0xf0] }
 0x19d   :  { %v6004_v44 = vor.u32 %v7651_v42, %v6003_v41  ;;  %v6028_v42 = vor.u32 %v7656_v37, %v6027_v35  ;;  %v7634_v37 = vld [vmem:[#allocation2 + $0x1e8] sm:$0xf] }
 0x19e   :  { %v702_v55 = vmul.f32 %v8386_v50, %v8386_v50 }
 0x19f   :  { %1083 = vmatpush.bf16.msra.mxu3 %v6004_v44 }
 0x1a3   :  { %v673_v47 = vpop.f32.mrf.mxu0 }
 0x1a4   :  { %v8388_v51 = vadd.f32 %v673_v47, %v655_v46  ;;  %v6008_v46 = vor.u32 %v7649_v43, %v6005_v45  ;;  %v5987_v47 = vld [vmem:[#allocation2 + $0x71c] sm:$0xf]  ;;  %v6029_v43 = vld [vmem:[#allocation2 + $0xb84] sm:$0xf0] }
 0x1a5   :  { %v6032_v44 = vor.u32 %v7654_v38, %v6029_v43  ;;  %v5949_v38 = vld [vmem:[#allocation2 + $0x2c4] sm:$0xf0] }
 0x1a6   :  { %v703_v53 = vmul.f32 %v8388_v51, %v8388_v51  ;;  %1102 = vmatpush.bf16.msrb.mxu0 %v6008_v46 }
 0x1a8   :  { %737 = vmatpush.msra.mxu1 %v703_v53  ;;  %v5988_v53 = vor.u32 %v7647_v48, %v5987_v47 }
 0x1aa   :  { %738 = vmatpush.msra.mxu1 %v702_v55  ;;  %v5989_v55 = vld [vmem:[#allocation2 + $0x7fc] sm:$0xf0]  ;;  %1084 = vmatpush.bf16.msra.mxu3 %v5988_v53  ;;  %v7652_v53 = vld [vmem:[#allocation2 + $0x9c0] sm:$0xf0] }
 0x1ac   :  { %739 = vmatpush.msra.mxu1 %v701_v56  ;;  %v5992_v56 = vor.u32 %v7645_v49, %v5989_v55  ;;  %v6011_v49 = vld [vmem:[#allocation2 + $0x8e4] sm:$0xf]  ;;  %v7650_v55 = vld [vmem:[#allocation2 + $0x8e8] sm:$0xf] }
 0x1ae   :  { %740 = vmatpush.msra.mxu1 %v700_v57  ;;  %1103 = vmatpush.bf16.msrb.mxu0 %v5992_v56 }
 0x1b0   :  { %741 = vmatpush.msra.mxu1 %v8388_v51 }
 0x1b2   :  { %742 = vmatpush.msra.mxu1 %v8386_v50 }
 0x1b4   :  { %743 = vmatpush.msra.mxu1 %v8390_v52 }
 0x1b6   :  { %744 = vmatpush.msra.mxu1 %v8394_v54 }
 0x1b7   :  { %5913 = vmatmul.msk.f32.vlgmr.msra.gmra.mxu1 %vm704_vm1, %v692_v58  ;;  %v5971_v58 = vld [vmem:[#allocation2 + $0x55c] sm:$0xf] }
 0x1bf   :  { %5914 = vmatmul.msk.f32.gmra.mxu1 %vm704_vm1, %v693_v59  ;;  %v7643_v59 = vld [vmem:[#allocation2 + $0x638] sm:$0xf0] }
 0x1c7   :  { %5915 = vmatmul.msk.f32.gmra.mxu1 %vm704_vm1, %v694_v60  ;;  %v7641_v60 = vld [vmem:[#allocation2 + $0x560] sm:$0xf] }
 0x1c8   :  { %v5976_v36 = vor.u32 %v7641_v60, %v5973_v62  ;;  %v5995_v60 = vld [vmem:[#allocation2 + $0x724] sm:$0xf] }
 0x1ca   :  { %1104 = vmatpush.bf16.msrb.mxu0 %v5976_v36  ;;  %v7648_v36 = vld [vmem:[#allocation2 + $0x800] sm:$0xf0] }
 0x1cf   :  { %5916 = vmatmul.msk.f32.gmra.mxu1 %vm704_vm1, %v695_v61  ;;  %v5972_v61 = vor.u32 %v7643_v59, %v5971_v58  ;;  %v6012_v58 = vor.u32 %v7652_v53, %v6011_v49  ;;  %v6013_v59 = vld [vmem:[#allocation2 + $0x9c4] sm:$0xf0]  ;;  %v5952_v53 = vor.u32 %v7634_v37, %v5949_v38 }
 0x1d0   :  { %v6016_v62 = vor.u32 %v7650_v55, %v6013_v59  ;;  %v5931_v55 = vld [vmem:[#allocation2 + $0x24] sm:$0xf] }
 0x1d1   :  { %1085 = vmatpush.bf16.msra.mxu3 %v5972_v61 }
 0x1d5   :  { %1086 = vmatpush.bf16.msra.mxu3 %v5956_v3  ;;  %v5996_v3 = vor.u32 %v7648_v36, %v5995_v60 }
 0x1d7   :  { %5917 = vmatmul.msk.f32.gmra.mxu1 %vm704_vm1, %v696_v1  ;;  %v7637_v1 = vld [vmem:[#allocation2 + $0x3a0] sm:$0xf] }
 0x1d8   :  { %v5960_v5 = vor.u32 %v7637_v1, %v5957_v4 }
 0x1d9   :  { %1087 = vmatpush.bf16.msra.mxu3 %v5940_v12 }
 0x1da   :  { %1105 = vmatpush.bf16.msrb.mxu0 %v5960_v5  ;;  %v6000_v5 = vor.u32 %v7646_v63, %v5997_v0 }
 0x1de   :  { %1106 = vmatpush.bf16.msrb.mxu0 %v5944_v14  ;;  %v7644_v14 = vld [vmem:[#allocation2 + $0x640] sm:$0xf0] }
 0x1df   :  { %5918 = vmatmul.msk.f32.gmra.mxu1 %vm704_vm1, %v697_v6 }
 0x1e7   :  { %5919 = vmatmul.msk.f32.gmra.mxu1 %vm704_vm1, %v698_v11 }
 0x1ef   :  { %5920 = vmatmul.msk.f32.gmra.mxu1 %vm704_vm1, %v699_v15 }
 0x234   :  { %v746_v17 = vpop.f32.mrf.mxu1 }
 0x235   :  { %786 = vmatmul.f32.vlgmr.msra.gmra.mxu2 %v746_v17  ;;  %v7631_v17 = vld [vmem:[#allocation2 + $0xf8] sm:$0xf0] }
 0x23c   :  { %v749_v18 = vpop.f32.mrf.mxu1 }
 0x23d   :  { %789 = vmatmul.f32.gmra.mxu2 %v749_v18  ;;  %v7629_v18 = vld [vmem:[#allocation2 + $0x20] sm:$0xf] }
 0x244   :  { %v752_v19 = vpop.f32.mrf.mxu1 }
 0x245   :  { %792 = vmatmul.f32.gmra.mxu2 %v752_v19 }
 0x24c   :  { %v755_v20 = vpop.f32.mrf.mxu1 }
 0x24d   :  { %795 = vmatmul.f32.gmra.mxu2 %v755_v20 }
 0x254   :  { %v758_v21 = vpop.f32.mrf.mxu1 }
 0x255   :  { %798 = vmatmul.f32.gmra.mxu2 %v758_v21  ;;  %v5924_v21 = vor.u32 %v7631_v17, %v5923_v16  ;;  %v5980_v17 = vor.u32 %v7644_v14, %v5979_v13 }
 0x257   :  { %1088 = vmatpush.bf16.msra.mxu3 %v5924_v21 }
 0x25c   :  { %v761_v22 = vpop.f32.mrf.mxu1 }
 0x25d   :  { %801 = vmatmul.f32.gmra.mxu2 %v761_v22  ;;  %v5925_v22 = vld [vmem:[#allocation2 + $0xfc] sm:$0xf0] }
 0x264   :  { %v764_v23 = vpop.f32.mrf.mxu1 }
 0x265   :  { %804 = vmatmul.f32.gmra.mxu2 %v764_v23  ;;  %v5928_v23 = vor.u32 %v7629_v18, %v5925_v22  ;;  %v5981_v18 = vld [vmem:[#allocation2 + $0x644] sm:$0xf0] }
 0x267   :  { %1107 = vmatpush.bf16.msrb.mxu0 %v5928_v23 }
 0x26b   :  { %1138 = vmatpush.bf16.msra.mxu0 %v6048_v33  ;;  %v7636_v33 = vld [vmem:[#allocation2 + $0x2c0] sm:$0xf0] }
 0x26c   :  { %v767_v24 = vpop.f32.mrf.mxu1 }
 0x26d   :  { %807 = vmatmul.f32.gmra.mxu2 %v767_v24 }
 0x26f   :  { %1139 = vmatpush.bf16.msra.mxu0 %v6032_v44 }
 0x273   :  { %1140 = vmatpush.bf16.msra.mxu0 %v6016_v62 }
 0x277   :  { %1141 = vmatpush.bf16.msra.mxu0 %v6000_v5 }
 0x2b8   :  { %v787_v25 = vpop.f32.mrf.mxu2 }
 0x2b9   :  { %v8420_v2 = vmul.f32 0.00390625, %v787_v25 }
 0x2bb   :  { %v819_v10 = vmul.f32 %v8420_v2, %v8420_v2  ;;  %v831_v43 = vsub.f32 %v8394_v54, %v8420_v2  ;;  %v7630_v54 = vld [vmem:[#allocation2 + $0x28] sm:$0xf] }
 0x2bc   :  { %v5933_v2 = vld [vmem:[#allocation2 + $0x104] sm:$0xf0] }
 0x2bd   :  { %v5936_v62 = vor.u32 %v7630_v54, %v5933_v2  ;;  %v1204_v54 = vld [vmem:[#allocation7 + $0xe8] sm:$0xff]  ;;  %v1203_v2 = vld [vmem:[#allocation7 + $0xe0] sm:$0xff] }
 0x2c0   :  { %v8414_v26 = vpop.f32.mrf.mxu2 }
 0x2c1   :  { %v8425_v19 = vmul.f32 0.00390625, %v8414_v26  ;;  %v6044_v26 = vor.u32 %v7660_v28, %v6043_v27  ;;  %v7638_v27 = vld [vmem:[#allocation2 + $0x3a8] sm:$0xf] }
 0x2c2   :  { %v5965_v28 = vld [vmem:[#allocation2 + $0x484] sm:$0xf0] }
 0x2c3   :  { %v820_v30 = vmul.f32 %v8425_v19, %v8425_v19  ;;  %1119 = vmatpush.bf16.msrb.mxu3 %v6044_v26  ;;  %v5968_v26 = vor.u32 %v7638_v27, %v5965_v28 }
 0x2c7   :  { %1120 = vmatpush.bf16.msrb.mxu3 %v6028_v42 }
 0x2c8   :  { %v8416_v40 = vpop.f32.mrf.mxu2 }
 0x2c9   :  { %v8433_v39 = vmul.f32 0.00390625, %v8416_v40 }
 0x2cb   :  { %v821_v40 = vmul.f32 %v8433_v39, %v8433_v39  ;;  %1121 = vmatpush.bf16.msrb.mxu3 %v6012_v58 }
 0x2cf   :  { %1122 = vmatpush.bf16.msrb.mxu3 %v5996_v3 }
 0x2d0   :  { %v8418_v57 = vpop.f32.mrf.mxu2 }
 0x2d3   :  { %1123 = vmatpush.bf16.msrb.mxu3 %v5980_v17 }
 0x2d8   :  { %v799_v6 = vpop.f32.mrf.mxu2 }
 0x2d9   :  { %v815_v11 = vmul.f32 0.00390625, %v799_v6  ;;  %v8446_v6 = vmul.f32 0.00390625, %v8418_v57 }
 0x2db   :  { %v823_v15 = vsub.f32 %v815_v11, %v819_v10  ;;  %v822_v16 = vmul.f32 %v8446_v6, %v8446_v6 }
 0x2dd   :  { %v827_v20 = vmax.f32 %v823_v15, 0.0  ;;  %v7642_v15 = vld [vmem:[#allocation2 + $0x568] sm:$0xf] }
 0x2de   :  { %v5984_v23 = vor.u32 %v7642_v15, %v5981_v18 }
 0x2df   :  { %v8427_v24 = vadd.f32 1e-05, %v827_v20  ;;  %v5963_v20 = vld [vmem:[#allocation2 + $0x3a4] sm:$0xf] }
 0x2e0   :  { %v802_v25 = vpop.f32.mrf.mxu2  ;;  %1142 = vmatpush.bf16.msra.mxu0 %v5984_v23 }
 0x2e1   :  { %8056 = vrsqrt.f32 %v8427_v24  ;;  %v816_v31 = vmul.f32 0.00390625, %v802_v25  ;;  %v7640_v25 = vld [vmem:[#allocation2 + $0x480] sm:$0xf0]  ;;  %vm845_vm3 = vweird.f32 %v8427_v24 }
 0x2e3   :  { %v824_v34 = vsub.f32 %v816_v31, %v820_v30  ;;  %v5964_v30 = vor.u32 %v7640_v25, %v5963_v20 }
 0x2e4   :  { %1143 = vmatpush.bf16.msra.mxu0 %v5968_v26 }
 0x2e5   :  { %v828_v41 = vmax.f32 %v824_v34, 0.0  ;;  %1124 = vmatpush.bf16.msrb.mxu3 %v5964_v30 }
 0x2e7   :  { %v8435_v45 = vpop.eup %8056  ;;  %v8437_v46 = vadd.f32 1e-05, %v828_v41 }
 0x2e8   :  { %v840_v47 = vmul.f32 %v8435_v45, %v8427_v24  ;;  %v805_v48 = vpop.f32.mrf.mxu2  ;;  %vm846_vm2 = vweird.f32 %v8435_v45  ;;  %1144 = vmatpush.bf16.msra.mxu0 %v5952_v53 }
 0x2e9   :  { %8058 = vrsqrt.f32 %v8437_v46  ;;  %v817_v56 = vmul.f32 0.00390625, %v805_v48  ;;  %vm8459_vm4 = vmor %vm845_vm3, %vm846_vm2  ;;  %vm855_vm6 = vweird.f32 %v8437_v46 }
 0x2ea   :  { %v841_v61 = vmul.f32 %v8435_v45, %v840_v47  ;;  %v5948_v47 = vor.u32 %v7636_v33, %v5947_v32 }
 0x2eb   :  { %v825_v1 = vsub.f32 %v817_v56, %v821_v40  ;;  %v7632_v40 = vld [vmem:[#allocation2 + $0x100] sm:$0xf0]  ;;  %v832_v56 = vsub.f32 %v8390_v52, %v8425_v19 }
 0x2ec   :  { %v842_v4 = vmul.f32 0.5, %v841_v61  ;;  %1125 = vmatpush.bf16.msrb.mxu3 %v5948_v47  ;;  %1145 = vmatpush.bf16.msra.mxu0 %v5936_v62  ;;  %v8039_v47 = vld [vmem:[#allocation6 + $0x1] ss:$0 sm:$0xff] }
 0x2ed   :  { %v829_v7 = vmax.f32 %v825_v1, 0.0  ;;  %v1209_v62 = vld [vmem:[#allocation9 + $0x48] sm:$0xff] }
 0x2ee   :  { %v843_v8 = vsub.f32 1.5, %v842_v4 }
 0x2ef   :  { %v8059_v9 = vpop.eup %8058  ;;  %v8448_v10 = vadd.f32 1e-05, %v829_v7 }
 0x2f0   :  { %v850_v11 = vmul.f32 %v8059_v9, %v8437_v46  ;;  %v808_v12 = vpop.f32.mrf.mxu2  ;;  %v844_v21 = vmul.f32 %v8435_v45, %v843_v8  ;;  %vm856_vm5 = vweird.f32 %v8059_v9  ;;  %v5932_v46 = vor.u32 %v7632_v40, %v5931_v55  ;;  %v1206_v40 = vld [vmem:[#allocation7 + $0xf8] sm:$0xff] }
 0x2f1   :  { %8060 = vrsqrt.f32 %v8448_v10  ;;  %v818_v57 = vmul.f32 0.00390625, %v808_v12  ;;  %vm857_vm7 = vmor %vm855_vm6, %vm856_vm5  ;;  %vm865_vm9 = vweird.f32 %v8448_v10  ;;  %v834_v12 = vsub.f32 %v8388_v51, %v8446_v6 }
 0x2f2   :  { %v851_v22 = vmul.f32 %v8059_v9, %v850_v11  ;;  %v848_v24 = vsel %vm8459_vm4, %v8435_v45, %v844_v21  ;;  %1126 = vmatpush.bf16.msrb.mxu3 %v5932_v46  ;;  %v1200_v46 = vld [vmem:[#allocation7 + $0xc8] sm:$0xff] }
 0x2f3   :  { %v826_v29 = vsub.f32 %v818_v57, %v822_v16  ;;  %v879_v45 = vmul.f32 %v848_v24, %v831_v43  ;;  %v7661_v24 = vld [vmem:[#allocation4 + $0x24] sm:$0xf0] }
 0x2f4   :  { %v852_v31 = vmul.f32 0.5, %v851_v22 }
 0x2f5   :  { %v830_v35 = vmax.f32 %v826_v29, 0.0  ;;  %v883_v36 = vmax.f32 %v879_v45, 0.0 }
 0x2f6   :  { %v853_v41 = vsub.f32 1.5, %v852_v31 }
 0x2f7   :  { %v8061_v42 = vpop.eup %8060  ;;  %v838_v44 = vadd.f32 1e-05, %v830_v35 }
 0x2f8   :  { %v854_v48 = vmul.f32 %v8059_v9, %v853_v41  ;;  %v860_v49 = vmul.f32 %v8061_v42, %v8448_v10  ;;  %vm866_vm8 = vweird.f32 %v8061_v42  ;;  %v6051_v41 = vld [vmem:[#allocation4 + $0x20] sm:$0xf] }
 0x2f9   :  { %8062 = vrsqrt.f32 %v838_v44  ;;  %vm867_vm10 = vmor %vm865_vm9, %vm866_vm8  ;;  %vm875_vm12 = vweird.f32 %v838_v44  ;;  %v6052_v43 = vor.u32 %v7661_v24, %v6051_v41  ;;  %v6141_v41 = vld [vmem:[#allocation2 + $0x9cc] sm:$0xf0]  ;;  %v6147_v24 = vld [vmem:[#allocation2 + $0x8f4] sm:$0xf] }
 0x2fa   :  { %v861_v58 = vmul.f32 %v8061_v42, %v860_v49  ;;  %v858_v59 = vsel %vm857_vm7, %v8059_v9, %v854_v48  ;;  %v833_v9 = vsub.f32 %v8386_v50, %v8433_v39  ;;  %vm1617_vm7 = vcmask 130048  }
 0x2fb   :  { %v880_v60 = vmul.f32 %v858_v59, %v832_v56  ;;  %v1205_v56 = vld [vmem:[#allocation7 + $0xf0] sm:$0xff]  ;;  %v1202_v59 = vld [vmem:[#allocation7 + $0xd8] sm:$0xff] }
 0x2fc   :  { %v862_v61 = vmul.f32 0.5, %v861_v58  ;;  %v1208_v58 = vld [vmem:[#allocation9 + $0x40] sm:$0xff] }
 0x2fd   :  { %v884_v63 = vmax.f32 %v880_v60, 0.0  ;;  %v1201_v60 = vld [vmem:[#allocation7 + $0xd0] sm:$0xff] }
 0x2fe   :  { %v863_v0 = vsub.f32 1.5, %v862_v61  ;;  %v1199_v61 = vld [vmem:[#allocation7 + $0xc0] sm:$0xff] }
 0x2ff   :  { %v8063_v1 = vpop.eup %8062  ;;  %v887_v3 = vpack.c.bf16 %v884_v63, %v883_v36  ;;  %v1198_v36 = vld [vmem:[#allocation7 + $0xb8] sm:$0xff]  ;;  %v1197_v63 = vld [vmem:[#allocation7 + $0xb0] sm:$0xff] }
 0x300   :  { %v870_v52 = vmul.f32 %v8063_v1, %v838_v44  ;;  %v864_v19 = vmul.f32 %v8061_v42, %v863_v0  ;;  %vm876_vm11 = vweird.f32 %v8063_v1  ;;  %v1196_v0 = vld [vmem:[#allocation7 + $0xa8] sm:$0xff] }
 0x301   :  { %1089 = vmatmul.bf16.vlgmr.msra.gmra.mxu3 %v887_v3  ;;  %1108 = vmatmul.bf16.vlgmr.msrb.gmra.mxu0 %v887_v3  ;;  %vm877_vm13 = vmor %vm875_vm12, %vm876_vm11  ;;  %vm1899_vm11 = vcmask 1043456   ;;  %vm1895_vm12 = vcmask 195584  }
 0x302   :  { %v871_v4 = vmul.f32 %v8063_v1, %v870_v52  ;;  %v868_v8 = vsel %vm867_vm10, %v8061_v42, %v864_v19  ;;  %1256 = vmatpush.msra.mxu3 %v1206_v40  ;;  %v1194_v52 = vld [vmem:[#allocation7 + $0x98] sm:$0xff]  ;;  %v1193_v19 = vld [vmem:[#allocation7 + $0x90] sm:$0xff] }
 0x303   :  { %v881_v13 = vmul.f32 %v868_v8, %v833_v9  ;;  %v6123_v40 = vld [vmem:[#allocation2 + $0x72c] sm:$0xf] }
 0x304   :  { %v872_v5 = vmul.f32 0.5, %v871_v4  ;;  %1257 = vmatpush.msra.mxu3 %v1205_v56  ;;  %v1192_v4 = vld [vmem:[#allocation7 + $0x88] sm:$0xff]  ;;  %v7680_v56 = vld [vmem:[#allocation2 + $0x808] sm:$0xf0] }
 0x305   :  { %v885_v16 = vmax.f32 %v881_v13, 0.0  ;;  %v6171_v13 = vld [vmem:[#allocation2 + $0xc6c] sm:$0xf] }
 0x306   :  { %v873_v7 = vsub.f32 1.5, %v872_v5  ;;  %1258 = vmatpush.msra.mxu3 %v1204_v54  ;;  %v1211_v5 = vld [vmem:[#allocation9 + $0x58] sm:$0xff]  ;;  %v6124_v54 = vor.u32 %v7680_v56, %v6123_v40 }
 0x308   :  { %v874_v11 = vmul.f32 %v8063_v1, %v873_v7  ;;  %1259 = vmatpush.msra.mxu3 %v1203_v2  ;;  %v1191_v7 = vld [vmem:[#allocation7 + $0x80] sm:$0xff]  ;;  %v6125_v2 = vld [vmem:[#allocation2 + $0x80c] sm:$0xf0] }
 0x30a   :  { %v878_v14 = vsel %vm877_vm13, %v8063_v1, %v874_v11  ;;  %1260 = vmatpush.msra.mxu3 %v1202_v59  ;;  %v1195_v1 = vld [vmem:[#allocation7 + $0xa0] sm:$0xff]  ;;  %v7681_v59 = vld [vmem:[#allocation2 + $0x810] sm:$0xf0] }
 0x30b   :  { %v882_v15 = vmul.f32 %v878_v14, %v834_v12  ;;  %v7692_v14 = vld [vmem:[#allocation2 + $0xd48] sm:$0xf0] }
 0x30c   :  { %1261 = vmatpush.msra.mxu3 %v1201_v60 }
 0x30d   :  { %v886_v57 = vmax.f32 %v882_v15, 0.0  ;;  %v7690_v15 = vld [vmem:[#allocation2 + $0xc70] sm:$0xf] }
 0x30e   :  { %1262 = vmatpush.msra.mxu3 %v1200_v46 }
 0x30f   :  { %v888_v10 = vpack.c.bf16 %v886_v57, %v885_v16  ;;  %v6172_v16 = vor.u32 %v7692_v14, %v6171_v13  ;;  %v6173_v57 = vld [vmem:[#allocation2 + $0xd4c] sm:$0xf0]  ;;  %v6091_v14 = vld [vmem:[#allocation2 + $0x3ac] sm:$0xf] }
 0x310   :  { %1263 = vmatpush.msra.mxu3 %v1199_v61  ;;  %v7679_v61 = vld [vmem:[#allocation2 + $0x738] sm:$0xf] }
 0x311   :  { %1094 = vmatmul.bf16.gmra.mxu3 %v888_v10  ;;  %1113 = vmatmul.bf16.gmra.mxu0 %v888_v10 }
 0x312   :  { %1264 = vmatpush.msra.mxu3 %v1198_v36  ;;  %1516 = vmatpush.bf16.msrb.mxu0 %v6172_v16  ;;  %v7670_v16 = vld [vmem:[#allocation2 + $0x3b0] sm:$0xf] }
 0x314   :  { %1265 = vmatpush.msra.mxu3 %v1197_v63 }
 0x316   :  { %1266 = vmatpush.msra.mxu3 %v1196_v0  ;;  %v6107_v0 = vld [vmem:[#allocation2 + $0x56c] sm:$0xf] }
 0x318   :  { %1267 = vmatpush.msra.mxu3 %v1195_v1  ;;  %v7676_v1 = vld [vmem:[#allocation2 + $0x648] sm:$0xf0] }
 0x31a   :  { %1268 = vmatpush.msra.mxu3 %v1194_v52  ;;  %v6108_v52 = vor.u32 %v7676_v1, %v6107_v0 }
 0x31c   :  { %1269 = vmatpush.msra.mxu3 %v1193_v19  ;;  %v6109_v19 = vld [vmem:[#allocation2 + $0x64c] sm:$0xf0] }
 0x31e   :  { %1270 = vmatpush.msra.mxu3 %v1192_v4  ;;  %v6115_v4 = vld [vmem:[#allocation2 + $0x574] sm:$0xf] }
 0x320   :  { %1271 = vmatpush.msra.mxu3 %v1191_v7  ;;  %v7677_v7 = vld [vmem:[#allocation2 + $0x650] sm:$0xf0] }
 0x321   :  { %1127 = vmatmul.bf16.vlgmr.msrb.gmra.mxu3 %v887_v3  ;;  %1146 = vmatmul.bf16.vlgmr.msra.gmra.mxu0 %v887_v3  ;;  %v1210_v3 = vld [vmem:[#allocation9 + $0x50] sm:$0xff] }
 0x331   :  { %1132 = vmatmul.bf16.gmra.mxu3 %v888_v10  ;;  %1151 = vmatmul.bf16.gmra.mxu0 %v888_v10  ;;  %v6179_v10 = vld [vmem:[#allocation2 + $0xc74] sm:$0xf] }
 0x37e   :  { %v1109_v17 = vpop.f32.mrf.mxu0 }
 0x384   :  { %v1090_v50 = vpop.f32.mrf.mxu3 }
 0x386   :  { %v1111_v39 = vpop.f32.mrf.mxu0 }
 0x387   :  { %v1162_v37 = vpack.c.bf16 %v1111_v39, %v1109_v17  ;;  %v7693_v17 = vld [vmem:[#allocation2 + $0xd50] sm:$0xf0] }
 0x388   :  { %v6180_v39 = vor.u32 %v7693_v17, %v6179_v10  ;;  %v6093_v10 = vld [vmem:[#allocation2 + $0x48c] sm:$0xf0]  ;;  %v6099_v17 = vld [vmem:[#allocation2 + $0x3b4] sm:$0xf] }
 0x38a   :  { %1544 = vmatpush.bf16.msrb.mxu2 %v6180_v39  ;;  %v6096_v39 = vor.u32 %v7670_v16, %v6093_v10 }
 0x38c   :  { %v1092_v18 = vpop.f32.mrf.mxu3 }
 0x38d   :  { %v1160_v42 = vpack.c.bf16 %v1092_v18, %v1090_v50  ;;  %v6176_v50 = vor.u32 %v7690_v15, %v6173_v57  ;;  %v7691_v18 = vld [vmem:[#allocation2 + $0xc78] sm:$0xf]  ;;  %v7672_v15 = vld [vmem:[#allocation2 + $0x488] sm:$0xf0] }
 0x38e   :  { %v1114_v20 = vpop.f32.mrf.mxu0  ;;  %v6092_v57 = vor.u32 %v7672_v15, %v6091_v14 }
 0x394   :  { %v1095_v21 = vpop.f32.mrf.mxu3 }
 0x396   :  { %v1116_v51 = vpop.f32.mrf.mxu0 }
 0x397   :  { %v1163_v35 = vpack.c.bf16 %v1116_v51, %v1114_v20  ;;  %v6181_v20 = vld [vmem:[#allocation2 + $0xd54] sm:$0xf0]  ;;  %v6155_v51 = vld [vmem:[#allocation2 + $0xaac] sm:$0xf] }
 0x39c   :  { %v1097_v6 = vpop.f32.mrf.mxu3 }
 0x39d   :  { %v1161_v38 = vpack.c.bf16 %v1097_v6, %v1095_v21  ;;  %v6184_v21 = vor.u32 %v7691_v18, %v6181_v20  ;;  %v7688_v6 = vld [vmem:[#allocation2 + $0xb88] sm:$0xf0]  ;;  %v7671_v20 = vld [vmem:[#allocation2 + $0x3b8] sm:$0xf] }
 0x39e   :  { %v1147_v22 = vpop.f32.mrf.mxu0 }
 0x39f   :  { %1558 = vmatpush.bf16.msrb.mxu3 %v6184_v21  ;;  %v6101_v21 = vld [vmem:[#allocation2 + $0x494] sm:$0xf0] }
 0x3a4   :  { %v1128_v23 = vpop.f32.mrf.mxu3 }
 0x3a6   :  { %v1149_v25 = vpop.f32.mrf.mxu0 }
 0x3a7   :  { %v1166_v26 = vpack.c.bf16 %v1149_v25, %v1147_v22  ;;  %v7686_v22 = vld [vmem:[#allocation2 + $0xab0] sm:$0xf] }
 0x3a8   :  { %v6157_v25 = vld [vmem:[#allocation2 + $0xb8c] sm:$0xf0] }
 0x3ac   :  { %v1130_v27 = vpop.f32.mrf.mxu3 }
 0x3ad   :  { %v1164_v34 = vpack.c.bf16 %v1130_v27, %v1128_v23  ;;  %v6156_v23 = vor.u32 %v7688_v6, %v6155_v51  ;;  %v6163_v27 = vld [vmem:[#allocation2 + $0xab4] sm:$0xf]  ;;  %v6104_v51 = vor.u32 %v7671_v20, %v6101_v21 }
 0x3ae   :  { %v1152_v28 = vpop.f32.mrf.mxu0 }
 0x3af   :  { %1517 = vmatpush.bf16.msrb.mxu0 %v6156_v23  ;;  %v7668_v23 = vld [vmem:[#allocation2 + $0x2c8] sm:$0xf0] }
 0x3b4   :  { %v1133_v29 = vpop.f32.mrf.mxu3 }
 0x3b6   :  { %v1154_v30 = vpop.f32.mrf.mxu0 }
 0x3b7   :  { %v1167_v31 = vpack.c.bf16 %v1154_v30, %v1152_v28  ;;  %v7689_v28 = vld [vmem:[#allocation2 + $0xb90] sm:$0xf0] }
 0x3b8   :  { %v6164_v30 = vor.u32 %v7689_v28, %v6163_v27 }
 0x3b9   :  { %1176 = vmatpush.bf16.msrb.mxu1 %v1167_v31  ;;  %v7687_v31 = vld [vmem:[#allocation2 + $0xab8] sm:$0xf] }
 0x3ba   :  { %1545 = vmatpush.bf16.msrb.mxu2 %v6164_v30  ;;  %v6077_v30 = vld [vmem:[#allocation2 + $0x2cc] sm:$0xf0] }
 0x3bc   :  { %v1135_v32 = vpop.f32.mrf.mxu3 }
 0x3bd   :  { %1177 = vmatpush.bf16.msrb.mxu1 %v1166_v26  ;;  %v1165_v33 = vpack.c.bf16 %v1135_v32, %v1133_v29  ;;  %v6160_v29 = vor.u32 %v7686_v22, %v6157_v25  ;;  %v6165_v26 = vld [vmem:[#allocation2 + $0xb94] sm:$0xf0]  ;;  %v6075_v22 = vld [vmem:[#allocation2 + $0x1ec] sm:$0xf]  ;;  %v7666_v25 = vld [vmem:[#allocation2 + $0x1f0] sm:$0xf] }
 0x3be   :  { %v6168_v32 = vor.u32 %v7687_v31, %v6165_v26  ;;  %v6083_v31 = vld [vmem:[#allocation2 + $0x1f4] sm:$0xf]  ;;  %v6080_v26 = vor.u32 %v7666_v25, %v6077_v30  ;;  %v8040_v30 = vld [vmem:[#allocation6 + $0x2] ss:$0 sm:$0xff] }
 0x3c0   :  { %1559 = vmatpush.bf16.msrb.mxu3 %v6168_v32  ;;  %v7669_v32 = vld [vmem:[#allocation2 + $0x2d0] sm:$0xf0] }
 0x3c1   :  { %1178 = vmatpush.bf16.msrb.mxu1 %v1165_v33 }
 0x3c5   :  { %1179 = vmatpush.bf16.msrb.mxu1 %v1164_v34  ;;  %v6139_v34 = vld [vmem:[#allocation2 + $0x8ec] sm:$0xf] }
 0x3c9   :  { %1180 = vmatpush.bf16.msrb.mxu1 %v1163_v35  ;;  %v7684_v35 = vld [vmem:[#allocation2 + $0x9c8] sm:$0xf0] }
 0x3cd   :  { %1181 = vmatpush.bf16.msrb.mxu1 %v1162_v37  ;;  %v7682_v37 = vld [vmem:[#allocation2 + $0x8f0] sm:$0xf] }
 0x3d1   :  { %1182 = vmatpush.bf16.msrb.mxu1 %v1161_v38  ;;  %v6140_v38 = vor.u32 %v7684_v35, %v6139_v34  ;;  %v6085_v34 = vld [vmem:[#allocation2 + $0x2d4] sm:$0xf0] }
 0x3d3   :  { %1518 = vmatpush.bf16.msrb.mxu0 %v6140_v38 }
 0x3d5   :  { %1183 = vmatpush.bf16.msrb.mxu1 %v1160_v42  ;;  %v6144_v42 = vor.u32 %v7682_v37, %v6141_v41  ;;  %v6084_v37 = vor.u32 %v7669_v32, %v6083_v31  ;;  %v6059_v41 = vld [vmem:[#allocation2 + $0x2c] sm:$0xf] }
 0x3d7   :  { %1519 = vmatpush.bf16.msrb.mxu0 %v6124_v54  ;;  %v7663_v54 = vld [vmem:[#allocation2 + $0x38] sm:$0xf] }
 0x3d8   :  { %1184 = vmatmul.bf16.vlgmr.msrb.gmra.mxu1 %v6052_v43  ;;  %v7685_v43 = vld [vmem:[#allocation2 + $0x9d0] sm:$0xf0] }
 0x3db   :  { %1520 = vmatpush.bf16.msrb.mxu0 %v6108_v52 }
 0x3df   :  { %1521 = vmatpush.bf16.msrb.mxu0 %v6092_v57 }
 0x455   :  { %v1185_v44 = vpop.f32.mrf.mxu1 }
 0x456   :  { %v8478_v49 = vadd.f32 %v8039_v47, %v1185_v44  ;;  %v7683_v44 = vld [vmem:[#allocation2 + $0x8f8] sm:$0xf] }
 0x458   :  { %v1212_v45 = vmul.f32 %v8478_v49, %v8478_v49 }
 0x45d   :  { %v1187_v48 = vpop.f32.mrf.mxu1 }
 0x45e   :  { %v8480_v53 = vadd.f32 %v8039_v47, %v1187_v48  ;;  %v6149_v47 = vld [vmem:[#allocation2 + $0x9d4] sm:$0xf0]  ;;  %v6148_v48 = vor.u32 %v7685_v43, %v6147_v24  ;;  %v7664_v24 = vld [vmem:[#allocation2 + $0x108] sm:$0xf0] }
 0x45f   :  { %v6060_v43 = vor.u32 %v7664_v24, %v6059_v41  ;;  %v8517_v41 = vld [vmem:[#allocation7 + $0x160] sm:$0xff]  ;;  %v8519_v24 = vld [vmem:[#allocation9 + $0x88] sm:$0xff] }
 0x460   :  { %v1213_v55 = vmul.f32 %v8480_v53, %v8480_v53  ;;  %1546 = vmatpush.bf16.msrb.mxu2 %v6148_v48  ;;  %v7665_v48 = vld [vmem:[#allocation2 + $0x110] sm:$0xf0] }
 0x462   :  { %1239 = vmatpush.msra.mxu1 %v1213_v55  ;;  %v6152_v55 = vor.u32 %v7683_v44, %v6149_v47  ;;  %v6061_v44 = vld [vmem:[#allocation2 + $0x10c] sm:$0xf0]  ;;  %v6067_v47 = vld [vmem:[#allocation2 + $0x34] sm:$0xf] }
 0x464   :  { %1240 = vmatpush.msra.mxu1 %v1212_v45  ;;  %v7678_v45 = vld [vmem:[#allocation2 + $0x730] sm:$0xf]  ;;  %1560 = vmatpush.bf16.msrb.mxu3 %v6152_v55 }
 0x465   :  { %v6128_v60 = vor.u32 %v7678_v45, %v6125_v2  ;;  %v6068_v45 = vor.u32 %v7665_v48, %v6067_v47  ;;  %v6069_v2 = vld [vmem:[#allocation2 + $0x114] sm:$0xf0]  ;;  %v8536_v48 = vld [vmem:[#allocation7 + $0x138] sm:$0xff] }
 0x466   :  { %1241 = vmatpush.msra.mxu1 %v8480_v53  ;;  %v8533_v47 = vld [vmem:[#allocation7 + $0x140] sm:$0xff] }
 0x468   :  { %1242 = vmatpush.msra.mxu1 %v8478_v49 }
 0x469   :  { %6053 = vmatmul.msk.f32.vlgmr.msra.gmra.mxu1 %vm1214_vm14, %v1208_v58  ;;  %v6131_v58 = vld [vmem:[#allocation2 + $0x734] sm:$0xf] }
 0x46a   :  { %1530 = vmatpush.bf16.msrb.mxu1 %v6176_v50  ;;  %v6132_v46 = vor.u32 %v7681_v59, %v6131_v58  ;;  %v7673_v50 = vld [vmem:[#allocation2 + $0x490] sm:$0xf0]  ;;  %v6072_v58 = vor.u32 %v7663_v54, %v6069_v2  ;;  %v8551_v54 = vld [vmem:[#allocation7 + $0x110] sm:$0xff]  ;;  %v8554_v2 = vld [vmem:[#allocation7 + $0x108] sm:$0xff] }
 0x46b   :  { %v6100_v18 = vor.u32 %v7673_v50, %v6099_v17 }
 0x46c   :  { %1547 = vmatpush.bf16.msrb.mxu2 %v6132_v46 }
 0x46e   :  { %1531 = vmatpush.bf16.msrb.mxu1 %v6160_v29  ;;  %v6076_v29 = vor.u32 %v7668_v23, %v6075_v22 }
 0x470   :  { %1522 = vmatpush.bf16.msrb.mxu0 %v6076_v29  ;;  %v1573_v29 = vld [vmem:[#allocation4 + $0x40] sm:$0xff] }
 0x471   :  { %6054 = vmatmul.msk.f32.gmra.mxu1 %vm1214_vm14, %v1209_v62  ;;  %v6133_v62 = vld [vmem:[#allocation2 + $0x814] sm:$0xf0] }
 0x472   :  { %1532 = vmatpush.bf16.msrb.mxu1 %v6144_v42  ;;  %v6136_v36 = vor.u32 %v7679_v61, %v6133_v62  ;;  %v7662_v42 = vld [vmem:[#allocation2 + $0x30] sm:$0xf] }
 0x473   :  { %v6064_v56 = vor.u32 %v7662_v42, %v6061_v44  ;;  %v8522_v42 = vld [vmem:[#allocation7 + $0x158] sm:$0xff]  ;;  %v8530_v44 = vld [vmem:[#allocation7 + $0x148] sm:$0xff] }
 0x474   :  { %1561 = vmatpush.bf16.msrb.mxu3 %v6136_v36  ;;  %1523 = vmatpush.bf16.msrb.mxu0 %v6060_v43  ;;  %v8527_v43 = vld [vmem:[#allocation7 + $0x150] sm:$0xff] }
 0x476   :  { %1533 = vmatpush.bf16.msrb.mxu1 %v6128_v60 }
 0x479   :  { %6055 = vmatmul.msk.f32.gmra.mxu1 %vm1214_vm14, %v1210_v3  ;;  %v7674_v3 = vld [vmem:[#allocation2 + $0x570] sm:$0xf] }
 0x481   :  { %6056 = vmatmul.msk.f32.gmra.mxu1 %vm1214_vm14, %v1211_v5  ;;  %v6112_v5 = vor.u32 %v7674_v3, %v6109_v19 }
 0x483   :  { %1534 = vmatpush.bf16.msrb.mxu1 %v6112_v5 }
 0x487   :  { %1535 = vmatpush.bf16.msrb.mxu1 %v6096_v39 }
 0x48b   :  { %1536 = vmatpush.bf16.msrb.mxu1 %v6080_v26 }
 0x48f   :  { %1537 = vmatpush.bf16.msrb.mxu1 %v6064_v56  ;;  %v8545_v56 = vld [vmem:[#allocation7 + $0x120] sm:$0xff] }
 0x4e6   :  { %v1244_v8 = vpop.f32.mrf.mxu1 }
 0x4e7   :  { %1272 = vmatmul.f32.vlgmr.msra.gmra.mxu3 %v1244_v8  ;;  %v7675_v8 = vld [vmem:[#allocation2 + $0x578] sm:$0xf] }
 0x4ee   :  { %v1247_v9 = vpop.f32.mrf.mxu1 }
 0x4ef   :  { %1275 = vmatmul.f32.gmra.mxu3 %v1247_v9  ;;  %v6117_v9 = vld [vmem:[#allocation2 + $0x654] sm:$0xf0] }
 0x4f0   :  { %v6120_v13 = vor.u32 %v7675_v8, %v6117_v9 }
 0x4f2   :  { %1562 = vmatpush.bf16.msrb.mxu3 %v6120_v13 }
 0x4f6   :  { %v1250_v11 = vpop.f32.mrf.mxu1  ;;  %1563 = vmatpush.bf16.msrb.mxu3 %v6104_v51 }
 0x4f7   :  { %1278 = vmatmul.f32.gmra.mxu3 %v1250_v11 }
 0x4fe   :  { %v1253_v12 = vpop.f32.mrf.mxu1 }
 0x4ff   :  { %1281 = vmatmul.f32.gmra.mxu3 %v1253_v12  ;;  %v6116_v12 = vor.u32 %v7677_v7, %v6115_v4 }
 0x501   :  { %1548 = vmatpush.bf16.msrb.mxu2 %v6116_v12 }
 0x505   :  { %1549 = vmatpush.bf16.msrb.mxu2 %v6100_v18 }
 0x509   :  { %1550 = vmatpush.bf16.msrb.mxu2 %v6084_v37  ;;  %v8511_v37 = vld [vmem:[#allocation7 + $0x170] sm:$0xff] }
 0x50d   :  { %1551 = vmatpush.bf16.msrb.mxu2 %v6068_v45  ;;  %v8548_v45 = vld [vmem:[#allocation7 + $0x118] sm:$0xff] }
 0x56a   :  { %v1273_v33 = vpop.f32.mrf.mxu3 }
 0x56b   :  { %v8492_v11 = vmul.f32 0.015625, %v1273_v33  ;;  %v7667_v33 = vld [vmem:[#allocation2 + $0x1f8] sm:$0xf] }
 0x56c   :  { %v6088_v38 = vor.u32 %v7667_v33, %v6085_v34  ;;  %v8504_v33 = vld [vmem:[#allocation9 + $0x80] sm:$0xff]  ;;  %v8506_v34 = vld [vmem:[#allocation7 + $0x178] sm:$0xff] }
 0x56d   :  { %v1289_v27 = vmul.f32 %v8492_v11, %v8492_v11  ;;  %v1295_v14 = vsub.f32 %v8478_v49, %v8492_v11 }
 0x56e   :  { %1564 = vmatpush.bf16.msrb.mxu3 %v6088_v38  ;;  %v8514_v38 = vld [vmem:[#allocation7 + $0x168] sm:$0xff] }
 0x572   :  { %v1276_v63 = vpop.f32.mrf.mxu3  ;;  %1565 = vmatpush.bf16.msrb.mxu3 %v6072_v58  ;;  %v8558_v58 = vld [vmem:[#allocation7 + $0x100] sm:$0xff] }
 0x573   :  { %v1286_v55 = vmul.f32 0.015625, %v1276_v63 }
 0x575   :  { %v1290_v46 = vmul.f32 %v1286_v55, %v1286_v55  ;;  %v1296_v16 = vsub.f32 %v8480_v53, %v1286_v55  ;;  %v8539_v55 = vld [vmem:[#allocation7 + $0x130] sm:$0xff] }
 0x57a   :  { %v1279_v6 = vpop.f32.mrf.mxu3 }
 0x57b   :  { %v1287_v28 = vmul.f32 0.015625, %v1279_v6 }
 0x57d   :  { %v1291_v35 = vsub.f32 %v1287_v28, %v1289_v27 }
 0x57f   :  { %v1293_v40 = vmax.f32 %v1291_v35, 0.0 }
 0x581   :  { %v1297_v59 = vadd.f32 1e-05, %v1293_v40  ;;  %v8542_v40 = vld [vmem:[#allocation7 + $0x128] sm:$0xff] }
 0x582   :  { %v1282_v60 = vpop.f32.mrf.mxu3 }
 0x583   :  { %8064 = vrsqrt.f32 %v1297_v59  ;;  %v1288_v61 = vmul.f32 0.015625, %v1282_v60  ;;  %vm1305_vm2 = vweird.f32 %v1297_v59 }
 0x585   :  { %v1292_v62 = vsub.f32 %v1288_v61, %v1290_v46  ;;  %v6274_v46 = vld [vmem:[#allocation2 + $0xc7c] sm:$0xf] }
 0x586   :  { %v7716_v61 = vld [vmem:[#allocation2 + $0xd58] sm:$0xf0] }
 0x587   :  { %v1294_v36 = vmax.f32 %v1292_v62, 0.0  ;;  %v7715_v62 = vld [vmem:[#allocation2 + $0xc80] sm:$0xf] }
 0x589   :  { %v8065_v63 = vpop.eup %8064  ;;  %v1298_v0 = vadd.f32 1e-05, %v1294_v36  ;;  %v6275_v36 = vor.u32 %v7716_v61, %v6274_v46  ;;  %v6214_v46 = vld [vmem:[#allocation2 + $0x3bc] sm:$0xf] }
 0x58a   :  { %v1300_v1 = vmul.f32 %v8065_v63, %v1297_v59  ;;  %vm1306_vm15 = vweird.f32 %v8065_v63  ;;  %v7701_v61 = vld [vmem:[#allocation2 + $0x498] sm:$0xf0] }
 0x58b   :  { %8066 = vrsqrt.f32 %v1298_v0  ;;  %vm1307_vm3 = vmor %vm1305_vm2, %vm1306_vm15  ;;  %vm1315_vm5 = vweird.f32 %v1298_v0  ;;  %1850 = vmatpush.bf16.msra.mxu3 %v6275_v36  ;;  %v6215_v36 = vor.u32 %v7701_v61, %v6214_v46 }
 0x58c   :  { %v1301_v3 = vmul.f32 %v8065_v63, %v1300_v1  ;;  %v7717_v1 = vld [vmem:[#allocation2 + $0xd60] sm:$0xf0] }
 0x58e   :  { %v1302_v52 = vmul.f32 0.5, %v1301_v3 }
 0x590   :  { %v1303_v19 = vsub.f32 1.5, %v1302_v52 }
 0x591   :  { %v8067_v4 = vpop.eup %8066 }
 0x592   :  { %v1310_v5 = vmul.f32 %v8067_v4, %v1298_v0  ;;  %v1304_v7 = vmul.f32 %v8065_v63, %v1303_v19  ;;  %vm1316_vm4 = vweird.f32 %v8067_v4  ;;  %v6282_v0 = vld [vmem:[#allocation2 + $0xc84] sm:$0xf]  ;;  %v6262_v19 = vld [vmem:[#allocation2 + $0xabc] sm:$0xf] }
 0x593   :  { %vm1317_vm6 = vmor %vm1315_vm5, %vm1316_vm4  ;;  %v6283_v52 = vor.u32 %v7717_v1, %v6282_v0  ;;  %v6222_v0 = vld [vmem:[#allocation2 + $0x3c4] sm:$0xf] }
 0x594   :  { %v1311_v8 = vmul.f32 %v8067_v4, %v1310_v5  ;;  %v1308_v13 = vsel %vm1307_vm3, %v8065_v63, %v1304_v7  ;;  %v6276_v63 = vld [vmem:[#allocation2 + $0xd5c] sm:$0xf0]  ;;  %v7702_v1 = vld [vmem:[#allocation2 + $0x4a0] sm:$0xf0] }
 0x595   :  { %v1319_v57 = vmul.f32 %v1308_v13, %v1295_v14  ;;  %v6279_v3 = vor.u32 %v7715_v62, %v6276_v63  ;;  %1876 = vmatpush.bf16.msra.mxu1 %v6283_v52  ;;  %v7712_v5 = vld [vmem:[#allocation2 + $0xac0] sm:$0xf]  ;;  %v6223_v52 = vor.u32 %v7702_v1, %v6222_v0 }
 0x596   :  { %v1312_v9 = vmul.f32 0.5, %v1311_v8  ;;  %v6264_v8 = vld [vmem:[#allocation2 + $0xb9c] sm:$0xf0] }
 0x597   :  { %v1321_v50 = vmax.f32 %v1319_v57, 0.0  ;;  %v6267_v13 = vor.u32 %v7712_v5, %v6264_v8  ;;  %v7709_v57 = vld [vmem:[#allocation2 + $0x900] sm:$0xf] }
 0x598   :  { %v1313_v12 = vsub.f32 1.5, %v1312_v9  ;;  %v6270_v9 = vld [vmem:[#allocation2 + $0xac4] sm:$0xf]  ;;  %v7700_v62 = vld [vmem:[#allocation2 + $0x3c0] sm:$0xf] }
 0x599   :  { %v6216_v63 = vld [vmem:[#allocation2 + $0x49c] sm:$0xf0] }
 0x59a   :  { %v1314_v15 = vmul.f32 %v8067_v4, %v1313_v12  ;;  %v7714_v12 = vld [vmem:[#allocation2 + $0xba0] sm:$0xf0]  ;;  %v7697_v5 = vld [vmem:[#allocation2 + $0x200] sm:$0xf] }
 0x59b   :  { %v6271_v14 = vor.u32 %v7714_v12, %v6270_v9  ;;  %v6204_v9 = vld [vmem:[#allocation2 + $0x2dc] sm:$0xf0]  ;;  %v6210_v12 = vld [vmem:[#allocation2 + $0x204] sm:$0xf] }
 0x59c   :  { %v1318_v10 = vsel %vm1317_vm6, %v8067_v4, %v1314_v15  ;;  %v7713_v4 = vld [vmem:[#allocation2 + $0xb98] sm:$0xf0] }
 0x59d   :  { %v1320_v17 = vmul.f32 %v1318_v10, %v1296_v16  ;;  %v6263_v7 = vor.u32 %v7713_v4, %v6262_v19  ;;  %1877 = vmatpush.bf16.msra.mxu1 %v6271_v14  ;;  %v6250_v15 = vld [vmem:[#allocation2 + $0x8fc] sm:$0xf]  ;;  %v6207_v14 = vor.u32 %v7697_v5, %v6204_v9 }
 0x59e   :  { %v7710_v16 = vld [vmem:[#allocation2 + $0x9d8] sm:$0xf0] }
 0x59f   :  { %v1322_v39 = vmax.f32 %v1320_v17, 0.0  ;;  %1851 = vmatpush.bf16.msra.mxu3 %v6263_v7  ;;  %v6251_v10 = vor.u32 %v7710_v16, %v6250_v15  ;;  %v6252_v17 = vld [vmem:[#allocation2 + $0x9dc] sm:$0xf0]  ;;  %v6202_v19 = vld [vmem:[#allocation2 + $0x1fc] sm:$0xf] }
 0x5a0   :  { %v7698_v4 = vld [vmem:[#allocation2 + $0x2d8] sm:$0xf0] }
 0x5a1   :  { %v1323_v18 = vpack.c.bf16 %v1322_v39, %v1321_v50  ;;  %v6258_v50 = vld [vmem:[#allocation2 + $0x904] sm:$0xf]  ;;  %v6203_v8 = vor.u32 %v7698_v4, %v6202_v19  ;;  %v6190_v16 = vld [vmem:[#allocation2 + $0x3c] sm:$0xf]  ;;  %v8041_v4 = vld [vmem:[#allocation6 + $0x3] ss:$0 sm:$0xff] }
 0x5a2   :  { %v7711_v39 = vld [vmem:[#allocation2 + $0x9e0] sm:$0xf0] }
 0x5a3   :  { %1524 = vmatmul.bf16.vlgmr.msrb.gmra.mxu0 %v1323_v18  ;;  %1538 = vmatmul.bf16.vlgmr.msrb.gmra.mxu1 %v1323_v18 }
 0x5a4   :  { %1552 = vmatmul.bf16.vlgmr.msrb.gmra.mxu2 %v1323_v18  ;;  %1566 = vmatmul.bf16.vlgmr.msrb.gmra.mxu3 %v1323_v18  ;;  %v6255_v18 = vor.u32 %v7709_v57, %v6252_v17  ;;  %v7695_v57 = vld [vmem:[#allocation2 + $0x118] sm:$0xf0]  ;;  %v7694_v17 = vld [vmem:[#allocation2 + $0x40] sm:$0xf] }
 0x5a5   :  { %1852 = vmatpush.bf16.msra.mxu3 %v6251_v10  ;;  %v6191_v10 = vor.u32 %v7695_v57, %v6190_v16  ;;  %v7739_v16 = vld [vmem:[#allocation2 + $0xc8c] sm:$0xf] }
 0x620   :  { %v1539_v51 = vpop.f32.mrf.mxu1  ;;  %v1525_v6 = vpop.f32.mrf.mxu0 }
 0x627   :  { %v1553_v20 = vpop.f32.mrf.mxu2  ;;  %v1567_v21 = vpop.f32.mrf.mxu3 }
 0x628   :  { %v1541_v23 = vpop.f32.mrf.mxu1  ;;  %v1527_v27 = vpop.f32.mrf.mxu0 }
 0x629   :  { %v1575_v25 = vpack.c.bf16 %v1541_v23, %v1539_v51  ;;  %v1574_v28 = vpack.c.bf16 %v1527_v27, %v1525_v6  ;;  %v7707_v51 = vld [vmem:[#allocation2 + $0x818] sm:$0xf0]  ;;  %v7706_v6 = vld [vmem:[#allocation2 + $0x740] sm:$0xf] }
 0x62a   :  { %v6226_v27 = vld [vmem:[#allocation2 + $0x57c] sm:$0xf] }
 0x62f   :  { %v1569_v49 = vpop.f32.mrf.mxu3  ;;  %v1555_v22 = vpop.f32.mrf.mxu2 }
 0x630   :  { %v1577_v11 = vpack.c.bf16 %v1569_v49, %v1567_v21  ;;  %v1576_v53 = vpack.c.bf16 %v1555_v22, %v1553_v20  ;;  %v6259_v20 = vor.u32 %v7711_v39, %v6258_v50  ;;  %v6238_v21 = vld [vmem:[#allocation2 + $0x73c] sm:$0xf]  ;;  %v6246_v22 = vld [vmem:[#allocation2 + $0x744] sm:$0xf]  ;;  %v6192_v50 = vld [vmem:[#allocation2 + $0x11c] sm:$0xf0] }
 0x631   :  { %v6239_v49 = vor.u32 %v7707_v51, %v6238_v21  ;;  %v6198_v39 = vld [vmem:[#allocation2 + $0x44] sm:$0xf] }
 0x632   :  { %1587 = vmatpush.bf16.msra.mxu0 %v1577_v11  ;;  %1878 = vmatpush.bf16.msra.mxu1 %v6259_v20  ;;  %v6240_v11 = vld [vmem:[#allocation2 + $0x81c] sm:$0xf0]  ;;  %v7696_v20 = vld [vmem:[#allocation2 + $0x120] sm:$0xf0] }
 0x633   :  { %v6243_v23 = vor.u32 %v7706_v6, %v6240_v11  ;;  %1853 = vmatpush.bf16.msra.mxu3 %v6239_v49  ;;  %v6199_v21 = vor.u32 %v7696_v20, %v6198_v39  ;;  %v6361_v20 = vld [vmem:[#allocation2 + $0xac8] sm:$0xf] }
 0x636   :  { %1588 = vmatpush.bf16.msra.mxu0 %v1576_v53  ;;  %v7708_v53 = vld [vmem:[#allocation2 + $0x820] sm:$0xf0] }
 0x63a   :  { %1589 = vmatpush.bf16.msra.mxu0 %v1575_v25  ;;  %v6247_v25 = vor.u32 %v7708_v53, %v6246_v22 }
 0x63c   :  { %1879 = vmatpush.bf16.msra.mxu1 %v6247_v25 }
 0x63e   :  { %1590 = vmatpush.bf16.msra.mxu0 %v1574_v28  ;;  %v7704_v28 = vld [vmem:[#allocation2 + $0x658] sm:$0xf0] }
 0x641   :  { %6185 = vmatmul.msk.bf16.vlgmr.msra.gmra.mxu0 %vm704_vm1, %v1573_v29  ;;  %v7703_v29 = vld [vmem:[#allocation2 + $0x580] sm:$0xf] }
 0x642   :  { %1863 = vmatpush.bf16.msrb.mxu0 %v6279_v3  ;;  %v6219_v3 = vor.u32 %v7700_v62, %v6216_v63 }
 0x646   :  { %1864 = vmatpush.bf16.msrb.mxu0 %v6267_v13  ;;  %v7699_v13 = vld [vmem:[#allocation2 + $0x2e0] sm:$0xf0] }
 0x647   :  { %v6211_v15 = vor.u32 %v7699_v13, %v6210_v12 }
 0x64a   :  { %1865 = vmatpush.bf16.msrb.mxu0 %v6255_v18  ;;  %v6195_v18 = vor.u32 %v7694_v17, %v6192_v50  ;;  %v6381_v17 = vld [vmem:[#allocation2 + $0xc90] sm:$0xf] }
 0x64b   :  { %v7741_v50 = vld [vmem:[#allocation2 + $0xd6c] sm:$0xf0] }
 0x64e   :  { %1866 = vmatpush.bf16.msrb.mxu0 %v6243_v23 }
 0x6be   :  { %v1592_v31 = vpop.f32.mrf.mxu0 }
 0x6bf   :  { %v8500_v26 = vadd.f32 %v8040_v30, %v1592_v31  ;;  %v6227_v30 = vor.u32 %v7704_v28, %v6226_v27  ;;  %v6228_v31 = vld [vmem:[#allocation2 + $0x65c] sm:$0xf0] }
 0x6c1   :  { %v1616_v32 = vmul.f32 %v8500_v26, %v8500_v26  ;;  %1854 = vmatpush.bf16.msra.mxu3 %v6227_v30 }
 0x6c3   :  { %1638 = vmatpush.msra.mxu2 %v1616_v32  ;;  %v6234_v32 = vld [vmem:[#allocation2 + $0x584] sm:$0xf] }
 0x6c5   :  { %1639 = vmatpush.msra.mxu2 %v8500_v26  ;;  %1855 = vmatpush.bf16.msra.mxu3 %v6215_v36 }
 0x6c6   :  { %6186 = vmatmul.msk.f32.vlgmr.msra.gmra.mxu2 %vm1617_vm7, %v8504_v33  ;;  %v1594_v35 = vpop.f32.mrf.mxu0 }
 0x6c7   :  { %1647 = vmatpush.msrb.mxu2 %v8506_v34  ;;  %v7705_v35 = vld [vmem:[#allocation2 + $0x660] sm:$0xf0] }
 0x6c9   :  { %1648 = vmatpush.msrb.mxu2 %v8511_v37  ;;  %1856 = vmatpush.bf16.msra.mxu3 %v6203_v8 }
 0x6cb   :  { %1649 = vmatpush.msrb.mxu2 %v8514_v38 }
 0x6cd   :  { %1650 = vmatpush.msrb.mxu2 %v8517_v41  ;;  %1857 = vmatpush.bf16.msra.mxu3 %v6191_v10  ;;  %v6375_v10 = vld [vmem:[#allocation2 + $0xd68] sm:$0xf0] }
 0x6ce   :  { %6187 = vmatmul.msk.f32.gmra.mxu2 %vm1617_vm7, %v8519_v24  ;;  %v6378_v39 = vor.u32 %v7739_v16, %v6375_v10  ;;  %v7725_v16 = vld [vmem:[#allocation2 + $0x4a4] sm:$0xf0] }
 0x6cf   :  { %1651 = vmatpush.msrb.mxu2 %v8522_v42 }
 0x6d1   :  { %1652 = vmatpush.msrb.mxu2 %v8527_v43 }
 0x6d3   :  { %1653 = vmatpush.msrb.mxu2 %v8530_v44 }
 0x6d5   :  { %1654 = vmatpush.msrb.mxu2 %v8533_v47 }
 0x6d7   :  { %1655 = vmatpush.msrb.mxu2 %v8536_v48 }
 0x6d9   :  { %1656 = vmatpush.msrb.mxu2 %v8539_v55 }
 0x6db   :  { %1657 = vmatpush.msrb.mxu2 %v8542_v40 }
 0x6dd   :  { %1658 = vmatpush.msrb.mxu2 %v8545_v56 }
 0x6df   :  { %1659 = vmatpush.msrb.mxu2 %v8548_v45 }
 0x6e1   :  { %1660 = vmatpush.msrb.mxu2 %v8551_v54 }
 0x6e3   :  { %1661 = vmatpush.msrb.mxu2 %v8554_v2 }
 0x6e5   :  { %1662 = vmatpush.msrb.mxu2 %v8558_v58 }
 0x749   :  { %v1641_v59 = vpop.f32.mrf.mxu2 }
 0x74a   :  { %1663 = vmatmul.f32.vlgmr.msrb.gmra.mxu2 %v1641_v59  ;;  %v6231_v59 = vor.u32 %v7703_v29, %v6228_v31 }
 0x74c   :  { %1867 = vmatpush.bf16.msrb.mxu0 %v6231_v59 }
 0x750   :  { %1868 = vmatpush.bf16.msrb.mxu0 %v6219_v3 }
 0x751   :  { %v1644_v60 = vpop.f32.mrf.mxu2 }
 0x752   :  { %1666 = vmatmul.f32.gmra.mxu2 %v1644_v60  ;;  %v6235_v60 = vor.u32 %v7705_v35, %v6234_v32 }
 0x754   :  { %1880 = vmatpush.bf16.msra.mxu1 %v6235_v60  ;;  %1869 = vmatpush.bf16.msrb.mxu0 %v6207_v14  ;;  %v6373_v14 = vld [vmem:[#allocation2 + $0xc88] sm:$0xf] }
 0x758   :  { %1881 = vmatpush.bf16.msra.mxu1 %v6223_v52  ;;  %1870 = vmatpush.bf16.msrb.mxu0 %v6195_v18  ;;  %v1890_v52 = vld [vmem:[#allocation4 + $0x60] sm:$0xff]  ;;  %v6382_v18 = vor.u32 %v7741_v50, %v6381_v17  ;;  %v6315_v17 = vld [vmem:[#allocation2 + $0x4a8] sm:$0xf0]  ;;  %v6321_v50 = vld [vmem:[#allocation2 + $0x3d0] sm:$0xf] }
 0x75c   :  { %1882 = vmatpush.bf16.msra.mxu1 %v6211_v15  ;;  %1940 = vmatpush.msra.mxu0 %v8506_v34  ;;  %v7740_v15 = vld [vmem:[#allocation2 + $0xd64] sm:$0xf0] }
 0x75d   :  { %v6374_v57 = vor.u32 %v7740_v15, %v6373_v14  ;;  %v6313_v15 = vld [vmem:[#allocation2 + $0x3c8] sm:$0xf] }
 0x75e   :  { %1941 = vmatpush.msra.mxu0 %v8511_v37  ;;  %v6314_v10 = vor.u32 %v7725_v16, %v6313_v15 }
 0x760   :  { %1883 = vmatpush.bf16.msra.mxu1 %v6199_v21  ;;  %1942 = vmatpush.msra.mxu0 %v8514_v38  ;;  %v7737_v21 = vld [vmem:[#allocation2 + $0xba4] sm:$0xf0] }
 0x762   :  { %1943 = vmatpush.msra.mxu0 %v8517_v41 }
 0x764   :  { %1944 = vmatpush.msra.mxu0 %v8522_v42  ;;  %2143 = vmatpush.bf16.msrb.mxu1 %v6374_v57  ;;  %v7724_v57 = vld [vmem:[#allocation2 + $0x3cc] sm:$0xf] }
 0x766   :  { %1945 = vmatpush.msra.mxu0 %v8527_v43 }
 0x768   :  { %1946 = vmatpush.msra.mxu0 %v8530_v44 }
 0x76a   :  { %1947 = vmatpush.msra.mxu0 %v8533_v47 }
 0x76c   :  { %1948 = vmatpush.msra.mxu0 %v8536_v48 }
 0x76e   :  { %1949 = vmatpush.msra.mxu0 %v8539_v55 }
 0x770   :  { %1950 = vmatpush.msra.mxu0 %v8542_v40 }
 0x772   :  { %1951 = vmatpush.msra.mxu0 %v8545_v56 }
 0x774   :  { %1952 = vmatpush.msra.mxu0 %v8548_v45 }
 0x776   :  { %1953 = vmatpush.msra.mxu0 %v8551_v54 }
 0x778   :  { %1954 = vmatpush.msra.mxu0 %v8554_v2 }
 0x77a   :  { %1955 = vmatpush.msra.mxu0 %v8558_v58 }
 0x7cd   :  { %v1664_v7 = vpop.f32.mrf.mxu2 }
 0x7ce   :  { %v1670_v51 = vmul.f32 0.0625, %v1664_v7 }
 0x7d0   :  { %v1672_v49 = vmul.f32 %v1670_v51, %v1670_v51  ;;  %v1675_v32 = vsub.f32 %v8500_v26, %v1670_v51  ;;  %v7736_v51 = vld [vmem:[#allocation2 + $0xacc] sm:$0xf] }
 0x7d5   :  { %v1667_v6 = vpop.f32.mrf.mxu2 }
 0x7d6   :  { %v1671_v11 = vmul.f32 0.0625, %v1667_v6  ;;  %v6362_v6 = vor.u32 %v7737_v21, %v6361_v20 }
 0x7d8   :  { %v1673_v22 = vsub.f32 %v1671_v11, %v1672_v49  ;;  %v6363_v49 = vld [vmem:[#allocation2 + $0xba8] sm:$0xf0]  ;;  %v6369_v11 = vld [vmem:[#allocation2 + $0xad0] sm:$0xf]  ;;  %2144 = vmatpush.bf16.msrb.mxu1 %v6362_v6  ;;  %v7722_v6 = vld [vmem:[#allocation2 + $0x2e4] sm:$0xf0] }
 0x7da   :  { %v1674_v53 = vmax.f32 %v1673_v22, 0.0  ;;  %v7738_v22 = vld [vmem:[#allocation2 + $0xbac] sm:$0xf0] }
 0x7dc   :  { %v1676_v23 = vadd.f32 1e-05, %v1674_v53  ;;  %v6366_v53 = vor.u32 %v7736_v51, %v6363_v49  ;;  %v6301_v51 = vld [vmem:[#allocation2 + $0x208] sm:$0xf]  ;;  %v7721_v49 = vld [vmem:[#allocation2 + $0x20c] sm:$0xf] }
 0x7de   :  { %8068 = vrsqrt.f32 %v1676_v23  ;;  %vm1683_vm9 = vweird.f32 %v1676_v23 }
 0x7e4   :  { %v8069_v25 = vpop.eup %8068 }
 0x7e5   :  { %v1678_v27 = vmul.f32 %v8069_v25, %v1676_v23  ;;  %vm1684_vm8 = vweird.f32 %v8069_v25  ;;  %v6370_v23 = vor.u32 %v7738_v22, %v6369_v11  ;;  %v6302_v11 = vor.u32 %v7722_v6, %v6301_v51  ;;  %v6303_v22 = vld [vmem:[#allocation2 + $0x2e8] sm:$0xf0]  ;;  %v2183_v51 = vld [vmem:[#allocation4 + $0x80] sm:$0xff] }
 0x7e6   :  { %vm1685_vm10 = vmor %vm1683_vm9, %vm1684_vm8  ;;  %v8042_v6 = vld [vmem:[#allocation6 + $0x4] ss:$0 sm:$0xff] }
 0x7e7   :  { %v1679_v28 = vmul.f32 %v8069_v25, %v1678_v27  ;;  %v7734_v27 = vld [vmem:[#allocation2 + $0x9e4] sm:$0xf0] }
 0x7e9   :  { %v1680_v29 = vmul.f32 0.5, %v1679_v28  ;;  %v7733_v28 = vld [vmem:[#allocation2 + $0x90c] sm:$0xf] }
 0x7eb   :  { %v1681_v30 = vsub.f32 1.5, %v1680_v29 }
 0x7ed   :  { %v1682_v31 = vmul.f32 %v8069_v25, %v1681_v30  ;;  %v6351_v30 = vld [vmem:[#allocation2 + $0x9e8] sm:$0xf0] }
 0x7ef   :  { %v1686_v35 = vsel %vm1685_vm10, %v8069_v25, %v1682_v31  ;;  %v6349_v25 = vld [vmem:[#allocation2 + $0x908] sm:$0xf]  ;;  %v6357_v31 = vld [vmem:[#allocation2 + $0x910] sm:$0xf] }
 0x7f0   :  { %v1687_v59 = vmul.f32 %v1686_v35, %v1675_v32  ;;  %v6350_v29 = vor.u32 %v7734_v27, %v6349_v25  ;;  %v7735_v32 = vld [vmem:[#allocation2 + $0x9ec] sm:$0xf0]  ;;  %v6354_v35 = vor.u32 %v7733_v28, %v6351_v30  ;;  %v6289_v27 = vld [vmem:[#allocation2 + $0x48] sm:$0xf] }
 0x7f1   :  { %v7723_v25 = vld [vmem:[#allocation2 + $0x2ec] sm:$0xf0]  ;;  %v7719_v28 = vld [vmem:[#allocation2 + $0x124] sm:$0xf0] }
 0x7f2   :  { %v8577_v60 = vmax.f32 %v1687_v59, 0.0  ;;  %v6358_v59 = vor.u32 %v7735_v32, %v6357_v31  ;;  %2145 = vmatpush.bf16.msrb.mxu1 %v6350_v29  ;;  %v6290_v30 = vor.u32 %v7719_v28, %v6289_v27  ;;  %v7718_v31 = vld [vmem:[#allocation2 + $0x4c] sm:$0xf]  ;;  %v6472_v27 = vld [vmem:[#allocation2 + $0xc94] sm:$0xf] }
 0x7f3   :  { %v6291_v32 = vld [vmem:[#allocation2 + $0x128] sm:$0xf0]  ;;  %v7764_v28 = vld [vmem:[#allocation2 + $0xd70] sm:$0xf0] }
 0x7f4   :  { %v1689_v46 = vpack.c.bf16 %v8577_v60, %v8577_v60 }
 0x7f6   :  { %1858 = vmatmul.bf16.vlgmr.msra.gmra.mxu3 %v1689_v46  ;;  %1871 = vmatmul.bf16.vlgmr.msrb.gmra.mxu0 %v1689_v46 }
 0x7f7   :  { %1884 = vmatmul.bf16.vlgmr.msra.gmra.mxu1 %v1689_v46  ;;  %v6337_v46 = vld [vmem:[#allocation2 + $0x748] sm:$0xf] }
 0x873   :  { %v1872_v61 = vpop.f32.mrf.mxu0 }
 0x874   :  { %v1885_v62 = vpop.f32.mrf.mxu1 }
 0x875   :  { %v1892_v26 = vpack.c.bf16 %v1885_v62, %v1885_v62  ;;  %v7730_v62 = vld [vmem:[#allocation2 + $0x74c] sm:$0xf] }
 0x877   :  { %v1901_v36 = vsel %vm1899_vm11, %v1892_v26, 0 }
 0x878   :  { %1909 = vmatpush.bf16.msra.mxu2 %v1901_v36  ;;  %v6339_v36 = vld [vmem:[#allocation2 + $0x828] sm:$0xf0] }
 0x879   :  { %v1859_v63 = vpop.f32.mrf.mxu3 }
 0x87a   :  { %v1891_v0 = vpack.c.bf16 %v1872_v61, %v1859_v63  ;;  %v7731_v61 = vld [vmem:[#allocation2 + $0x824] sm:$0xf0]  ;;  %v6345_v63 = vld [vmem:[#allocation2 + $0x750] sm:$0xf] }
 0x87b   :  { %v1874_v1 = vpop.f32.mrf.mxu0  ;;  %v6338_v26 = vor.u32 %v7731_v61, %v6337_v46  ;;  %v7720_v46 = vld [vmem:[#allocation2 + $0x12c] sm:$0xf0] }
 0x87c   :  { %v1887_v3 = vpop.f32.mrf.mxu1  ;;  %1910 = vmatpush.bf16.msra.mxu2 %v1891_v0  ;;  %v7732_v0 = vld [vmem:[#allocation2 + $0x82c] sm:$0xf0]  ;;  %v6342_v1 = vor.u32 %v7730_v62, %v6339_v36 }
 0x87d   :  { %v6346_v3 = vor.u32 %v7732_v0, %v6345_v63  ;;  %2146 = vmatpush.bf16.msrb.mxu1 %v6338_v26 }
 0x87f   :  { %6284 = vmatmul.msk.bf16.vlgmr.msra.gmra.mxu2 %vm1895_vm12, %v1890_v52  ;;  %v6325_v52 = vld [vmem:[#allocation2 + $0x588] sm:$0xf] }
 0x880   :  { %2156 = vmatpush.bf16.msrb.mxu2 %v6378_v39  ;;  %v7726_v39 = vld [vmem:[#allocation2 + $0x4ac] sm:$0xf0] }
 0x881   :  { %v1861_v19 = vpop.f32.mrf.mxu3  ;;  %v6322_v20 = vor.u32 %v7726_v39, %v6321_v50 }
 0x882   :  { %v7728_v19 = vld [vmem:[#allocation2 + $0x664] sm:$0xf0] }
 0x884   :  { %2157 = vmatpush.bf16.msrb.mxu2 %v6366_v53  ;;  %v6309_v53 = vld [vmem:[#allocation2 + $0x210] sm:$0xf] }
 0x885   :  { %v6310_v29 = vor.u32 %v7723_v25, %v6309_v53 }
 0x888   :  { %2158 = vmatpush.bf16.msrb.mxu2 %v6354_v35  ;;  %v6297_v35 = vld [vmem:[#allocation2 + $0x50] sm:$0xf] }
 0x889   :  { %v6298_v62 = vor.u32 %v7720_v46, %v6297_v35  ;;  %v7765_v35 = vld [vmem:[#allocation2 + $0xd78] sm:$0xf0] }
 0x88c   :  { %2159 = vmatpush.bf16.msrb.mxu2 %v6342_v1 }
 0x902   :  { %v1912_v5 = vpop.f32.mrf.mxu2 }
 0x903   :  { %v8584_v7 = vadd.f32 %v8041_v4, %v1912_v5  ;;  %v7727_v4 = vld [vmem:[#allocation2 + $0x58c] sm:$0xf]  ;;  %v6326_v5 = vor.u32 %v7728_v19, %v6325_v52 }
 0x905   :  { %v1916_v8 = vmul.f32 %v8584_v7, %v8584_v7  ;;  %2147 = vmatpush.bf16.msrb.mxu1 %v6326_v5 }
 0x907   :  { %1931 = vmatpush.msrb.mxu3 %v1916_v8  ;;  %v6327_v8 = vld [vmem:[#allocation2 + $0x668] sm:$0xf0] }
 0x909   :  { %1932 = vmatpush.msrb.mxu3 %v8584_v7  ;;  %2148 = vmatpush.bf16.msrb.mxu1 %v6314_v10 }
 0x90a   :  { %6285 = vmatmul.msk.f32.vlgmr.msrb.gmra.mxu3 %vm1617_vm7, %v8504_v33  ;;  %v1914_v9 = vpop.f32.mrf.mxu2 }
 0x90b   :  { %2169 = vmatpush.bf16.msra.mxu3 %v6382_v18  ;;  %v6333_v9 = vld [vmem:[#allocation2 + $0x590] sm:$0xf]  ;;  %v6318_v18 = vor.u32 %v7724_v57, %v6315_v17 }
 0x90d   :  { %2149 = vmatpush.bf16.msrb.mxu1 %v6302_v11 }
 0x90f   :  { %2170 = vmatpush.bf16.msra.mxu3 %v6370_v23  ;;  %v6306_v23 = vor.u32 %v7721_v49, %v6303_v22 }
 0x911   :  { %2150 = vmatpush.bf16.msrb.mxu1 %v6290_v30  ;;  %v6473_v30 = vor.u32 %v7764_v28, %v6472_v27  ;;  %v7749_v27 = vld [vmem:[#allocation2 + $0x4b0] sm:$0xf0]  ;;  %v7748_v28 = vld [vmem:[#allocation2 + $0x3d8] sm:$0xf] }
 0x912   :  { %6286 = vmatmul.msk.f32.gmra.mxu3 %vm1617_vm7, %v8519_v24 }
 0x913   :  { %2171 = vmatpush.bf16.msra.mxu3 %v6358_v59  ;;  %v6294_v59 = vor.u32 %v7718_v31, %v6291_v32  ;;  %v6474_v31 = vld [vmem:[#allocation2 + $0xd74] sm:$0xf0]  ;;  %v6480_v32 = vld [vmem:[#allocation2 + $0xc9c] sm:$0xf] }
 0x914   :  { %v6481_v46 = vor.u32 %v7765_v35, %v6480_v32  ;;  %v7750_v32 = vld [vmem:[#allocation2 + $0x4b8] sm:$0xf0] }
 0x917   :  { %2172 = vmatpush.bf16.msra.mxu3 %v6346_v3 }
 0x98d   :  { %v1934_v12 = vpop.f32.mrf.mxu3 }
 0x98e   :  { %1956 = vmatmul.f32.vlgmr.msra.gmra.mxu0 %v1934_v12  ;;  %v7729_v12 = vld [vmem:[#allocation2 + $0x66c] sm:$0xf0] }
 0x98f   :  { %v6334_v14 = vor.u32 %v7729_v12, %v6333_v9 }
 0x991   :  { %2173 = vmatpush.bf16.msra.mxu3 %v6334_v14 }
 0x995   :  { %v1937_v13 = vpop.f32.mrf.mxu3  ;;  %2174 = vmatpush.bf16.msra.mxu3 %v6322_v20 }
 0x996   :  { %1959 = vmatmul.f32.gmra.mxu0 %v1937_v13  ;;  %v6330_v13 = vor.u32 %v7727_v4, %v6327_v8 }
 0x998   :  { %2160 = vmatpush.bf16.msrb.mxu2 %v6330_v13 }
 0x999   :  { %2175 = vmatpush.bf16.msra.mxu3 %v6310_v29  ;;  %v7763_v29 = vld [vmem:[#allocation2 + $0xc98] sm:$0xf] }
 0x99c   :  { %2161 = vmatpush.bf16.msrb.mxu2 %v6318_v18 }
 0x99d   :  { %2176 = vmatpush.bf16.msra.mxu3 %v6298_v62  ;;  %v7760_v62 = vld [vmem:[#allocation2 + $0xad8] sm:$0xf] }
 0x9a0   :  { %2162 = vmatpush.bf16.msrb.mxu2 %v6306_v23 }
 0x9a1   :  { %2434 = vmatpush.bf16.msrb.mxu3 %v6473_v30  ;;  %v6414_v30 = vld [vmem:[#allocation2 + $0x4b4] sm:$0xf0] }
 0x9a2   :  { %v6417_v35 = vor.u32 %v7748_v28, %v6414_v30  ;;  %v7788_v28 = vld [vmem:[#allocation2 + $0xd7c] sm:$0xf0] }
 0x9a4   :  { %2163 = vmatpush.bf16.msrb.mxu2 %v6294_v59  ;;  %v6477_v59 = vor.u32 %v7763_v29, %v6474_v31  ;;  %v6420_v31 = vld [vmem:[#allocation2 + $0x3dc] sm:$0xf] }
 0x9a8   :  { %2231 = vmatpush.msra.mxu2 %v8506_v34 }
 0x9aa   :  { %2232 = vmatpush.msra.mxu2 %v8511_v37 }
 0x9ac   :  { %2233 = vmatpush.msra.mxu2 %v8514_v38 }
 0x9ae   :  { %2234 = vmatpush.msra.mxu2 %v8517_v41 }
 0x9b0   :  { %2235 = vmatpush.msra.mxu2 %v8522_v42 }
 0x9b2   :  { %2236 = vmatpush.msra.mxu2 %v8527_v43 }
 0x9b4   :  { %2237 = vmatpush.msra.mxu2 %v8530_v44 }
 0x9b6   :  { %2238 = vmatpush.msra.mxu2 %v8533_v47 }
 0x9b8   :  { %2239 = vmatpush.msra.mxu2 %v8536_v48 }
 0x9ba   :  { %2240 = vmatpush.msra.mxu2 %v8539_v55 }
 0x9bc   :  { %2241 = vmatpush.msra.mxu2 %v8542_v40 }
 0x9be   :  { %2242 = vmatpush.msra.mxu2 %v8545_v56 }
 0x9c0   :  { %2243 = vmatpush.msra.mxu2 %v8548_v45 }
 0x9c2   :  { %2244 = vmatpush.msra.mxu2 %v8551_v54 }
 0x9c4   :  { %2245 = vmatpush.msra.mxu2 %v8554_v2 }
 0x9c6   :  { %2246 = vmatpush.msra.mxu2 %v8558_v58 }
 0xa0b   :  { %v1957_v21 = vpop.f32.mrf.mxu0 }
 0xa0c   :  { %v1963_v61 = vmul.f32 0.0625, %v1957_v21 }
 0xa0e   :  { %v1965_v36 = vmul.f32 %v1963_v61, %v1963_v61  ;;  %v1968_v12 = vsub.f32 %v8584_v7, %v1963_v61  ;;  %v7761_v61 = vld [vmem:[#allocation2 + $0xbb0] sm:$0xf0] }
 0xa13   :  { %v1960_v26 = vpop.f32.mrf.mxu0 }
 0xa14   :  { %v1964_v63 = vmul.f32 0.0625, %v1960_v26  ;;  %v6462_v26 = vld [vmem:[#allocation2 + $0xbb4] sm:$0xf0] }
 0xa16   :  { %v1966_v0 = vsub.f32 %v1964_v63, %v1965_v36  ;;  %v6468_v36 = vld [vmem:[#allocation2 + $0xadc] sm:$0xf] }
 0xa17   :  { %v7762_v63 = vld [vmem:[#allocation2 + $0xbb8] sm:$0xf0] }
 0xa18   :  { %v1967_v1 = vmax.f32 %v1966_v0, 0.0  ;;  %v6465_v0 = vor.u32 %v7760_v62, %v6462_v26  ;;  %v6402_v26 = vld [vmem:[#allocation2 + $0x2f4] sm:$0xf0] }
 0xa1a   :  { %v1969_v3 = vadd.f32 1e-05, %v1967_v1  ;;  %v6469_v1 = vor.u32 %v7762_v63, %v6468_v36  ;;  %v6408_v36 = vld [vmem:[#allocation2 + $0x21c] sm:$0xf] }
 0xa1b   :  { %v7747_v63 = vld [vmem:[#allocation2 + $0x2f8] sm:$0xf0] }
 0xa1c   :  { %8070 = vrsqrt.f32 %v1969_v3  ;;  %vm1976_vm15 = vweird.f32 %v1969_v3 }
 0xa22   :  { %v8071_v52 = vpop.eup %8070 }
 0xa23   :  { %v1971_v19 = vmul.f32 %v8071_v52, %v1969_v3  ;;  %vm1977_vm13 = vweird.f32 %v8071_v52  ;;  %v6448_v3 = vld [vmem:[#allocation2 + $0x914] sm:$0xf] }
 0xa24   :  { %vm1978_vm2 = vmor %vm1976_vm15, %vm1977_vm13 }
 0xa25   :  { %v1972_v4 = vmul.f32 %v8071_v52, %v1971_v19  ;;  %v7757_v19 = vld [vmem:[#allocation2 + $0x918] sm:$0xf] }
 0xa27   :  { %v1973_v5 = vmul.f32 0.5, %v1972_v4 }
 0xa29   :  { %v1974_v8 = vsub.f32 1.5, %v1973_v5  ;;  %v6450_v5 = vld [vmem:[#allocation2 + $0x9f4] sm:$0xf0] }
 0xa2b   :  { %v1975_v9 = vmul.f32 %v8071_v52, %v1974_v8  ;;  %v6456_v8 = vld [vmem:[#allocation2 + $0x91c] sm:$0xf] }
 0xa2d   :  { %v1979_v13 = vsel %vm1978_vm2, %v8071_v52, %v1975_v9  ;;  %v7758_v52 = vld [vmem:[#allocation2 + $0x9f0] sm:$0xf0]  ;;  %v7759_v9 = vld [vmem:[#allocation2 + $0x9f8] sm:$0xf0] }
 0xa2e   :  { %v1980_v14 = vmul.f32 %v1979_v13, %v1968_v12  ;;  %v6449_v4 = vor.u32 %v7758_v52, %v6448_v3  ;;  %v6453_v12 = vor.u32 %v7757_v19, %v6450_v5  ;;  %v6457_v13 = vor.u32 %v7759_v9, %v6456_v8  ;;  %v6388_v3 = vld [vmem:[#allocation2 + $0x54] sm:$0xf]  ;;  %v7742_v19 = vld [vmem:[#allocation2 + $0x58] sm:$0xf]  ;;  %v6396_v8 = vld [vmem:[#allocation2 + $0x5c] sm:$0xf] }
 0xa2f   :  { %v7743_v52 = vld [vmem:[#allocation2 + $0x130] sm:$0xf0]  ;;  %v6390_v5 = vld [vmem:[#allocation2 + $0x134] sm:$0xf0]  ;;  %v7744_v9 = vld [vmem:[#allocation2 + $0x138] sm:$0xf0] }
 0xa30   :  { %v1981_v15 = vmax.f32 %v1980_v14, 0.0  ;;  %v6436_v14 = vld [vmem:[#allocation2 + $0x754] sm:$0xf] }
 0xa32   :  { %v1982_v16 = vpack.c.bf16 %v1981_v15, %v1981_v15  ;;  %v7755_v15 = vld [vmem:[#allocation2 + $0x830] sm:$0xf0] }
 0xa34   :  { %2151 = vmatmul.bf16.vlgmr.msrb.gmra.mxu1 %v1982_v16  ;;  %2164 = vmatmul.bf16.vlgmr.msrb.gmra.mxu2 %v1982_v16 }
 0xa35   :  { %2177 = vmatmul.bf16.vlgmr.msra.gmra.mxu3 %v1982_v16  ;;  %v7754_v16 = vld [vmem:[#allocation2 + $0x758] sm:$0xf] }
 0xab1   :  { %v2152_v57 = vpop.f32.mrf.mxu1 }
 0xab7   :  { %v2165_v10 = vpop.f32.mrf.mxu2 }
 0xab8   :  { %v2178_v17 = vpop.f32.mrf.mxu3  ;;  %v2184_v18 = vpack.c.bf16 %v2165_v10, %v2152_v57  ;;  %v6437_v57 = vor.u32 %v7755_v15, %v6436_v14  ;;  %v6438_v10 = vld [vmem:[#allocation2 + $0x834] sm:$0xf0]  ;;  %v6397_v14 = vor.u32 %v7744_v9, %v6396_v8  ;;  %v6555_v8 = vld [vmem:[#allocation2 + $0x928] sm:$0xf] }
 0xab9   :  { %v2185_v7 = vpack.c.bf16 %v2178_v17, %v2178_v17  ;;  %v2154_v50 = vpop.f32.mrf.mxu1  ;;  %v6444_v17 = vld [vmem:[#allocation2 + $0x75c] sm:$0xf]  ;;  %v7783_v9 = vld [vmem:[#allocation2 + $0xa04] sm:$0xf0] }
 0xaba   :  { %v6441_v50 = vor.u32 %v7754_v16, %v6438_v10 }
 0xabb   :  { %v2192_v39 = vsel %vm1899_vm11, %v2185_v7, 0  ;;  %v7756_v7 = vld [vmem:[#allocation2 + $0x838] sm:$0xf0] }
 0xabc   :  { %2200 = vmatpush.bf16.msrb.mxu0 %v2192_v39  ;;  %v6445_v39 = vor.u32 %v7756_v7, %v6444_v17 }
 0xabf   :  { %v2167_v20 = vpop.f32.mrf.mxu2 }
 0xac0   :  { %v2180_v21 = vpop.f32.mrf.mxu3  ;;  %2201 = vmatpush.bf16.msrb.mxu0 %v2184_v18  ;;  %v6424_v18 = vld [vmem:[#allocation2 + $0x594] sm:$0xf] }
 0xac1   :  { %v7752_v20 = vld [vmem:[#allocation2 + $0x670] sm:$0xf0]  ;;  %v7751_v21 = vld [vmem:[#allocation2 + $0x598] sm:$0xf] }
 0xac3   :  { %6383 = vmatmul.msk.bf16.vlgmr.msrb.gmra.mxu0 %vm1895_vm12, %v2183_v51  ;;  %v6425_v51 = vor.u32 %v7752_v20, %v6424_v18  ;;  %v8043_v20 = vld [vmem:[#allocation6 + $0x5] ss:$0 sm:$0xff] }
 0xac4   :  { %2447 = vmatpush.bf16.msra.mxu0 %v6477_v59  ;;  %v6421_v59 = vor.u32 %v7750_v32, %v6420_v31  ;;  %v6573_v31 = vld [vmem:[#allocation2 + $0xd80] sm:$0xf0]  ;;  %v6579_v32 = vld [vmem:[#allocation2 + $0xca8] sm:$0xf] }
 0xac8   :  { %2448 = vmatpush.bf16.msra.mxu0 %v6465_v0 }
 0xacc   :  { %2449 = vmatpush.bf16.msra.mxu0 %v6453_v12 }
 0xad0   :  { %2450 = vmatpush.bf16.msra.mxu0 %v6441_v50 }
 0xb40   :  { %v2203_v49 = vpop.f32.mrf.mxu0 }
 0xb41   :  { %v8612_v11 = vadd.f32 %v8042_v6, %v2203_v49  ;;  %v6426_v6 = vld [vmem:[#allocation2 + $0x674] sm:$0xf0]  ;;  %v6432_v49 = vld [vmem:[#allocation2 + $0x59c] sm:$0xf] }
 0xb43   :  { %v2207_v22 = vmul.f32 %v8612_v11, %v8612_v11 }
 0xb45   :  { %2222 = vmatpush.msra.mxu1 %v2207_v22  ;;  %v7753_v22 = vld [vmem:[#allocation2 + $0x678] sm:$0xf0] }
 0xb47   :  { %2223 = vmatpush.msra.mxu1 %v8612_v11 }
 0xb48   :  { %6384 = vmatmul.msk.f32.vlgmr.msra.gmra.mxu1 %vm1617_vm7, %v8504_v33  ;;  %v2205_v53 = vpop.f32.mrf.mxu0  ;;  %v6460_v33 = vld [vmem:[#allocation2 + $0xad4] sm:$0xf] }
 0xb49   :  { %2460 = vmatpush.bf16.msrb.mxu1 %v6481_v46  ;;  %v6429_v53 = vor.u32 %v7751_v21, %v6426_v6  ;;  %v6400_v46 = vld [vmem:[#allocation2 + $0x214] sm:$0xf] }
 0xb4b   :  { %2451 = vmatpush.bf16.msra.mxu0 %v6429_v53  ;;  %v8654_v53 = vld [vmem:[#allocation9 + $0x88] sm:$0xff] }
 0xb4d   :  { %2461 = vmatpush.bf16.msrb.mxu1 %v6469_v1  ;;  %v6409_v1 = vor.u32 %v7747_v63, %v6408_v36  ;;  %v6567_v36 = vld [vmem:[#allocation2 + $0xae8] sm:$0xf] }
 0xb4e   :  { %v7786_v63 = vld [vmem:[#allocation2 + $0xbc4] sm:$0xf0] }
 0xb4f   :  { %2452 = vmatpush.bf16.msra.mxu0 %v6417_v35  ;;  %v7789_v35 = vld [vmem:[#allocation2 + $0xd84] sm:$0xf0] }
 0xb50   :  { %6385 = vmatmul.msk.f32.gmra.mxu1 %vm1617_vm7, %v8519_v24  ;;  %v6461_v24 = vor.u32 %v7761_v61, %v6460_v33  ;;  %v7746_v33 = vld [vmem:[#allocation2 + $0x2f0] sm:$0xf0]  ;;  %v7745_v61 = vld [vmem:[#allocation2 + $0x218] sm:$0xf] }
 0xb51   :  { %2462 = vmatpush.bf16.msrb.mxu1 %v6457_v13  ;;  %v6405_v0 = vor.u32 %v7745_v61, %v6402_v26  ;;  %v6393_v13 = vor.u32 %v7742_v19, %v6390_v5  ;;  %v7785_v61 = vld [vmem:[#allocation2 + $0xbbc] sm:$0xf0]  ;;  %v6561_v26 = vld [vmem:[#allocation2 + $0xbc0] sm:$0xf0] }
 0xb52   :  { %2435 = vmatpush.bf16.msrb.mxu3 %v6461_v24  ;;  %v6401_v24 = vor.u32 %v7746_v33, %v6400_v46  ;;  %v6580_v46 = vor.u32 %v7789_v35, %v6579_v32  ;;  %v6559_v33 = vld [vmem:[#allocation2 + $0xae0] sm:$0xf]  ;;  %v7781_v19 = vld [vmem:[#allocation2 + $0x924] sm:$0xf] }
 0xb53   :  { %2453 = vmatpush.bf16.msra.mxu0 %v6405_v0  ;;  %v6549_v5 = vld [vmem:[#allocation2 + $0xa00] sm:$0xf0] }
 0xb55   :  { %2463 = vmatpush.bf16.msrb.mxu1 %v6445_v39 }
 0xb56   :  { %2436 = vmatpush.bf16.msrb.mxu3 %v6449_v4  ;;  %v6389_v4 = vor.u32 %v7743_v52, %v6388_v3  ;;  %v6547_v3 = vld [vmem:[#allocation2 + $0x920] sm:$0xf] }
 0xb57   :  { %2454 = vmatpush.bf16.msra.mxu0 %v6393_v13  ;;  %v7782_v52 = vld [vmem:[#allocation2 + $0x9fc] sm:$0xf0]  ;;  %v6556_v13 = vor.u32 %v7783_v9, %v6555_v8  ;;  %v8667_v8 = vld [vmem:[#allocation7 + $0x160] sm:$0xff]  ;;  %v8670_v9 = vld [vmem:[#allocation7 + $0x158] sm:$0xff] }
 0xb5a   :  { %2437 = vmatpush.bf16.msrb.mxu3 %v6437_v57 }
 0xb5b   :  { %2522 = vmatpush.msrb.mxu0 %v8506_v34 }
 0xb5d   :  { %2523 = vmatpush.msrb.mxu0 %v8511_v37 }
 0xb5e   :  { %2438 = vmatpush.bf16.msrb.mxu3 %v6425_v51 }
 0xb5f   :  { %2524 = vmatpush.msrb.mxu0 %v8514_v38 }
 0xb61   :  { %2525 = vmatpush.msrb.mxu0 %v8517_v41 }
 0xb63   :  { %2526 = vmatpush.msrb.mxu0 %v8522_v42 }
 0xb65   :  { %2527 = vmatpush.msrb.mxu0 %v8527_v43 }
 0xb67   :  { %2528 = vmatpush.msrb.mxu0 %v8530_v44 }
 0xb69   :  { %2529 = vmatpush.msrb.mxu0 %v8533_v47 }
 0xb6b   :  { %2530 = vmatpush.msrb.mxu0 %v8536_v48 }
 0xb6d   :  { %2531 = vmatpush.msrb.mxu0 %v8539_v55 }
 0xb6f   :  { %2532 = vmatpush.msrb.mxu0 %v8542_v40 }
 0xb71   :  { %2533 = vmatpush.msrb.mxu0 %v8545_v56 }
 0xb73   :  { %2534 = vmatpush.msrb.mxu0 %v8548_v45 }
 0xb75   :  { %2535 = vmatpush.msrb.mxu0 %v8551_v54 }
 0xb77   :  { %2536 = vmatpush.msrb.mxu0 %v8554_v2 }
 0xb79   :  { %2537 = vmatpush.msrb.mxu0 %v8558_v58 }
 0xbc5   :  { %v2225_v23 = vpop.f32.mrf.mxu1 }
 0xbc6   :  { %2247 = vmatmul.f32.vlgmr.msra.gmra.mxu2 %v2225_v23  ;;  %v6433_v23 = vor.u32 %v7753_v22, %v6432_v49  ;;  %v8650_v49 = vld [vmem:[#allocation9 + $0x80] sm:$0xff] }
 0xbc8   :  { %2464 = vmatpush.bf16.msrb.mxu1 %v6433_v23 }
 0xbcc   :  { %2465 = vmatpush.bf16.msrb.mxu1 %v6421_v59 }
 0xbcd   :  { %v2228_v25 = vpop.f32.mrf.mxu1 }
 0xbce   :  { %2250 = vmatmul.f32.gmra.mxu2 %v2228_v25  ;;  %v6412_v25 = vld [vmem:[#allocation2 + $0x3d4] sm:$0xf] }
 0xbcf   :  { %v6413_v29 = vor.u32 %v7749_v27, %v6412_v25  ;;  %v6571_v27 = vld [vmem:[#allocation2 + $0xca0] sm:$0xf] }
 0xbd0   :  { %2466 = vmatpush.bf16.msrb.mxu1 %v6409_v1  ;;  %v6572_v30 = vor.u32 %v7788_v28, %v6571_v27  ;;  %v6568_v1 = vor.u32 %v7786_v63, %v6567_v36  ;;  %v6507_v27 = vld [vmem:[#allocation2 + $0x228] sm:$0xf] }
 0xbd1   :  { %2439 = vmatpush.bf16.msrb.mxu3 %v6413_v29  ;;  %v7787_v29 = vld [vmem:[#allocation2 + $0xca4] sm:$0xf] }
 0xbd2   :  { %v6576_v59 = vor.u32 %v7787_v29, %v6573_v31  ;;  %v7771_v29 = vld [vmem:[#allocation2 + $0x304] sm:$0xf0]  ;;  %v7767_v31 = vld [vmem:[#allocation2 + $0x13c] sm:$0xf0] }
 0xbd3   :  { %v6508_v32 = vor.u32 %v7771_v29, %v6507_v27 }
 0xbd4   :  { %2467 = vmatpush.bf16.msrb.mxu1 %v6397_v14  ;;  %v6535_v14 = vld [vmem:[#allocation2 + $0x760] sm:$0xf] }
 0xbd5   :  { %2440 = vmatpush.bf16.msrb.mxu3 %v6401_v24  ;;  %v6560_v24 = vor.u32 %v7785_v61, %v6559_v33  ;;  %v6495_v33 = vld [vmem:[#allocation2 + $0x68] sm:$0xf] }
 0xbd8   :  { %2725 = vmatpush.bf16.msra.mxu1 %v6572_v30  ;;  %v6487_v30 = vld [vmem:[#allocation2 + $0x60] sm:$0xf] }
 0xbd9   :  { %2441 = vmatpush.bf16.msrb.mxu3 %v6389_v4  ;;  %v6548_v4 = vor.u32 %v7782_v52, %v6547_v3  ;;  %v6488_v35 = vor.u32 %v7767_v31, %v6487_v30  ;;  %v8661_v52 = vld [vmem:[#allocation7 + $0x170] sm:$0xff] }
 0xbda   :  { %v6670_v30 = vld [vmem:[#allocation2 + $0xcac] sm:$0xf] }
 0xbdb   :  { %v7812_v31 = vld [vmem:[#allocation2 + $0xd88] sm:$0xf0] }
 0xbdc   :  { %2726 = vmatpush.bf16.msra.mxu1 %v6560_v24 }
 0xbe0   :  { %2727 = vmatpush.bf16.msra.mxu1 %v6548_v4  ;;  %v8664_v4 = vld [vmem:[#allocation7 + $0x168] sm:$0xff] }
 0xc49   :  { %v2248_v62 = vpop.f32.mrf.mxu2 }
 0xc4a   :  { %v2254_v12 = vmul.f32 0.0625, %v2248_v62  ;;  %v7784_v62 = vld [vmem:[#allocation2 + $0xae4] sm:$0xf] }
 0xc4b   :  { %v6564_v0 = vor.u32 %v7784_v62, %v6561_v26  ;;  %v7768_v62 = vld [vmem:[#allocation2 + $0x144] sm:$0xf0] }
 0xc4c   :  { %v2256_v16 = vmul.f32 %v2254_v12, %v2254_v12  ;;  %v2259_v43 = vsub.f32 %v8612_v11, %v2254_v12  ;;  %v6552_v12 = vor.u32 %v7781_v19, %v6549_v5  ;;  %v6496_v26 = vor.u32 %v7768_v62, %v6495_v33  ;;  %v7813_v33 = vld [vmem:[#allocation2 + $0xd90] sm:$0xf0] }
 0xc51   :  { %v2251_v15 = vpop.f32.mrf.mxu2 }
 0xc52   :  { %v2255_v57 = vmul.f32 0.0625, %v2251_v15  ;;  %v7779_v15 = vld [vmem:[#allocation2 + $0x83c] sm:$0xf0] }
 0xc54   :  { %v2257_v10 = vsub.f32 %v2255_v57, %v2256_v16  ;;  %v7778_v16 = vld [vmem:[#allocation2 + $0x764] sm:$0xf]  ;;  %v6536_v57 = vor.u32 %v7779_v15, %v6535_v14  ;;  %v8679_v15 = vld [vmem:[#allocation7 + $0x140] sm:$0xff] }
 0xc56   :  { %v2258_v17 = vmax.f32 %v2257_v10, 0.0  ;;  %v6537_v10 = vld [vmem:[#allocation2 + $0x840] sm:$0xf0]  ;;  %2728 = vmatpush.bf16.msra.mxu1 %v6536_v57  ;;  %v8682_v57 = vld [vmem:[#allocation7 + $0x138] sm:$0xff] }
 0xc58   :  { %v2260_v7 = vadd.f32 1e-05, %v2258_v17  ;;  %v6543_v17 = vld [vmem:[#allocation2 + $0x768] sm:$0xf] }
 0xc5a   :  { %8072 = vrsqrt.f32 %v2260_v7  ;;  %vm2267_vm4 = vweird.f32 %v2260_v7 }
 0xc60   :  { %v8073_v34 = vpop.eup %8072 }
 0xc61   :  { %v2262_v50 = vmul.f32 %v8073_v34, %v2260_v7  ;;  %vm2268_vm3 = vweird.f32 %v8073_v34  ;;  %v7780_v7 = vld [vmem:[#allocation2 + $0x844] sm:$0xf0] }
 0xc62   :  { %vm2269_vm5 = vmor %vm2267_vm4, %vm2268_vm3 }
 0xc63   :  { %v2263_v37 = vmul.f32 %v8073_v34, %v2262_v50  ;;  %v6544_v50 = vor.u32 %v7780_v7, %v6543_v17  ;;  %v8685_v17 = vld [vmem:[#allocation7 + $0x130] sm:$0xff] }
 0xc65   :  { %v2264_v38 = vmul.f32 0.5, %v2263_v37  ;;  %v6523_v37 = vld [vmem:[#allocation2 + $0x5a0] sm:$0xf] }
 0xc67   :  { %v2265_v41 = vsub.f32 1.5, %v2264_v38  ;;  %v7776_v38 = vld [vmem:[#allocation2 + $0x67c] sm:$0xf0] }
 0xc69   :  { %v2266_v42 = vmul.f32 %v8073_v34, %v2265_v41  ;;  %v7775_v41 = vld [vmem:[#allocation2 + $0x5a4] sm:$0xf] }
 0xc6b   :  { %v2270_v44 = vsel %vm2269_vm5, %v8073_v34, %v2266_v42  ;;  %v6540_v34 = vor.u32 %v7778_v16, %v6537_v10  ;;  %v6524_v42 = vor.u32 %v7776_v38, %v6523_v37  ;;  %v8691_v37 = vld [vmem:[#allocation7 + $0x120] sm:$0xff] }
 0xc6c   :  { %v2271_v47 = vmul.f32 %v2270_v44, %v2259_v43  ;;  %v6525_v43 = vld [vmem:[#allocation2 + $0x680] sm:$0xf0]  ;;  %v6531_v44 = vld [vmem:[#allocation2 + $0x5a8] sm:$0xf] }
 0xc6d   :  { %2729 = vmatpush.bf16.msra.mxu1 %v6524_v42  ;;  %v8695_v42 = vld [vmem:[#allocation7 + $0x118] sm:$0xff] }
 0xc6e   :  { %v8638_v48 = vadd.f32 %v2271_v47, %v8577_v60  ;;  %v2474_v60 = vld [vmem:[#allocation4 + $0xa0] sm:$0xff]  ;;  %v7777_v47 = vld [vmem:[#allocation2 + $0x684] sm:$0xf0] }
 0xc70   :  { %v2273_v55 = vpack.c.bf16 %v8638_v48, %v8638_v48 }
 0xc72   :  { %2442 = vmatmul.bf16.vlgmr.msrb.gmra.mxu3 %v2273_v55  ;;  %2455 = vmatmul.bf16.vlgmr.msra.gmra.mxu0 %v2273_v55 }
 0xc73   :  { %2468 = vmatmul.bf16.vlgmr.msrb.gmra.mxu1 %v2273_v55  ;;  %v6528_v55 = vor.u32 %v7775_v41, %v6525_v43 }
 0xcef   :  { %v2456_v40 = vpop.f32.mrf.mxu0 }
 0xcf0   :  { %v2469_v56 = vpop.f32.mrf.mxu1 }
 0xcf1   :  { %v2476_v45 = vpack.c.bf16 %v2469_v56, %v2469_v56  ;;  %v6511_v56 = vld [vmem:[#allocation2 + $0x3e0] sm:$0xf] }
 0xcf3   :  { %v2483_v11 = vsel %vm1899_vm11, %v2476_v45, 0  ;;  %v7773_v45 = vld [vmem:[#allocation2 + $0x4bc] sm:$0xf0] }
 0xcf4   :  { %2491 = vmatpush.bf16.msrb.mxu2 %v2483_v11  ;;  %v7772_v11 = vld [vmem:[#allocation2 + $0x3e4] sm:$0xf] }
 0xcf5   :  { %v2443_v54 = vpop.f32.mrf.mxu3 }
 0xcf6   :  { %v2475_v39 = vpack.c.bf16 %v2456_v40, %v2443_v54  ;;  %v6532_v40 = vor.u32 %v7777_v47, %v6531_v44  ;;  %v6512_v54 = vor.u32 %v7773_v45, %v6511_v56  ;;  %v8698_v47 = vld [vmem:[#allocation7 + $0x110] sm:$0xff]  ;;  %v8704_v45 = vld [vmem:[#allocation7 + $0x100] sm:$0xff] }
 0xcf7   :  { %v2458_v2 = vpop.f32.mrf.mxu0 }
 0xcf8   :  { %v2471_v18 = vpop.f32.mrf.mxu1  ;;  %2492 = vmatpush.bf16.msrb.mxu2 %v2475_v39  ;;  %v6513_v39 = vld [vmem:[#allocation2 + $0x4c0] sm:$0xf0]  ;;  %v6519_v2 = vld [vmem:[#allocation2 + $0x3e8] sm:$0xf]  ;;  %2730 = vmatpush.bf16.msra.mxu1 %v6512_v54 }
 0xcf9   :  { %v7774_v18 = vld [vmem:[#allocation2 + $0x4c4] sm:$0xf0] }
 0xcfb   :  { %6482 = vmatmul.msk.bf16.vlgmr.msrb.gmra.mxu2 %vm1895_vm12, %v2474_v60  ;;  %v6516_v60 = vor.u32 %v7772_v11, %v6513_v39 }
 0xcfc   :  { %2738 = vmatpush.bf16.msra.mxu2 %v6576_v59  ;;  %v7766_v59 = vld [vmem:[#allocation2 + $0x64] sm:$0xf] }
 0xcfd   :  { %v2445_v58 = vpop.f32.mrf.mxu3 }
 0xcfe   :  { %v6520_v58 = vor.u32 %v7774_v18, %v6519_v2 }
 0xd00   :  { %2739 = vmatpush.bf16.msra.mxu2 %v6564_v0 }
 0xd04   :  { %2740 = vmatpush.bf16.msra.mxu2 %v6552_v12  ;;  %v8673_v12 = vld [vmem:[#allocation7 + $0x150] sm:$0xff] }
 0xd08   :  { %2741 = vmatpush.bf16.msra.mxu2 %v6540_v34  ;;  %v8688_v34 = vld [vmem:[#allocation7 + $0x128] sm:$0xff] }
 0xd0c   :  { %2742 = vmatpush.bf16.msra.mxu2 %v6528_v55 }
 0xd10   :  { %2743 = vmatpush.bf16.msra.mxu2 %v6516_v60 }
 0xd7e   :  { %v2494_v21 = vpop.f32.mrf.mxu2 }
 0xd7f   :  { %v8645_v51 = vadd.f32 %v8043_v20, %v2494_v21  ;;  %v6499_v21 = vld [vmem:[#allocation2 + $0x220] sm:$0xf] }
 0xd81   :  { %v2498_v6 = vmul.f32 %v8645_v51, %v8645_v51 }
 0xd83   :  { %2513 = vmatpush.msra.mxu3 %v2498_v6  ;;  %v7770_v6 = vld [vmem:[#allocation2 + $0x2fc] sm:$0xf0] }
 0xd85   :  { %2514 = vmatpush.msra.mxu3 %v8645_v51 }
 0xd86   :  { %6483 = vmatmul.msk.f32.vlgmr.msra.gmra.mxu3 %vm1617_vm7, %v8650_v49  ;;  %v2496_v22 = vpop.f32.mrf.mxu2 }
 0xd87   :  { %2751 = vmatpush.bf16.msrb.mxu3 %v6580_v46  ;;  %v7769_v22 = vld [vmem:[#allocation2 + $0x224] sm:$0xf] }
 0xd88   :  { %v6489_v46 = vld [vmem:[#allocation2 + $0x140] sm:$0xf0] }
 0xd89   :  { %v6492_v61 = vor.u32 %v7766_v59, %v6489_v46  ;;  %v6672_v59 = vld [vmem:[#allocation2 + $0xd8c] sm:$0xf0]  ;;  %v6678_v46 = vld [vmem:[#allocation2 + $0xcb4] sm:$0xf] }
 0xd8a   :  { %v6679_v62 = vor.u32 %v7813_v33, %v6678_v46  ;;  %v6612_v46 = vld [vmem:[#allocation2 + $0x4cc] sm:$0xf0]  ;;  %v6618_v33 = vld [vmem:[#allocation2 + $0x3f4] sm:$0xf] }
 0xd8b   :  { %2752 = vmatpush.bf16.msrb.mxu3 %v6568_v1  ;;  %v8658_v1 = vld [vmem:[#allocation7 + $0x178] sm:$0xff] }
 0xd8e   :  { %6484 = vmatmul.msk.f32.gmra.mxu3 %vm1617_vm7, %v8654_v53 }
 0xd8f   :  { %2753 = vmatpush.bf16.msrb.mxu3 %v6556_v13  ;;  %v8676_v13 = vld [vmem:[#allocation7 + $0x148] sm:$0xff] }
 0xd93   :  { %2754 = vmatpush.bf16.msrb.mxu3 %v6544_v50 }
 0xd97   :  { %2755 = vmatpush.bf16.msrb.mxu3 %v6532_v40  ;;  %v8701_v40 = vld [vmem:[#allocation7 + $0x108] sm:$0xff] }
 0xd9b   :  { %2756 = vmatpush.bf16.msrb.mxu3 %v6520_v58 }
 0xd9f   :  { %2757 = vmatpush.bf16.msrb.mxu3 %v6508_v32  ;;  %v7811_v32 = vld [vmem:[#allocation2 + $0xcb0] sm:$0xf] }
 0xda3   :  { %2758 = vmatpush.bf16.msrb.mxu3 %v6496_v26  ;;  %v7809_v26 = vld [vmem:[#allocation2 + $0xbc8] sm:$0xf0] }
 0xe09   :  { %v2516_v23 = vpop.f32.mrf.mxu3 }
 0xe0a   :  { %2538 = vmatmul.f32.vlgmr.msrb.gmra.mxu0 %v2516_v23  ;;  %v6500_v23 = vor.u32 %v7770_v6, %v6499_v21  ;;  %v2765_v21 = vld [vmem:[#allocation4 + $0xc0] sm:$0xff] }
 0xe0b   :  { %v8044_v6 = vld [vmem:[#allocation6 + $0x6] ss:$0 sm:$0xff] }
 0xe0c   :  { %2731 = vmatpush.bf16.msra.mxu1 %v6500_v23 }
 0xe10   :  { %2732 = vmatpush.bf16.msra.mxu1 %v6488_v35  ;;  %v6671_v35 = vor.u32 %v7812_v31, %v6670_v30  ;;  %v6610_v31 = vld [vmem:[#allocation2 + $0x3ec] sm:$0xf] }
 0xe11   :  { %v2519_v25 = vpop.f32.mrf.mxu3 }
 0xe12   :  { %2541 = vmatmul.f32.gmra.mxu0 %v2519_v25  ;;  %v6501_v25 = vld [vmem:[#allocation2 + $0x300] sm:$0xf0]  ;;  %3016 = vmatpush.bf16.msra.mxu3 %v6671_v35  ;;  %v7796_v35 = vld [vmem:[#allocation2 + $0x3f0] sm:$0xf] }
 0xe13   :  { %v6504_v28 = vor.u32 %v7769_v22, %v6501_v25 }
 0xe15   :  { %2744 = vmatpush.bf16.msra.mxu2 %v6504_v28 }
 0xe19   :  { %2745 = vmatpush.bf16.msra.mxu2 %v6492_v61  ;;  %v6675_v61 = vor.u32 %v7811_v32, %v6672_v59  ;;  %v7797_v32 = vld [vmem:[#allocation2 + $0x4c8] sm:$0xf0] }
 0xe1a   :  { %v6611_v59 = vor.u32 %v7797_v32, %v6610_v31 }
 0xe1d   :  { %2813 = vmatpush.msrb.mxu2 %v8658_v1 }
 0xe1f   :  { %2814 = vmatpush.msrb.mxu2 %v8661_v52 }
 0xe21   :  { %2815 = vmatpush.msrb.mxu2 %v8664_v4 }
 0xe23   :  { %2816 = vmatpush.msrb.mxu2 %v8667_v8 }
 0xe25   :  { %2817 = vmatpush.msrb.mxu2 %v8670_v9 }
 0xe27   :  { %2818 = vmatpush.msrb.mxu2 %v8673_v12 }
 0xe29   :  { %2819 = vmatpush.msrb.mxu2 %v8676_v13 }
 0xe2b   :  { %2820 = vmatpush.msrb.mxu2 %v8679_v15 }
 0xe2d   :  { %2821 = vmatpush.msrb.mxu2 %v8682_v57 }
 0xe2f   :  { %2822 = vmatpush.msrb.mxu2 %v8685_v17 }
 0xe31   :  { %2823 = vmatpush.msrb.mxu2 %v8688_v34 }
 0xe33   :  { %2824 = vmatpush.msrb.mxu2 %v8691_v37 }
 0xe35   :  { %2825 = vmatpush.msrb.mxu2 %v8695_v42 }
 0xe37   :  { %2826 = vmatpush.msrb.mxu2 %v8698_v47 }
 0xe39   :  { %2827 = vmatpush.msrb.mxu2 %v8701_v40 }
 0xe3b   :  { %2828 = vmatpush.msrb.mxu2 %v8704_v45 }
 0xe87   :  { %v2539_v20 = vpop.f32.mrf.mxu0 }
 0xe88   :  { %v2545_v24 = vmul.f32 0.0625, %v2539_v20 }
 0xe8a   :  { %v2547_v63 = vmul.f32 %v2545_v24, %v2545_v24  ;;  %v2550_v41 = vsub.f32 %v8645_v51, %v2545_v24  ;;  %v6658_v24 = vld [vmem:[#allocation2 + $0xaec] sm:$0xf] }
 0xe8f   :  { %v2542_v36 = vpop.f32.mrf.mxu0 }
 0xe90   :  { %v2546_v0 = vmul.f32 0.0625, %v2542_v36  ;;  %v7808_v36 = vld [vmem:[#allocation2 + $0xaf0] sm:$0xf] }
 0xe92   :  { %v2548_v3 = vsub.f32 %v2546_v0, %v2547_v63  ;;  %v6659_v63 = vor.u32 %v7809_v26, %v6658_v24  ;;  %v6660_v0 = vld [vmem:[#allocation2 + $0xbcc] sm:$0xf0]  ;;  %v6598_v26 = vld [vmem:[#allocation2 + $0x22c] sm:$0xf] }
 0xe94   :  { %v2549_v19 = vmax.f32 %v2548_v3, 0.0  ;;  %v6666_v3 = vld [vmem:[#allocation2 + $0xaf4] sm:$0xf]  ;;  %3017 = vmatpush.bf16.msra.mxu3 %v6659_v63  ;;  %v7793_v63 = vld [vmem:[#allocation2 + $0x230] sm:$0xf] }
 0xe96   :  { %v2551_v5 = vadd.f32 1e-05, %v2549_v19  ;;  %v7810_v19 = vld [vmem:[#allocation2 + $0xbd0] sm:$0xf0] }
 0xe98   :  { %8074 = vrsqrt.f32 %v2551_v5  ;;  %vm2558_vm8 = vweird.f32 %v2551_v5 }
 0xe9e   :  { %v8075_v14 = vpop.eup %8074 }
 0xe9f   :  { %v2553_v16 = vmul.f32 %v8075_v14, %v2551_v5  ;;  %vm2559_vm6 = vweird.f32 %v8075_v14  ;;  %v6663_v5 = vor.u32 %v7808_v36, %v6660_v0  ;;  %v7794_v36 = vld [vmem:[#allocation2 + $0x308] sm:$0xf0] }
 0xea0   :  { %vm2560_vm9 = vmor %vm2558_vm8, %vm2559_vm6 }
 0xea1   :  { %v2554_v10 = vmul.f32 %v8075_v14, %v2553_v16  ;;  %v6646_v16 = vld [vmem:[#allocation2 + $0x92c] sm:$0xf] }
 0xea3   :  { %v2555_v7 = vmul.f32 0.5, %v2554_v10  ;;  %v7806_v10 = vld [vmem:[#allocation2 + $0xa08] sm:$0xf0] }
 0xea5   :  { %v2556_v50 = vsub.f32 1.5, %v2555_v7  ;;  %v7805_v7 = vld [vmem:[#allocation2 + $0x930] sm:$0xf] }
 0xea7   :  { %v2557_v38 = vmul.f32 %v8075_v14, %v2556_v50  ;;  %v6647_v50 = vor.u32 %v7806_v10, %v6646_v16 }
 0xea9   :  { %v2561_v43 = vsel %vm2560_vm9, %v8075_v14, %v2557_v38  ;;  %v6667_v14 = vor.u32 %v7810_v19, %v6666_v3  ;;  %v6648_v38 = vld [vmem:[#allocation2 + $0xa0c] sm:$0xf0]  ;;  %3018 = vmatpush.bf16.msra.mxu3 %v6647_v50  ;;  %v6599_v3 = vor.u32 %v7794_v36, %v6598_v26  ;;  %v7791_v50 = vld [vmem:[#allocation2 + $0x148] sm:$0xf0]  ;;  %v8045_v36 = vld [vmem:[#allocation6 + $0x7] ss:$0 sm:$0xff] }
 0xeaa   :  { %v2562_v44 = vmul.f32 %v2561_v43, %v2550_v41  ;;  %v6654_v41 = vld [vmem:[#allocation2 + $0x934] sm:$0xf]  ;;  %v6600_v19 = vld [vmem:[#allocation2 + $0x30c] sm:$0xf0] }
 0xeab   :  { %v7807_v43 = vld [vmem:[#allocation2 + $0xa10] sm:$0xf0]  ;;  %v6603_v16 = vor.u32 %v7793_v63, %v6600_v19 }
 0xeac   :  { %v2563_v55 = vmax.f32 %v2562_v44, 0.0  ;;  %v6651_v44 = vor.u32 %v7805_v7, %v6648_v38  ;;  %v6586_v7 = vld [vmem:[#allocation2 + $0x6c] sm:$0xf]  ;;  %v7790_v38 = vld [vmem:[#allocation2 + $0x70] sm:$0xf] }
 0xeae   :  { %v2564_v56 = vpack.c.bf16 %v2563_v55, %v2563_v55  ;;  %v6655_v55 = vor.u32 %v7807_v43, %v6654_v41  ;;  %v6587_v41 = vor.u32 %v7791_v50, %v6586_v7  ;;  %v6588_v43 = vld [vmem:[#allocation2 + $0x14c] sm:$0xf0]  ;;  %v7835_v7 = vld [vmem:[#allocation2 + $0xcbc] sm:$0xf] }
 0xeb0   :  { %2733 = vmatmul.bf16.vlgmr.msra.gmra.mxu1 %v2564_v56  ;;  %2746 = vmatmul.bf16.vlgmr.msra.gmra.mxu2 %v2564_v56 }
 0xeb1   :  { %2759 = vmatmul.bf16.vlgmr.msrb.gmra.mxu3 %v2564_v56  ;;  %v6634_v56 = vld [vmem:[#allocation2 + $0x76c] sm:$0xf] }
 0xf2d   :  { %v2734_v51 = vpop.f32.mrf.mxu1 }
 0xf33   :  { %v2747_v11 = vpop.f32.mrf.mxu2 }
 0xf34   :  { %v2760_v54 = vpop.f32.mrf.mxu3  ;;  %v2766_v60 = vpack.c.bf16 %v2747_v11, %v2734_v51  ;;  %v7803_v51 = vld [vmem:[#allocation2 + $0x848] sm:$0xf0]  ;;  %v7802_v11 = vld [vmem:[#allocation2 + $0x770] sm:$0xf] }
 0xf35   :  { %v2767_v39 = vpack.c.bf16 %v2760_v54, %v2760_v54  ;;  %v2736_v2 = vpop.f32.mrf.mxu1  ;;  %v6635_v54 = vor.u32 %v7803_v51, %v6634_v56  ;;  %v6591_v51 = vor.u32 %v7790_v38, %v6588_v43  ;;  %v6771_v38 = vld [vmem:[#allocation2 + $0xd98] sm:$0xf0]  ;;  %v7837_v43 = vld [vmem:[#allocation2 + $0xd9c] sm:$0xf0] }
 0xf36   :  { %v6642_v2 = vld [vmem:[#allocation2 + $0x774] sm:$0xf] }
 0xf37   :  { %v2774_v18 = vsel %vm1899_vm11, %v2767_v39, 0  ;;  %v6636_v39 = vld [vmem:[#allocation2 + $0x84c] sm:$0xf0]  ;;  %3019 = vmatpush.bf16.msra.mxu3 %v6635_v54 }
 0xf38   :  { %2782 = vmatpush.bf16.msra.mxu0 %v2774_v18  ;;  %v7804_v18 = vld [vmem:[#allocation2 + $0x850] sm:$0xf0] }
 0xf3b   :  { %v2749_v58 = vpop.f32.mrf.mxu2 }
 0xf3c   :  { %v2762_v20 = vpop.f32.mrf.mxu3  ;;  %2783 = vmatpush.bf16.msra.mxu0 %v2766_v60  ;;  %v6639_v60 = vor.u32 %v7802_v11, %v6636_v39  ;;  %v6643_v58 = vor.u32 %v7804_v18, %v6642_v2 }
 0xf3d   :  { %v6622_v20 = vld [vmem:[#allocation2 + $0x5ac] sm:$0xf] }
 0xf3f   :  { %6581 = vmatmul.msk.bf16.vlgmr.msra.gmra.mxu0 %vm1895_vm12, %v2765_v21  ;;  %v7800_v21 = vld [vmem:[#allocation2 + $0x688] sm:$0xf0] }
 0xf40   :  { %3029 = vmatpush.bf16.msrb.mxu0 %v6675_v61  ;;  %v7798_v61 = vld [vmem:[#allocation2 + $0x4d0] sm:$0xf0] }
 0xf41   :  { %v6619_v24 = vor.u32 %v7798_v61, %v6618_v33 }
 0xf44   :  { %3030 = vmatpush.bf16.msrb.mxu0 %v6663_v5  ;;  %v6606_v5 = vld [vmem:[#allocation2 + $0x234] sm:$0xf] }
 0xf48   :  { %3031 = vmatpush.bf16.msrb.mxu0 %v6651_v44  ;;  %v6594_v44 = vld [vmem:[#allocation2 + $0x74] sm:$0xf] }
 0xf4c   :  { %3032 = vmatpush.bf16.msrb.mxu0 %v6639_v60 }
 0xfbc   :  { %v2785_v22 = vpop.f32.mrf.mxu0 }
 0xfbd   :  { %v8709_v23 = vadd.f32 %v8044_v6, %v2785_v22  ;;  %v7799_v6 = vld [vmem:[#allocation2 + $0x5b0] sm:$0xf]  ;;  %v6623_v22 = vor.u32 %v7800_v21, %v6622_v20 }
 0xfbf   :  { %v2789_v25 = vmul.f32 %v8709_v23, %v8709_v23  ;;  %3020 = vmatpush.bf16.msra.mxu3 %v6623_v22 }
 0xfc1   :  { %2804 = vmatpush.msrb.mxu1 %v2789_v25  ;;  %v6624_v25 = vld [vmem:[#allocation2 + $0x68c] sm:$0xf0] }
 0xfc3   :  { %2805 = vmatpush.msrb.mxu1 %v8709_v23  ;;  %3021 = vmatpush.bf16.msra.mxu3 %v6611_v59 }
 0xfc4   :  { %6582 = vmatmul.msk.f32.vlgmr.msrb.gmra.mxu1 %vm1617_vm7, %v8650_v49  ;;  %v2787_v27 = vpop.f32.mrf.mxu0 }
 0xfc5   :  { %3042 = vmatpush.bf16.msra.mxu1 %v6679_v62  ;;  %v6630_v27 = vld [vmem:[#allocation2 + $0x5b4] sm:$0xf]  ;;  %v6615_v62 = vor.u32 %v7796_v35, %v6612_v46 }
 0xfc7   :  { %3022 = vmatpush.bf16.msra.mxu3 %v6599_v3 }
 0xfc9   :  { %3043 = vmatpush.bf16.msra.mxu1 %v6667_v14  ;;  %v7795_v14 = vld [vmem:[#allocation2 + $0x310] sm:$0xf0] }
 0xfca   :  { %v6607_v10 = vor.u32 %v7795_v14, %v6606_v5 }
 0xfcb   :  { %3023 = vmatpush.bf16.msra.mxu3 %v6587_v41  ;;  %v6777_v41 = vld [vmem:[#allocation2 + $0xcc0] sm:$0xf] }
 0xfcc   :  { %6583 = vmatmul.msk.f32.gmra.mxu1 %vm1617_vm7, %v8654_v53 }
 0xfcd   :  { %3044 = vmatpush.bf16.msra.mxu1 %v6655_v55  ;;  %v7792_v55 = vld [vmem:[#allocation2 + $0x150] sm:$0xf0] }
 0xfce   :  { %v6595_v11 = vor.u32 %v7792_v55, %v6594_v44  ;;  %v6774_v44 = vor.u32 %v7835_v7, %v6771_v38  ;;  %v6778_v55 = vor.u32 %v7837_v43, %v6777_v41  ;;  %v7821_v7 = vld [vmem:[#allocation2 + $0x4d4] sm:$0xf0]  ;;  %v6711_v41 = vld [vmem:[#allocation2 + $0x4d8] sm:$0xf0]  ;;  %v6717_v43 = vld [vmem:[#allocation2 + $0x400] sm:$0xf] }
 0xfd1   :  { %3045 = vmatpush.bf16.msra.mxu1 %v6643_v58 }
0x1041   :  { %v2807_v28 = vpop.f32.mrf.mxu1 }
0x1042   :  { %2829 = vmatmul.f32.vlgmr.msrb.gmra.mxu2 %v2807_v28  ;;  %v7801_v28 = vld [vmem:[#allocation2 + $0x690] sm:$0xf0] }
0x1043   :  { %v6631_v30 = vor.u32 %v7801_v28, %v6630_v27 }
0x1045   :  { %3046 = vmatpush.bf16.msra.mxu1 %v6631_v30 }
0x1049   :  { %v2810_v29 = vpop.f32.mrf.mxu1  ;;  %3047 = vmatpush.bf16.msra.mxu1 %v6619_v24 }
0x104a   :  { %2832 = vmatmul.f32.gmra.mxu2 %v2810_v29  ;;  %v6627_v29 = vor.u32 %v7799_v6, %v6624_v25 }
0x104c   :  { %3033 = vmatpush.bf16.msrb.mxu0 %v6627_v29 }
0x104d   :  { %3048 = vmatpush.bf16.msra.mxu1 %v6607_v10  ;;  %v7836_v10 = vld [vmem:[#allocation2 + $0xd94] sm:$0xf0] }
0x1050   :  { %3034 = vmatpush.bf16.msrb.mxu0 %v6615_v62 }
0x1051   :  { %3049 = vmatpush.bf16.msra.mxu1 %v6595_v11  ;;  %v7832_v11 = vld [vmem:[#allocation2 + $0xafc] sm:$0xf] }
0x1054   :  { %3035 = vmatpush.bf16.msrb.mxu0 %v6603_v16  ;;  %v6769_v16 = vld [vmem:[#allocation2 + $0xcb8] sm:$0xf] }
0x1055   :  { %v6770_v50 = vor.u32 %v7836_v10, %v6769_v16  ;;  %v6709_v10 = vld [vmem:[#allocation2 + $0x3f8] sm:$0xf] }
0x1056   :  { %v6710_v38 = vor.u32 %v7821_v7, %v6709_v10 }
0x1057   :  { %3307 = vmatpush.bf16.msrb.mxu1 %v6770_v50  ;;  %v7820_v50 = vld [vmem:[#allocation2 + $0x3fc] sm:$0xf] }
0x1058   :  { %3036 = vmatpush.bf16.msrb.mxu0 %v6591_v51  ;;  %v7833_v51 = vld [vmem:[#allocation2 + $0xbd4] sm:$0xf0] }
0x105c   :  { %3104 = vmatpush.msra.mxu0 %v8658_v1 }
0x105e   :  { %3105 = vmatpush.msra.mxu0 %v8661_v52 }
0x1060   :  { %3106 = vmatpush.msra.mxu0 %v8664_v4 }
0x1062   :  { %3107 = vmatpush.msra.mxu0 %v8667_v8 }
0x1064   :  { %3108 = vmatpush.msra.mxu0 %v8670_v9 }
0x1066   :  { %3109 = vmatpush.msra.mxu0 %v8673_v12 }
0x1068   :  { %3110 = vmatpush.msra.mxu0 %v8676_v13 }
0x106a   :  { %3111 = vmatpush.msra.mxu0 %v8679_v15 }
0x106c   :  { %3112 = vmatpush.msra.mxu0 %v8682_v57 }
0x106e   :  { %3113 = vmatpush.msra.mxu0 %v8685_v17 }
0x1070   :  { %3114 = vmatpush.msra.mxu0 %v8688_v34 }
0x1072   :  { %3115 = vmatpush.msra.mxu0 %v8691_v37 }
0x1074   :  { %3116 = vmatpush.msra.mxu0 %v8695_v42 }
0x1076   :  { %3117 = vmatpush.msra.mxu0 %v8698_v47 }
0x1078   :  { %3118 = vmatpush.msra.mxu0 %v8701_v40 }
0x107a   :  { %3119 = vmatpush.msra.mxu0 %v8704_v45 }
0x10c5   :  { %v2830_v0 = vpop.f32.mrf.mxu2 }
0x10c6   :  { %v2836_v56 = vmul.f32 0.0625, %v2830_v0 }
0x10c8   :  { %v2838_v39 = vmul.f32 %v2836_v56, %v2836_v56  ;;  %v2841_v28 = vsub.f32 %v8709_v23, %v2836_v56  ;;  %v6757_v56 = vld [vmem:[#allocation2 + $0xaf8] sm:$0xf] }
0x10cd   :  { %v2833_v54 = vpop.f32.mrf.mxu2 }
0x10ce   :  { %v2837_v2 = vmul.f32 0.0625, %v2833_v54  ;;  %v6758_v54 = vor.u32 %v7833_v51, %v6757_v56 }
0x10d0   :  { %v2839_v18 = vsub.f32 %v2837_v2, %v2838_v39  ;;  %v6759_v39 = vld [vmem:[#allocation2 + $0xbd8] sm:$0xf0]  ;;  %v6765_v2 = vld [vmem:[#allocation2 + $0xb00] sm:$0xf]  ;;  %3308 = vmatpush.bf16.msrb.mxu1 %v6758_v54  ;;  %v7818_v54 = vld [vmem:[#allocation2 + $0x314] sm:$0xf0] }
0x10d2   :  { %v2840_v60 = vmax.f32 %v2839_v18, 0.0  ;;  %v7834_v18 = vld [vmem:[#allocation2 + $0xbdc] sm:$0xf0] }
0x10d4   :  { %v2842_v58 = vadd.f32 1e-05, %v2840_v60  ;;  %v6762_v60 = vor.u32 %v7832_v11, %v6759_v39  ;;  %v6697_v11 = vld [vmem:[#allocation2 + $0x238] sm:$0xf]  ;;  %v7817_v39 = vld [vmem:[#allocation2 + $0x23c] sm:$0xf] }
0x10d6   :  { %8076 = vrsqrt.f32 %v2842_v58  ;;  %vm2849_vm13 = vweird.f32 %v2842_v58 }
0x10dc   :  { %v8077_v20 = vpop.eup %8076 }
0x10dd   :  { %v2844_v21 = vmul.f32 %v8077_v20, %v2842_v58  ;;  %vm2850_vm10 = vweird.f32 %v8077_v20  ;;  %v6766_v58 = vor.u32 %v7834_v18, %v6765_v2  ;;  %v6698_v2 = vor.u32 %v7818_v54, %v6697_v11  ;;  %v6699_v18 = vld [vmem:[#allocation2 + $0x318] sm:$0xf0]  ;;  %v3347_v11 = vld [vmem:[#allocation4 + $0x100] sm:$0xff]  ;;  %v8046_v54 = vld [vmem:[#allocation6 + $0x8] ss:$0 sm:$0xff] }
0x10de   :  { %vm2851_vm15 = vmor %vm2849_vm13, %vm2850_vm10 }
0x10df   :  { %v2845_v6 = vmul.f32 %v8077_v20, %v2844_v21  ;;  %v7830_v21 = vld [vmem:[#allocation2 + $0xa14] sm:$0xf0] }
0x10e1   :  { %v2846_v22 = vmul.f32 0.5, %v2845_v6  ;;  %v7829_v6 = vld [vmem:[#allocation2 + $0x93c] sm:$0xf] }
0x10e3   :  { %v2847_v25 = vsub.f32 1.5, %v2846_v22 }
0x10e5   :  { %v2848_v27 = vmul.f32 %v8077_v20, %v2847_v25  ;;  %v6747_v25 = vld [vmem:[#allocation2 + $0xa18] sm:$0xf0] }
0x10e7   :  { %v2852_v29 = vsel %vm2851_vm15, %v8077_v20, %v2848_v27  ;;  %v6745_v20 = vld [vmem:[#allocation2 + $0x938] sm:$0xf]  ;;  %v6753_v27 = vld [vmem:[#allocation2 + $0x940] sm:$0xf] }
0x10e8   :  { %v2853_v30 = vmul.f32 %v2852_v29, %v2841_v28  ;;  %v6746_v22 = vor.u32 %v7830_v21, %v6745_v20  ;;  %v7831_v28 = vld [vmem:[#allocation2 + $0xa1c] sm:$0xf0]  ;;  %v6750_v29 = vor.u32 %v7829_v6, %v6747_v25  ;;  %v6685_v21 = vld [vmem:[#allocation2 + $0x78] sm:$0xf] }
0x10e9   :  { %v7819_v20 = vld [vmem:[#allocation2 + $0x31c] sm:$0xf0]  ;;  %v7815_v6 = vld [vmem:[#allocation2 + $0x154] sm:$0xf0] }
0x10ea   :  { %v8735_v31 = vadd.f32 %v2853_v30, %v8638_v48  ;;  %v3056_v48 = vld [vmem:[#allocation4 + $0xe0] sm:$0xff]  ;;  %v6754_v30 = vor.u32 %v7831_v28, %v6753_v27  ;;  %3309 = vmatpush.bf16.msrb.mxu1 %v6746_v22  ;;  %v6686_v25 = vor.u32 %v7815_v6, %v6685_v21  ;;  %v7814_v27 = vld [vmem:[#allocation2 + $0x7c] sm:$0xf] }
0x10eb   :  { %v6687_v28 = vld [vmem:[#allocation2 + $0x158] sm:$0xf0]  ;;  %v6868_v21 = vld [vmem:[#allocation2 + $0xcc4] sm:$0xf] }
0x10ec   :  { %v2855_v32 = vpack.c.bf16 %v8735_v31, %v8735_v31  ;;  %v7860_v6 = vld [vmem:[#allocation2 + $0xda0] sm:$0xf0] }
0x10ee   :  { %3024 = vmatmul.bf16.vlgmr.msra.gmra.mxu3 %v2855_v32  ;;  %3037 = vmatmul.bf16.vlgmr.msrb.gmra.mxu0 %v2855_v32 }
0x10ef   :  { %3050 = vmatmul.bf16.vlgmr.msra.gmra.mxu1 %v2855_v32  ;;  %v6733_v32 = vld [vmem:[#allocation2 + $0x778] sm:$0xf] }
0x116b   :  { %v3038_v35 = vpop.f32.mrf.mxu0 }
0x116c   :  { %v3051_v23 = vpop.f32.mrf.mxu1 }
0x116d   :  { %v3058_v59 = vpack.c.bf16 %v3051_v23, %v3051_v23  ;;  %v7826_v23 = vld [vmem:[#allocation2 + $0x77c] sm:$0xf] }
0x116f   :  { %v3065_v46 = vsel %vm1899_vm11, %v3058_v59, 0 }
0x1170   :  { %3073 = vmatpush.bf16.msra.mxu2 %v3065_v46  ;;  %v6735_v46 = vld [vmem:[#allocation2 + $0x858] sm:$0xf0] }
0x1171   :  { %v3025_v33 = vpop.f32.mrf.mxu3 }
0x1172   :  { %v3057_v61 = vpack.c.bf16 %v3038_v35, %v3025_v33  ;;  %v7827_v35 = vld [vmem:[#allocation2 + $0x854] sm:$0xf0]  ;;  %v6741_v33 = vld [vmem:[#allocation2 + $0x780] sm:$0xf] }
0x1173   :  { %v3040_v62 = vpop.f32.mrf.mxu0  ;;  %v6734_v59 = vor.u32 %v7827_v35, %v6733_v32  ;;  %v7816_v32 = vld [vmem:[#allocation2 + $0x15c] sm:$0xf0] }
0x1174   :  { %v3053_v24 = vpop.f32.mrf.mxu1  ;;  %3074 = vmatpush.bf16.msra.mxu2 %v3057_v61  ;;  %v7828_v61 = vld [vmem:[#allocation2 + $0x85c] sm:$0xf0]  ;;  %v6738_v62 = vor.u32 %v7826_v23, %v6735_v46 }
0x1175   :  { %v6742_v24 = vor.u32 %v7828_v61, %v6741_v33  ;;  %3310 = vmatpush.bf16.msrb.mxu1 %v6734_v59 }
0x1177   :  { %6680 = vmatmul.msk.bf16.vlgmr.msra.gmra.mxu2 %vm1895_vm12, %v3056_v48  ;;  %v6721_v48 = vld [vmem:[#allocation2 + $0x5b8] sm:$0xf] }
0x1178   :  { %3320 = vmatpush.bf16.msrb.mxu2 %v6774_v44  ;;  %v7822_v44 = vld [vmem:[#allocation2 + $0x4dc] sm:$0xf0] }
0x1179   :  { %v3027_v26 = vpop.f32.mrf.mxu3  ;;  %v6718_v56 = vor.u32 %v7822_v44, %v6717_v43 }
0x117a   :  { %v7824_v26 = vld [vmem:[#allocation2 + $0x694] sm:$0xf0] }
0x117c   :  { %3321 = vmatpush.bf16.msrb.mxu2 %v6762_v60  ;;  %v6705_v60 = vld [vmem:[#allocation2 + $0x240] sm:$0xf] }
0x117d   :  { %v6706_v22 = vor.u32 %v7819_v20, %v6705_v60 }
0x1180   :  { %3322 = vmatpush.bf16.msrb.mxu2 %v6750_v29  ;;  %v6693_v29 = vld [vmem:[#allocation2 + $0x80] sm:$0xf] }
0x1181   :  { %v6694_v23 = vor.u32 %v7816_v32, %v6693_v29  ;;  %v7861_v29 = vld [vmem:[#allocation2 + $0xda8] sm:$0xf0] }
0x1184   :  { %3323 = vmatpush.bf16.msrb.mxu2 %v6738_v62 }
0x11fa   :  { %v3076_v63 = vpop.f32.mrf.mxu2 }
0x11fb   :  { %v8742_v0 = vadd.f32 %v8045_v36, %v3076_v63  ;;  %v7823_v36 = vld [vmem:[#allocation2 + $0x5bc] sm:$0xf]  ;;  %v6722_v63 = vor.u32 %v7824_v26, %v6721_v48 }
0x11fd   :  { %v3080_v3 = vmul.f32 %v8742_v0, %v8742_v0  ;;  %3311 = vmatpush.bf16.msrb.mxu1 %v6722_v63 }
0x11ff   :  { %3095 = vmatpush.msrb.mxu3 %v3080_v3  ;;  %v6723_v3 = vld [vmem:[#allocation2 + $0x698] sm:$0xf0] }
0x1201   :  { %3096 = vmatpush.msrb.mxu3 %v8742_v0  ;;  %3312 = vmatpush.bf16.msrb.mxu1 %v6710_v38 }
0x1202   :  { %6681 = vmatmul.msk.f32.vlgmr.msrb.gmra.mxu3 %vm1617_vm7, %v8650_v49  ;;  %v3078_v19 = vpop.f32.mrf.mxu2 }
0x1203   :  { %3333 = vmatpush.bf16.msra.mxu3 %v6778_v55  ;;  %v6729_v19 = vld [vmem:[#allocation2 + $0x5c0] sm:$0xf]  ;;  %v6714_v55 = vor.u32 %v7820_v50, %v6711_v41 }
0x1205   :  { %3313 = vmatpush.bf16.msrb.mxu1 %v6698_v2 }
0x1207   :  { %3334 = vmatpush.bf16.msra.mxu3 %v6766_v58  ;;  %v6702_v58 = vor.u32 %v7817_v39, %v6699_v18 }
0x1209   :  { %3314 = vmatpush.bf16.msrb.mxu1 %v6686_v25  ;;  %v6869_v25 = vor.u32 %v7860_v6, %v6868_v21  ;;  %v7845_v21 = vld [vmem:[#allocation2 + $0x4e0] sm:$0xf0]  ;;  %v7844_v6 = vld [vmem:[#allocation2 + $0x408] sm:$0xf] }
0x120a   :  { %6682 = vmatmul.msk.f32.gmra.mxu3 %vm1617_vm7, %v8654_v53 }
0x120b   :  { %3335 = vmatpush.bf16.msra.mxu3 %v6754_v30  ;;  %v6690_v30 = vor.u32 %v7814_v27, %v6687_v28  ;;  %v6870_v27 = vld [vmem:[#allocation2 + $0xda4] sm:$0xf0]  ;;  %v6876_v28 = vld [vmem:[#allocation2 + $0xccc] sm:$0xf] }
0x120c   :  { %v6877_v32 = vor.u32 %v7861_v29, %v6876_v28  ;;  %v7846_v28 = vld [vmem:[#allocation2 + $0x4e8] sm:$0xf0] }
0x120f   :  { %3336 = vmatpush.bf16.msra.mxu3 %v6742_v24 }
0x1285   :  { %v3098_v5 = vpop.f32.mrf.mxu3 }
0x1286   :  { %3120 = vmatmul.f32.vlgmr.msra.gmra.mxu0 %v3098_v5  ;;  %v7825_v5 = vld [vmem:[#allocation2 + $0x69c] sm:$0xf0] }
0x1287   :  { %v6730_v16 = vor.u32 %v7825_v5, %v6729_v19 }
0x1289   :  { %3337 = vmatpush.bf16.msra.mxu3 %v6730_v16 }
0x128d   :  { %v3101_v14 = vpop.f32.mrf.mxu3  ;;  %3338 = vmatpush.bf16.msra.mxu3 %v6718_v56 }
0x128e   :  { %3123 = vmatmul.f32.gmra.mxu0 %v3101_v14  ;;  %v6726_v14 = vor.u32 %v7823_v36, %v6723_v3 }
0x1290   :  { %3324 = vmatpush.bf16.msrb.mxu2 %v6726_v14 }
0x1291   :  { %3339 = vmatpush.bf16.msra.mxu3 %v6706_v22  ;;  %v7859_v22 = vld [vmem:[#allocation2 + $0xcc8] sm:$0xf] }
0x1294   :  { %3325 = vmatpush.bf16.msrb.mxu2 %v6714_v55 }
0x1295   :  { %3340 = vmatpush.bf16.msra.mxu3 %v6694_v23  ;;  %v7856_v23 = vld [vmem:[#allocation2 + $0xb08] sm:$0xf] }
0x1298   :  { %3326 = vmatpush.bf16.msrb.mxu2 %v6702_v58 }
0x1299   :  { %3598 = vmatpush.bf16.msrb.mxu3 %v6869_v25  ;;  %v6810_v25 = vld [vmem:[#allocation2 + $0x4e4] sm:$0xf0] }
0x129a   :  { %v6813_v29 = vor.u32 %v7844_v6, %v6810_v25  ;;  %v7884_v6 = vld [vmem:[#allocation2 + $0xdac] sm:$0xf0] }
0x129c   :  { %3327 = vmatpush.bf16.msrb.mxu2 %v6690_v30  ;;  %v6873_v30 = vor.u32 %v7859_v22, %v6870_v27  ;;  %v6816_v27 = vld [vmem:[#allocation2 + $0x40c] sm:$0xf] }
0x12a0   :  { %3395 = vmatpush.msra.mxu2 %v8658_v1 }
0x12a2   :  { %3396 = vmatpush.msra.mxu2 %v8661_v52 }
0x12a4   :  { %3397 = vmatpush.msra.mxu2 %v8664_v4 }
0x12a6   :  { %3398 = vmatpush.msra.mxu2 %v8667_v8 }
0x12a8   :  { %3399 = vmatpush.msra.mxu2 %v8670_v9 }
0x12aa   :  { %3400 = vmatpush.msra.mxu2 %v8673_v12 }
0x12ac   :  { %3401 = vmatpush.msra.mxu2 %v8676_v13 }
0x12ae   :  { %3402 = vmatpush.msra.mxu2 %v8679_v15 }
0x12b0   :  { %3403 = vmatpush.msra.mxu2 %v8682_v57 }
0x12b2   :  { %3404 = vmatpush.msra.mxu2 %v8685_v17 }
0x12b4   :  { %3405 = vmatpush.msra.mxu2 %v8688_v34 }
0x12b6   :  { %3406 = vmatpush.msra.mxu2 %v8691_v37 }
0x12b8   :  { %3407 = vmatpush.msra.mxu2 %v8695_v42 }
0x12ba   :  { %3408 = vmatpush.msra.mxu2 %v8698_v47 }
0x12bc   :  { %3409 = vmatpush.msra.mxu2 %v8701_v40 }
0x12be   :  { %3410 = vmatpush.msra.mxu2 %v8704_v45 }
0x1303   :  { %v3121_v51 = vpop.f32.mrf.mxu0 }
0x1304   :  { %v3127_v35 = vmul.f32 0.0625, %v3121_v51 }
0x1306   :  { %v3129_v46 = vmul.f32 %v3127_v35, %v3127_v35  ;;  %v3132_v5 = vsub.f32 %v8742_v0, %v3127_v35  ;;  %v7857_v35 = vld [vmem:[#allocation2 + $0xbe0] sm:$0xf0] }
0x130b   :  { %v3124_v59 = vpop.f32.mrf.mxu0 }
0x130c   :  { %v3128_v33 = vmul.f32 0.0625, %v3124_v59  ;;  %v6858_v59 = vld [vmem:[#allocation2 + $0xbe4] sm:$0xf0] }
0x130e   :  { %v3130_v61 = vsub.f32 %v3128_v33, %v3129_v46  ;;  %v6864_v46 = vld [vmem:[#allocation2 + $0xb0c] sm:$0xf] }
0x130f   :  { %v7858_v33 = vld [vmem:[#allocation2 + $0xbe8] sm:$0xf0] }
0x1310   :  { %v3131_v62 = vmax.f32 %v3130_v61, 0.0  ;;  %v6861_v61 = vor.u32 %v7856_v23, %v6858_v59  ;;  %v6798_v59 = vld [vmem:[#allocation2 + $0x324] sm:$0xf0] }
0x1312   :  { %v3133_v24 = vadd.f32 1e-05, %v3131_v62  ;;  %v6865_v62 = vor.u32 %v7858_v33, %v6864_v46  ;;  %v6804_v46 = vld [vmem:[#allocation2 + $0x24c] sm:$0xf] }
0x1313   :  { %v7843_v33 = vld [vmem:[#allocation2 + $0x328] sm:$0xf0] }
0x1314   :  { %8078 = vrsqrt.f32 %v3133_v24  ;;  %vm3140_vm3 = vweird.f32 %v3133_v24 }
0x131a   :  { %v8079_v48 = vpop.eup %8078 }
0x131b   :  { %v3135_v26 = vmul.f32 %v8079_v48, %v3133_v24  ;;  %vm3141_vm2 = vweird.f32 %v8079_v48  ;;  %v6844_v24 = vld [vmem:[#allocation2 + $0x944] sm:$0xf] }
0x131c   :  { %vm3142_vm4 = vmor %vm3140_vm3, %vm3141_vm2  ;;  %vm4354_vm2 = vcmask 326656  }
0x131d   :  { %v3136_v36 = vmul.f32 %v8079_v48, %v3135_v26  ;;  %v7853_v26 = vld [vmem:[#allocation2 + $0x948] sm:$0xf] }
0x131f   :  { %v3137_v63 = vmul.f32 0.5, %v3136_v36 }
0x1321   :  { %v3138_v3 = vsub.f32 1.5, %v3137_v63  ;;  %v6846_v63 = vld [vmem:[#allocation2 + $0xa24] sm:$0xf0] }
0x1323   :  { %v3139_v19 = vmul.f32 %v8079_v48, %v3138_v3  ;;  %v6852_v3 = vld [vmem:[#allocation2 + $0x94c] sm:$0xf] }
0x1325   :  { %v3143_v14 = vsel %vm3142_vm4, %v8079_v48, %v3139_v19  ;;  %v7854_v48 = vld [vmem:[#allocation2 + $0xa20] sm:$0xf0]  ;;  %v7855_v19 = vld [vmem:[#allocation2 + $0xa28] sm:$0xf0] }
0x1326   :  { %v3144_v16 = vmul.f32 %v3143_v14, %v3132_v5  ;;  %v6845_v36 = vor.u32 %v7854_v48, %v6844_v24  ;;  %v6849_v5 = vor.u32 %v7853_v26, %v6846_v63  ;;  %v6853_v14 = vor.u32 %v7855_v19, %v6852_v3  ;;  %v6784_v24 = vld [vmem:[#allocation2 + $0x84] sm:$0xf]  ;;  %v7838_v26 = vld [vmem:[#allocation2 + $0x88] sm:$0xf]  ;;  %v6792_v3 = vld [vmem:[#allocation2 + $0x8c] sm:$0xf] }
0x1327   :  { %v7839_v48 = vld [vmem:[#allocation2 + $0x160] sm:$0xf0]  ;;  %v6786_v63 = vld [vmem:[#allocation2 + $0x164] sm:$0xf0]  ;;  %v7840_v19 = vld [vmem:[#allocation2 + $0x168] sm:$0xf0] }
0x1328   :  { %v3145_v10 = vmax.f32 %v3144_v16, 0.0  ;;  %v6832_v16 = vld [vmem:[#allocation2 + $0x784] sm:$0xf] }
0x132a   :  { %v3146_v7 = vpack.c.bf16 %v3145_v10, %v3145_v10  ;;  %v7851_v10 = vld [vmem:[#allocation2 + $0x860] sm:$0xf0] }
0x132c   :  { %3315 = vmatmul.bf16.vlgmr.msrb.gmra.mxu1 %v3146_v7  ;;  %3328 = vmatmul.bf16.vlgmr.msrb.gmra.mxu2 %v3146_v7 }
0x132d   :  { %3341 = vmatmul.bf16.vlgmr.msra.gmra.mxu3 %v3146_v7  ;;  %v7850_v7 = vld [vmem:[#allocation2 + $0x788] sm:$0xf] }
0x13a9   :  { %v3316_v50 = vpop.f32.mrf.mxu1 }
0x13af   :  { %v3329_v38 = vpop.f32.mrf.mxu2 }
0x13b0   :  { %v3342_v41 = vpop.f32.mrf.mxu3  ;;  %v3348_v55 = vpack.c.bf16 %v3329_v38, %v3316_v50  ;;  %v6833_v50 = vor.u32 %v7851_v10, %v6832_v16  ;;  %v6834_v38 = vld [vmem:[#allocation2 + $0x864] sm:$0xf0]  ;;  %v6793_v16 = vor.u32 %v7840_v19, %v6792_v3  ;;  %v6951_v3 = vld [vmem:[#allocation2 + $0x958] sm:$0xf] }
0x13b1   :  { %v3349_v0 = vpack.c.bf16 %v3342_v41, %v3342_v41  ;;  %v3318_v43 = vpop.f32.mrf.mxu1  ;;  %v6840_v41 = vld [vmem:[#allocation2 + $0x78c] sm:$0xf]  ;;  %v7879_v19 = vld [vmem:[#allocation2 + $0xa34] sm:$0xf0] }
0x13b2   :  { %v6837_v43 = vor.u32 %v7850_v7, %v6834_v38 }
0x13b3   :  { %v3356_v44 = vsel %vm1899_vm11, %v3349_v0, 0  ;;  %v7852_v0 = vld [vmem:[#allocation2 + $0x868] sm:$0xf0] }
0x13b4   :  { %3364 = vmatpush.bf16.msrb.mxu0 %v3356_v44  ;;  %v6841_v44 = vor.u32 %v7852_v0, %v6840_v41 }
0x13b7   :  { %v3331_v56 = vpop.f32.mrf.mxu2 }
0x13b8   :  { %v3344_v51 = vpop.f32.mrf.mxu3  ;;  %3365 = vmatpush.bf16.msrb.mxu0 %v3348_v55  ;;  %v6820_v55 = vld [vmem:[#allocation2 + $0x5c4] sm:$0xf] }
0x13b9   :  { %v7848_v56 = vld [vmem:[#allocation2 + $0x6a0] sm:$0xf0]  ;;  %v7847_v51 = vld [vmem:[#allocation2 + $0x5c8] sm:$0xf] }
0x13bb   :  { %6779 = vmatmul.msk.bf16.vlgmr.msrb.gmra.mxu0 %vm1895_vm12, %v3347_v11  ;;  %v6821_v11 = vor.u32 %v7848_v56, %v6820_v55  ;;  %v8047_v56 = vld [vmem:[#allocation6 + $0x9] ss:$0 sm:$0xff] }
0x13bc   :  { %3611 = vmatpush.bf16.msra.mxu0 %v6873_v30  ;;  %v6817_v30 = vor.u32 %v7846_v28, %v6816_v27  ;;  %v6969_v27 = vld [vmem:[#allocation2 + $0xdb0] sm:$0xf0]  ;;  %v6975_v28 = vld [vmem:[#allocation2 + $0xcd8] sm:$0xf] }
0x13c0   :  { %3612 = vmatpush.bf16.msra.mxu0 %v6861_v61 }
0x13c4   :  { %3613 = vmatpush.bf16.msra.mxu0 %v6849_v5 }
0x13c8   :  { %3614 = vmatpush.bf16.msra.mxu0 %v6837_v43 }
0x1438   :  { %v3367_v39 = vpop.f32.mrf.mxu0 }
0x1439   :  { %v8770_v2 = vadd.f32 %v8046_v54, %v3367_v39  ;;  %v6822_v54 = vld [vmem:[#allocation2 + $0x6a4] sm:$0xf0]  ;;  %v6828_v39 = vld [vmem:[#allocation2 + $0x5cc] sm:$0xf] }
0x143b   :  { %v3371_v18 = vmul.f32 %v8770_v2, %v8770_v2 }
0x143d   :  { %3386 = vmatpush.msra.mxu1 %v3371_v18  ;;  %v7849_v18 = vld [vmem:[#allocation2 + $0x6a8] sm:$0xf0] }
0x143f   :  { %3387 = vmatpush.msra.mxu1 %v8770_v2 }
0x1440   :  { %6780 = vmatmul.msk.f32.vlgmr.msra.gmra.mxu1 %vm1617_vm7, %v8650_v49  ;;  %v3369_v60 = vpop.f32.mrf.mxu0  ;;  %v6856_v49 = vld [vmem:[#allocation2 + $0xb04] sm:$0xf] }
0x1441   :  { %3624 = vmatpush.bf16.msrb.mxu1 %v6877_v32  ;;  %v6825_v60 = vor.u32 %v7847_v51, %v6822_v54  ;;  %v6796_v32 = vld [vmem:[#allocation2 + $0x244] sm:$0xf] }
0x1443   :  { %3615 = vmatpush.bf16.msra.mxu0 %v6825_v60  ;;  %v8812_v60 = vld [vmem:[#allocation9 + $0x88] sm:$0xff] }
0x1445   :  { %3625 = vmatpush.bf16.msrb.mxu1 %v6865_v62  ;;  %v6805_v62 = vor.u32 %v7843_v33, %v6804_v46  ;;  %v6963_v46 = vld [vmem:[#allocation2 + $0xb18] sm:$0xf] }
0x1446   :  { %v7882_v33 = vld [vmem:[#allocation2 + $0xbf4] sm:$0xf0] }
0x1447   :  { %3616 = vmatpush.bf16.msra.mxu0 %v6813_v29  ;;  %v7885_v29 = vld [vmem:[#allocation2 + $0xdb4] sm:$0xf0] }
0x1448   :  { %6781 = vmatmul.msk.f32.gmra.mxu1 %vm1617_vm7, %v8654_v53  ;;  %v6857_v53 = vor.u32 %v7857_v35, %v6856_v49  ;;  %v7842_v49 = vld [vmem:[#allocation2 + $0x320] sm:$0xf0]  ;;  %v7841_v35 = vld [vmem:[#allocation2 + $0x248] sm:$0xf] }
0x1449   :  { %3626 = vmatpush.bf16.msrb.mxu1 %v6853_v14  ;;  %v6801_v61 = vor.u32 %v7841_v35, %v6798_v59  ;;  %v6789_v14 = vor.u32 %v7838_v26, %v6786_v63  ;;  %v7881_v35 = vld [vmem:[#allocation2 + $0xbec] sm:$0xf0]  ;;  %v6957_v59 = vld [vmem:[#allocation2 + $0xbf0] sm:$0xf0] }
0x144a   :  { %3599 = vmatpush.bf16.msrb.mxu3 %v6857_v53  ;;  %v6797_v53 = vor.u32 %v7842_v49, %v6796_v32  ;;  %v6976_v32 = vor.u32 %v7885_v29, %v6975_v28  ;;  %v6955_v49 = vld [vmem:[#allocation2 + $0xb10] sm:$0xf]  ;;  %v7877_v26 = vld [vmem:[#allocation2 + $0x954] sm:$0xf] }
0x144b   :  { %3617 = vmatpush.bf16.msra.mxu0 %v6801_v61  ;;  %v6945_v63 = vld [vmem:[#allocation2 + $0xa30] sm:$0xf0]  ;;  %v7863_v28 = vld [vmem:[#allocation2 + $0x16c] sm:$0xf0] }
0x144c   :  { %v7862_v29 = vld [vmem:[#allocation2 + $0x94] sm:$0xf] }
0x144d   :  { %3627 = vmatpush.bf16.msrb.mxu1 %v6841_v44 }
0x144e   :  { %3600 = vmatpush.bf16.msrb.mxu3 %v6845_v36  ;;  %v6785_v36 = vor.u32 %v7839_v48, %v6784_v24  ;;  %v6943_v24 = vld [vmem:[#allocation2 + $0x950] sm:$0xf] }
0x144f   :  { %3618 = vmatpush.bf16.msra.mxu0 %v6789_v14  ;;  %v7878_v48 = vld [vmem:[#allocation2 + $0xa2c] sm:$0xf0]  ;;  %v6952_v14 = vor.u32 %v7879_v19, %v6951_v3  ;;  %v8141_v3 = vld [vmem:[#allocation7 + $0x160] sm:$0xff] }
0x1450   :  { %v8142_v19 = vld [vmem:[#allocation7 + $0x158] sm:$0xff] }
0x1452   :  { %3601 = vmatpush.bf16.msrb.mxu3 %v6833_v50 }
0x1453   :  { %3686 = vmatpush.msrb.mxu0 %v8658_v1 }
0x1455   :  { %3687 = vmatpush.msrb.mxu0 %v8661_v52 }
0x1456   :  { %3602 = vmatpush.bf16.msrb.mxu3 %v6821_v11 }
0x1457   :  { %3688 = vmatpush.msrb.mxu0 %v8664_v4 }
0x1459   :  { %3689 = vmatpush.msrb.mxu0 %v8667_v8 }
0x145b   :  { %3690 = vmatpush.msrb.mxu0 %v8670_v9 }
0x145d   :  { %3691 = vmatpush.msrb.mxu0 %v8673_v12 }
0x145f   :  { %3692 = vmatpush.msrb.mxu0 %v8676_v13 }
0x1461   :  { %3693 = vmatpush.msrb.mxu0 %v8679_v15 }
0x1463   :  { %3694 = vmatpush.msrb.mxu0 %v8682_v57 }
0x1465   :  { %3695 = vmatpush.msrb.mxu0 %v8685_v17 }
0x1467   :  { %3696 = vmatpush.msrb.mxu0 %v8688_v34 }
0x1469   :  { %3697 = vmatpush.msrb.mxu0 %v8691_v37 }
0x146b   :  { %3698 = vmatpush.msrb.mxu0 %v8695_v42 }
0x146d   :  { %3699 = vmatpush.msrb.mxu0 %v8698_v47 }
0x146f   :  { %3700 = vmatpush.msrb.mxu0 %v8701_v40 }
0x1471   :  { %3701 = vmatpush.msrb.mxu0 %v8704_v45 }
0x14bd   :  { %v3389_v58 = vpop.f32.mrf.mxu1 }
0x14be   :  { %3411 = vmatmul.f32.vlgmr.msra.gmra.mxu2 %v3389_v58  ;;  %v6829_v58 = vor.u32 %v7849_v18, %v6828_v39  ;;  %v8808_v39 = vld [vmem:[#allocation9 + $0x80] sm:$0xff] }
0x14c0   :  { %3628 = vmatpush.bf16.msrb.mxu1 %v6829_v58 }
0x14c4   :  { %3629 = vmatpush.bf16.msrb.mxu1 %v6817_v30 }
0x14c5   :  { %v3392_v20 = vpop.f32.mrf.mxu1 }
0x14c6   :  { %3414 = vmatmul.f32.gmra.mxu2 %v3392_v20  ;;  %v6808_v20 = vld [vmem:[#allocation2 + $0x404] sm:$0xf] }
0x14c7   :  { %v6809_v22 = vor.u32 %v7845_v21, %v6808_v20  ;;  %v6967_v21 = vld [vmem:[#allocation2 + $0xcd0] sm:$0xf] }
0x14c8   :  { %3630 = vmatpush.bf16.msrb.mxu1 %v6805_v62  ;;  %v6968_v25 = vor.u32 %v7884_v6, %v6967_v21  ;;  %v6964_v62 = vor.u32 %v7882_v33, %v6963_v46  ;;  %v6903_v21 = vld [vmem:[#allocation2 + $0x258] sm:$0xf] }
0x14c9   :  { %3603 = vmatpush.bf16.msrb.mxu3 %v6809_v22  ;;  %v7883_v22 = vld [vmem:[#allocation2 + $0xcd4] sm:$0xf] }
0x14ca   :  { %v6972_v30 = vor.u32 %v7883_v22, %v6969_v27  ;;  %v7867_v22 = vld [vmem:[#allocation2 + $0x334] sm:$0xf0]  ;;  %v6883_v27 = vld [vmem:[#allocation2 + $0x90] sm:$0xf] }
0x14cc   :  { %3631 = vmatpush.bf16.msrb.mxu1 %v6793_v16  ;;  %v6931_v16 = vld [vmem:[#allocation2 + $0x790] sm:$0xf] }
0x14cd   :  { %3604 = vmatpush.bf16.msrb.mxu3 %v6797_v53  ;;  %v6956_v53 = vor.u32 %v7881_v35, %v6955_v49  ;;  %v6891_v49 = vld [vmem:[#allocation2 + $0x98] sm:$0xf] }
0x14ce   :  { %v7864_v35 = vld [vmem:[#allocation2 + $0x174] sm:$0xf0] }
0x14d0   :  { %3889 = vmatpush.bf16.msra.mxu1 %v6968_v25  ;;  %v6904_v25 = vor.u32 %v7867_v22, %v6903_v21  ;;  %v7923_v22 = vld [vmem:[#allocation2 + $0xdb8] sm:$0xf0] }
0x14d1   :  { %3605 = vmatpush.bf16.msrb.mxu3 %v6785_v36  ;;  %v6944_v36 = vor.u32 %v7878_v48, %v6943_v24  ;;  %v8139_v48 = vld [vmem:[#allocation7 + $0x170] sm:$0xff] }
0x14d4   :  { %3890 = vmatpush.bf16.msra.mxu1 %v6956_v53 }
0x14d8   :  { %3891 = vmatpush.bf16.msra.mxu1 %v6944_v36  ;;  %v8140_v36 = vld [vmem:[#allocation7 + $0x168] sm:$0xff] }
0x1541   :  { %v3412_v23 = vpop.f32.mrf.mxu2 }
0x1542   :  { %v3418_v5 = vmul.f32 0.0625, %v3412_v23  ;;  %v7880_v23 = vld [vmem:[#allocation2 + $0xb14] sm:$0xf] }
0x1543   :  { %v6960_v61 = vor.u32 %v7880_v23, %v6957_v59  ;;  %v6892_v59 = vor.u32 %v7864_v35, %v6891_v49  ;;  %v7082_v49 = vld [vmem:[#allocation2 + $0x95c] sm:$0xf] }
0x1544   :  { %v3420_v7 = vmul.f32 %v3418_v5, %v3418_v5  ;;  %v3423_v12 = vsub.f32 %v8770_v2, %v3418_v5  ;;  %v6948_v5 = vor.u32 %v7877_v26, %v6945_v63  ;;  %v7913_v35 = vld [vmem:[#allocation2 + $0xa38] sm:$0xf0] }
0x1549   :  { %v3415_v10 = vpop.f32.mrf.mxu2 }
0x154a   :  { %v3419_v50 = vmul.f32 0.0625, %v3415_v10  ;;  %v7875_v10 = vld [vmem:[#allocation2 + $0x86c] sm:$0xf0] }
0x154c   :  { %v3421_v38 = vsub.f32 %v3419_v50, %v3420_v7  ;;  %v7874_v7 = vld [vmem:[#allocation2 + $0x794] sm:$0xf]  ;;  %v6932_v50 = vor.u32 %v7875_v10, %v6931_v16  ;;  %v8145_v10 = vld [vmem:[#allocation7 + $0x140] sm:$0xff] }
0x154e   :  { %v3422_v41 = vmax.f32 %v3421_v38, 0.0  ;;  %v6933_v38 = vld [vmem:[#allocation2 + $0x870] sm:$0xf0]  ;;  %3892 = vmatpush.bf16.msra.mxu1 %v6932_v50 }
0x154f   :  { %v8146_v50 = vld [vmem:[#allocation7 + $0x138] sm:$0xff] }
0x1550   :  { %v3424_v0 = vadd.f32 1e-05, %v3422_v41  ;;  %v6939_v41 = vld [vmem:[#allocation2 + $0x798] sm:$0xf] }
0x1552   :  { %8080 = vrsqrt.f32 %v3424_v0  ;;  %vm3431_vm6 = vweird.f32 %v3424_v0 }
0x1558   :  { %v8081_v1 = vpop.eup %8080 }
0x1559   :  { %v3426_v43 = vmul.f32 %v8081_v1, %v3424_v0  ;;  %vm3432_vm5 = vweird.f32 %v8081_v1  ;;  %v7876_v0 = vld [vmem:[#allocation2 + $0x874] sm:$0xf0] }
0x155a   :  { %vm3433_vm8 = vmor %vm3431_vm6, %vm3432_vm5 }
0x155b   :  { %v3427_v52 = vmul.f32 %v8081_v1, %v3426_v43  ;;  %v6940_v43 = vor.u32 %v7876_v0, %v6939_v41  ;;  %v8147_v41 = vld [vmem:[#allocation7 + $0x130] sm:$0xff] }
0x155d   :  { %v3428_v4 = vmul.f32 0.5, %v3427_v52  ;;  %v6919_v52 = vld [vmem:[#allocation2 + $0x5d0] sm:$0xf] }
0x155f   :  { %v3429_v8 = vsub.f32 1.5, %v3428_v4  ;;  %v7872_v4 = vld [vmem:[#allocation2 + $0x6ac] sm:$0xf0] }
0x1561   :  { %v3430_v9 = vmul.f32 %v8081_v1, %v3429_v8  ;;  %v7871_v8 = vld [vmem:[#allocation2 + $0x5d4] sm:$0xf] }
0x1563   :  { %v3434_v13 = vsel %vm3433_vm8, %v8081_v1, %v3430_v9  ;;  %v6936_v1 = vor.u32 %v7874_v7, %v6933_v38  ;;  %v6920_v9 = vor.u32 %v7872_v4, %v6919_v52  ;;  %v8149_v52 = vld [vmem:[#allocation7 + $0x120] sm:$0xff] }
0x1564   :  { %v3435_v15 = vmul.f32 %v3434_v13, %v3423_v12  ;;  %v6921_v12 = vld [vmem:[#allocation2 + $0x6b0] sm:$0xf0]  ;;  %v6927_v13 = vld [vmem:[#allocation2 + $0x5d8] sm:$0xf] }
0x1565   :  { %3893 = vmatpush.bf16.msra.mxu1 %v6920_v9  ;;  %v8150_v9 = vld [vmem:[#allocation7 + $0x118] sm:$0xff] }
0x1566   :  { %v8796_v57 = vadd.f32 %v3435_v15, %v8735_v31  ;;  %v3638_v31 = vld [vmem:[#allocation4 + $0x120] sm:$0xff]  ;;  %v7873_v15 = vld [vmem:[#allocation2 + $0x6b4] sm:$0xf0] }
0x1568   :  { %v3437_v17 = vpack.c.bf16 %v8796_v57, %v8796_v57 }
0x156a   :  { %3606 = vmatmul.bf16.vlgmr.msrb.gmra.mxu3 %v3437_v17  ;;  %3619 = vmatmul.bf16.vlgmr.msra.gmra.mxu0 %v3437_v17 }
0x156b   :  { %3632 = vmatmul.bf16.vlgmr.msrb.gmra.mxu1 %v3437_v17  ;;  %v6924_v17 = vor.u32 %v7871_v8, %v6921_v12 }
0x15e7   :  { %v3620_v34 = vpop.f32.mrf.mxu0 }
0x15e8   :  { %v3633_v37 = vpop.f32.mrf.mxu1 }
0x15e9   :  { %v3640_v42 = vpack.c.bf16 %v3633_v37, %v3633_v37  ;;  %v6907_v37 = vld [vmem:[#allocation2 + $0x410] sm:$0xf] }
0x15eb   :  { %v3647_v2 = vsel %vm1899_vm11, %v3640_v42, 0  ;;  %v7869_v42 = vld [vmem:[#allocation2 + $0x4ec] sm:$0xf0] }
0x15ec   :  { %3655 = vmatpush.bf16.msrb.mxu2 %v3647_v2  ;;  %v7868_v2 = vld [vmem:[#allocation2 + $0x414] sm:$0xf] }
0x15ed   :  { %v3607_v47 = vpop.f32.mrf.mxu3 }
0x15ee   :  { %v3639_v44 = vpack.c.bf16 %v3620_v34, %v3607_v47  ;;  %v6928_v34 = vor.u32 %v7873_v15, %v6927_v13  ;;  %v6908_v47 = vor.u32 %v7869_v42, %v6907_v37  ;;  %v8151_v15 = vld [vmem:[#allocation7 + $0x110] sm:$0xff]  ;;  %v8153_v42 = vld [vmem:[#allocation7 + $0x100] sm:$0xff] }
0x15ef   :  { %v3622_v40 = vpop.f32.mrf.mxu0 }
0x15f0   :  { %v3635_v55 = vpop.f32.mrf.mxu1  ;;  %3656 = vmatpush.bf16.msrb.mxu2 %v3639_v44  ;;  %v6909_v44 = vld [vmem:[#allocation2 + $0x4f0] sm:$0xf0]  ;;  %v6915_v40 = vld [vmem:[#allocation2 + $0x418] sm:$0xf]  ;;  %3894 = vmatpush.bf16.msra.mxu1 %v6908_v47 }
0x15f1   :  { %v7870_v55 = vld [vmem:[#allocation2 + $0x4f4] sm:$0xf0] }
0x15f3   :  { %6878 = vmatmul.msk.bf16.vlgmr.msrb.gmra.mxu2 %vm1895_vm12, %v3638_v31  ;;  %v6912_v31 = vor.u32 %v7868_v2, %v6909_v44 }
0x15f4   :  { %3902 = vmatpush.bf16.msra.mxu2 %v6972_v30  ;;  %v6884_v30 = vor.u32 %v7863_v28, %v6883_v27 }
0x15f5   :  { %v3609_v45 = vpop.f32.mrf.mxu3 }
0x15f6   :  { %v6916_v45 = vor.u32 %v7870_v55, %v6915_v40 }
0x15f8   :  { %3903 = vmatpush.bf16.msra.mxu2 %v6960_v61 }
0x15fc   :  { %3904 = vmatpush.bf16.msra.mxu2 %v6948_v5  ;;  %v8143_v5 = vld [vmem:[#allocation7 + $0x150] sm:$0xff] }
0x1600   :  { %3905 = vmatpush.bf16.msra.mxu2 %v6936_v1  ;;  %v8148_v1 = vld [vmem:[#allocation7 + $0x128] sm:$0xff] }
0x1604   :  { %3906 = vmatpush.bf16.msra.mxu2 %v6924_v17 }
0x1608   :  { %3907 = vmatpush.bf16.msra.mxu2 %v6912_v31 }
0x1676   :  { %v3658_v51 = vpop.f32.mrf.mxu2 }
0x1677   :  { %v8803_v11 = vadd.f32 %v8047_v56, %v3658_v51  ;;  %v6895_v51 = vld [vmem:[#allocation2 + $0x250] sm:$0xf] }
0x1679   :  { %v3662_v54 = vmul.f32 %v8803_v11, %v8803_v11 }
0x167b   :  { %3677 = vmatpush.msra.mxu3 %v3662_v54  ;;  %v7866_v54 = vld [vmem:[#allocation2 + $0x32c] sm:$0xf0] }
0x167d   :  { %3678 = vmatpush.msra.mxu3 %v8803_v11 }
0x167e   :  { %6879 = vmatmul.msk.f32.vlgmr.msra.gmra.mxu3 %vm1617_vm7, %v8808_v39  ;;  %v3660_v18 = vpop.f32.mrf.mxu2 }
0x167f   :  { %3915 = vmatpush.bf16.msrb.mxu3 %v6976_v32  ;;  %v7865_v18 = vld [vmem:[#allocation2 + $0x254] sm:$0xf] }
0x1680   :  { %v6885_v32 = vld [vmem:[#allocation2 + $0x170] sm:$0xf0] }
0x1681   :  { %v6888_v53 = vor.u32 %v7862_v29, %v6885_v32  ;;  %v7102_v29 = vld [vmem:[#allocation2 + $0xb1c] sm:$0xf] }
0x1683   :  { %3916 = vmatpush.bf16.msrb.mxu3 %v6964_v62  ;;  %v8138_v62 = vld [vmem:[#allocation7 + $0x178] sm:$0xff] }
0x1686   :  { %6880 = vmatmul.msk.f32.gmra.mxu3 %vm1617_vm7, %v8812_v60 }
0x1687   :  { %3917 = vmatpush.bf16.msrb.mxu3 %v6952_v14  ;;  %v8144_v14 = vld [vmem:[#allocation7 + $0x148] sm:$0xff] }
0x168b   :  { %3918 = vmatpush.bf16.msrb.mxu3 %v6940_v43 }
0x168f   :  { %3919 = vmatpush.bf16.msrb.mxu3 %v6928_v34  ;;  %v8152_v34 = vld [vmem:[#allocation7 + $0x108] sm:$0xff] }
0x1693   :  { %3920 = vmatpush.bf16.msrb.mxu3 %v6916_v45 }
0x1697   :  { %3921 = vmatpush.bf16.msrb.mxu3 %v6904_v25 }
0x169b   :  { %3922 = vmatpush.bf16.msrb.mxu3 %v6892_v59 }
0x1701   :  { %v3680_v58 = vpop.f32.mrf.mxu3 }
0x1702   :  { %3702 = vmatmul.f32.vlgmr.msrb.gmra.mxu0 %v3680_v58  ;;  %v6896_v58 = vor.u32 %v7866_v54, %v6895_v51  ;;  %v3929_v51 = vld [vmem:[#allocation4 + $0x140] sm:$0xff]  ;;  %v8048_v54 = vld [vmem:[#allocation6 + $0xa] ss:$0 sm:$0xff] }
0x1704   :  { %3895 = vmatpush.bf16.msra.mxu1 %v6896_v58 }
0x1708   :  { %3896 = vmatpush.bf16.msra.mxu1 %v6884_v30  ;;  %v7918_v30 = vld [vmem:[#allocation2 + $0xbf8] sm:$0xf0] }
0x1709   :  { %v3683_v20 = vpop.f32.mrf.mxu3  ;;  %v7103_v32 = vor.u32 %v7918_v30, %v7102_v29  ;;  %v7902_v29 = vld [vmem:[#allocation2 + $0x5e8] sm:$0xf] }
0x170a   :  { %3705 = vmatmul.f32.gmra.mxu0 %v3683_v20  ;;  %v6897_v20 = vld [vmem:[#allocation2 + $0x330] sm:$0xf0]  ;;  %v7052_v30 = vld [vmem:[#allocation2 + $0x6c4] sm:$0xf0] }
0x170b   :  { %v6900_v6 = vor.u32 %v7865_v18, %v6897_v20 }
0x170d   :  { %3908 = vmatpush.bf16.msra.mxu2 %v6900_v6  ;;  %v7122_v6 = vld [vmem:[#allocation2 + $0xcdc] sm:$0xf] }
0x170e   :  { %v7123_v25 = vor.u32 %v7923_v22, %v7122_v6  ;;  %v7901_v6 = vld [vmem:[#allocation2 + $0x5e0] sm:$0xf] }
0x170f   :  { %v7044_v22 = vld [vmem:[#allocation2 + $0x6bc] sm:$0xf0] }
0x1710   :  { %4276 = vmatpush.bf16.msra.mxu3 %v7123_v25  ;;  %v7050_v25 = vld [vmem:[#allocation2 + $0x5e4] sm:$0xf] }
0x1711   :  { %3909 = vmatpush.bf16.msra.mxu2 %v6888_v53  ;;  %v7908_v53 = vld [vmem:[#allocation2 + $0x878] sm:$0xf0] }
0x1714   :  { %4277 = vmatpush.bf16.msra.mxu3 %v7103_v32 }
0x1715   :  { %3977 = vmatpush.msrb.mxu2 %v8138_v62  ;;  %v7924_v62 = vld [vmem:[#allocation2 + $0xdc0] sm:$0xf0] }
0x1717   :  { %3978 = vmatpush.msrb.mxu2 %v8139_v48  ;;  %v7132_v48 = vld [vmem:[#allocation2 + $0xdc4] sm:$0xf0] }
0x1719   :  { %3979 = vmatpush.msrb.mxu2 %v8140_v36 }
0x171b   :  { %3980 = vmatpush.msrb.mxu2 %v8141_v3  ;;  %v7903_v3 = vld [vmem:[#allocation2 + $0x6b8] sm:$0xf0] }
0x171d   :  { %3981 = vmatpush.msrb.mxu2 %v8142_v19 }
0x171f   :  { %3982 = vmatpush.msrb.mxu2 %v8143_v5  ;;  %v7916_v5 = vld [vmem:[#allocation2 + $0xb20] sm:$0xf] }
0x1721   :  { %3983 = vmatpush.msrb.mxu2 %v8144_v14  ;;  %v7104_v14 = vld [vmem:[#allocation2 + $0xbfc] sm:$0xf0] }
0x1723   :  { %3984 = vmatpush.msrb.mxu2 %v8145_v10  ;;  %v7107_v10 = vor.u32 %v7916_v5, %v7104_v14  ;;  %v7010_v5 = vld [vmem:[#allocation2 + $0x264] sm:$0xf] }
0x1725   :  { %3985 = vmatpush.msrb.mxu2 %v8146_v50  ;;  %v7917_v50 = vld [vmem:[#allocation2 + $0xb28] sm:$0xf] }
0x1727   :  { %3986 = vmatpush.msrb.mxu2 %v8147_v41 }
0x1729   :  { %3987 = vmatpush.msrb.mxu2 %v8148_v1  ;;  %v7022_v1 = vld [vmem:[#allocation2 + $0x41c] sm:$0xf] }
0x172b   :  { %3988 = vmatpush.msrb.mxu2 %v8149_v52 }
0x172d   :  { %3989 = vmatpush.msrb.mxu2 %v8150_v9  ;;  %v7090_v9 = vld [vmem:[#allocation2 + $0x964] sm:$0xf] }
0x172f   :  { %3990 = vmatpush.msrb.mxu2 %v8151_v15  ;;  %v7912_v15 = vld [vmem:[#allocation2 + $0x968] sm:$0xf] }
0x1731   :  { %3991 = vmatpush.msrb.mxu2 %v8152_v34 }
0x1733   :  { %3992 = vmatpush.msrb.mxu2 %v8153_v42  ;;  %v7002_v42 = vld [vmem:[#allocation2 + $0x25c] sm:$0xf] }
0x177f   :  { %v3703_v56 = vpop.f32.mrf.mxu0 }
0x1780   :  { %v3709_v23 = vmul.f32 0.0625, %v3703_v56 }
0x1782   :  { %v3711_v33 = vmul.f32 %v3709_v23, %v3709_v23  ;;  %v3714_v8 = vsub.f32 %v8803_v11, %v3709_v23  ;;  %v7083_v23 = vor.u32 %v7913_v35, %v7082_v49  ;;  %v7055_v49 = vor.u32 %v7902_v29, %v7052_v30  ;;  %v7138_v35 = vld [vmem:[#allocation2 + $0xcec] sm:$0xf] }
0x1784   :  { %4278 = vmatpush.bf16.msra.mxu3 %v7083_v23  ;;  %v7925_v23 = vld [vmem:[#allocation2 + $0xdc8] sm:$0xf0] }
0x1787   :  { %v3706_v46 = vpop.f32.mrf.mxu0 }
0x1788   :  { %v3710_v61 = vmul.f32 0.0625, %v3706_v46  ;;  %v7124_v46 = vld [vmem:[#allocation2 + $0xdbc] sm:$0xf0] }
0x178a   :  { %v3712_v24 = vsub.f32 %v3710_v61, %v3711_v33  ;;  %v7130_v33 = vld [vmem:[#allocation2 + $0xce4] sm:$0xf] }
0x178c   :  { %v3713_v26 = vmax.f32 %v3712_v24, 0.0  ;;  %v7922_v24 = vld [vmem:[#allocation2 + $0xce8] sm:$0xf] }
0x178d   :  { %v7135_v36 = vor.u32 %v7922_v24, %v7132_v48 }
0x178e   :  { %v3715_v63 = vadd.f32 1e-05, %v3713_v26  ;;  %v7131_v26 = vor.u32 %v7924_v62, %v7130_v33  ;;  %v7899_v33 = vld [vmem:[#allocation2 + $0x500] sm:$0xf0]  ;;  %v7032_v62 = vld [vmem:[#allocation2 + $0x504] sm:$0xf0] }
0x1790   :  { %8082 = vrsqrt.f32 %v3715_v63  ;;  %vm3722_vm10 = vweird.f32 %v3715_v63 }
0x1796   :  { %v8083_v16 = vpop.eup %8082 }
0x1797   :  { %v3717_v7 = vmul.f32 %v8083_v16, %v3715_v63  ;;  %vm3723_vm9 = vweird.f32 %v8083_v16  ;;  %v7042_v63 = vld [vmem:[#allocation2 + $0x5dc] sm:$0xf] }
0x1798   :  { %vm3724_vm13 = vmor %vm3722_vm10, %vm3723_vm9  ;;  %v7043_v19 = vor.u32 %v7903_v3, %v7042_v63  ;;  %v7891_v3 = vld [vmem:[#allocation2 + $0x260] sm:$0xf] }
0x1799   :  { %v3718_v38 = vmul.f32 %v8083_v16, %v3717_v7  ;;  %v7919_v7 = vld [vmem:[#allocation2 + $0xc00] sm:$0xf0] }
0x179b   :  { %v3719_v0 = vmul.f32 0.5, %v3718_v38  ;;  %v7112_v38 = vld [vmem:[#allocation2 + $0xc04] sm:$0xf0] }
0x179d   :  { %v3720_v43 = vsub.f32 1.5, %v3719_v0  ;;  %v7115_v0 = vor.u32 %v7917_v50, %v7112_v38  ;;  %v7012_v50 = vld [vmem:[#allocation2 + $0x344] sm:$0xf0] }
0x179f   :  { %v3721_v4 = vmul.f32 %v8083_v16, %v3720_v43  ;;  %v7898_v43 = vld [vmem:[#allocation2 + $0x4f8] sm:$0xf0] }
0x17a0   :  { %v7023_v52 = vor.u32 %v7898_v43, %v7022_v1  ;;  %v7915_v1 = vld [vmem:[#allocation2 + $0xa48] sm:$0xf0] }
0x17a1   :  { %v3725_v12 = vsel %vm3724_vm13, %v8083_v16, %v3721_v4  ;;  %v7110_v16 = vld [vmem:[#allocation2 + $0xb24] sm:$0xf]  ;;  %v7911_v4 = vld [vmem:[#allocation2 + $0x960] sm:$0xf] }
0x17a2   :  { %v3726_v13 = vmul.f32 %v3725_v12, %v3714_v8  ;;  %v7111_v41 = vor.u32 %v7919_v7, %v7110_v16  ;;  %v7084_v8 = vld [vmem:[#allocation2 + $0xa3c] sm:$0xf0]  ;;  %v7892_v7 = vld [vmem:[#allocation2 + $0x268] sm:$0xf] }
0x17a3   :  { %v7087_v12 = vor.u32 %v7911_v4, %v7084_v8  ;;  %v6984_v4 = vld [vmem:[#allocation2 + $0x17c] sm:$0xf0]  ;;  %v6990_v8 = vld [vmem:[#allocation2 + $0xa4] sm:$0xf] }
0x17a4   :  { %v3727_v17 = vmax.f32 %v3726_v13, 0.0  ;;  %v7914_v13 = vld [vmem:[#allocation2 + $0xa40] sm:$0xf0] }
0x17a5   :  { %v7091_v34 = vor.u32 %v7914_v13, %v7090_v9  ;;  %v7887_v13 = vld [vmem:[#allocation2 + $0xa8] sm:$0xf] }
0x17a6   :  { %v3728_v37 = vpack.c.bf16 %v3727_v17, %v3727_v17  ;;  %v7092_v17 = vld [vmem:[#allocation2 + $0xa44] sm:$0xf0] }
0x17a8   :  { %3897 = vmatmul.bf16.vlgmr.msra.gmra.mxu1 %v3728_v37  ;;  %3910 = vmatmul.bf16.vlgmr.msra.gmra.mxu2 %v3728_v37 }
0x17a9   :  { %3923 = vmatmul.bf16.vlgmr.msrb.gmra.mxu3 %v3728_v37  ;;  %4315 = vmatpush.bf16.msra.mxu2 %v7135_v36  ;;  %v7095_v37 = vor.u32 %v7912_v15, %v7092_v17  ;;  %v7920_v36 = vld [vmem:[#allocation2 + $0xc08] sm:$0xf0]  ;;  %v6992_v15 = vld [vmem:[#allocation2 + $0x184] sm:$0xf0] }
0x17ad   :  { %4316 = vmatpush.bf16.msra.mxu2 %v7115_v0  ;;  %v7098_v0 = vld [vmem:[#allocation2 + $0x96c] sm:$0xf] }
0x17ae   :  { %v7099_v43 = vor.u32 %v7915_v1, %v7098_v0 }
0x17b1   :  { %4317 = vmatpush.bf16.msra.mxu2 %v7095_v37  ;;  %v6995_v37 = vor.u32 %v7887_v13, %v6992_v15  ;;  %v8157_v13 = vld [vmem:[#allocation9 + $0x58] sm:$0xff] }
0x1825   :  { %v3898_v2 = vpop.f32.mrf.mxu1 }
0x182b   :  { %v3911_v47 = vpop.f32.mrf.mxu2 }
0x182c   :  { %v3924_v44 = vpop.f32.mrf.mxu3  ;;  %v3930_v31 = vpack.c.bf16 %v3911_v47, %v3898_v2  ;;  %v7893_v2 = vld [vmem:[#allocation2 + $0x338] sm:$0xf0] }
0x182d   :  { %v3931_v11 = vpack.c.bf16 %v3924_v44, %v3924_v44  ;;  %v3900_v40 = vpop.f32.mrf.mxu1  ;;  %v7003_v47 = vor.u32 %v7893_v2, %v7002_v42  ;;  %v7906_v44 = vld [vmem:[#allocation2 + $0x7a0] sm:$0xf]  ;;  %v7078_v42 = vld [vmem:[#allocation2 + $0x7ac] sm:$0xf] }
0x182e   :  { %v7070_v40 = vld [vmem:[#allocation2 + $0x7a4] sm:$0xf]  ;;  %v7910_v2 = vld [vmem:[#allocation2 + $0x888] sm:$0xf0] }
0x182f   :  { %v3938_v55 = vsel %vm1899_vm11, %v3931_v11, 0  ;;  %v7064_v11 = vld [vmem:[#allocation2 + $0x87c] sm:$0xf0] }
0x1830   :  { %3946 = vmatpush.bf16.msra.mxu0 %v3938_v55  ;;  %v7067_v55 = vor.u32 %v7906_v44, %v7064_v11  ;;  %v7058_v11 = vld [vmem:[#allocation2 + $0x5ec] sm:$0xf] }
0x1833   :  { %v3913_v45 = vpop.f32.mrf.mxu2 }
0x1834   :  { %v3926_v56 = vpop.f32.mrf.mxu3  ;;  %3947 = vmatpush.bf16.msra.mxu0 %v3930_v31  ;;  %v7909_v31 = vld [vmem:[#allocation2 + $0x880] sm:$0xf0]  ;;  %v7907_v45 = vld [vmem:[#allocation2 + $0x7a8] sm:$0xf] }
0x1835   :  { %v7072_v56 = vld [vmem:[#allocation2 + $0x884] sm:$0xf0] }
0x1837   :  { %6977 = vmatmul.msk.bf16.vlgmr.msra.gmra.mxu0 %vm1895_vm12, %v3929_v51  ;;  %v7071_v51 = vor.u32 %v7909_v31, %v7070_v40  ;;  %v7905_v40 = vld [vmem:[#allocation2 + $0x6c8] sm:$0xf0] }
0x18b4   :  { %v3949_v18 = vpop.f32.mrf.mxu0 }
0x18b5   :  { %v8819_v58 = vadd.f32 %v8048_v54, %v3949_v18  ;;  %v7075_v54 = vor.u32 %v7907_v45, %v7072_v56  ;;  %v6982_v18 = vld [vmem:[#allocation2 + $0x9c] sm:$0xf]  ;;  %v7059_v45 = vor.u32 %v7905_v40, %v7058_v11  ;;  %v7038_v56 = vld [vmem:[#allocation2 + $0x42c] sm:$0xf]  ;;  %v7271_v40 = vld [vmem:[#allocation2 + $0xb30] sm:$0xf] }
0x18b7   :  { %v3953_v20 = vmul.f32 %v8819_v58, %v8819_v58  ;;  %4318 = vmatpush.bf16.msra.mxu2 %v7075_v54 }
0x18b9   :  { %3968 = vmatpush.msrb.mxu1 %v3953_v20  ;;  %v7888_v20 = vld [vmem:[#allocation2 + $0x178] sm:$0xf0] }
0x18bb   :  { %3969 = vmatpush.msrb.mxu1 %v8819_v58  ;;  %4319 = vmatpush.bf16.msra.mxu2 %v7055_v49 }
0x18bc   :  { %6978 = vmatmul.msk.f32.vlgmr.msrb.gmra.mxu1 %vm1617_vm7, %v8808_v39  ;;  %v3951_v21 = vpop.f32.mrf.mxu0  ;;  %v7062_v39 = vld [vmem:[#allocation2 + $0x79c] sm:$0xf] }
0x18bd   :  { %v7063_v59 = vor.u32 %v7908_v53, %v7062_v39  ;;  %4302 = vmatpush.bf16.msra.mxu1 %v7131_v26  ;;  %v6983_v21 = vor.u32 %v7888_v20, %v6982_v18  ;;  %v7139_v39 = vor.u32 %v7925_v23, %v7138_v35  ;;  %v7896_v53 = vld [vmem:[#allocation2 + $0x420] sm:$0xf]  ;;  %v7118_v26 = vld [vmem:[#allocation2 + $0xb2c] sm:$0xf] }
0x18be   :  { %v7119_v63 = vor.u32 %v7920_v36, %v7118_v26 }
0x18bf   :  { %4279 = vmatpush.bf16.msra.mxu3 %v7063_v59  ;;  %v7024_v59 = vld [vmem:[#allocation2 + $0x4fc] sm:$0xf0] }
0x18c1   :  { %4303 = vmatpush.bf16.msra.mxu1 %v7111_v41  ;;  %v7015_v41 = vor.u32 %v7892_v7, %v7012_v50 }
0x18c3   :  { %4280 = vmatpush.bf16.msra.mxu3 %v7043_v19  ;;  %v7004_v19 = vld [vmem:[#allocation2 + $0x33c] sm:$0xf0] }
0x18c4   :  { %6979 = vmatmul.msk.f32.gmra.mxu1 %vm1617_vm7, %v8812_v60  ;;  %v7921_v60 = vld [vmem:[#allocation2 + $0xce0] sm:$0xf]  ;;  %v7007_v16 = vor.u32 %v7891_v3, %v7004_v19 }
0x18c5   :  { %v7127_v61 = vor.u32 %v7921_v60, %v7124_v46  ;;  %4304 = vmatpush.bf16.msra.mxu1 %v7091_v34  ;;  %v7030_v60 = vld [vmem:[#allocation2 + $0x424] sm:$0xf]  ;;  %v7027_v46 = vor.u32 %v7896_v53, %v7024_v59 }
0x18c6   :  { %v7031_v24 = vor.u32 %v7899_v33, %v7030_v60 }
0x18c7   :  { %4289 = vmatpush.bf16.msrb.mxu0 %v7127_v61  ;;  %4281 = vmatpush.bf16.msra.mxu3 %v7023_v52  ;;  %v7897_v61 = vld [vmem:[#allocation2 + $0x428] sm:$0xf]  ;;  %v7886_v52 = vld [vmem:[#allocation2 + $0xa0] sm:$0xf] }
0x18c8   :  { %v7035_v48 = vor.u32 %v7897_v61, %v7032_v62  ;;  %v6987_v9 = vor.u32 %v7886_v52, %v6984_v4 }
0x18c9   :  { %4305 = vmatpush.bf16.msra.mxu1 %v7071_v51  ;;  %v7900_v51 = vld [vmem:[#allocation2 + $0x508] sm:$0xf0] }
0x18ca   :  { %4320 = vmatpush.bf16.msra.mxu2 %v7035_v48  ;;  %v7039_v18 = vor.u32 %v7900_v51, %v7038_v56  ;;  %v7251_v51 = vld [vmem:[#allocation2 + $0x970] sm:$0xf] }
0x18cb   :  { %4290 = vmatpush.bf16.msrb.mxu0 %v7107_v10  ;;  %4282 = vmatpush.bf16.msra.mxu3 %v7003_v47  ;;  %v7894_v10 = vld [vmem:[#allocation2 + $0x340] sm:$0xf0]  ;;  %v7079_v47 = vor.u32 %v7910_v2, %v7078_v42  ;;  %v7291_v2 = vld [vmem:[#allocation2 + $0xcf0] sm:$0xf] }
0x18cc   :  { %v7011_v38 = vor.u32 %v7894_v10, %v7010_v5  ;;  %v7926_v10 = vld [vmem:[#allocation4 + $0x164] sm:$0xf0] }
0x18ce   :  { %4321 = vmatpush.bf16.msra.mxu2 %v7015_v41  ;;  %v8049_v41 = vld [vmem:[#allocation6 + $0xb] ss:$0 sm:$0xff] }
0x18cf   :  { %4291 = vmatpush.bf16.msrb.mxu0 %v7087_v12  ;;  %4283 = vmatpush.bf16.msra.mxu3 %v6983_v21  ;;  %v7889_v12 = vld [vmem:[#allocation2 + $0x180] sm:$0xf0]  ;;  %v7018_v21 = vld [vmem:[#allocation2 + $0x26c] sm:$0xf] }
0x18d0   :  { %v6991_v34 = vor.u32 %v7889_v12, %v6990_v8  ;;  %v8154_v8 = vld [vmem:[#allocation9 + $0x40] sm:$0xff]  ;;  %v8156_v12 = vld [vmem:[#allocation9 + $0x50] sm:$0xff] }
0x18d2   :  { %4322 = vmatpush.bf16.msra.mxu2 %v6995_v37 }
0x18d3   :  { %4292 = vmatpush.bf16.msrb.mxu0 %v7067_v55  ;;  %4328 = vmatpush.bf16.msrb.mxu3 %v7139_v39 }
0x18d7   :  { %4329 = vmatpush.bf16.msrb.mxu3 %v7119_v63 }
0x18db   :  { %4330 = vmatpush.bf16.msrb.mxu3 %v7099_v43 }
0x18df   :  { %4331 = vmatpush.bf16.msrb.mxu3 %v7079_v47  ;;  %v7964_v47 = vld [vmem:[#allocation2 + $0xdcc] sm:$0xf0] }
0x18e3   :  { %4332 = vmatpush.bf16.msrb.mxu3 %v7059_v45 }
0x18e7   :  { %4333 = vmatpush.bf16.msrb.mxu3 %v7039_v18 }
0x1939   :  { %v3971_v27 = vpop.f32.mrf.mxu1 }
0x193a   :  { %3993 = vmatmul.f32.vlgmr.msrb.gmra.mxu2 %v3971_v27  ;;  %v7047_v27 = vor.u32 %v7901_v6, %v7044_v22  ;;  %v7895_v6 = vld [vmem:[#allocation2 + $0x348] sm:$0xf0] }
0x193c   :  { %4293 = vmatpush.bf16.msrb.mxu0 %v7047_v27  ;;  %v6998_v27 = vld [vmem:[#allocation2 + $0xac] sm:$0xf] }
0x1940   :  { %4294 = vmatpush.bf16.msrb.mxu0 %v7027_v46 }
0x1941   :  { %v3974_v28 = vpop.f32.mrf.mxu1 }
0x1942   :  { %3996 = vmatmul.f32.gmra.mxu2 %v3974_v28  ;;  %v7904_v28 = vld [vmem:[#allocation2 + $0x6c0] sm:$0xf0] }
0x1943   :  { %v7051_v32 = vor.u32 %v7904_v28, %v7050_v25  ;;  %v7019_v25 = vor.u32 %v7895_v6, %v7018_v21  ;;  %v7890_v28 = vld [vmem:[#allocation2 + $0x188] sm:$0xf0]  ;;  %v7231_v6 = vld [vmem:[#allocation2 + $0x7b0] sm:$0xf] }
0x1944   :  { %4295 = vmatpush.bf16.msrb.mxu0 %v7007_v16  ;;  %v6999_v29 = vor.u32 %v7890_v28, %v6998_v27  ;;  %v7142_v16 = vld [vmem:[#allocation4 + $0x160] sm:$0xf]  ;;  %v7962_v28 = vld [vmem:[#allocation2 + $0xcf4] sm:$0xf] }
0x1945   :  { %4306 = vmatpush.bf16.msra.mxu1 %v7051_v32  ;;  %4334 = vmatpush.bf16.msrb.mxu3 %v7019_v25  ;;  %v7143_v50 = vor.u32 %v7926_v10, %v7142_v16  ;;  %v7952_v10 = vld [vmem:[#allocation2 + $0x974] sm:$0xf] }
0x1948   :  { %4296 = vmatpush.bf16.msrb.mxu0 %v6987_v9  ;;  %v8155_v9 = vld [vmem:[#allocation9 + $0x48] sm:$0xff] }
0x1949   :  { %4307 = vmatpush.bf16.msra.mxu1 %v7031_v24  ;;  %4335 = vmatpush.bf16.msrb.mxu3 %v6999_v29  ;;  %v7293_v29 = vld [vmem:[#allocation2 + $0xdd0] sm:$0xf0] }
0x194d   :  { %4308 = vmatpush.bf16.msra.mxu1 %v7011_v38 }
0x1951   :  { %4309 = vmatpush.bf16.msra.mxu1 %v6991_v34 }
0x19bd   :  { %v3994_v14 = vpop.f32.mrf.mxu2 }
0x19be   :  { %v4000_v17 = vmul.f32 0.0625, %v3994_v14 }
0x19c0   :  { %v4002_v55 = vmul.f32 %v4000_v17, %v4000_v17  ;;  %v4005_v53 = vsub.f32 %v8819_v58, %v4000_v17 }
0x19c5   :  { %v3997_v44 = vpop.f32.mrf.mxu2 }
0x19c6   :  { %v4001_v31 = vmul.f32 0.0625, %v3997_v44  ;;  %v7292_v44 = vor.u32 %v7964_v47, %v7291_v2 }
0x19c8   :  { %v4003_v54 = vsub.f32 %v4001_v31, %v4002_v55  ;;  %v7959_v55 = vld [vmem:[#allocation2 + $0xc0c] sm:$0xf0] }
0x19c9   :  { %v7272_v31 = vor.u32 %v7959_v55, %v7271_v40  ;;  %v7239_v40 = vld [vmem:[#allocation2 + $0x7b8] sm:$0xf] }
0x19ca   :  { %v4004_v20 = vmax.f32 %v4003_v54, 0.0  ;;  %v7954_v54 = vld [vmem:[#allocation2 + $0xa4c] sm:$0xf0]  ;;  %v7950_v55 = vld [vmem:[#allocation2 + $0x894] sm:$0xf0] }
0x19cb   :  { %v7252_v18 = vor.u32 %v7954_v54, %v7251_v51  ;;  %v7151_v51 = vld [vmem:[#allocation2 + $0xb0] sm:$0xf] }
0x19cc   :  { %v4006_v22 = vadd.f32 1e-05, %v4004_v20 }
0x19ce   :  { %8084 = vrsqrt.f32 %v4006_v22  ;;  %vm4013_vm12 = vweird.f32 %v4006_v22 }
0x19d4   :  { %v8085_v30 = vpop.eup %8084 }
0x19d5   :  { %v4008_v32 = vmul.f32 %v8085_v30, %v4006_v22  ;;  %vm4014_vm7 = vweird.f32 %v8085_v30  ;;  %v7949_v22 = vld [vmem:[#allocation2 + $0x88c] sm:$0xf0] }
0x19d6   :  { %vm4015_vm15 = vmor %vm4013_vm12, %vm4014_vm7  ;;  %v7232_v27 = vor.u32 %v7949_v22, %v7231_v6  ;;  %v7942_v6 = vld [vmem:[#allocation2 + $0x5f4] sm:$0xf] }
0x19d7   :  { %v4009_v49 = vmul.f32 %v8085_v30, %v4008_v32 }
0x19d9   :  { %v4010_v35 = vmul.f32 0.5, %v4009_v49  ;;  %v7296_v49 = vor.u32 %v7962_v28, %v7293_v29  ;;  %v7213_v28 = vld [vmem:[#allocation2 + $0x6d0] sm:$0xf0]  ;;  %v7219_v29 = vld [vmem:[#allocation2 + $0x5f8] sm:$0xf] }
0x19db   :  { %v4011_v23 = vsub.f32 1.5, %v4010_v35  ;;  %v7965_v35 = vld [vmem:[#allocation2 + $0xdd4] sm:$0xf0] }
0x19dd   :  { %v4012_v39 = vmul.f32 %v8085_v30, %v4011_v23  ;;  %v7963_v23 = vld [vmem:[#allocation2 + $0xcfc] sm:$0xf] }
0x19df   :  { %v4016_v59 = vsel %vm4015_vm15, %v8085_v30, %v4012_v39  ;;  %v7299_v30 = vld [vmem:[#allocation2 + $0xcf8] sm:$0xf]  ;;  %v7301_v39 = vld [vmem:[#allocation2 + $0xdd8] sm:$0xf0]  ;;  %vm4843_vm15 = vcmask 654336  }
0x19e0   :  { %v4017_v60 = vmul.f32 %v4016_v59, %v4005_v53  ;;  %v7300_v59 = vor.u32 %v7965_v35, %v7299_v30  ;;  %v7945_v30 = vld [vmem:[#allocation2 + $0x6d4] sm:$0xf0]  ;;  %v7216_v35 = vor.u32 %v7942_v6, %v7213_v28  ;;  %v7928_v6 = vld [vmem:[#allocation2 + $0xbc] sm:$0xf] }
0x19e2   :  { %v4018_v46 = vadd.f32 %v4017_v60, %v8796_v57  ;;  %v7304_v60 = vor.u32 %v7963_v23, %v7301_v39  ;;  %4779 = vmatpush.bf16.msrb.mxu2 %v7300_v59  ;;  %v7220_v23 = vor.u32 %v7945_v30, %v7219_v29  ;;  %v7221_v39 = vld [vmem:[#allocation2 + $0x6d8] sm:$0xf0]  ;;  %v7966_v59 = vld [vmem:[#allocation2 + $0xddc] sm:$0xf0] }
0x19e4   :  { %v4019_v33 = vpack.c.bf16 %v4018_v46, %v4018_v46 }
0x19e6   :  { %4284 = vmatmul.bf16.vlgmr.msra.gmra.mxu3 %v4019_v33  ;;  %4297 = vmatmul.bf16.vlgmr.msrb.gmra.mxu0 %v4019_v33 }
0x19e7   :  { %4310 = vmatmul.bf16.vlgmr.msra.gmra.mxu1 %v4019_v33  ;;  %4323 = vmatmul.bf16.vlgmr.msra.gmra.mxu2 %v4019_v33 }
0x19e8   :  { %4793 = vmatpush.bf16.msra.mxu3 %v7304_v60 }
0x19f6   :  { %4336 = vmatmul.bf16.vlgmr.msrb.gmra.mxu3 %v4019_v33  ;;  %v7211_v33 = vld [vmem:[#allocation2 + $0x5f0] sm:$0xf] }
0x1a63   :  { %v4298_v61 = vpop.f32.mrf.mxu0 }
0x1a64   :  { %v4311_v62 = vpop.f32.mrf.mxu1 }
0x1a69   :  { %v4285_v24 = vpop.f32.mrf.mxu3 }
0x1a6a   :  { %v4324_v48 = vpop.f32.mrf.mxu2  ;;  %v4344_v7 = vpack.c.bf16 %v4298_v61, %v4285_v24  ;;  %v7944_v61 = vld [vmem:[#allocation2 + $0x6cc] sm:$0xf0]  ;;  %v7957_v24 = vld [vmem:[#allocation2 + $0xb34] sm:$0xf] }
0x1a6b   :  { %v4300_v26 = vpop.f32.mrf.mxu0  ;;  %v4345_v57 = vpack.c.bf16 %v4324_v48, %v4311_v62  ;;  %v7212_v62 = vor.u32 %v7944_v61, %v7211_v33  ;;  %v7273_v48 = vld [vmem:[#allocation2 + $0xc10] sm:$0xf0]  ;;  %v7199_v61 = vld [vmem:[#allocation2 + $0x438] sm:$0xf] }
0x1a6c   :  { %v4313_v36 = vpop.f32.mrf.mxu1  ;;  %v7279_v26 = vld [vmem:[#allocation2 + $0xb38] sm:$0xf]  ;;  %v7193_v33 = vld [vmem:[#allocation2 + $0x510] sm:$0xf0] }
0x1a71   :  { %v4287_v63 = vpop.f32.mrf.mxu3 }
0x1a72   :  { %v4326_v3 = vpop.f32.mrf.mxu2  ;;  %v7276_v63 = vor.u32 %v7957_v24, %v7273_v48  ;;  %v7940_v48 = vld [vmem:[#allocation2 + $0x514] sm:$0xf0] }
0x1a73   :  { %v7960_v3 = vld [vmem:[#allocation2 + $0xc14] sm:$0xf0] }
0x1a79   :  { %v4337_v58 = vpop.f32.mrf.mxu3 }
0x1a7a   :  { %v4346_v19 = vpack.c.bf16 %v4337_v58, %v4337_v58  ;;  %v7958_v58 = vld [vmem:[#allocation2 + $0xb3c] sm:$0xf] }
0x1a7c   :  { %v4359_v5 = vsel %vm1899_vm11, %v4346_v19, 0  ;;  %v7280_v19 = vor.u32 %v7960_v3, %v7279_v26  ;;  %v7938_v26 = vld [vmem:[#allocation2 + $0x43c] sm:$0xf] }
0x1a7d   :  { %4366 = vmatpush.bf16.msra.mxu0 %v4359_v5  ;;  %v7281_v5 = vld [vmem:[#allocation2 + $0xc18] sm:$0xf0] }
0x1a7e   :  { %4780 = vmatpush.bf16.msrb.mxu2 %v7280_v19  ;;  %v7201_v3 = vld [vmem:[#allocation2 + $0x518] sm:$0xf0]  ;;  %v7961_v19 = vld [vmem:[#allocation2 + $0xc1c] sm:$0xf0] }
0x1a81   :  { %v4339_v14 = vpop.f32.mrf.mxu3  ;;  %4367 = vmatpush.bf16.msra.mxu0 %v4345_v57  ;;  %v7191_v57 = vld [vmem:[#allocation2 + $0x430] sm:$0xf] }
0x1a82   :  { %v7939_v14 = vld [vmem:[#allocation2 + $0x50c] sm:$0xf0] }
0x1a85   :  { %4368 = vmatpush.bf16.msra.mxu0 %v4344_v7 }
0x1a88   :  { %7144 = vmatmul.msk.bf16.vlgmr.msra.gmra.mxu0 %vm4354_vm2, %v7143_v50  ;;  %v7284_v50 = vor.u32 %v7958_v58, %v7281_v5  ;;  %v7287_v58 = vld [vmem:[#allocation2 + $0xb40] sm:$0xf] }
0x1a89   :  { %4751 = vmatpush.bf16.msrb.mxu0 %v7292_v44 }
0x1a8a   :  { %4794 = vmatpush.bf16.msra.mxu3 %v7284_v50  ;;  %v7179_v50 = vld [vmem:[#allocation2 + $0x278] sm:$0xf] }
0x1a8d   :  { %4752 = vmatpush.bf16.msrb.mxu0 %v7272_v31  ;;  %v7240_v31 = vor.u32 %v7950_v55, %v7239_v40  ;;  %v7930_v40 = vld [vmem:[#allocation2 + $0x194] sm:$0xf0]  ;;  %v7247_v55 = vld [vmem:[#allocation2 + $0x7c0] sm:$0xf] }
0x1a91   :  { %4753 = vmatpush.bf16.msrb.mxu0 %v7252_v18 }
0x1a95   :  { %4754 = vmatpush.bf16.msrb.mxu0 %v7232_v27 }
0x1a99   :  { %4755 = vmatpush.bf16.msrb.mxu0 %v7212_v62 }
0x1b05   :  { %v4370_v38 = vpop.f32.mrf.mxu0 }
0x1b06   :  { %v8831_v1 = vadd.f32 %v8049_v41, %v4370_v38  ;;  %v7192_v38 = vor.u32 %v7939_v14, %v7191_v57  ;;  %v7200_v57 = vor.u32 %v7940_v48, %v7199_v61  ;;  %v7288_v14 = vor.u32 %v7961_v19, %v7287_v58  ;;  %v7936_v48 = vld [vmem:[#allocation2 + $0x35c] sm:$0xf0] }
0x1b07   :  { %v7167_v19 = vld [vmem:[#allocation2 + $0xc0] sm:$0xf] }
0x1b08   :  { %v4375_v4 = vmul.f32 %v8831_v1, %v8831_v1  ;;  %4756 = vmatpush.bf16.msrb.mxu0 %v7192_v38  ;;  %v7935_v38 = vld [vmem:[#allocation2 + $0x354] sm:$0xf0] }
0x1b0d   :  { %v4372_v0 = vpop.f32.mrf.mxu0 }
0x1b0e   :  { %v8833_v43 = vadd.f32 %v8049_v41, %v4372_v0  ;;  %v7253_v41 = vld [vmem:[#allocation2 + $0xa50] sm:$0xf0]  ;;  %v7259_v0 = vld [vmem:[#allocation2 + $0x978] sm:$0xf] }
0x1b10   :  { %v4376_v52 = vmul.f32 %v8833_v43, %v8833_v43 }
0x1b12   :  { %4389 = vmatpush.msrb.mxu1 %v4376_v52  ;;  %v7955_v52 = vld [vmem:[#allocation2 + $0xa54] sm:$0xf0] }
0x1b14   :  { %4390 = vmatpush.msrb.mxu1 %v4375_v4 }
0x1b16   :  { %4391 = vmatpush.msrb.mxu1 %v8833_v43 }
0x1b18   :  { %4392 = vmatpush.msrb.mxu1 %v8831_v1 }
0x1b19   :  { %7145 = vmatmul.msk.f32.vlgmr.msrb.gmra.mxu1 %vm1214_vm14, %v8154_v8  ;;  %v7256_v8 = vor.u32 %v7952_v10, %v7253_v41  ;;  %v7173_v10 = vld [vmem:[#allocation2 + $0x350] sm:$0xf0] }
0x1b1a   :  { %4765 = vmatpush.bf16.msra.mxu1 %v7296_v49 }
0x1b1e   :  { %4766 = vmatpush.bf16.msra.mxu1 %v7276_v63 }
0x1b21   :  { %7146 = vmatmul.msk.f32.gmra.mxu1 %vm1214_vm14, %v8155_v9  ;;  %v7260_v9 = vor.u32 %v7955_v52, %v7259_v0  ;;  %v7204_v52 = vor.u32 %v7938_v26, %v7201_v3 }
0x1b22   :  { %4767 = vmatpush.bf16.msra.mxu1 %v7256_v8  ;;  %v7956_v8 = vld [vmem:[#allocation2 + $0xa5c] sm:$0xf0] }
0x1b23   :  { %4781 = vmatpush.bf16.msrb.mxu2 %v7260_v9 }
0x1b27   :  { %4782 = vmatpush.bf16.msrb.mxu2 %v7240_v31  ;;  %v7951_v31 = vld [vmem:[#allocation2 + $0x89c] sm:$0xf0] }
0x1b29   :  { %7147 = vmatmul.msk.f32.gmra.mxu1 %vm1214_vm14, %v8156_v12  ;;  %v7953_v12 = vld [vmem:[#allocation2 + $0x97c] sm:$0xf] }
0x1b2b   :  { %4783 = vmatpush.bf16.msrb.mxu2 %v7220_v23 }
0x1b2f   :  { %4784 = vmatpush.bf16.msrb.mxu2 %v7200_v57 }
0x1b31   :  { %7148 = vmatmul.msk.f32.gmra.mxu1 %vm1214_vm14, %v8157_v13  ;;  %v7261_v13 = vld [vmem:[#allocation2 + $0xa58] sm:$0xf0] }
0x1b96   :  { %v4394_v15 = vpop.f32.mrf.mxu1 }
0x1b97   :  { %4406 = vadd.xlane.f32.xlu0 %v4394_v15  ;;  %v7171_v15 = vld [vmem:[#allocation2 + $0x270] sm:$0xf] }
0x1b9e   :  { %v4397_v17 = vpop.f32.mrf.mxu1 }
0x1b9f   :  { %4408 = vadd.xlane.f32.xlu0 %v4397_v17  ;;  %v7264_v17 = vor.u32 %v7953_v12, %v7261_v13  ;;  %v7933_v13 = vld [vmem:[#allocation2 + $0x27c] sm:$0xf] }
0x1ba1   :  { %4795 = vmatpush.bf16.msra.mxu3 %v7264_v17 }
0x1ba6   :  { %v4400_v34 = vpop.f32.mrf.mxu1 }
0x1ba7   :  { %4410 = vadd.xlane.f32.xlu1 %v4400_v34  ;;  %v7934_v34 = vld [vmem:[#allocation2 + $0x34c] sm:$0xf0] }
0x1ba8   :  { %v7172_v47 = vor.u32 %v7934_v34, %v7171_v15  ;;  %v7181_v15 = vld [vmem:[#allocation2 + $0x358] sm:$0xf0] }
0x1baa   :  { %4757 = vmatpush.bf16.msrb.mxu0 %v7172_v47  ;;  %v7153_v47 = vld [vmem:[#allocation2 + $0x190] sm:$0xf0] }
0x1bae   :  { %v4403_v37 = vpop.f32.mrf.mxu1 }
0x1baf   :  { %4412 = vadd.xlane.f32.xlu1 %v4403_v37  ;;  %v7947_v37 = vld [vmem:[#allocation2 + $0x7b4] sm:$0xf] }
0x1c0a   :  { %v4407_v42 = vpop.xlane.xlu0 %4406 }
0x1c0b   :  { %v8845_v11 = vmul.f32 0.0009765625, %v4407_v42  ;;  %v7233_v42 = vld [vmem:[#allocation2 + $0x890] sm:$0xf0] }
0x1c0c   :  { %v7236_v44 = vor.u32 %v7947_v37, %v7233_v42  ;;  %v7180_v42 = vor.u32 %v7935_v38, %v7179_v50 }
0x1c0d   :  { %v4416_v56 = vmul.f32 1024.0, %v8845_v11 }
0x1c0e   :  { %4768 = vmatpush.bf16.msra.mxu1 %v7236_v44  ;;  %v7159_v44 = vld [vmem:[#allocation2 + $0xb8] sm:$0xf]  ;;  %4785 = vmatpush.bf16.msrb.mxu2 %v7180_v42 }
0x1c0f   :  { %v4418_v21 = vmul.f32 %v4416_v56, %v8845_v11  ;;  %v7241_v56 = vld [vmem:[#allocation2 + $0x898] sm:$0xf0]  ;;  %v7160_v29 = vor.u32 %v7930_v40, %v7159_v44 }
0x1c12   :  { %v4409_v45 = vpop.xlane.xlu0 %4408  ;;  %4769 = vmatpush.bf16.msra.mxu1 %v7216_v35  ;;  %4786 = vmatpush.bf16.msrb.mxu2 %v7160_v29  ;;  %v7946_v35 = vld [vmem:[#allocation2 + $0x6dc] sm:$0xf0] }
0x1c13   :  { %v8848_v20 = vmul.f32 0.0009765625, %v4409_v45  ;;  %v7948_v45 = vld [vmem:[#allocation2 + $0x7bc] sm:$0xf] }
0x1c15   :  { %v4417_v53 = vmul.f32 1024.0, %v8848_v20 }
0x1c17   :  { %v4419_v16 = vmul.f32 %v4417_v53, %v8848_v20  ;;  %v7307_v53 = vld [vmem:[#allocation2 + $0xd00] sm:$0xf] }
0x1c18   :  { %v7308_v60 = vor.u32 %v7966_v59, %v7307_v53  ;;  %v7207_v59 = vld [vmem:[#allocation2 + $0x440] sm:$0xf] }
0x1c1a   :  { %v4411_v25 = vpop.xlane.xlu1 %4410 }
0x1c1b   :  { %v4420_v32 = vsub.f32 %v4411_v25, %v4418_v21  ;;  %v7929_v21 = vld [vmem:[#allocation2 + $0x18c] sm:$0xf0]  ;;  %v7244_v25 = vor.u32 %v7948_v45, %v7241_v56 }
0x1c1c   :  { %v7152_v27 = vor.u32 %v7929_v21, %v7151_v51  ;;  %v7184_v51 = vor.u32 %v7933_v13, %v7181_v15  ;;  %v8050_v13 = vld [vmem:[#allocation6 + $0xc] ss:$0 sm:$0xff] }
0x1c1d   :  { %v4422_v46 = vmul.f32 0.0009775171, %v4420_v32  ;;  %v7943_v32 = vld [vmem:[#allocation2 + $0x5fc] sm:$0xf]  ;;  %4796 = vmatpush.bf16.msra.mxu3 %v7244_v25  ;;  %v7248_v25 = vor.u32 %v7951_v31, %v7247_v55 }
0x1c1e   :  { %4758 = vmatpush.bf16.msrb.mxu0 %v7152_v27  ;;  %v7224_v24 = vor.u32 %v7943_v32, %v7221_v39 }
0x1c1f   :  { %v8852_v36 = vmax.f32 %v4422_v46, 0.0  ;;  %v7937_v46 = vld [vmem:[#allocation2 + $0x434] sm:$0xf] }
0x1c20   :  { %v7196_v63 = vor.u32 %v7937_v46, %v7193_v33 }
0x1c21   :  { %8086 = vrsqrt.f32 %v8852_v36  ;;  %4797 = vmatpush.bf16.msra.mxu3 %v7224_v24  ;;  %vm4435_vm14 = vcmp.eq.f32.partialorder %v8852_v36, inf  ;;  %v4438_v9 = vand.u32 2147483648, %v8852_v36  ;;  %vm4437_vm11 = vcmp.eq.f32.partialorder %v8852_v36, 0.0  ;;  %v7187_v24 = vld [vmem:[#allocation2 + $0x280] sm:$0xf] }
0x1c22   :  { %v4413_v7 = vpop.xlane.xlu1 %4412  ;;  %4807 = vmatpush.bf16.msra.mxu0 %v7308_v60  ;;  %4770 = vmatpush.bf16.msra.mxu1 %v7196_v63  ;;  %v7941_v60 = vld [vmem:[#allocation2 + $0x51c] sm:$0xf0]  ;;  %v7188_v3 = vor.u32 %v7936_v48, %v7187_v24 }
0x1c23   :  { %v4421_v4 = vsub.f32 %v4413_v7, %v4419_v16  ;;  %v7932_v16 = vld [vmem:[#allocation2 + $0x274] sm:$0xf]  ;;  %v7208_v33 = vor.u32 %v7941_v60, %v7207_v59 }
0x1c24   :  { %v7176_v12 = vor.u32 %v7932_v16, %v7173_v10 }
0x1c25   :  { %v4423_v2 = vmul.f32 0.0009775171, %v4421_v4  ;;  %v7267_v4 = vld [vmem:[#allocation2 + $0x980] sm:$0xf]  ;;  %4798 = vmatpush.bf16.msra.mxu3 %v7204_v52 }
0x1c26   :  { %4808 = vmatpush.bf16.msra.mxu0 %v7288_v14  ;;  %v7268_v17 = vor.u32 %v7956_v8, %v7267_v4  ;;  %4771 = vmatpush.bf16.msra.mxu1 %v7176_v12 }
0x1c27   :  { %v8087_v54 = vpop.eup %8086  ;;  %v8856_v18 = vmax.f32 %v4423_v2, 0.0  ;;  %v7927_v2 = vld [vmem:[#allocation2 + $0xb4] sm:$0xf] }
0x1c28   :  { %v4429_v22 = vmul.f32 %v8087_v54, %v8852_v36  ;;  %v7156_v21 = vor.u32 %v7927_v2, %v7153_v47  ;;  %v8051_v2 = vld [vmem:[#allocation6 + $0xd] ss:$0 sm:$0xff] }
0x1c29   :  { %8088 = vrsqrt.f32 %v8856_v18  ;;  %4799 = vmatpush.bf16.msra.mxu3 %v7184_v51  ;;  %vm4447_vm3 = vcmp.eq.f32.partialorder %v8856_v18, inf  ;;  %v4450_v23 = vand.u32 2147483648, %v8856_v18  ;;  %vm4449_vm4 = vcmp.eq.f32.partialorder %v8856_v18, 0.0 }
0x1c2a   :  { %v4430_v49 = vmul.f32 %v8087_v54, %v4429_v22  ;;  %4809 = vmatpush.bf16.msra.mxu0 %v7268_v17  ;;  %v7161_v22 = vld [vmem:[#allocation2 + $0x198] sm:$0xf0]  ;;  %4772 = vmatpush.bf16.msra.mxu1 %v7156_v21 }
0x1c2b   :  { %v7164_v32 = vor.u32 %v7928_v6, %v7161_v22 }
0x1c2c   :  { %v4431_v62 = vmul.f32 0.5, %v4430_v49  ;;  %v7227_v49 = vld [vmem:[#allocation2 + $0x600] sm:$0xf] }
0x1c2d   :  { %v7228_v39 = vor.u32 %v7946_v35, %v7227_v49  ;;  %4800 = vmatpush.bf16.msra.mxu3 %v7164_v32  ;;  %v7967_v49 = vld [vmem:[#allocation4 + $0x184] sm:$0xf0] }
0x1c2e   :  { %v4432_v5 = vsub.f32 1.5, %v4431_v62  ;;  %4810 = vmatpush.bf16.msra.mxu0 %v7248_v25 }
0x1c2f   :  { %v8089_v7 = vpop.eup %8088 }
0x1c30   :  { %v4433_v41 = vmul.f32 %v8087_v54, %v4432_v5  ;;  %v4441_v0 = vmul.f32 %v8089_v7, %v8856_v18  ;;  %v7931_v5 = vld [vmem:[#allocation2 + $0x19c] sm:$0xf0] }
0x1c31   :  { %v7168_v16 = vor.u32 %v7931_v5, %v7167_v19 }
0x1c32   :  { %v4434_v34 = vmul.f32 %v4433_v41, %v8852_v36  ;;  %v4442_v37 = vmul.f32 %v8089_v7, %v4441_v0  ;;  %4811 = vmatpush.bf16.msra.mxu0 %v7228_v39  ;;  %v4426_v0 = vsub.f32 %v8831_v1, %v8845_v11  ;;  %v7315_v39 = vld [vmem:[#allocation4 + $0x190] sm:$0xf] }
0x1c34   :  { %v4436_v45 = vsel %vm4435_vm14, %v8852_v36, %v4434_v34  ;;  %v4443_v56 = vmul.f32 0.5, %v4442_v37  ;;  %v4427_v34 = vsub.f32 %v8833_v43, %v8848_v20 }
0x1c35   :  { %v4439_v54 = vsel %vm4437_vm11, %v4438_v9, %v4436_v45 }
0x1c36   :  { %v4452_v27 = vadd.f32 1e-05, %v4439_v54  ;;  %v4444_v28 = vsub.f32 1.5, %v4443_v56  ;;  %4812 = vmatpush.bf16.msra.mxu0 %v7208_v33 }
0x1c38   :  { %8090 = vrcp.f32 %v4452_v27  ;;  %v4445_v30 = vmul.f32 %v8089_v7, %v4444_v28  ;;  %v4465_v58 = vand.u32 2147483648, %v4452_v27  ;;  %vm4459_vm6 = vweird.f32 %v4452_v27 }
0x1c3a   :  { %v4446_v36 = vmul.f32 %v4445_v30, %v8856_v18  ;;  %4813 = vmatpush.bf16.msra.mxu0 %v7188_v3  ;;  %v4466_v7 = vor.u32 1.1754944e-38, %v4465_v58 }
0x1c3c   :  { %v4448_v53 = vsel %vm4447_vm3, %v8856_v18, %v4446_v36  ;;  %v4463_v18 = vand.u32 2147483647, %v4452_v27  ;;  %v7311_v36 = vld [vmem:[#allocation4 + $0x180] sm:$0xf] }
0x1c3d   :  { %v4451_v46 = vsel %vm4449_vm4, %v4450_v23, %v4448_v53  ;;  %v7312_v23 = vor.u32 %v7967_v49, %v7311_v36  ;;  %v7968_v53 = vld [vmem:[#allocation4 + $0x194] sm:$0xf0]  ;;  %v7499_v36 = vld [vmem:[#allocation2 + $0xc24] sm:$0xf0]  ;;  %v7505_v49 = vld [vmem:[#allocation2 + $0xb4c] sm:$0xf] }
0x1c3e   :  { %v8091_v61 = vpop.eup %8090  ;;  %v4453_v62 = vadd.f32 1e-05, %v4451_v46  ;;  %vm4464_vm9 = vcmp.eq.f32.partialorder %v4463_v18, 8.507059e+37  ;;  %4814 = vmatpush.bf16.msra.mxu0 %v7168_v16  ;;  %v7316_v59 = vor.u32 %v7968_v53, %v7315_v39  ;;  %v8159_v18 = vld [vmem:[#allocation9 + $0x8] sm:$0xff]  ;;  %v8161_v16 = vld [vmem:[#allocation9 + $0x18] sm:$0xff] }
0x1c3f   :  { %v4455_v26 = vmul.f32 %v8091_v61, %v4452_v27  ;;  %vm4460_vm5 = vweird.f32 %v8091_v61  ;;  %v7513_v39 = vld [vmem:[#allocation2 + $0xb54] sm:$0xf] }
0x1c40   :  { %8092 = vrcp.f32 %v4453_v62  ;;  %vm4461_vm8 = vmor %vm4459_vm6, %vm4460_vm5  ;;  %v4480_v4 = vand.u32 2147483648, %v4453_v62  ;;  %v4478_v12 = vand.u32 2147483647, %v4453_v62  ;;  %vm4474_vm13 = vweird.f32 %v4453_v62  ;;  %v8016_v53 = vld [vmem:[#allocation2 + $0xc30] sm:$0xf0] }
0x1c41   :  { %v4456_v63 = vsub.f32 1.0, %v4455_v26 }
0x1c42   :  { %v4481_v17 = vor.u32 1.1754944e-38, %v4480_v4  ;;  %vm4479_vm12 = vcmp.eq.f32.partialorder %v4478_v12, 8.507059e+37 }
0x1c43   :  { %v4457_v57 = vmul.f32 %v8091_v61, %v4456_v63 }
0x1c45   :  { %v4458_v14 = vadd.f32 %v8091_v61, %v4457_v57  ;;  %v8158_v57 = vld [vmem:[#allocation9] sm:$0xff] }
0x1c46   :  { %v8093_v10 = vpop.eup %8092 }
0x1c47   :  { %v4462_v50 = vsel %vm4461_vm8, %v8091_v61, %v4458_v14  ;;  %v4470_v38 = vmul.f32 %v8093_v10, %v4453_v62  ;;  %vm4475_vm10 = vweird.f32 %v8093_v10  ;;  %v8052_v61 = vld [vmem:[#allocation6 + $0xe] ss:$0 sm:$0xff] }
0x1c48   :  { %v4467_v41 = vsel %vm4464_vm9, %v4466_v7, %v4462_v50  ;;  %vm4476_vm7 = vmor %vm4474_vm13, %vm4475_vm10  ;;  %v8160_v14 = vld [vmem:[#allocation9 + $0x10] sm:$0xff]  ;;  %v8163_v7 = vld [vmem:[#allocation9 + $0x28] sm:$0xff] }
0x1c49   :  { %v4471_v52 = vsub.f32 1.0, %v4470_v38  ;;  %v4468_v8 = vmul.f32 %v4467_v41, %v4426_v0  ;;  %v8164_v50 = vld [vmem:[#allocation9 + $0x30] sm:$0xff]  ;;  %v8165_v38 = vld [vmem:[#allocation9 + $0x38] sm:$0xff] }
0x1c4b   :  { %v4472_v9 = vmul.f32 %v8093_v10, %v4471_v52  ;;  %v4486_v42 = vmul.f32 %v8050_v13, %v4468_v8 }
0x1c4d   :  { %v4473_v15 = vadd.f32 %v8093_v10, %v4472_v9  ;;  %v4490_v44 = vadd.f32 %v8051_v2, %v4486_v42 }
0x1c4f   :  { %v4477_v37 = vsel %vm4476_vm7, %v8093_v10, %v4473_v15  ;;  %v4492_v55 = vmax.f32 %v4490_v44, 0.0  ;;  %v8162_v10 = vld [vmem:[#allocation9 + $0x20] sm:$0xff]  ;;  %v8018_v44 = vld [vmem:[#allocation2 + $0xd08] sm:$0xf] }
0x1c50   :  { %v4482_v1 = vsel %vm4479_vm12, %v4481_v17, %v4477_v37 }
0x1c51   :  { %v4483_v11 = vmul.f32 %v4482_v1, %v4427_v34 }
0x1c53   :  { %v4487_v47 = vmul.f32 %v8050_v13, %v4483_v11  ;;  %v7525_v11 = vld [vmem:[#allocation2 + $0xd04] sm:$0xf] }
0x1c55   :  { %v4491_v40 = vadd.f32 %v8051_v2, %v4487_v47  ;;  %v8021_v47 = vld [vmem:[#allocation2 + $0xde0] sm:$0xf0] }
0x1c57   :  { %v4493_v31 = vmax.f32 %v4491_v40, 0.0 }
0x1c59   :  { %v4494_v45 = vpack.c.bf16 %v4493_v31, %v4492_v55  ;;  %v7526_v55 = vor.u32 %v8021_v47, %v7525_v11  ;;  %v7527_v31 = vld [vmem:[#allocation2 + $0xde4] sm:$0xf0]  ;;  %v8001_v11 = vld [vmem:[#allocation2 + $0x8a8] sm:$0xf0]  ;;  %v7457_v47 = vld [vmem:[#allocation2 + $0x7d4] sm:$0xf] }
0x1c5b   :  { %4759 = vmatmul.bf16.vlgmr.msrb.gmra.mxu0 %v4494_v45  ;;  %4773 = vmatmul.bf16.vlgmr.msra.gmra.mxu1 %v4494_v45 }
0x1c5c   :  { %4787 = vmatmul.bf16.vlgmr.msrb.gmra.mxu2 %v4494_v45  ;;  %4801 = vmatmul.bf16.vlgmr.msra.gmra.mxu3 %v4494_v45 }
0x1c5d   :  { %5440 = vmatpush.bf16.msrb.mxu3 %v7526_v55 }
0x1c6b   :  { %4815 = vmatmul.bf16.vlgmr.msra.gmra.mxu0 %v4494_v45  ;;  %v7533_v45 = vld [vmem:[#allocation2 + $0xd0c] sm:$0xf] }
0x1cd8   :  { %v4760_v56 = vpop.f32.mrf.mxu0  ;;  %v4774_v21 = vpop.f32.mrf.mxu1 }
0x1cdf   :  { %v4802_v43 = vpop.f32.mrf.mxu3  ;;  %v4788_v54 = vpop.f32.mrf.mxu2 }
0x1ce0   :  { %v4762_v51 = vpop.f32.mrf.mxu0  ;;  %v4776_v30 = vpop.f32.mrf.mxu1 }
0x1ce1   :  { %v4827_v32 = vpack.c.bf16 %v4776_v30, %v4774_v21  ;;  %v4826_v35 = vpack.c.bf16 %v4762_v51, %v4760_v56  ;;  %v8022_v56 = vld [vmem:[#allocation2 + $0xde8] sm:$0xf0]  ;;  %v7530_v51 = vor.u32 %v8018_v44, %v7527_v31  ;;  %v8002_v44 = vld [vmem:[#allocation2 + $0x8b0] sm:$0xf0] }
0x1ce7   :  { %v4804_v25 = vpop.f32.mrf.mxu3  ;;  %v4790_v28 = vpop.f32.mrf.mxu2 }
0x1ce8   :  { %v4816_v20 = vpop.f32.mrf.mxu0  ;;  %v4829_v27 = vpack.c.bf16 %v4804_v25, %v4802_v43  ;;  %v4828_v29 = vpack.c.bf16 %v4790_v28, %v4788_v54  ;;  %v7534_v43 = vor.u32 %v8022_v56, %v7533_v45  ;;  %v8023_v54 = vld [vmem:[#allocation2 + $0xdf0] sm:$0xf0]  ;;  %v8014_v28 = vld [vmem:[#allocation2 + $0xc20] sm:$0xf0] }
0x1cea   :  { %5478 = vmatpush.bf16.msrb.mxu0 %v7534_v43  ;;  %v7413_v43 = vld [vmem:[#allocation2 + $0x604] sm:$0xf] }
0x1cf0   :  { %v4818_v6 = vpop.f32.mrf.mxu0 }
0x1cf1   :  { %v4830_v22 = vpack.c.bf16 %v4818_v6, %v4816_v20  ;;  %v7541_v20 = vld [vmem:[#allocation2 + $0xd14] sm:$0xf] }
0x1cf3   :  { %4853 = vmatpush.bf16.msrb.mxu1 %v4830_v22  ;;  %v7542_v22 = vor.u32 %v8023_v54, %v7541_v20  ;;  %v7993_v20 = vld [vmem:[#allocation2 + $0x6e0] sm:$0xf0]  ;;  %v7990_v54 = vld [vmem:[#allocation2 + $0x608] sm:$0xf] }
0x1cf7   :  { %4854 = vmatpush.bf16.msrb.mxu1 %v4829_v27  ;;  %v7497_v27 = vld [vmem:[#allocation2 + $0xb44] sm:$0xf] }
0x1cfb   :  { %4855 = vmatpush.bf16.msrb.mxu1 %v4828_v29  ;;  %v8011_v29 = vld [vmem:[#allocation2 + $0xb48] sm:$0xf] }
0x1cff   :  { %4856 = vmatpush.bf16.msrb.mxu1 %v4827_v32  ;;  %v7498_v32 = vor.u32 %v8014_v28, %v7497_v27  ;;  %v7994_v27 = vld [vmem:[#allocation2 + $0x6e8] sm:$0xf0] }
0x1d01   :  { %5441 = vmatpush.bf16.msrb.mxu3 %v7498_v32 }
0x1d03   :  { %4857 = vmatpush.bf16.msrb.mxu1 %v4826_v35  ;;  %v7502_v35 = vor.u32 %v8011_v29, %v7499_v36  ;;  %v7429_v36 = vld [vmem:[#allocation2 + $0x614] sm:$0xf] }
0x1d06   :  { %7317 = vmatmul.msk.bf16.vlgmr.msrb.gmra.mxu1 %vm4843_vm15, %v7312_v23  ;;  %v8015_v23 = vld [vmem:[#allocation2 + $0xc28] sm:$0xf0] }
0x1d07   :  { %5459 = vmatpush.bf16.msra.mxu1 %v7530_v51  ;;  %v7458_v51 = vor.u32 %v8002_v44, %v7457_v47 }
0x1d0b   :  { %5460 = vmatpush.bf16.msra.mxu1 %v7502_v35 }
0x1d16   :  { %7318 = vmatmul.msk.bf16.gmra.mxu1 %vm4843_vm15, %v7316_v59 }
0x1d83   :  { %v4859_v60 = vpop.f32.mrf.mxu1 }
0x1d84   :  { %v8885_v3 = vadd.f32 %v8052_v61, %v4859_v60 }
0x1d86   :  { %v4869_v5 = vmul.f32 %v8885_v3, %v8885_v3 }
0x1d8b   :  { %v4861_v46 = vpop.f32.mrf.mxu1 }
0x1d8c   :  { %v8881_v26 = vadd.f32 %v8052_v61, %v4861_v46 }
0x1d8e   :  { %v4870_v19 = vmul.f32 %v8881_v26, %v8881_v26 }
0x1d93   :  { %v4864_v33 = vpop.f32.mrf.mxu1 }
0x1d94   :  { %v8877_v24 = vadd.f32 %v8052_v61, %v4864_v33  ;;  %v7506_v33 = vor.u32 %v8015_v23, %v7505_v49  ;;  %v7995_v49 = vld [vmem:[#allocation2 + $0x6f0] sm:$0xf0] }
0x1d96   :  { %v4871_v58 = vmul.f32 %v8877_v24, %v8877_v24  ;;  %5479 = vmatpush.bf16.msrb.mxu0 %v7506_v33 }
0x1d9b   :  { %v4866_v62 = vpop.f32.mrf.mxu1 }
0x1d9c   :  { %v8879_v48 = vadd.f32 %v8052_v61, %v4866_v62  ;;  %v7514_v61 = vor.u32 %v8016_v53, %v7513_v39  ;;  %v7469_v62 = vld [vmem:[#allocation2 + $0x984] sm:$0xf]  ;;  %v7430_v39 = vor.u32 %v7995_v49, %v7429_v36  ;;  %v7337_v36 = vld [vmem:[#allocation2 + $0xcc] sm:$0xf] }
0x1d9d   :  { %v7973_v49 = vld [vmem:[#allocation2 + $0x1a8] sm:$0xf0] }
0x1d9e   :  { %v4872_v63 = vmul.f32 %v8879_v48, %v8879_v48 }
0x1da0   :  { %4881 = vmatpush.msra.mxu2 %v4872_v63  ;;  %v8007_v63 = vld [vmem:[#allocation2 + $0xa60] sm:$0xf0] }
0x1da2   :  { %4882 = vmatpush.msra.mxu2 %v4871_v58  ;;  %v8004_v58 = vld [vmem:[#allocation2 + $0x988] sm:$0xf] }
0x1da4   :  { %4883 = vmatpush.msra.mxu2 %v4870_v19 }
0x1da6   :  { %4884 = vmatpush.msra.mxu2 %v4869_v5  ;;  %v7470_v5 = vor.u32 %v8007_v63, %v7469_v62  ;;  %v7983_v63 = vld [vmem:[#allocation2 + $0x448] sm:$0xf] }
0x1da8   :  { %4885 = vmatpush.msra.mxu2 %v8879_v48  ;;  %5442 = vmatpush.bf16.msrb.mxu3 %v7470_v5 }
0x1daa   :  { %4886 = vmatpush.msra.mxu2 %v8877_v24 }
0x1dac   :  { %4887 = vmatpush.msra.mxu2 %v8881_v26 }
0x1dae   :  { %4888 = vmatpush.msra.mxu2 %v8885_v3 }
0x1daf   :  { %7319 = vmatmul.msk.f32.vlgmr.msra.gmra.mxu2 %vm704_vm1, %v8158_v57  ;;  %v7471_v57 = vld [vmem:[#allocation2 + $0xa64] sm:$0xf0] }
0x1db0   :  { %5516 = vmatpush.bf16.msrb.mxu2 %v7542_v22  ;;  %v7415_v22 = vld [vmem:[#allocation2 + $0x6e4] sm:$0xf0] }
0x1db1   :  { %v7418_v29 = vor.u32 %v7990_v54, %v7415_v22 }
0x1db4   :  { %5517 = vmatpush.bf16.msrb.mxu2 %v7514_v61 }
0x1db7   :  { %7320 = vmatmul.msk.f32.gmra.mxu2 %vm704_vm1, %v8159_v18  ;;  %v7477_v18 = vld [vmem:[#allocation2 + $0x98c] sm:$0xf] }
0x1dbf   :  { %7321 = vmatmul.msk.f32.gmra.mxu2 %vm704_vm1, %v8160_v14  ;;  %v7474_v14 = vor.u32 %v8004_v58, %v7471_v57  ;;  %v7387_v58 = vld [vmem:[#allocation2 + $0x524] sm:$0xf0] }
0x1dc0   :  { %v7390_v57 = vor.u32 %v7983_v63, %v7387_v58 }
0x1dc1   :  { %5461 = vmatpush.bf16.msra.mxu1 %v7474_v14  ;;  %v7987_v14 = vld [vmem:[#allocation2 + $0x528] sm:$0xf0] }
0x1dc7   :  { %7322 = vmatmul.msk.f32.gmra.mxu2 %vm704_vm1, %v8161_v16  ;;  %v8008_v16 = vld [vmem:[#allocation2 + $0xa68] sm:$0xf0] }
0x1dcf   :  { %7323 = vmatmul.msk.f32.gmra.mxu2 %vm704_vm1, %v8162_v10  ;;  %v7485_v10 = vld [vmem:[#allocation2 + $0x994] sm:$0xf] }
0x1dd7   :  { %7324 = vmatmul.msk.f32.gmra.mxu2 %vm704_vm1, %v8163_v7  ;;  %v8009_v7 = vld [vmem:[#allocation2 + $0xa70] sm:$0xf0] }
0x1ddf   :  { %7325 = vmatmul.msk.f32.gmra.mxu2 %vm704_vm1, %v8164_v50 }
0x1de7   :  { %7326 = vmatmul.msk.f32.gmra.mxu2 %vm704_vm1, %v8165_v38 }
0x1e32   :  { %v4890_v41 = vpop.f32.mrf.mxu2 }
0x1e33   :  { %4914 = vadd.xlane.f32.xlu2 %v4890_v41  ;;  %v7478_v41 = vor.u32 %v8008_v16, %v7477_v18  ;;  %v7393_v18 = vld [vmem:[#allocation2 + $0x44c] sm:$0xf]  ;;  %v7401_v16 = vld [vmem:[#allocation2 + $0x454] sm:$0xf] }
0x1e35   :  { %5480 = vmatpush.bf16.msrb.mxu0 %v7478_v41 }
0x1e3a   :  { %v4893_v0 = vpop.f32.mrf.mxu2 }
0x1e3b   :  { %4916 = vadd.xlane.f32.xlu2 %v4893_v0 }
0x1e42   :  { %v4896_v52 = vpop.f32.mrf.mxu2 }
0x1e43   :  { %4918 = vadd.xlane.f32.xlu2 %v4896_v52  ;;  %v7486_v52 = vor.u32 %v8009_v7, %v7485_v10 }
0x1e45   :  { %5518 = vmatpush.bf16.msrb.mxu2 %v7486_v52  ;;  %v7394_v52 = vor.u32 %v7987_v14, %v7393_v18 }
0x1e49   :  { %5519 = vmatpush.bf16.msrb.mxu2 %v7458_v51 }
0x1e4a   :  { %v4899_v4 = vpop.f32.mrf.mxu2 }
0x1e4d   :  { %5520 = vmatpush.bf16.msrb.mxu2 %v7430_v39 }
0x1e52   :  { %v4902_v8 = vpop.f32.mrf.mxu2 }
0x1e53   :  { %4922 = vadd.xlane.f32.xlu0 %v4902_v8  ;;  %v8000_v8 = vld [vmem:[#allocation2 + $0x8a0] sm:$0xf0] }
0x1e5a   :  { %v4905_v9 = vpop.f32.mrf.mxu2 }
0x1e5b   :  { %4920 = vadd.xlane.f32.xlu0 %v4899_v4  ;;  %4924 = vadd.xlane.f32.xlu1 %v4905_v9  ;;  %v7441_v4 = vld [vmem:[#allocation2 + $0x7c4] sm:$0xf]  ;;  %v7997_v9 = vld [vmem:[#allocation2 + $0x7c8] sm:$0xf] }
0x1e62   :  { %v4908_v12 = vpop.f32.mrf.mxu2 }
0x1e63   :  { %4926 = vadd.xlane.f32.xlu1 %v4908_v12 }
0x1e6a   :  { %v4911_v13 = vpop.f32.mrf.mxu2 }
0x1e6b   :  { %4928 = vadd.xlane.f32.xlu2 %v4911_v13 }
0x1ea6   :  { %v4915_v15 = vpop.xlane.xlu2 %4914 }
0x1ea7   :  { %v8905_v17 = vmul.f32 0.00048828125, %v4915_v15  ;;  %v7442_v15 = vor.u32 %v8000_v8, %v7441_v4  ;;  %v7357_v8 = vld [vmem:[#allocation2 + $0x284] sm:$0xf] }
0x1ea9   :  { %v4934_v37 = vmul.f32 2048.0, %v8905_v17  ;;  %5443 = vmatpush.bf16.msrb.mxu3 %v7442_v15 }
0x1eab   :  { %v4938_v2 = vmul.f32 %v4934_v37, %v8905_v17  ;;  %v7449_v37 = vld [vmem:[#allocation2 + $0x7cc] sm:$0xf] }
0x1eac   :  { %v7450_v56 = vor.u32 %v8001_v11, %v7449_v37  ;;  %v7359_v37 = vld [vmem:[#allocation2 + $0x364] sm:$0xf0] }
0x1eae   :  { %v4917_v34 = vpop.xlane.xlu2 %4916  ;;  %5481 = vmatpush.bf16.msrb.mxu0 %v7450_v56 }
0x1eaf   :  { %v8908_v42 = vmul.f32 0.00048828125, %v4917_v34  ;;  %v7443_v34 = vld [vmem:[#allocation2 + $0x8a4] sm:$0xf0] }
0x1eb1   :  { %v4935_v6 = vmul.f32 2048.0, %v8908_v42 }
0x1eb3   :  { %v4939_v60 = vmul.f32 %v4935_v6, %v8908_v42  ;;  %v7414_v6 = vor.u32 %v7993_v20, %v7413_v43 }
0x1eb5   :  { %5444 = vmatpush.bf16.msrb.mxu3 %v7414_v6 }
0x1eb6   :  { %v4919_v25 = vpop.xlane.xlu2 %4918 }
0x1eb7   :  { %v8914_v59 = vmul.f32 0.00048828125, %v4919_v25  ;;  %v7421_v25 = vld [vmem:[#allocation2 + $0x60c] sm:$0xf] }
0x1eb8   :  { %v7422_v32 = vor.u32 %v7994_v27, %v7421_v25  ;;  %v7972_v25 = vld [vmem:[#allocation2 + $0x1a0] sm:$0xf0]  ;;  %v7969_v27 = vld [vmem:[#allocation2 + $0xc8] sm:$0xf] }
0x1eb9   :  { %v4936_v38 = vmul.f32 2048.0, %v8914_v59 }
0x1eba   :  { %5482 = vmatpush.bf16.msrb.mxu0 %v7422_v32  ;;  %v7331_v32 = vld [vmem:[#allocation2 + $0x1a4] sm:$0xf0] }
0x1ebb   :  { %v4940_v55 = vmul.f32 %v4936_v38, %v8914_v59 }
0x1ebe   :  { %5483 = vmatpush.bf16.msrb.mxu0 %v7394_v52 }
0x1ec6   :  { %v4923_v1 = vpop.xlane.xlu0 %4922 }
0x1ec7   :  { %v4942_v40 = vsub.f32 %v4923_v1, %v4938_v2  ;;  %v7446_v1 = vor.u32 %v7997_v9, %v7443_v34  ;;  %v7979_v9 = vld [vmem:[#allocation2 + $0x360] sm:$0xf0] }
0x1ec8   :  { %v7358_v34 = vor.u32 %v7979_v9, %v7357_v8  ;;  %v8012_v8 = vld [vmem:[#allocation2 + $0xb50] sm:$0xf] }
0x1ec9   :  { %v4946_v21 = vmul.f32 0.0004885198, %v4942_v40  ;;  %5462 = vmatpush.bf16.msra.mxu1 %v7446_v1  ;;  %v7980_v1 = vld [vmem:[#allocation2 + $0x368] sm:$0xf0]  ;;  %v7507_v9 = vld [vmem:[#allocation2 + $0xc2c] sm:$0xf0] }
0x1ecb   :  { %v8912_v30 = vmax.f32 %v4946_v21, 0.0 }
0x1ecd   :  { %8094 = vrsqrt.f32 %v8912_v30  ;;  %5463 = vmatpush.bf16.msra.mxu1 %v7418_v29  ;;  %vm4965_vm1 = vcmp.eq.f32.partialorder %v8912_v30, inf  ;;  %vm4967_vm2 = vcmp.eq.f32.partialorder %v8912_v30, 0.0  ;;  %v4968_v10 = vand.u32 2147483648, %v8912_v30 }
0x1ece   :  { %v4925_v46 = vpop.xlane.xlu1 %4924  ;;  %v4921_v0 = vpop.xlane.xlu0 %4920 }
0x1ecf   :  { %v4943_v19 = vsub.f32 %v4925_v46, %v4939_v60  ;;  %v8922_v40 = vmul.f32 0.00048828125, %v4921_v0  ;;  %v7385_v60 = vld [vmem:[#allocation2 + $0x444] sm:$0xf] }
0x1ed0   :  { %v7986_v46 = vld [vmem:[#allocation2 + $0x520] sm:$0xf0] }
0x1ed1   :  { %v4947_v50 = vmul.f32 0.0004885198, %v4943_v19  ;;  %v4937_v35 = vmul.f32 2048.0, %v8922_v40  ;;  %v7386_v62 = vor.u32 %v7986_v46, %v7385_v60  ;;  %5464 = vmatpush.bf16.msra.mxu1 %v7390_v57  ;;  %v7338_v60 = vor.u32 %v7973_v49, %v7337_v36  ;;  %v7974_v46 = vld [vmem:[#allocation2 + $0x1b0] sm:$0xf0] }
0x1ed3   :  { %v8095_v12 = vpop.eup %8094  ;;  %v8919_v13 = vmax.f32 %v4947_v50, 0.0  ;;  %v4941_v7 = vmul.f32 %v4937_v35, %v8922_v40  ;;  %5445 = vmatpush.bf16.msrb.mxu3 %v7386_v62  ;;  %v7988_v50 = vld [vmem:[#allocation2 + $0x530] sm:$0xf0] }
0x1ed4   :  { %v4959_v2 = vmul.f32 %v8095_v12, %v8912_v30  ;;  %v7402_v4 = vor.u32 %v7988_v50, %v7401_v16  ;;  %v7345_v35 = vld [vmem:[#allocation2 + $0xd4] sm:$0xf]  ;;  %v8020_v16 = vld [vmem:[#allocation2 + $0xd18] sm:$0xf] }
0x1ed5   :  { %8096 = vrsqrt.f32 %v8919_v13  ;;  %vm4977_vm14 = vcmp.eq.f32.partialorder %v8919_v13, inf  ;;  %vm4979_vm11 = vcmp.eq.f32.partialorder %v8919_v13, 0.0  ;;  %v7346_v62 = vor.u32 %v7974_v46, %v7345_v35  ;;  %v7493_v35 = vld [vmem:[#allocation2 + $0x99c] sm:$0xf]  ;;  %v7451_v46 = vld [vmem:[#allocation2 + $0x8ac] sm:$0xf0] }
0x1ed6   :  { %v4960_v31 = vmul.f32 %v8095_v12, %v4959_v2  ;;  %v4927_v45 = vpop.xlane.xlu1 %4926  ;;  %v7365_v2 = vld [vmem:[#allocation2 + $0x28c] sm:$0xf]  ;;  %5521 = vmatpush.bf16.msrb.mxu2 %v7402_v4  ;;  %v8024_v4 = vld [vmem:[#allocation2 + $0xdf8] sm:$0xf0] }
0x1ed7   :  { %v4944_v21 = vsub.f32 %v4927_v45, %v4940_v55  ;;  %v7366_v55 = vor.u32 %v7980_v1, %v7365_v2  ;;  %v7981_v45 = vld [vmem:[#allocation2 + $0x370] sm:$0xf0]  ;;  %5446 = vmatpush.bf16.msrb.mxu3 %v7358_v34  ;;  %v7515_v2 = vld [vmem:[#allocation2 + $0xc34] sm:$0xf0] }
0x1ed8   :  { %v4961_v28 = vmul.f32 0.5, %v4960_v31  ;;  %v7373_v31 = vld [vmem:[#allocation2 + $0x294] sm:$0xf] }
0x1ed9   :  { %v4948_v23 = vmul.f32 0.0004885198, %v4944_v21  ;;  %v7374_v43 = vor.u32 %v7981_v45, %v7373_v31  ;;  %v7329_v21 = vld [vmem:[#allocation2 + $0xc4] sm:$0xf]  ;;  %5484 = vmatpush.bf16.msrb.mxu0 %v7366_v55  ;;  %v7521_v55 = vld [vmem:[#allocation2 + $0xb5c] sm:$0xf] }
0x1eda   :  { %v4962_v53 = vsub.f32 1.5, %v4961_v28 }
0x1edb   :  { %v8097_v33 = vpop.eup %8096  ;;  %v8928_v61 = vmax.f32 %v4948_v23, 0.0  ;;  %5522 = vmatpush.bf16.msrb.mxu2 %v7374_v43  ;;  %v8017_v43 = vld [vmem:[#allocation2 + $0xc38] sm:$0xf0] }
0x1edc   :  { %v4963_v19 = vmul.f32 %v8095_v12, %v4962_v53  ;;  %v4971_v5 = vmul.f32 %v8097_v33, %v8919_v13  ;;  %v7976_v12 = vld [vmem:[#allocation2 + $0x288] sm:$0xf]  ;;  %v7334_v53 = vor.u32 %v7969_v27, %v7331_v32  ;;  %v7522_v27 = vor.u32 %v8017_v43, %v7521_v55  ;;  %v7992_v55 = vld [vmem:[#allocation2 + $0x618] sm:$0xf]  ;;  %v7996_v43 = vld [vmem:[#allocation2 + $0x6f8] sm:$0xf0] }
0x1edd   :  { %8098 = vrsqrt.f32 %v8928_v61  ;;  %v7362_v44 = vor.u32 %v7976_v12, %v7359_v37  ;;  %vm4989_vm3 = vcmp.eq.f32.partialorder %v8928_v61, inf  ;;  %5485 = vmatpush.bf16.msrb.mxu0 %v7338_v60  ;;  %vm4991_vm4 = vcmp.eq.f32.partialorder %v8928_v61, 0.0  ;;  %v8013_v37 = vld [vmem:[#allocation2 + $0xb58] sm:$0xf]  ;;  %v7998_v60 = vld [vmem:[#allocation2 + $0x7d0] sm:$0xf] }
0x1ede   :  { %v4964_v38 = vmul.f32 %v4963_v19, %v8912_v30  ;;  %v4972_v41 = vmul.f32 %v8097_v33, %v4971_v5  ;;  %v4929_v0 = vpop.xlane.xlu2 %4928  ;;  %v8019_v19 = vld [vmem:[#allocation2 + $0xd10] sm:$0xf] }
0x1edf   :  { %v4945_v15 = vsub.f32 %v4929_v0, %v4941_v7  ;;  %5465 = vmatpush.bf16.msra.mxu1 %v7362_v44  ;;  %v7535_v5 = vld [vmem:[#allocation2 + $0xdec] sm:$0xf0]  ;;  %5523 = vmatpush.bf16.msrb.mxu2 %v7346_v62 }
0x1ee0   :  { %v4966_v11 = vsel %vm4965_vm1, %v8912_v30, %v4964_v38  ;;  %v4973_v47 = vmul.f32 0.5, %v4972_v41  ;;  %v7330_v30 = vor.u32 %v7972_v25, %v7329_v21  ;;  %v7538_v14 = vor.u32 %v8019_v19, %v7535_v5  ;;  %v7549_v41 = vld [vmem:[#allocation2 + $0xd1c] sm:$0xf]  ;;  %v7479_v21 = vld [vmem:[#allocation2 + $0xa6c] sm:$0xf0] }
0x1ee1   :  { %v4969_v56 = vsel %vm4967_vm2, %v4968_v10, %v4966_v11  ;;  %v4949_v51 = vmul.f32 0.0004885198, %v4945_v15  ;;  %v7543_v10 = vld [vmem:[#allocation2 + $0xdf4] sm:$0xf0]  ;;  %v4992_v15 = vand.u32 2147483648, %v8928_v61  ;;  %v7550_v44 = vor.u32 %v8024_v4, %v7549_v41 }
0x1ee2   :  { %v8941_v20 = vadd.f32 1e-05, %v4969_v56  ;;  %v4974_v54 = vsub.f32 1.5, %v4973_v47  ;;  %5447 = vmatpush.bf16.msrb.mxu3 %v7330_v30  ;;  %v7510_v56 = vor.u32 %v8012_v8, %v7507_v9  ;;  %v7459_v5 = vld [vmem:[#allocation2 + $0x8b4] sm:$0xf0]  ;;  %v4954_v41 = vsub.f32 %v8885_v3, %v8905_v17 }
0x1ee3   :  { %v8099_v6 = vpop.eup %8098  ;;  %v8943_v22 = vmax.f32 %v4949_v51, 0.0  ;;  %5466 = vmatpush.bf16.msra.mxu1 %v7334_v53  ;;  %v7518_v51 = vor.u32 %v8013_v37, %v7515_v2  ;;  %5554 = vmatpush.bf16.msra.mxu0 %v7550_v44  ;;  %v7423_v37 = vld [vmem:[#allocation2 + $0x6ec] sm:$0xf0] }
0x1ee4   :  { %8100 = vrcp.f32 %v8941_v20  ;;  %v4975_v28 = vmul.f32 %v8097_v33, %v4974_v54  ;;  %v4983_v29 = vmul.f32 %v8099_v6, %v8928_v61  ;;  %v4980_v33 = vand.u32 2147483648, %v8919_v13  ;;  %v8005_v54 = vld [vmem:[#allocation2 + $0x990] sm:$0xf] }
0x1ee5   :  { %8102 = vrsqrt.f32 %v8943_v22  ;;  %v5019_v18 = vand.u32 2147483647, %v8941_v20  ;;  %v5021_v47 = vand.u32 2147483648, %v8941_v20  ;;  %v7482_v36 = vor.u32 %v8005_v54, %v7479_v21 }
0x1ee6   :  { %v4976_v23 = vmul.f32 %v4975_v28, %v8919_v13  ;;  %v4984_v39 = vmul.f32 %v8099_v6, %v4983_v29  ;;  %5497 = vmatpush.bf16.msra.mxu3 %v7538_v14  ;;  %v8006_v28 = vld [vmem:[#allocation2 + $0x998] sm:$0xf]  ;;  %vm5015_vm8 = vweird.f32 %v8941_v20  ;;  %vm5001_vm10 = vcmp.eq.f32.partialorder %v8943_v22, inf }
0x1ee7   :  { %vm8965_vm5 = vcmp.eq.f32.partialorder %v5019_v18, 8.507059e+37  ;;  %v7487_v29 = vld [vmem:[#allocation2 + $0xa74] sm:$0xf0]  ;;  %v5022_v19 = vor.u32 1.1754944e-38, %v5021_v47  ;;  %5555 = vmatpush.bf16.msra.mxu0 %v7522_v27  ;;  %v7454_v18 = vor.u32 %v7998_v60, %v7451_v46  ;;  %vm5003_vm7 = vcmp.eq.f32.partialorder %v8943_v22, 0.0 }
0x1ee8   :  { %v4978_v63 = vsel %vm4977_vm14, %v8919_v13, %v4976_v23  ;;  %v4985_v58 = vmul.f32 0.5, %v4984_v39  ;;  %v7546_v13 = vor.u32 %v8020_v16, %v7543_v10  ;;  %v7490_v49 = vor.u32 %v8006_v28, %v7487_v29  ;;  %v8010_v23 = vld [vmem:[#allocation2 + $0xa78] sm:$0xf0]  ;;  %v9011_v47 = vld [vmem:[#allocation6 + $0x10] ss:$0 sm:$0xff] }
0x1ee9   :  { %v4981_v57 = vsel %vm4979_vm11, %v4980_v33, %v4978_v63  ;;  %v7999_v33 = vld [vmem:[#allocation2 + $0x7d8] sm:$0xf]  ;;  %v4955_v54 = vsub.f32 %v8881_v26, %v8908_v42  ;;  %v7984_v27 = vld [vmem:[#allocation2 + $0x450] sm:$0xf]  ;;  %v7409_v42 = vld [vmem:[#allocation2 + $0x45c] sm:$0xf] }
0x1eea   :  { %v8955_v7 = vpop.eup %8100  ;;  %v8957_v50 = vadd.f32 1e-05, %v4981_v57  ;;  %v4986_v38 = vsub.f32 1.5, %v4985_v58  ;;  %5535 = vmatpush.bf16.msrb.mxu1 %v7546_v13  ;;  %5498 = vmatpush.bf16.msra.mxu3 %v7510_v56  ;;  %v7462_v10 = vor.u32 %v7999_v33, %v7459_v5  ;;  %v8003_v13 = vld [vmem:[#allocation2 + $0x8b8] sm:$0xf0] }
0x1eeb   :  { %v8103_v0 = vpop.eup %8102  ;;  %v5011_v52 = vmul.f32 %v8955_v7, %v8941_v20  ;;  %vm5016_vm6 = vweird.f32 %v8955_v7  ;;  %v7494_v20 = vor.u32 %v8010_v23, %v7493_v35  ;;  %v7395_v28 = vld [vmem:[#allocation2 + $0x52c] sm:$0xf0]  ;;  %v7985_v29 = vld [vmem:[#allocation2 + $0x458] sm:$0xf]  ;;  %v7989_v23 = vld [vmem:[#allocation2 + $0x538] sm:$0xf0] }
0x1eec   :  { %8104 = vrcp.f32 %v8957_v50  ;;  %v4987_v12 = vmul.f32 %v8099_v6, %v4986_v38  ;;  %v4995_v34 = vmul.f32 %v8103_v0, %v8943_v22  ;;  %v5034_v25 = vand.u32 2147483647, %v8957_v50  ;;  %vm5017_vm9 = vmor %vm5015_vm8, %vm5016_vm6  ;;  %v7465_v38 = vld [vmem:[#allocation2 + $0x7dc] sm:$0xf]  ;;  %v7403_v26 = vld [vmem:[#allocation2 + $0x534] sm:$0xf0] }
0x1eed   :  { %v5012_v1 = vsub.f32 1.0, %v5011_v52  ;;  %5556 = vmatpush.bf16.msra.mxu0 %v7494_v20  ;;  %vm5030_vm12 = vweird.f32 %v8957_v50  ;;  %v7406_v60 = vor.u32 %v7985_v29, %v7403_v26  ;;  %v7367_v46 = vld [vmem:[#allocation2 + $0x36c] sm:$0xf0]  ;;  %v7978_v33 = vld [vmem:[#allocation2 + $0x298] sm:$0xf]  ;;  %v7410_v5 = vor.u32 %v7989_v23, %v7409_v42 }
0x1eee   :  { %v4988_v31 = vmul.f32 %v4987_v12, %v8928_v61  ;;  %v4996_v45 = vmul.f32 %v8103_v0, %v4995_v34  ;;  %5536 = vmatpush.bf16.msrb.mxu1 %v7518_v51  ;;  %5499 = vmatpush.bf16.msra.mxu3 %v7482_v36  ;;  %v9001_v12 = vld [vmem:[#allocation6 + $0xf] ss:$0 sm:$0xff]  ;;  %vm9006_vm15 = vcmp.eq.f32.partialorder %v5034_v25, 8.507059e+37  ;;  %v7991_v34 = vld [vmem:[#allocation2 + $0x610] sm:$0xf] }
0x1eef   :  { %v5013_v6 = vmul.f32 %v8955_v7, %v5012_v1  ;;  %v7426_v44 = vor.u32 %v7991_v34, %v7423_v37  ;;  %v7437_v51 = vld [vmem:[#allocation2 + $0x61c] sm:$0xf] }
0x1ef0   :  { %v4990_v30 = vsel %vm4989_vm3, %v8928_v61, %v4988_v31  ;;  %v4997_v32 = vmul.f32 0.5, %v4996_v45  ;;  %v7431_v31 = vld [vmem:[#allocation2 + $0x6f4] sm:$0xf0]  ;;  %v7438_v35 = vor.u32 %v7996_v43, %v7437_v51 }
0x1ef1   :  { %v4993_v39 = vsel %vm4991_vm4, %v4992_v15, %v4990_v30  ;;  %v5014_v53 = vadd.f32 %v8955_v7, %v5013_v6  ;;  %v7466_v15 = vor.u32 %v8003_v13, %v7465_v38  ;;  %v7434_v56 = vor.u32 %v7992_v55, %v7431_v31  ;;  %v7381_v38 = vld [vmem:[#allocation2 + $0x29c] sm:$0xf] }
0x1ef2   :  { %v8981_v62 = vpop.eup %8104  ;;  %v8983_v63 = vadd.f32 1e-05, %v4993_v39  ;;  %v4998_v58 = vsub.f32 1.5, %v4997_v32  ;;  %5537 = vmatpush.bf16.msrb.mxu1 %v7490_v49  ;;  %5500 = vmatpush.bf16.msra.mxu3 %v7454_v18  ;;  %v7977_v39 = vld [vmem:[#allocation2 + $0x290] sm:$0xf] }
0x1ef3   :  { %v5026_v61 = vmul.f32 %v8981_v62, %v8957_v50  ;;  %v5018_v57 = vsel %vm5017_vm9, %v8955_v7, %v5014_v53  ;;  %v5036_v7 = vand.u32 2147483648, %v8957_v50  ;;  %vm5031_vm13 = vweird.f32 %v8981_v62  ;;  %5557 = vmatpush.bf16.msra.mxu0 %v7466_v15  ;;  %v7347_v15 = vld [vmem:[#allocation2 + $0x1b4] sm:$0xf0]  ;;  %v7353_v55 = vld [vmem:[#allocation2 + $0xdc] sm:$0xf] }
0x1ef4   :  { %8106 = vrcp.f32 %v8983_v63  ;;  %v4999_v14 = vmul.f32 %v8103_v0, %v4998_v58  ;;  %v5023_v16 = vsel %vm8965_vm5, %v5022_v19, %v5018_v57  ;;  %v5004_v0 = vand.u32 2147483648, %v8943_v22  ;;  %vm5032_vm1 = vmor %vm5030_vm12, %vm5031_vm13  ;;  %v7975_v31 = vld [vmem:[#allocation2 + $0x1b8] sm:$0xf0] }
0x1ef5   :  { %v5027_v52 = vsub.f32 1.0, %v5026_v61  ;;  %v5024_v8 = vmul.f32 %v5023_v16, %v4954_v41  ;;  %v5037_v11 = vor.u32 1.1754944e-38, %v5036_v7  ;;  %v5049_v30 = vand.u32 2147483647, %v8983_v63  ;;  %v7375_v61 = vld [vmem:[#allocation2 + $0x374] sm:$0xf0] }
0x1ef6   :  { %v5000_v4 = vmul.f32 %v4999_v14, %v8943_v22  ;;  %5538 = vmatpush.bf16.msrb.mxu1 %v7462_v10  ;;  %5501 = vmatpush.bf16.msra.mxu3 %v7426_v44  ;;  %v5051_v49 = vand.u32 2147483648, %v8983_v63  ;;  %v7398_v53 = vor.u32 %v7984_v27, %v7395_v28  ;;  %vm5045_vm14 = vweird.f32 %v8983_v63  ;;  %v7982_v41 = vld [vmem:[#allocation2 + $0x378] sm:$0xf0] }
0x1ef7   :  { %v5028_v9 = vmul.f32 %v8981_v62, %v5027_v52  ;;  %v5072_v25 = vmul.f32 %v9001_v12, %v5024_v8  ;;  %5558 = vmatpush.bf16.msra.mxu0 %v7438_v35  ;;  %v7370_v57 = vor.u32 %v7977_v39, %v7367_v46  ;;  %v7378_v20 = vor.u32 %v7978_v33, %v7375_v61  ;;  %v7339_v52 = vld [vmem:[#allocation2 + $0x1ac] sm:$0xf0] }
0x1ef8   :  { %v5002_v3 = vsel %vm5001_vm10, %v8943_v22, %v5000_v4  ;;  %vm5050_vm3 = vcmp.eq.f32.partialorder %v5049_v30, 8.507059e+37  ;;  %v5052_v10 = vor.u32 1.1754944e-38, %v5051_v49 }
0x1ef9   :  { %v5005_v2 = vsel %vm5003_vm7, %v5004_v0, %v5002_v3  ;;  %v5029_v1 = vadd.f32 %v8981_v62, %v5028_v9  ;;  %v5078_v58 = vadd.f32 %v9011_v47, %v5072_v25  ;;  %v7971_v9 = vld [vmem:[#allocation2 + $0xd8] sm:$0xf]  ;;  %v4956_v3 = vsub.f32 %v8877_v24, %v8914_v59 }
0x1efa   :  { %v9013_v22 = vpop.eup %8106  ;;  %v9015_v45 = vadd.f32 1e-05, %v5005_v2  ;;  %5539 = vmatpush.bf16.msrb.mxu1 %v7434_v56  ;;  %5502 = vmatpush.bf16.msra.mxu3 %v7398_v53  ;;  %v7382_v2 = vor.u32 %v7982_v41, %v7381_v38  ;;  %v7350_v44 = vor.u32 %v7971_v9, %v7347_v15  ;;  %v7354_v59 = vor.u32 %v7975_v31, %v7353_v55  ;;  %v7553_v55 = vld [vmem:[#allocation4 + $0x1a0] sm:$0xf]  ;;  %v8026_v31 = vld [vmem:[#allocation4 + $0x1a4] sm:$0xf0] }
0x1efb   :  { %v5041_v21 = vmul.f32 %v9013_v22, %v8983_v63  ;;  %v5033_v6 = vsel %vm5032_vm1, %v8981_v62, %v5029_v1  ;;  %vm5046_vm2 = vweird.f32 %v9013_v22  ;;  %v7970_v63 = vld [vmem:[#allocation2 + $0xd0] sm:$0xf]  ;;  %v5082_v4 = vmax.f32 %v5078_v58, 0.0  ;;  %5559 = vmatpush.bf16.msra.mxu0 %v7410_v5 }
0x1efc   :  { %8108 = vrcp.f32 %v9015_v45  ;;  %v5038_v50 = vsel %vm9006_vm15, %v5037_v11, %v5033_v6  ;;  %vm9041_vm11 = vmor %vm5045_vm14, %vm5046_vm2  ;;  %v7342_v1 = vor.u32 %v7970_v63, %v7339_v52  ;;  %v5066_v11 = vand.u32 2147483648, %v9015_v45 }
0x1efd   :  { %v5042_v32 = vsub.f32 1.0, %v5041_v21  ;;  %v5039_v36 = vmul.f32 %v5038_v50, %v4955_v54  ;;  %v5064_v51 = vand.u32 2147483647, %v9015_v45  ;;  %vm5060_vm5 = vweird.f32 %v9015_v45 }
0x1efe   :  { %5540 = vmatpush.bf16.msrb.mxu1 %v7406_v60  ;;  %5503 = vmatpush.bf16.msra.mxu3 %v7370_v57  ;;  %v5067_v43 = vor.u32 1.1754944e-38, %v5066_v11  ;;  %v4957_v54 = vsub.f32 %v8879_v48, %v8922_v40 }
0x1eff   :  { %v5073_v62 = vmul.f32 %v9001_v12, %v5039_v36  ;;  %v5043_v19 = vmul.f32 %v9013_v22, %v5042_v32  ;;  %5560 = vmatpush.bf16.msra.mxu0 %v7382_v2  ;;  %vm5065_vm8 = vcmp.eq.f32.partialorder %v5064_v51, 8.507059e+37  ;;  %v7563_v51 = vld [vmem:[#allocation4 + $0x1b8] sm:$0xf0] }
0x1f01   :  { %v5079_v18 = vadd.f32 %v9011_v47, %v5073_v62  ;;  %v5044_v14 = vadd.f32 %v9013_v22, %v5043_v19 }
0x1f02   :  { %v8109_v13 = vpop.eup %8108  ;;  %5541 = vmatpush.bf16.msrb.mxu1 %v7378_v20  ;;  %5504 = vmatpush.bf16.msra.mxu3 %v7342_v1 }
0x1f03   :  { %v5056_v7 = vmul.f32 %v8109_v13, %v9015_v45  ;;  %v5083_v0 = vmax.f32 %v5079_v18, 0.0  ;;  %v5048_v8 = vsel %vm9041_vm11, %v9013_v22, %v5044_v14  ;;  %vm5061_vm4 = vweird.f32 %v8109_v13  ;;  %5561 = vmatpush.bf16.msra.mxu0 %v7354_v59  ;;  %v7561_v59 = vld [vmem:[#allocation4 + $0x1b0] sm:$0xf] }
0x1f04   :  { %v5053_v17 = vsel %vm5050_vm3, %v5052_v10, %v5048_v8  ;;  %vm5062_vm6 = vmor %vm5060_vm5, %vm5061_vm4 }
0x1f05   :  { %v5057_v34 = vsub.f32 1.0, %v5056_v7  ;;  %v5086_v37 = vpack.c.bf16 %v5083_v0, %v5082_v4  ;;  %v5054_v22 = vmul.f32 %v5053_v17, %v4956_v3 }
0x1f06   :  { %5542 = vmatpush.bf16.msrb.mxu1 %v7350_v44 }
0x1f07   :  { %5448 = vmatmul.bf16.vlgmr.msrb.gmra.mxu3 %v5086_v37  ;;  %5467 = vmatmul.bf16.vlgmr.msra.gmra.mxu1 %v5086_v37  ;;  %v5058_v56 = vmul.f32 %v8109_v13, %v5057_v34  ;;  %v5074_v6 = vmul.f32 %v9001_v12, %v5054_v22  ;;  %v8025_v34 = vld [vmem:[#allocation4 + $0x1a4] sm:$0xf]  ;;  %v7554_v22 = vor.u32 %v8026_v31, %v7553_v55 }
0x1f08   :  { %5486 = vmatmul.bf16.vlgmr.msrb.gmra.mxu0 %v5086_v37  ;;  %5524 = vmatmul.bf16.vlgmr.msrb.gmra.mxu2 %v5086_v37 }
0x1f09   :  { %v5059_v24 = vadd.f32 %v8109_v13, %v5058_v56  ;;  %v5080_v45 = vadd.f32 %v9011_v47, %v5074_v6  ;;  %v8027_v56 = vld [vmem:[#allocation4 + $0x1b4] sm:$0xf]  ;;  %v8055_v6 = vld [vmem:[#allocation6 + $0x11] ss:$0 sm:$0xff] }
0x1f0b   :  { %v5063_v21 = vsel %vm5062_vm6, %v8109_v13, %v5059_v24  ;;  %v5084_v50 = vmax.f32 %v5080_v45, 0.0  ;;  %v7566_v24 = vor.u32 %v8027_v56, %v7563_v51 }
0x1f0c   :  { %v5068_v25 = vsel %vm5065_vm8, %v5067_v43, %v5063_v21  ;;  %v8028_v43 = vld [vmem:[#allocation4 + $0x1b4] sm:$0xf0] }
0x1f0d   :  { %v5069_v27 = vmul.f32 %v5068_v25, %v4957_v54  ;;  %v7562_v54 = vor.u32 %v8028_v43, %v7561_v59 }
0x1f0f   :  { %v5075_v28 = vmul.f32 %v9001_v12, %v5069_v27 }
0x1f11   :  { %v5081_v29 = vadd.f32 %v9011_v47, %v5075_v28 }
0x1f13   :  { %v5085_v30 = vmax.f32 %v5081_v29, 0.0 }
0x1f15   :  { %v5087_v26 = vpack.c.bf16 %v5085_v30, %v5084_v50 }
0x1f17   :  { %5453 = vmatmul.bf16.gmra.mxu3 %v5087_v26  ;;  %5472 = vmatmul.bf16.gmra.mxu1 %v5087_v26 }
0x1f18   :  { %5491 = vmatmul.bf16.gmra.mxu0 %v5087_v26  ;;  %5529 = vmatmul.bf16.gmra.mxu2 %v5087_v26 }
0x1f27   :  { %5505 = vmatmul.bf16.vlgmr.msra.gmra.mxu3 %v5086_v37  ;;  %5543 = vmatmul.bf16.vlgmr.msrb.gmra.mxu1 %v5086_v37 }
0x1f28   :  { %5562 = vmatmul.bf16.vlgmr.msra.gmra.mxu0 %v5086_v37  ;;  %v7555_v37 = vld [vmem:[#allocation4 + $0x1a8] sm:$0xf0] }
0x1f29   :  { %v7558_v11 = vor.u32 %v8025_v34, %v7555_v37 }
0x1f37   :  { %5510 = vmatmul.bf16.gmra.mxu3 %v5087_v26  ;;  %5548 = vmatmul.bf16.gmra.mxu1 %v5087_v26 }
0x1f38   :  { %5567 = vmatmul.bf16.gmra.mxu0 %v5087_v26 }
0x1f84   :  { %v5468_v48 = vpop.f32.mrf.mxu1 }
0x1f85   :  { %v5487_v40 = vpop.f32.mrf.mxu0 }
0x1f8a   :  { %v5449_v12 = vpop.f32.mrf.mxu3 }
0x1f8b   :  { %v5525_v5 = vpop.f32.mrf.mxu2 }
0x1f8c   :  { %v5470_v42 = vpop.f32.mrf.mxu1 }
0x1f8d   :  { %v5580_v32 = vpack.c.bf16 %v5470_v42, %v5468_v48  ;;  %v5489_v36 = vpop.f32.mrf.mxu0 }
0x1f8e   :  { %v5582_v47 = vpack.c.bf16 %v5489_v36, %v5487_v40 }
0x1f92   :  { %v5451_v49 = vpop.f32.mrf.mxu3 }
0x1f93   :  { %v5578_v35 = vpack.c.bf16 %v5451_v49, %v5449_v12  ;;  %v5527_v14 = vpop.f32.mrf.mxu2 }
0x1f94   :  { %v5473_v23 = vpop.f32.mrf.mxu1  ;;  %v5586_v2 = vpack.c.bf16 %v5527_v14, %v5525_v5 }
0x1f95   :  { %v5492_v39 = vpop.f32.mrf.mxu0 }
0x1f9a   :  { %v5454_v53 = vpop.f32.mrf.mxu3 }
0x1f9b   :  { %v5530_v41 = vpop.f32.mrf.mxu2 }
0x1f9c   :  { %v5475_v60 = vpop.f32.mrf.mxu1 }
0x1f9d   :  { %v5494_v46 = vpop.f32.mrf.mxu0  ;;  %v5581_v1 = vpack.c.bf16 %v5475_v60, %v5473_v23 }
0x1f9e   :  { %v5583_v15 = vpack.c.bf16 %v5494_v46, %v5492_v39 }
0x1fa2   :  { %v5456_v33 = vpop.f32.mrf.mxu3 }
0x1fa3   :  { %v5532_v3 = vpop.f32.mrf.mxu2  ;;  %v5579_v44 = vpack.c.bf16 %v5456_v33, %v5454_v53 }
0x1fa4   :  { %v5544_v62 = vpop.f32.mrf.mxu1  ;;  %v5587_v17 = vpack.c.bf16 %v5532_v3, %v5530_v41 }
0x1fa5   :  { %v5563_v58 = vpop.f32.mrf.mxu0 }
0x1faa   :  { %v5506_v19 = vpop.f32.mrf.mxu3 }
0x1fac   :  { %v5546_v57 = vpop.f32.mrf.mxu1 }
0x1fad   :  { %v5565_v61 = vpop.f32.mrf.mxu0  ;;  %v5588_v9 = vpack.c.bf16 %v5546_v57, %v5544_v62 }
0x1fae   :  { %v5590_v63 = vpack.c.bf16 %v5565_v61, %v5563_v58 }
0x1fb2   :  { %v5508_v20 = vpop.f32.mrf.mxu3 }
0x1fb3   :  { %v5584_v8 = vpack.c.bf16 %v5508_v20, %v5506_v19 }
0x1fb4   :  { %v5549_v16 = vpop.f32.mrf.mxu1 }
0x1fb5   :  { %v5568_v18 = vpop.f32.mrf.mxu0 }
0x1fba   :  { %v5511_v10 = vpop.f32.mrf.mxu3 }
0x1fbc   :  { %v5551_v7 = vpop.f32.mrf.mxu1 }
0x1fbd   :  { %v5570_v38 = vpop.f32.mrf.mxu0  ;;  %v5589_v0 = vpack.c.bf16 %v5551_v7, %v5549_v16 }
0x1fbe   :  { %v5591_v13 = vpack.c.bf16 %v5570_v38, %v5568_v18 }
0x1fc0   :  { %5639 = vmatpush.bf16.msra.mxu2 %v5591_v13 }
0x1fc2   :  { %v5513_v52 = vpop.f32.mrf.mxu3 }
0x1fc3   :  { %v5585_v4 = vpack.c.bf16 %v5513_v52, %v5511_v10 }
0x1fc4   :  { %5640 = vmatpush.bf16.msra.mxu2 %v5590_v63 }
0x1fc5   :  { %5618 = vmatpush.bf16.msrb.mxu3 %v5585_v4 }
0x1fc8   :  { %5641 = vmatpush.bf16.msra.mxu2 %v5589_v0 }
0x1fc9   :  { %5619 = vmatpush.bf16.msrb.mxu3 %v5584_v8 }
0x1fcc   :  { %5642 = vmatpush.bf16.msra.mxu2 %v5588_v9 }
0x1fcd   :  { %5620 = vmatpush.bf16.msrb.mxu3 %v5583_v15 }
0x1fd0   :  { %5643 = vmatpush.bf16.msra.mxu2 %v5587_v17 }
0x1fd1   :  { %5621 = vmatpush.bf16.msrb.mxu3 %v5582_v47 }
0x1fd4   :  { %5644 = vmatpush.bf16.msra.mxu2 %v5586_v2 }
0x1fd5   :  { %5622 = vmatpush.bf16.msrb.mxu3 %v5581_v1 }
0x1fd7   :  { %7567 = vmatmul.msk.bf16.vlgmr.msra.gmra.mxu2 %vm631_vm0, %v7558_v11 }
0x1fd9   :  { %5623 = vmatpush.bf16.msrb.mxu3 %v5580_v32 }
0x1fdd   :  { %5624 = vmatpush.bf16.msrb.mxu3 %v5579_v44 }
0x1fe1   :  { %5625 = vmatpush.bf16.msrb.mxu3 %v5578_v35 }
0x1fe4   :  { %5626 = vmatmul.bf16.vlgmr.msrb.gmra.mxu3 %v7554_v22 }
0x1fe7   :  { %7568 = vmatmul.msk.bf16.gmra.mxu2 %vm631_vm0, %v7566_v24 }
0x1ff4   :  { %5631 = vmatmul.bf16.gmra.mxu3 %v7562_v54 }
0x205a   :  { %v5646_v21 = vpop.f32.mrf.mxu2 }
0x2062   :  { %v5648_v45 = vpop.f32.mrf.mxu2 }
0x2067   :  { %v5627_v25 = vpop.f32.mrf.mxu3 }
0x2068   :  { %v5628_v27 = vadd.f32 %v8055_v6, %v5627_v25 }
0x206a   :  { %v5647_v28 = vadd.f32 %v5646_v21, %v5628_v27  ;;  %v5651_v40 = vpop.f32.mrf.mxu2 }
0x206c   :  { %8110 = vtanh.f32 %v5647_v28 }
0x206f   :  { %v5629_v29 = vpop.f32.mrf.mxu3 }
0x2070   :  { %v5630_v50 = vadd.f32 %v8055_v6, %v5629_v29 }
0x2072   :  { %v8111_v30 = vpop.eup %8110  ;;  %v5649_v26 = vadd.f32 %v5648_v45, %v5630_v50  ;;  %v5653_v49 = vpop.f32.mrf.mxu2 }
0x2073   :  { %5660 = vst [vmem:[%s9080_s6] sm:$0xff] %v8111_v30 }
0x2074   :  { %8112 = vtanh.f32 %v5649_v26 }
0x2077   :  { %v5632_v48 = vpop.f32.mrf.mxu3 }
0x2078   :  { %v5633_v12 = vadd.f32 %v8055_v6, %v5632_v48 }
0x207a   :  { %v8113_v42 = vpop.eup %8112  ;;  %v5652_v32 = vadd.f32 %v5651_v40, %v5633_v12 }
0x207b   :  { %5661 = vst [vmem:[%s9080_s6 + $0x8] sm:$0xff] %v8113_v42 }
0x207c   :  { %8114 = vtanh.f32 %v5652_v32 }
0x207f   :  { %v5634_v36 = vpop.f32.mrf.mxu3 }
0x2080   :  { %v5635_v47 = vadd.f32 %v8055_v6, %v5634_v36 }
0x2082   :  { %v8115_v35 = vpop.eup %8114  ;;  %v5654_v23 = vadd.f32 %v5653_v49, %v5635_v47 }
0x2083   :  { %5662 = vst [vmem:[%s9080_s6 + $0x10] sm:$0xff] %v8115_v35 }
0x2084   :  { %8116 = vtanh.f32 %v5654_v23 }
0x208a   :  { %v8117_v39 = vpop.eup %8116 }
0x208b   :  { %5663 = vst [vmem:[%s9080_s6 + $0x18] sm:$0xff] %v8117_v39 }
0x208c   :  { %5668 = vsyncpa [#allocation3], 1 }
0x208d   :  { %5669 = vsyncpa [#allocation5], 1 }
0x208e   :  { %5670 = vsyncpa [#allocation8], 1 }

</bundles_post_ra>
